<compile_context>
chip_gen: v7x
topology: tpu7x:2x2x1
jax: 0.10.0
libtpu: 0.0.40
codegen_flags: <defaults>
</compile_context>

<pallas_src>
import functools

import jax
import jax.numpy as jnp
from jax.experimental import pallas as pl
from jax.experimental.pallas import tpu as pltpu


LANE = 128  # TPU lane width


def _round_up(x, m):
    return ((x + m - 1) // m) * m


# ---------------------------------------------------------------------------
# Pallas kernels
# ---------------------------------------------------------------------------
def _matmul_bias_relu_kernel(x_ref, w_ref, b_ref, o_ref):
    # x_ref: (TM, K) bf16   w_ref: (K, Cout) bf16   b_ref: (1, Cout) f32
    # o_ref: (TM, Cout) bf16
    acc = jnp.dot(x_ref[...], w_ref[...], preferred_element_type=jnp.float32)
    o_ref[...] = jnp.maximum(acc + b_ref[...], 0.0).astype(o_ref.dtype)


def _avgpool_kernel(x_ref, o_ref):
    # x_ref: (N, HW, C) bf16   o_ref: (N, C) f32
    o_ref[...] = jnp.mean(x_ref[...].astype(jnp.float32), axis=1)


# ---------------------------------------------------------------------------
# Wrappers
# ---------------------------------------------------------------------------
def matmul_bias_relu(patches, w_flat, b_row):
    """(M, K) @ (K, Cout) + b, ReLU — tiled over M on a Pallas grid."""
    M, K = patches.shape
    _, Cout = w_flat.shape

    # Per-layer row tile: big layers get 256-row tiles (>=2 parallel grid
    # steps); small layers run as one un-padded tile (rounded to 8 sublanes).
    if M > 256:
        tm = 256
    else:
        tm = max(8, _round_up(M, 8))
    M_pad = _round_up(M, tm)
    if M_pad != M:
        patches = jnp.pad(patches, ((0, M_pad - M), (0, 0)))

    out = pl.pallas_call(
        _matmul_bias_relu_kernel,
        out_shape=jax.ShapeDtypeStruct((M_pad, Cout), jnp.bfloat16),
        grid=(M_pad // tm,),
        in_specs=[
            pl.BlockSpec((tm, K), lambda i: (i, 0)),
            pl.BlockSpec((K, Cout), lambda i: (0, 0)),   # resident across steps
            pl.BlockSpec((1, Cout), lambda i: (0, 0)),   # resident across steps
        ],
        out_specs=pl.BlockSpec((tm, Cout), lambda i: (i, 0)),
        compiler_params=pltpu.CompilerParams(
            dimension_semantics=("parallel",)),
    )(patches, w_flat, b_row)

    if M_pad != M:
        out = out[:M]
    return out


def conv2d_relu(x_nhwc, w_flat, b_row, k, stride):
    """Conv2d + ReLU via im2col + Pallas matmul.  k, stride are static ints.

    padding = 1 for 3x3 kernels, 0 for 1x1 (matches the module).
    """
    N, H, W, Cin = x_nhwc.shape
    Cout = w_flat.shape[1]
    pad = (k - 1) // 2
    Ho = (H + 2 * pad - k) // stride + 1
    Wo = (W + 2 * pad - k) // stride + 1

    if k == 1 and stride == 1:
        patches = x_nhwc.reshape(N * H * W, Cin)
    else:
        xp = jnp.pad(x_nhwc, ((0, 0), (pad, pad), (pad, pad), (0, 0)))
        cols = []
        for dy in range(k):
            for dx in range(k):
                cols.append(
                    xp[:,
                       dy:dy + stride * (Ho - 1) + 1:stride,
                       dx:dx + stride * (Wo - 1) + 1:stride,
                       :])
        patches = jnp.concatenate(cols, axis=-1)        # (N, Ho, Wo, k*k*Cin)
        patches = patches.reshape(N * Ho * Wo, k * k * Cin)

    out = matmul_bias_relu(patches, w_flat, b_row)
    return out.reshape(N, Ho, Wo, Cout)


def global_avg_pool(x_nhwc):
    N, H, W, C = x_nhwc.shape
    x = x_nhwc.reshape(N, H * W, C)
    return pl.pallas_call(
        _avgpool_kernel,
        out_shape=jax.ShapeDtypeStruct((N, C), jnp.float32),
    )(x)


# ---------------------------------------------------------------------------
# Static layer specs, parameters (deterministic init), forward
# ---------------------------------------------------------------------------
def layer_specs(input_size, n_classes):
    # (cin, cout, kernel_size, stride)  — static Python ints.
    return (
        (input_size, 96, 3, 1),   # conv1
        (96, 96, 3, 1),           # conv2
        (96, 96, 3, 2),           # conv3
        (96, 192, 3, 1),          # conv4
        (192, 192, 3, 1),         # conv5
        (192, 192, 3, 2),         # conv6
        (192, 192, 3, 1),         # conv7
        (192, 192, 1, 1),         # conv8
        (192, n_classes, 1, 1),   # class_conv
    )


def init_params(input_size, n_classes=10, seed=0):
    """He-init conv weights, pre-flattened to (K, Cout_pad) bf16 + (1, Cout_pad)
    f32 bias, with channel counts zero-padded to >=128 lanes."""
    specs = layer_specs(input_size, n_classes)
    params = []
    key = jax.random.PRNGKey(seed)
    cin_pad_prev = input_size          # the raw network input is not padded
    for (cin, cout, k, _stride) in specs:
        key, kw_, kb_ = jax.random.split(key, 3)
        fan_in = cin * k * k
        std = (2.0 / fan_in) ** 0.5
        w = std * jax.random.normal(kw_, (cout, cin, k, k), dtype=jnp.float32)
        b = 0.01 * jax.random.normal(kb_, (cout,), dtype=jnp.float32)

        cout_pad = max(cout, LANE)
        # (cout, cin, kh, kw) -> (kh, kw, cin, cout); zero-pad cin -> padded
        # cin of the incoming activation and cout -> cout_pad; flatten.
        w_t = jnp.transpose(w, (2, 3, 1, 0))
        w_t = jnp.pad(w_t, ((0, 0), (0, 0),
                            (0, cin_pad_prev - cin), (0, cout_pad - cout)))
        w_flat = w_t.reshape(k * k * cin_pad_prev, cout_pad).astype(jnp.bfloat16)
        b_row = jnp.pad(b, (0, cout_pad - cout)).reshape(1, cout_pad)

        params.append((w_flat, b_row))
        cin_pad_prev = cout_pad
    return params


@functools.partial(jax.jit, static_argnums=(2, 3))
def model_c_forward(x_nchw, params, specs, n_classes):
    # NCHW (PyTorch convention) -> NHWC bf16 for the TPU kernels.
    x = jnp.transpose(x_nchw, (0, 2, 3, 1)).astype(jnp.bfloat16)

    # dropout(0.2) / dropout(0.5) -> identity (see TODO at top).
    for (w_flat, b_row), (_cin, _cout, k, stride) in zip(params, specs):
        x = conv2d_relu(x, w_flat, b_row, k, stride)

    # adaptive_avg_pool2d(., 1) + squeeze -> (N, n_classes); slice off the
    # zero-padded class channels after the lane-dense pool.
    pooled = global_avg_pool(x)                 # (N, Cout_pad) f32
    return pooled[:, :n_classes]


# ---------------------------------------------------------------------------
if __name__ == "__main__":
    batch, in_ch, spatial, n_classes = 2, 4, 16, 10

    key = jax.random.PRNGKey(0)
    x = jax.random.normal(key, (batch, in_ch, spatial, spatial),
                          dtype=jnp.float32)

    specs = layer_specs(in_ch, n_classes)
    params = init_params(in_ch, n_classes=n_classes, seed=0)

    out = model_c_forward(x, params, specs, n_classes)
    out = jax.block_until_ready(out)

    assert out.shape == (batch, n_classes), out.shape
    assert jnp.all(jnp.isfinite(out))
    print("KERNEL_OK")
</pallas_src>

<mosaic_0001>
module attributes {stable_mosaic.version = 11 : i64} {
  func.func @_matmul_bias_relu_kernel(%arg0: i32, %arg1: memref<256x36xbf16, #tpu.memory_space<vmem>>, %arg2: memref<36x128xbf16, #tpu.memory_space<vmem>>, %arg3: memref<1x128xf32, #tpu.memory_space<vmem>>, %arg4: memref<256x128xbf16, #tpu.memory_space<vmem>>) attributes {dimension_semantics = [#tpu.dimension_semantics<parallel>], iteration_bounds = array<i64: 2>, scalar_prefetch = 0 : i64, scratch_operands = 0 : i64, tpu.core_type = #tpu.core_type<tc>, window_params = [{transform_indices = @transform_0, window_bounds = array<i64: 256, 36>}, {pipeline_mode = #tpu.pipeline_mode<synchronous>, transform_indices = @transform_1, window_bounds = array<i64: 36, 128>}, {pipeline_mode = #tpu.pipeline_mode<synchronous>, transform_indices = @transform_2, window_bounds = array<i64: 1, 128>}, {transform_indices = @transform_3, window_bounds = array<i64: 256, 128>}]} {
    %c0 = arith.constant 0 : index
    %c0_0 = arith.constant 0 : index
    %0 = vector.load %arg1[%c0, %c0_0] : memref<256x36xbf16, #tpu.memory_space<vmem>>, vector<256x36xbf16>
    %c0_1 = arith.constant 0 : index
    %c0_2 = arith.constant 0 : index
    %1 = vector.load %arg2[%c0_1, %c0_2] : memref<36x128xbf16, #tpu.memory_space<vmem>>, vector<36x128xbf16>
    %cst = arith.constant dense<0.000000e+00> : vector<256x128xf32>
    %2 = tpu.matmul %0, %1, %cst {dimension_numbers = #tpu.dot_dimension_numbers<[1], [0], [0], [1], [0, 0, 1, 1], [], []>} : vector<256x36xbf16>, vector<36x128xbf16>, vector<256x128xf32> -> vector<256x128xf32>
    %c0_3 = arith.constant 0 : index
    %c0_4 = arith.constant 0 : index
    %3 = vector.load %arg3[%c0_3, %c0_4] : memref<1x128xf32, #tpu.memory_space<vmem>>, vector<1x128xf32>
    %4 = vector.broadcast %3 : vector<1x128xf32> to vector<256x128xf32>
    %5 = arith.addf %2, %4 : vector<256x128xf32>
    %cst_5 = arith.constant 0.000000e+00 : f32
    %6 = vector.broadcast %cst_5 : f32 to vector<256x128xf32>
    %7 = arith.maximumf %5, %6 : vector<256x128xf32>
    %8 = arith.truncf %7 : vector<256x128xf32> to vector<256x128xbf16>
    %c0_6 = arith.constant 0 : index
    %c0_7 = arith.constant 0 : index
    %9 = vector.load %arg4[%c0_6, %c0_7] : memref<256x128xbf16, #tpu.memory_space<vmem>>, vector<256x128xbf16>
    tpu.vector_store %arg4[%c0_6, %c0_7], %8 {strides = array<i32>} : memref<256x128xbf16, #tpu.memory_space<vmem>>, vector<256x128xbf16>,
    return
  }
  func.func @transform_0(%arg0: i32) -> (i32, i32) {
    %c0_i32 = arith.constant 0 : i32
    %c0_i32_0 = arith.constant 0 : i32
    return %arg0, %c0_i32 : i32, i32
  }
  func.func @transform_1(%arg0: i32) -> (i32, i32) {
    %c0_i32 = arith.constant 0 : i32
    %c0_i32_0 = arith.constant 0 : i32
    %c0_i32_1 = arith.constant 0 : i32
    return %c0_i32, %c0_i32_0 : i32, i32
  }
  func.func @transform_2(%arg0: i32) -> (i32, i32) {
    %c0_i32 = arith.constant 0 : i32
    %c0_i32_0 = arith.constant 0 : i32
    %c0_i32_1 = arith.constant 0 : i32
    return %c0_i32, %c0_i32_0 : i32, i32
  }
  func.func @transform_3(%arg0: i32) -> (i32, i32) {
    %c0_i32 = arith.constant 0 : i32
    %c0_i32_0 = arith.constant 0 : i32
    return %arg0, %c0_i32 : i32, i32
  }
}

module attributes {stable_mosaic.version = 11 : i64} {
  func.func @_matmul_bias_relu_kernel(%arg0: i32, %arg1: memref<256x1152xbf16, #tpu.memory_space<vmem>>, %arg2: memref<1152x128xbf16, #tpu.memory_space<vmem>>, %arg3: memref<1x128xf32, #tpu.memory_space<vmem>>, %arg4: memref<256x128xbf16, #tpu.memory_space<vmem>>) attributes {dimension_semantics = [#tpu.dimension_semantics<parallel>], iteration_bounds = array<i64: 2>, scalar_prefetch = 0 : i64, scratch_operands = 0 : i64, tpu.core_type = #tpu.core_type<tc>, window_params = [{transform_indices = @transform_0, window_bounds = array<i64: 256, 1152>}, {pipeline_mode = #tpu.pipeline_mode<synchronous>, transform_indices = @transform_1, window_bounds = array<i64: 1152, 128>}, {pipeline_mode = #tpu.pipeline_mode<synchronous>, transform_indices = @transform_2, window_bounds = array<i64: 1, 128>}, {transform_indices = @transform_3, window_bounds = array<i64: 256, 128>}]} {
    %c0 = arith.constant 0 : index
    %c0_0 = arith.constant 0 : index
    %0 = vector.load %arg1[%c0, %c0_0] : memref<256x1152xbf16, #tpu.memory_space<vmem>>, vector<256x1152xbf16>
    %c0_1 = arith.constant 0 : index
    %c0_2 = arith.constant 0 : index
    %1 = vector.load %arg2[%c0_1, %c0_2] : memref<1152x128xbf16, #tpu.memory_space<vmem>>, vector<1152x128xbf16>
    %cst = arith.constant dense<0.000000e+00> : vector<256x128xf32>
    %2 = tpu.matmul %0, %1, %cst {dimension_numbers = #tpu.dot_dimension_numbers<[1], [0], [0], [1], [0, 0, 1, 1], [], []>} : vector<256x1152xbf16>, vector<1152x128xbf16>, vector<256x128xf32> -> vector<256x128xf32>
    %c0_3 = arith.constant 0 : index
    %c0_4 = arith.constant 0 : index
    %3 = vector.load %arg3[%c0_3, %c0_4] : memref<1x128xf32, #tpu.memory_space<vmem>>, vector<1x128xf32>
    %4 = vector.broadcast %3 : vector<1x128xf32> to vector<256x128xf32>
    %5 = arith.addf %2, %4 : vector<256x128xf32>
    %cst_5 = arith.constant 0.000000e+00 : f32
    %6 = vector.broadcast %cst_5 : f32 to vector<256x128xf32>
    %7 = arith.maximumf %5, %6 : vector<256x128xf32>
    %8 = arith.truncf %7 : vector<256x128xf32> to vector<256x128xbf16>
    %c0_6 = arith.constant 0 : index
    %c0_7 = arith.constant 0 : index
    %9 = vector.load %arg4[%c0_6, %c0_7] : memref<256x128xbf16, #tpu.memory_space<vmem>>, vector<256x128xbf16>
    tpu.vector_store %arg4[%c0_6, %c0_7], %8 {strides = array<i32>} : memref<256x128xbf16, #tpu.memory_space<vmem>>, vector<256x128xbf16>,
    return
  }
  func.func @transform_0(%arg0: i32) -> (i32, i32) {
    %c0_i32 = arith.constant 0 : i32
    %c0_i32_0 = arith.constant 0 : i32
    return %arg0, %c0_i32 : i32, i32
  }
  func.func @transform_1(%arg0: i32) -> (i32, i32) {
    %c0_i32 = arith.constant 0 : i32
    %c0_i32_0 = arith.constant 0 : i32
    %c0_i32_1 = arith.constant 0 : i32
    return %c0_i32, %c0_i32_0 : i32, i32
  }
  func.func @transform_2(%arg0: i32) -> (i32, i32) {
    %c0_i32 = arith.constant 0 : i32
    %c0_i32_0 = arith.constant 0 : i32
    %c0_i32_1 = arith.constant 0 : i32
    return %c0_i32, %c0_i32_0 : i32, i32
  }
  func.func @transform_3(%arg0: i32) -> (i32, i32) {
    %c0_i32 = arith.constant 0 : i32
    %c0_i32_0 = arith.constant 0 : i32
    return %arg0, %c0_i32 : i32, i32
  }
}

module attributes {stable_mosaic.version = 11 : i64} {
  func.func @_matmul_bias_relu_kernel(%arg0: i32, %arg1: memref<128x1152xbf16, #tpu.memory_space<vmem>>, %arg2: memref<1152x128xbf16, #tpu.memory_space<vmem>>, %arg3: memref<1x128xf32, #tpu.memory_space<vmem>>, %arg4: memref<128x128xbf16, #tpu.memory_space<vmem>>) attributes {dimension_semantics = [#tpu.dimension_semantics<parallel>], iteration_bounds = array<i64: 1>, scalar_prefetch = 0 : i64, scratch_operands = 0 : i64, tpu.core_type = #tpu.core_type<tc>, window_params = [{transform_indices = @transform_0, window_bounds = array<i64: 128, 1152>}, {pipeline_mode = #tpu.pipeline_mode<synchronous>, transform_indices = @transform_1, window_bounds = array<i64: 1152, 128>}, {pipeline_mode = #tpu.pipeline_mode<synchronous>, transform_indices = @transform_2, window_bounds = array<i64: 1, 128>}, {transform_indices = @transform_3, window_bounds = array<i64: 128, 128>}]} {
    %c0 = arith.constant 0 : index
    %c0_0 = arith.constant 0 : index
    %0 = vector.load %arg1[%c0, %c0_0] : memref<128x1152xbf16, #tpu.memory_space<vmem>>, vector<128x1152xbf16>
    %c0_1 = arith.constant 0 : index
    %c0_2 = arith.constant 0 : index
    %1 = vector.load %arg2[%c0_1, %c0_2] : memref<1152x128xbf16, #tpu.memory_space<vmem>>, vector<1152x128xbf16>
    %cst = arith.constant dense<0.000000e+00> : vector<128x128xf32>
    %2 = tpu.matmul %0, %1, %cst {dimension_numbers = #tpu.dot_dimension_numbers<[1], [0], [0], [1], [0, 0, 1, 1], [], []>} : vector<128x1152xbf16>, vector<1152x128xbf16>, vector<128x128xf32> -> vector<128x128xf32>
    %c0_3 = arith.constant 0 : index
    %c0_4 = arith.constant 0 : index
    %3 = vector.load %arg3[%c0_3, %c0_4] : memref<1x128xf32, #tpu.memory_space<vmem>>, vector<1x128xf32>
    %4 = vector.broadcast %3 : vector<1x128xf32> to vector<128x128xf32>
    %5 = arith.addf %2, %4 : vector<128x128xf32>
    %cst_5 = arith.constant 0.000000e+00 : f32
    %6 = vector.broadcast %cst_5 : f32 to vector<128x128xf32>
    %7 = arith.maximumf %5, %6 : vector<128x128xf32>
    %8 = arith.truncf %7 : vector<128x128xf32> to vector<128x128xbf16>
    %c0_6 = arith.constant 0 : index
    %c0_7 = arith.constant 0 : index
    %9 = vector.load %arg4[%c0_6, %c0_7] : memref<128x128xbf16, #tpu.memory_space<vmem>>, vector<128x128xbf16>
    tpu.vector_store %arg4[%c0_6, %c0_7], %8 {strides = array<i32>} : memref<128x128xbf16, #tpu.memory_space<vmem>>, vector<128x128xbf16>,
    return
  }
  func.func @transform_0(%arg0: i32) -> (i32, i32) {
    %c0_i32 = arith.constant 0 : i32
    %c0_i32_0 = arith.constant 0 : i32
    return %arg0, %c0_i32 : i32, i32
  }
  func.func @transform_1(%arg0: i32) -> (i32, i32) {
    %c0_i32 = arith.constant 0 : i32
    %c0_i32_0 = arith.constant 0 : i32
    %c0_i32_1 = arith.constant 0 : i32
    return %c0_i32, %c0_i32_0 : i32, i32
  }
  func.func @transform_2(%arg0: i32) -> (i32, i32) {
    %c0_i32 = arith.constant 0 : i32
    %c0_i32_0 = arith.constant 0 : i32
    %c0_i32_1 = arith.constant 0 : i32
    return %c0_i32, %c0_i32_0 : i32, i32
  }
  func.func @transform_3(%arg0: i32) -> (i32, i32) {
    %c0_i32 = arith.constant 0 : i32
    %c0_i32_0 = arith.constant 0 : i32
    return %arg0, %c0_i32 : i32, i32
  }
}

module attributes {stable_mosaic.version = 11 : i64} {
  func.func @_matmul_bias_relu_kernel(%arg0: i32, %arg1: memref<128x1152xbf16, #tpu.memory_space<vmem>>, %arg2: memref<1152x192xbf16, #tpu.memory_space<vmem>>, %arg3: memref<1x192xf32, #tpu.memory_space<vmem>>, %arg4: memref<128x192xbf16, #tpu.memory_space<vmem>>) attributes {dimension_semantics = [#tpu.dimension_semantics<parallel>], iteration_bounds = array<i64: 1>, scalar_prefetch = 0 : i64, scratch_operands = 0 : i64, tpu.core_type = #tpu.core_type<tc>, window_params = [{transform_indices = @transform_0, window_bounds = array<i64: 128, 1152>}, {pipeline_mode = #tpu.pipeline_mode<synchronous>, transform_indices = @transform_1, window_bounds = array<i64: 1152, 192>}, {pipeline_mode = #tpu.pipeline_mode<synchronous>, transform_indices = @transform_2, window_bounds = array<i64: 1, 192>}, {transform_indices = @transform_3, window_bounds = array<i64: 128, 192>}]} {
    %c0 = arith.constant 0 : index
    %c0_0 = arith.constant 0 : index
    %0 = vector.load %arg1[%c0, %c0_0] : memref<128x1152xbf16, #tpu.memory_space<vmem>>, vector<128x1152xbf16>
    %c0_1 = arith.constant 0 : index
    %c0_2 = arith.constant 0 : index
    %1 = vector.load %arg2[%c0_1, %c0_2] : memref<1152x192xbf16, #tpu.memory_space<vmem>>, vector<1152x192xbf16>
    %cst = arith.constant dense<0.000000e+00> : vector<128x192xf32>
    %2 = tpu.matmul %0, %1, %cst {dimension_numbers = #tpu.dot_dimension_numbers<[1], [0], [0], [1], [0, 0, 1, 1], [], []>} : vector<128x1152xbf16>, vector<1152x192xbf16>, vector<128x192xf32> -> vector<128x192xf32>
    %c0_3 = arith.constant 0 : index
    %c0_4 = arith.constant 0 : index
    %3 = vector.load %arg3[%c0_3, %c0_4] : memref<1x192xf32, #tpu.memory_space<vmem>>, vector<1x192xf32>
    %4 = vector.broadcast %3 : vector<1x192xf32> to vector<128x192xf32>
    %5 = arith.addf %2, %4 : vector<128x192xf32>
    %cst_5 = arith.constant 0.000000e+00 : f32
    %6 = vector.broadcast %cst_5 : f32 to vector<128x192xf32>
    %7 = arith.maximumf %5, %6 : vector<128x192xf32>
    %8 = arith.truncf %7 : vector<128x192xf32> to vector<128x192xbf16>
    %c0_6 = arith.constant 0 : index
    %c0_7 = arith.constant 0 : index
    %9 = vector.load %arg4[%c0_6, %c0_7] : memref<128x192xbf16, #tpu.memory_space<vmem>>, vector<128x192xbf16>
    tpu.vector_store %arg4[%c0_6, %c0_7], %8 {strides = array<i32>} : memref<128x192xbf16, #tpu.memory_space<vmem>>, vector<128x192xbf16>,
    return
  }
  func.func @transform_0(%arg0: i32) -> (i32, i32) {
    %c0_i32 = arith.constant 0 : i32
    %c0_i32_0 = arith.constant 0 : i32
    return %arg0, %c0_i32 : i32, i32
  }
  func.func @transform_1(%arg0: i32) -> (i32, i32) {
    %c0_i32 = arith.constant 0 : i32
    %c0_i32_0 = arith.constant 0 : i32
    %c0_i32_1 = arith.constant 0 : i32
    return %c0_i32, %c0_i32_0 : i32, i32
  }
  func.func @transform_2(%arg0: i32) -> (i32, i32) {
    %c0_i32 = arith.constant 0 : i32
    %c0_i32_0 = arith.constant 0 : i32
    %c0_i32_1 = arith.constant 0 : i32
    return %c0_i32, %c0_i32_0 : i32, i32
  }
  func.func @transform_3(%arg0: i32) -> (i32, i32) {
    %c0_i32 = arith.constant 0 : i32
    %c0_i32_0 = arith.constant 0 : i32
    return %arg0, %c0_i32 : i32, i32
  }
}

module attributes {stable_mosaic.version = 11 : i64} {
  func.func @_matmul_bias_relu_kernel(%arg0: i32, %arg1: memref<128x1728xbf16, #tpu.memory_space<vmem>>, %arg2: memref<1728x192xbf16, #tpu.memory_space<vmem>>, %arg3: memref<1x192xf32, #tpu.memory_space<vmem>>, %arg4: memref<128x192xbf16, #tpu.memory_space<vmem>>) attributes {dimension_semantics = [#tpu.dimension_semantics<parallel>], iteration_bounds = array<i64: 1>, scalar_prefetch = 0 : i64, scratch_operands = 0 : i64, tpu.core_type = #tpu.core_type<tc>, window_params = [{transform_indices = @transform_0, window_bounds = array<i64: 128, 1728>}, {pipeline_mode = #tpu.pipeline_mode<synchronous>, transform_indices = @transform_1, window_bounds = array<i64: 1728, 192>}, {pipeline_mode = #tpu.pipeline_mode<synchronous>, transform_indices = @transform_2, window_bounds = array<i64: 1, 192>}, {transform_indices = @transform_3, window_bounds = array<i64: 128, 192>}]} {
    %c0 = arith.constant 0 : index
    %c0_0 = arith.constant 0 : index
    %0 = vector.load %arg1[%c0, %c0_0] : memref<128x1728xbf16, #tpu.memory_space<vmem>>, vector<128x1728xbf16>
    %c0_1 = arith.constant 0 : index
    %c0_2 = arith.constant 0 : index
    %1 = vector.load %arg2[%c0_1, %c0_2] : memref<1728x192xbf16, #tpu.memory_space<vmem>>, vector<1728x192xbf16>
    %cst = arith.constant dense<0.000000e+00> : vector<128x192xf32>
    %2 = tpu.matmul %0, %1, %cst {dimension_numbers = #tpu.dot_dimension_numbers<[1], [0], [0], [1], [0, 0, 1, 1], [], []>} : vector<128x1728xbf16>, vector<1728x192xbf16>, vector<128x192xf32> -> vector<128x192xf32>
    %c0_3 = arith.constant 0 : index
    %c0_4 = arith.constant 0 : index
    %3 = vector.load %arg3[%c0_3, %c0_4] : memref<1x192xf32, #tpu.memory_space<vmem>>, vector<1x192xf32>
    %4 = vector.broadcast %3 : vector<1x192xf32> to vector<128x192xf32>
    %5 = arith.addf %2, %4 : vector<128x192xf32>
    %cst_5 = arith.constant 0.000000e+00 : f32
    %6 = vector.broadcast %cst_5 : f32 to vector<128x192xf32>
    %7 = arith.maximumf %5, %6 : vector<128x192xf32>
    %8 = arith.truncf %7 : vector<128x192xf32> to vector<128x192xbf16>
    %c0_6 = arith.constant 0 : index
    %c0_7 = arith.constant 0 : index
    %9 = vector.load %arg4[%c0_6, %c0_7] : memref<128x192xbf16, #tpu.memory_space<vmem>>, vector<128x192xbf16>
    tpu.vector_store %arg4[%c0_6, %c0_7], %8 {strides = array<i32>} : memref<128x192xbf16, #tpu.memory_space<vmem>>, vector<128x192xbf16>,
    return
  }
  func.func @transform_0(%arg0: i32) -> (i32, i32) {
    %c0_i32 = arith.constant 0 : i32
    %c0_i32_0 = arith.constant 0 : i32
    return %arg0, %c0_i32 : i32, i32
  }
  func.func @transform_1(%arg0: i32) -> (i32, i32) {
    %c0_i32 = arith.constant 0 : i32
    %c0_i32_0 = arith.constant 0 : i32
    %c0_i32_1 = arith.constant 0 : i32
    return %c0_i32, %c0_i32_0 : i32, i32
  }
  func.func @transform_2(%arg0: i32) -> (i32, i32) {
    %c0_i32 = arith.constant 0 : i32
    %c0_i32_0 = arith.constant 0 : i32
    %c0_i32_1 = arith.constant 0 : i32
    return %c0_i32, %c0_i32_0 : i32, i32
  }
  func.func @transform_3(%arg0: i32) -> (i32, i32) {
    %c0_i32 = arith.constant 0 : i32
    %c0_i32_0 = arith.constant 0 : i32
    return %arg0, %c0_i32 : i32, i32
  }
}

module attributes {stable_mosaic.version = 11 : i64} {
  func.func @_matmul_bias_relu_kernel(%arg0: i32, %arg1: memref<32x1728xbf16, #tpu.memory_space<vmem>>, %arg2: memref<1728x192xbf16, #tpu.memory_space<vmem>>, %arg3: memref<1x192xf32, #tpu.memory_space<vmem>>, %arg4: memref<32x192xbf16, #tpu.memory_space<vmem>>) attributes {dimension_semantics = [#tpu.dimension_semantics<parallel>], iteration_bounds = array<i64: 1>, scalar_prefetch = 0 : i64, scratch_operands = 0 : i64, tpu.core_type = #tpu.core_type<tc>, window_params = [{transform_indices = @transform_0, window_bounds = array<i64: 32, 1728>}, {pipeline_mode = #tpu.pipeline_mode<synchronous>, transform_indices = @transform_1, window_bounds = array<i64: 1728, 192>}, {pipeline_mode = #tpu.pipeline_mode<synchronous>, transform_indices = @transform_2, window_bounds = array<i64: 1, 192>}, {transform_indices = @transform_3, window_bounds = array<i64: 32, 192>}]} {
    %c0 = arith.constant 0 : index
    %c0_0 = arith.constant 0 : index
    %0 = vector.load %arg1[%c0, %c0_0] : memref<32x1728xbf16, #tpu.memory_space<vmem>>, vector<32x1728xbf16>
    %c0_1 = arith.constant 0 : index
    %c0_2 = arith.constant 0 : index
    %1 = vector.load %arg2[%c0_1, %c0_2] : memref<1728x192xbf16, #tpu.memory_space<vmem>>, vector<1728x192xbf16>
    %cst = arith.constant dense<0.000000e+00> : vector<32x192xf32>
    %2 = tpu.matmul %0, %1, %cst {dimension_numbers = #tpu.dot_dimension_numbers<[1], [0], [0], [1], [0, 0, 1, 1], [], []>} : vector<32x1728xbf16>, vector<1728x192xbf16>, vector<32x192xf32> -> vector<32x192xf32>
    %c0_3 = arith.constant 0 : index
    %c0_4 = arith.constant 0 : index
    %3 = vector.load %arg3[%c0_3, %c0_4] : memref<1x192xf32, #tpu.memory_space<vmem>>, vector<1x192xf32>
    %4 = vector.broadcast %3 : vector<1x192xf32> to vector<32x192xf32>
    %5 = arith.addf %2, %4 : vector<32x192xf32>
    %cst_5 = arith.constant 0.000000e+00 : f32
    %6 = vector.broadcast %cst_5 : f32 to vector<32x192xf32>
    %7 = arith.maximumf %5, %6 : vector<32x192xf32>
    %8 = arith.truncf %7 : vector<32x192xf32> to vector<32x192xbf16>
    %c0_6 = arith.constant 0 : index
    %c0_7 = arith.constant 0 : index
    %9 = vector.load %arg4[%c0_6, %c0_7] : memref<32x192xbf16, #tpu.memory_space<vmem>>, vector<32x192xbf16>
    tpu.vector_store %arg4[%c0_6, %c0_7], %8 {strides = array<i32>} : memref<32x192xbf16, #tpu.memory_space<vmem>>, vector<32x192xbf16>,
    return
  }
  func.func @transform_0(%arg0: i32) -> (i32, i32) {
    %c0_i32 = arith.constant 0 : i32
    %c0_i32_0 = arith.constant 0 : i32
    return %arg0, %c0_i32 : i32, i32
  }
  func.func @transform_1(%arg0: i32) -> (i32, i32) {
    %c0_i32 = arith.constant 0 : i32
    %c0_i32_0 = arith.constant 0 : i32
    %c0_i32_1 = arith.constant 0 : i32
    return %c0_i32, %c0_i32_0 : i32, i32
  }
  func.func @transform_2(%arg0: i32) -> (i32, i32) {
    %c0_i32 = arith.constant 0 : i32
    %c0_i32_0 = arith.constant 0 : i32
    %c0_i32_1 = arith.constant 0 : i32
    return %c0_i32, %c0_i32_0 : i32, i32
  }
  func.func @transform_3(%arg0: i32) -> (i32, i32) {
    %c0_i32 = arith.constant 0 : i32
    %c0_i32_0 = arith.constant 0 : i32
    return %arg0, %c0_i32 : i32, i32
  }
}

module attributes {stable_mosaic.version = 11 : i64} {
  func.func @_matmul_bias_relu_kernel(%arg0: i32, %arg1: memref<32x192xbf16, #tpu.memory_space<vmem>>, %arg2: memref<192x192xbf16, #tpu.memory_space<vmem>>, %arg3: memref<1x192xf32, #tpu.memory_space<vmem>>, %arg4: memref<32x192xbf16, #tpu.memory_space<vmem>>) attributes {dimension_semantics = [#tpu.dimension_semantics<parallel>], iteration_bounds = array<i64: 1>, scalar_prefetch = 0 : i64, scratch_operands = 0 : i64, tpu.core_type = #tpu.core_type<tc>, window_params = [{transform_indices = @transform_0, window_bounds = array<i64: 32, 192>}, {pipeline_mode = #tpu.pipeline_mode<synchronous>, transform_indices = @transform_1, window_bounds = array<i64: 192, 192>}, {pipeline_mode = #tpu.pipeline_mode<synchronous>, transform_indices = @transform_2, window_bounds = array<i64: 1, 192>}, {transform_indices = @transform_3, window_bounds = array<i64: 32, 192>}]} {
    %c0 = arith.constant 0 : index
    %c0_0 = arith.constant 0 : index
    %0 = vector.load %arg1[%c0, %c0_0] : memref<32x192xbf16, #tpu.memory_space<vmem>>, vector<32x192xbf16>
    %c0_1 = arith.constant 0 : index
    %c0_2 = arith.constant 0 : index
    %1 = vector.load %arg2[%c0_1, %c0_2] : memref<192x192xbf16, #tpu.memory_space<vmem>>, vector<192x192xbf16>
    %cst = arith.constant dense<0.000000e+00> : vector<32x192xf32>
    %2 = tpu.matmul %0, %1, %cst {dimension_numbers = #tpu.dot_dimension_numbers<[1], [0], [0], [1], [0, 0, 1, 1], [], []>} : vector<32x192xbf16>, vector<192x192xbf16>, vector<32x192xf32> -> vector<32x192xf32>
    %c0_3 = arith.constant 0 : index
    %c0_4 = arith.constant 0 : index
    %3 = vector.load %arg3[%c0_3, %c0_4] : memref<1x192xf32, #tpu.memory_space<vmem>>, vector<1x192xf32>
    %4 = vector.broadcast %3 : vector<1x192xf32> to vector<32x192xf32>
    %5 = arith.addf %2, %4 : vector<32x192xf32>
    %cst_5 = arith.constant 0.000000e+00 : f32
    %6 = vector.broadcast %cst_5 : f32 to vector<32x192xf32>
    %7 = arith.maximumf %5, %6 : vector<32x192xf32>
    %8 = arith.truncf %7 : vector<32x192xf32> to vector<32x192xbf16>
    %c0_6 = arith.constant 0 : index
    %c0_7 = arith.constant 0 : index
    %9 = vector.load %arg4[%c0_6, %c0_7] : memref<32x192xbf16, #tpu.memory_space<vmem>>, vector<32x192xbf16>
    tpu.vector_store %arg4[%c0_6, %c0_7], %8 {strides = array<i32>} : memref<32x192xbf16, #tpu.memory_space<vmem>>, vector<32x192xbf16>,
    return
  }
  func.func @transform_0(%arg0: i32) -> (i32, i32) {
    %c0_i32 = arith.constant 0 : i32
    %c0_i32_0 = arith.constant 0 : i32
    return %arg0, %c0_i32 : i32, i32
  }
  func.func @transform_1(%arg0: i32) -> (i32, i32) {
    %c0_i32 = arith.constant 0 : i32
    %c0_i32_0 = arith.constant 0 : i32
    %c0_i32_1 = arith.constant 0 : i32
    return %c0_i32, %c0_i32_0 : i32, i32
  }
  func.func @transform_2(%arg0: i32) -> (i32, i32) {
    %c0_i32 = arith.constant 0 : i32
    %c0_i32_0 = arith.constant 0 : i32
    %c0_i32_1 = arith.constant 0 : i32
    return %c0_i32, %c0_i32_0 : i32, i32
  }
  func.func @transform_3(%arg0: i32) -> (i32, i32) {
    %c0_i32 = arith.constant 0 : i32
    %c0_i32_0 = arith.constant 0 : i32
    return %arg0, %c0_i32 : i32, i32
  }
}

module attributes {stable_mosaic.version = 11 : i64} {
  func.func @_matmul_bias_relu_kernel(%arg0: i32, %arg1: memref<32x192xbf16, #tpu.memory_space<vmem>>, %arg2: memref<192x128xbf16, #tpu.memory_space<vmem>>, %arg3: memref<1x128xf32, #tpu.memory_space<vmem>>, %arg4: memref<32x128xbf16, #tpu.memory_space<vmem>>) attributes {dimension_semantics = [#tpu.dimension_semantics<parallel>], iteration_bounds = array<i64: 1>, scalar_prefetch = 0 : i64, scratch_operands = 0 : i64, tpu.core_type = #tpu.core_type<tc>, window_params = [{transform_indices = @transform_0, window_bounds = array<i64: 32, 192>}, {pipeline_mode = #tpu.pipeline_mode<synchronous>, transform_indices = @transform_1, window_bounds = array<i64: 192, 128>}, {pipeline_mode = #tpu.pipeline_mode<synchronous>, transform_indices = @transform_2, window_bounds = array<i64: 1, 128>}, {transform_indices = @transform_3, window_bounds = array<i64: 32, 128>}]} {
    %c0 = arith.constant 0 : index
    %c0_0 = arith.constant 0 : index
    %0 = vector.load %arg1[%c0, %c0_0] : memref<32x192xbf16, #tpu.memory_space<vmem>>, vector<32x192xbf16>
    %c0_1 = arith.constant 0 : index
    %c0_2 = arith.constant 0 : index
    %1 = vector.load %arg2[%c0_1, %c0_2] : memref<192x128xbf16, #tpu.memory_space<vmem>>, vector<192x128xbf16>
    %cst = arith.constant dense<0.000000e+00> : vector<32x128xf32>
    %2 = tpu.matmul %0, %1, %cst {dimension_numbers = #tpu.dot_dimension_numbers<[1], [0], [0], [1], [0, 0, 1, 1], [], []>} : vector<32x192xbf16>, vector<192x128xbf16>, vector<32x128xf32> -> vector<32x128xf32>
    %c0_3 = arith.constant 0 : index
    %c0_4 = arith.constant 0 : index
    %3 = vector.load %arg3[%c0_3, %c0_4] : memref<1x128xf32, #tpu.memory_space<vmem>>, vector<1x128xf32>
    %4 = vector.broadcast %3 : vector<1x128xf32> to vector<32x128xf32>
    %5 = arith.addf %2, %4 : vector<32x128xf32>
    %cst_5 = arith.constant 0.000000e+00 : f32
    %6 = vector.broadcast %cst_5 : f32 to vector<32x128xf32>
    %7 = arith.maximumf %5, %6 : vector<32x128xf32>
    %8 = arith.truncf %7 : vector<32x128xf32> to vector<32x128xbf16>
    %c0_6 = arith.constant 0 : index
    %c0_7 = arith.constant 0 : index
    %9 = vector.load %arg4[%c0_6, %c0_7] : memref<32x128xbf16, #tpu.memory_space<vmem>>, vector<32x128xbf16>
    tpu.vector_store %arg4[%c0_6, %c0_7], %8 {strides = array<i32>} : memref<32x128xbf16, #tpu.memory_space<vmem>>, vector<32x128xbf16>,
    return
  }
  func.func @transform_0(%arg0: i32) -> (i32, i32) {
    %c0_i32 = arith.constant 0 : i32
    %c0_i32_0 = arith.constant 0 : i32
    return %arg0, %c0_i32 : i32, i32
  }
  func.func @transform_1(%arg0: i32) -> (i32, i32) {
    %c0_i32 = arith.constant 0 : i32
    %c0_i32_0 = arith.constant 0 : i32
    %c0_i32_1 = arith.constant 0 : i32
    return %c0_i32, %c0_i32_0 : i32, i32
  }
  func.func @transform_2(%arg0: i32) -> (i32, i32) {
    %c0_i32 = arith.constant 0 : i32
    %c0_i32_0 = arith.constant 0 : i32
    %c0_i32_1 = arith.constant 0 : i32
    return %c0_i32, %c0_i32_0 : i32, i32
  }
  func.func @transform_3(%arg0: i32) -> (i32, i32) {
    %c0_i32 = arith.constant 0 : i32
    %c0_i32_0 = arith.constant 0 : i32
    return %arg0, %c0_i32 : i32, i32
  }
}

module attributes {stable_mosaic.version = 11 : i64} {
  func.func @_avgpool_kernel(%arg0: memref<2x16x128xbf16, #tpu.memory_space<vmem>>, %arg1: memref<2x128xf32, #tpu.memory_space<vmem>>) attributes {dimension_semantics = [], scalar_prefetch = 0 : i64, scratch_operands = 0 : i64, tpu.core_type = #tpu.core_type<tc>} {
    %c0 = arith.constant 0 : index
    %c0_0 = arith.constant 0 : index
    %c0_1 = arith.constant 0 : index
    %0 = vector.load %arg0[%c0, %c0_0, %c0_1] : memref<2x16x128xbf16, #tpu.memory_space<vmem>>, vector<2x16x128xbf16>
    %1 = arith.extf %0 : vector<2x16x128xbf16> to vector<2x16x128xf32>
    %cst = arith.constant dense<0.000000e+00> : vector<2x128xf32>
    %2 = vector.multi_reduction <add>, %1, %cst [1] : vector<2x16x128xf32> to vector<2x128xf32>
    %cst_2 = arith.constant 1.600000e+01 : f32
    %3 = vector.broadcast %cst_2 : f32 to vector<2x128xf32>
    %4 = arith.divf %2, %3 : vector<2x128xf32>
    %c0_3 = arith.constant 0 : index
    %c0_4 = arith.constant 0 : index
    %5 = vector.load %arg1[%c0_3, %c0_4] : memref<2x128xf32, #tpu.memory_space<vmem>>, vector<2x128xf32>
    tpu.vector_store %arg1[%c0_3, %c0_4], %4 {strides = array<i32>} : memref<2x128xf32, #tpu.memory_space<vmem>>, vector<2x128xf32>,
    return
  }
}

</mosaic_0001>

<bundles_post_ra>
// kernel: model_c_forward.10
= control target key start
LH: loop header
LB: loop body
LE: loop exit
PB: predicated region body
PF: predicated region fallthrough
CT: control target
= control target key end

     0   :  { %s1102_s12 = smov 0   ;;  %s1224_s0 = inlined_call_operand.vmem [shape: bf16[512,36], index: 0, kind: input, shape index: {}]   ;;  %s1225_s1 = inlined_call_operand.vmem [shape: bf16[36,128], index: 1, kind: input, shape index: {}]   ;;  %s1226_s2 = inlined_call_operand.vmem [shape: f32[1,128], index: 2, kind: input, shape index: {}]   ;;  %s1227_s3 = inlined_call_operand.vmem [shape: bf16[512,128], index: 3, kind: output, shape index: {}]  }
   0x1 LB: > { %s776_s13 = sadd.s32 4294967295, %s1080_s12   ;;  %p780_p0 = scmp.ge.s32.totalorder %s1080_s12, 1  ;;  %s1080_s12 = sphi %s1102_s12, %s13_s12  }
   0x2   : > { %p138_p1 = scmp.lt.s32.totalorder %s1080_s12, 3 }
   0x4   : > { %p139_p2 = pnand %p780_p0, %p138_p1 }
   0x5   : > { %v1055_v0 = vld [vmem:[%s1225_s1] sm:$0xff] (!%p139_p2)   ;;  %v1056_v1 = vld [vmem:[%s1225_s1 + $0x8] sm:$0xff] (!%p139_p2)   ;;  %s781_s18 = sshll.u32 (!%p139_p2), %s776_s13, 5  ;;  %v1057_v2 = vld [vmem:[%s1225_s1 + $0x10] ss:$0 sps:$4 sm:$0x33] (!%p139_p2)  }
   0x6   : > { %142 = sbr.rel (%p139_p2) target bundleno = 265 (0x109), region = 32  ;;  %1001 = vmatprep.subr.bf16.mxu0 (!%p139_p2), %v1055_v0  ;;  %1039 = vmatprep.subr.bf16.mxu1 (!%p139_p2), %v1055_v0  ;;  %p163_p3 = scmp.lt.s32.totalorder (!%p139_p2), %s781_s18, 63  ;;  %vm363_vm0 = vcmask (!%p139_p2), 1041408   ;;  %vm314_vm1 = vcmask (!%p139_p2), 293888   ;;  %v1164_v20 = vld [vmem:[%s1226_s2] ss:$0 sm:$0xff] (!%p139_p2) }
   0x7   : > { %1002 = vmatpush3.bf16.msra.mxu0 (!%p139_p2), %v1055_v0  ;;  %1042 = vmatpush3.bf16.msra.mxu1 (!%p139_p2), %v1055_v0  ;;  %v365_v3 = vsel (!%p139_p2), %vm363_vm0, %v1057_v2, 0 }
   0x8   : > { %1003 = vmatprep.subr.bf16.mxu0 (!%p139_p2), %v1056_v1  ;;  %1040 = vmatprep.subr.bf16.mxu1 (!%p139_p2), %v1056_v1 }
   0xb   : > { %1004 = vmatpush3.bf16.msra.mxu0 (!%p139_p2), %v1056_v1  ;;  %1043 = vmatpush3.bf16.msra.mxu1 (!%p139_p2), %v1056_v1 }
   0xc   : > { %1045 = vmatprep.subr.msk.bf16.mxu0 (!%p139_p2), %vm363_vm0, %v1057_v2  ;;  %1046 = vmatprep.subr.msk.bf16.mxu1 (!%p139_p2), %vm363_vm0, %v1057_v2 }
   0xd   : > { %s1229_s18 = smov (!%p163_p3, %s781_s18), 63 }
   0xe   : > { %s782_s21 = sshll.u32 %s1229_s18, 2 }
   0xf   : > { %s1127_s24 = scalar_lea.vmem %s1224_s0, %s782_s21  ;;  %1006 = vmatpush3.bf16.msra.mxu0 %v365_v3  ;;  %1044 = vmatpush3.bf16.msra.mxu1 %v365_v3  ;;  %s1179_s29 = scalar_lea.vmem %s1227_s3, %s782_s21 }
  0x10   : > { %v1058_v4 = vld [vmem:[%s1127_s24] sm:$0xff]   ;;  %v1060_v6 = vld [vmem:[%s1127_s24 + $0x8] sm:$0xff]   ;;  %v1062_v8 = vld [vmem:[%s1127_s24 + $0x10] sm:$0xff]  }
  0x11   : > { %v1059_v5 = vld [vmem:[%s1127_s24 + $0x40] sm:$0xff]   ;;  %1007 = vmatprep.mubr.msk.bf16.mxu0 %vm314_vm1, %v1058_v4  ;;  %v1061_v7 = vld [vmem:[%s1127_s24 + $0x48] sm:$0xff]   ;;  %v1063_v9 = vld [vmem:[%s1127_s24 + $0x50] sm:$0xff]  }
  0x12   : > { %1023 = vmatprep.mubr.msk.bf16.mxu1 %vm314_vm1, %v1059_v5  ;;  %1008 = vmatmul.mubr.msk.bf16.vlgmr.msra.gmra.mrb[0].mxu0 %vm314_vm1, %v1060_v6  ;;  %v1064_v10 = vld [vmem:[%s1127_s24 + $0x18] sm:$0xff]   ;;  %v1066_v12 = vld [vmem:[%s1127_s24 + $0x20] sm:$0xff]   ;;  %v1068_v14 = vld [vmem:[%s1127_s24 + $0x28] sm:$0xff]  }
  0x13   : > { %1024 = vmatmul.mubr.msk.bf16.vlgmr.msra.gmra.mrb[0].mxu1 %vm314_vm1, %v1061_v7  ;;  %1011 = vmatprep.mubr.msk.bf16.mxu0 %vm314_vm1, %v1062_v8  ;;  %v1065_v11 = vld [vmem:[%s1127_s24 + $0x58] sm:$0xff]   ;;  %v1067_v13 = vld [vmem:[%s1127_s24 + $0x60] sm:$0xff]   ;;  %v1069_v15 = vld [vmem:[%s1127_s24 + $0x68] sm:$0xff]  }
  0x14   : > { %1027 = vmatprep.mubr.msk.bf16.mxu1 %vm314_vm1, %v1063_v9  ;;  %v1070_v16 = vld [vmem:[%s1127_s24 + $0x30] sm:$0xff]   ;;  %v1072_v18 = vld [vmem:[%s1127_s24 + $0x38] sm:$0xff]  }
  0x15   : > { %v1071_v17 = vld [vmem:[%s1127_s24 + $0x70] sm:$0xff]   ;;  %v1073_v19 = vld [vmem:[%s1127_s24 + $0x78] sm:$0xff]  }
  0x1a   : > { %1012 = vmatmul.mubr.msk.bf16.gmra.mrb[4].mxu0 %vm314_vm1, %v1064_v10 }
  0x1b   : > { %1028 = vmatmul.mubr.msk.bf16.gmra.mrb[4].mxu1 %vm314_vm1, %v1065_v11  ;;  %1015 = vmatprep.mubr.msk.bf16.mxu0 %vm314_vm1, %v1066_v12 }
  0x1c   : > { %1031 = vmatprep.mubr.msk.bf16.mxu1 %vm314_vm1, %v1067_v13 }
  0x22   : > { %1016 = vmatmul.mubr.msk.bf16.gmra.mrb[8].mxu0 %vm314_vm1, %v1068_v14 }
  0x23   : > { %1032 = vmatmul.mubr.msk.bf16.gmra.mrb[8].mxu1 %vm314_vm1, %v1069_v15  ;;  %1019 = vmatprep.mubr.msk.bf16.mxu0 %vm314_vm1, %v1070_v16 }
  0x24   : > { %1035 = vmatprep.mubr.msk.bf16.mxu1 %vm314_vm1, %v1071_v17 }
  0x2a   : > { %1020 = vmatmul.mubr.msk.bf16.gmra.mrb[12].mxu0 %vm314_vm1, %v1072_v18 }
  0x2b   : > { %1036 = vmatmul.mubr.msk.bf16.gmra.mrb[12].mxu1 %vm314_vm1, %v1073_v19 }
  0xe5   : > { %v1009_v21 = vpop.f32.mrb[0].mxu0 }
  0xe6   : > { %v1025_v22 = vpop.f32.mrb[0].mxu1  ;;  %v410_v23 = vadd.f32 %v1009_v21, %v1164_v20  ;;  %v401_v25 = vpop.f32.mrb[1].mxu0 }
  0xe7   : > { %v474_v24 = vadd.f32 %v1025_v22, %v1164_v20  ;;  %v465_v26 = vpop.f32.mrb[1].mxu1  ;;  %v402_v27 = vadd.f32 %v1164_v20, %v401_v25  ;;  %v1010_v29 = vpop.f32.mrb[2].mxu0 }
  0xe8   : > { %v466_v28 = vadd.f32 %v1164_v20, %v465_v26  ;;  %v1026_v30 = vpop.f32.mrb[2].mxu1  ;;  %v413_v31 = vadd.f32 %v1010_v29, %v1164_v20  ;;  %v404_v33 = vpop.f32.mrb[3].mxu0  ;;  %v530_v37 = vmax.f32 %v410_v23, 0.0 }
  0xe9   : > { %v477_v32 = vadd.f32 %v1026_v30, %v1164_v20  ;;  %v468_v34 = vpop.f32.mrb[3].mxu1  ;;  %v405_v35 = vadd.f32 %v1164_v20, %v404_v33  ;;  %v546_v38 = vmax.f32 %v474_v24, 0.0  ;;  %v528_v41 = vmax.f32 %v402_v27, 0.0 }
  0xea   : > { %v469_v36 = vadd.f32 %v1164_v20, %v468_v34  ;;  %v531_v39 = vmax.f32 %v413_v31, 0.0  ;;  %v544_v42 = vmax.f32 %v466_v28, 0.0 }
  0xeb   : > { %v547_v40 = vmax.f32 %v477_v32, 0.0  ;;  %v529_v43 = vmax.f32 %v405_v35, 0.0 }
  0xec   : > { %v545_v44 = vmax.f32 %v469_v36, 0.0  ;;  %v895_v45 = vpack.c.bf16 %v531_v39, %v530_v37 }
  0xed   : > { %v935_v46 = vpack.c.bf16 %v547_v40, %v546_v38  ;;  %v890_v47 = vpack.c.bf16 %v529_v43, %v528_v41  ;;  %v1013_v49 = vpop.f32.mrb[4].mxu0 }
  0xee   : > { %v930_v48 = vpack.c.bf16 %v545_v44, %v544_v42  ;;  %v1029_v50 = vpop.f32.mrb[4].mxu1  ;;  %967 = vst [vmem:[%s1179_s29 + $0x8] sm:$0xff] %v895_v45   ;;  %v426_v51 = vadd.f32 %v1013_v49, %v1164_v20  ;;  %v417_v53 = vpop.f32.mrb[5].mxu0 }
  0xef   : > { %975 = vst [vmem:[%s1179_s29 + $0x48] sm:$0xff] %v935_v46   ;;  %v490_v52 = vadd.f32 %v1029_v50, %v1164_v20  ;;  %v481_v54 = vpop.f32.mrb[5].mxu1  ;;  %891 = vst [vmem:[%s1179_s29] sm:$0xff] %v890_v47   ;;  %v418_v55 = vadd.f32 %v1164_v20, %v417_v53  ;;  %v1014_v57 = vpop.f32.mrb[6].mxu0 }
  0xf0   : > { %974 = vst [vmem:[%s1179_s29 + $0x40] sm:$0xff] %v930_v48   ;;  %v482_v56 = vadd.f32 %v1164_v20, %v481_v54  ;;  %v1030_v58 = vpop.f32.mrb[6].mxu1  ;;  %v429_v59 = vadd.f32 %v1014_v57, %v1164_v20  ;;  %v420_v61 = vpop.f32.mrb[7].mxu0  ;;  %v534_v1 = vmax.f32 %v426_v51, 0.0 }
  0xf1   : > { %v493_v60 = vadd.f32 %v1030_v58, %v1164_v20  ;;  %v484_v62 = vpop.f32.mrb[7].mxu1  ;;  %v421_v63 = vadd.f32 %v1164_v20, %v420_v61  ;;  %v550_v2 = vmax.f32 %v490_v52, 0.0  ;;  %v532_v5 = vmax.f32 %v418_v55, 0.0 }
  0xf2   : > { %v485_v0 = vadd.f32 %v1164_v20, %v484_v62  ;;  %v535_v3 = vmax.f32 %v429_v59, 0.0  ;;  %v548_v6 = vmax.f32 %v482_v56, 0.0 }
  0xf3   : > { %v551_v4 = vmax.f32 %v493_v60, 0.0  ;;  %v533_v7 = vmax.f32 %v421_v63, 0.0 }
  0xf4   : > { %v549_v8 = vmax.f32 %v485_v0, 0.0  ;;  %v905_v9 = vpack.c.bf16 %v535_v3, %v534_v1 }
  0xf5   : > { %v945_v10 = vpack.c.bf16 %v551_v4, %v550_v2  ;;  %v900_v11 = vpack.c.bf16 %v533_v7, %v532_v5  ;;  %v1017_v13 = vpop.f32.mrb[8].mxu0 }
  0xf6   : > { %v940_v12 = vpack.c.bf16 %v549_v8, %v548_v6  ;;  %v1033_v14 = vpop.f32.mrb[8].mxu1  ;;  %969 = vst [vmem:[%s1179_s29 + $0x18] sm:$0xff] %v905_v9   ;;  %v442_v15 = vadd.f32 %v1017_v13, %v1164_v20  ;;  %v433_v17 = vpop.f32.mrb[9].mxu0 }
  0xf7   : > { %977 = vst [vmem:[%s1179_s29 + $0x58] sm:$0xff] %v945_v10   ;;  %v506_v16 = vadd.f32 %v1033_v14, %v1164_v20  ;;  %v497_v18 = vpop.f32.mrb[9].mxu1  ;;  %968 = vst [vmem:[%s1179_s29 + $0x10] sm:$0xff] %v900_v11   ;;  %v434_v19 = vadd.f32 %v1164_v20, %v433_v17  ;;  %v1018_v22 = vpop.f32.mrb[10].mxu0 }
  0xf8   : > { %976 = vst [vmem:[%s1179_s29 + $0x50] sm:$0xff] %v940_v12   ;;  %v498_v21 = vadd.f32 %v1164_v20, %v497_v18  ;;  %v1034_v23 = vpop.f32.mrb[10].mxu1  ;;  %v445_v24 = vadd.f32 %v1018_v22, %v1164_v20  ;;  %v436_v26 = vpop.f32.mrb[11].mxu0  ;;  %v538_v30 = vmax.f32 %v442_v15, 0.0 }
  0xf9   : > { %v509_v25 = vadd.f32 %v1034_v23, %v1164_v20  ;;  %v500_v27 = vpop.f32.mrb[11].mxu1  ;;  %v437_v28 = vadd.f32 %v1164_v20, %v436_v26  ;;  %v554_v31 = vmax.f32 %v506_v16, 0.0  ;;  %v536_v34 = vmax.f32 %v434_v19, 0.0 }
  0xfa   : > { %v501_v29 = vadd.f32 %v1164_v20, %v500_v27  ;;  %v539_v32 = vmax.f32 %v445_v24, 0.0  ;;  %v552_v35 = vmax.f32 %v498_v21, 0.0 }
  0xfb   : > { %v555_v33 = vmax.f32 %v509_v25, 0.0  ;;  %v537_v36 = vmax.f32 %v437_v28, 0.0 }
  0xfc   : > { %v553_v37 = vmax.f32 %v501_v29, 0.0  ;;  %v915_v38 = vpack.c.bf16 %v539_v32, %v538_v30 }
  0xfd   : > { %v955_v39 = vpack.c.bf16 %v555_v33, %v554_v31  ;;  %v910_v40 = vpack.c.bf16 %v537_v36, %v536_v34  ;;  %v1021_v42 = vpop.f32.mrb[12].mxu0 }
  0xfe   : > { %v950_v41 = vpack.c.bf16 %v553_v37, %v552_v35  ;;  %v1037_v43 = vpop.f32.mrb[12].mxu1  ;;  %971 = vst [vmem:[%s1179_s29 + $0x28] sm:$0xff] %v915_v38   ;;  %v458_v44 = vadd.f32 %v1021_v42, %v1164_v20  ;;  %v449_v46 = vpop.f32.mrb[13].mxu0 }
  0xff   : > { %979 = vst [vmem:[%s1179_s29 + $0x68] sm:$0xff] %v955_v39   ;;  %v522_v45 = vadd.f32 %v1037_v43, %v1164_v20  ;;  %v513_v47 = vpop.f32.mrb[13].mxu1  ;;  %970 = vst [vmem:[%s1179_s29 + $0x20] sm:$0xff] %v910_v40   ;;  %v450_v48 = vadd.f32 %v1164_v20, %v449_v46  ;;  %v1022_v50 = vpop.f32.mrb[14].mxu0 }
 0x100   : > { %978 = vst [vmem:[%s1179_s29 + $0x60] sm:$0xff] %v950_v41   ;;  %v514_v49 = vadd.f32 %v1164_v20, %v513_v47  ;;  %v1038_v51 = vpop.f32.mrb[14].mxu1  ;;  %v461_v52 = vadd.f32 %v1022_v50, %v1164_v20  ;;  %v452_v54 = vpop.f32.mrb[15].mxu0  ;;  %v542_v58 = vmax.f32 %v458_v44, 0.0 }
 0x101   : > { %v525_v53 = vadd.f32 %v1038_v51, %v1164_v20  ;;  %v516_v55 = vpop.f32.mrb[15].mxu1  ;;  %v453_v56 = vadd.f32 %v1164_v20, %v452_v54  ;;  %v558_v59 = vmax.f32 %v522_v45, 0.0  ;;  %v540_v62 = vmax.f32 %v450_v48, 0.0 }
 0x102   : > { %v517_v57 = vadd.f32 %v1164_v20, %v516_v55  ;;  %v543_v60 = vmax.f32 %v461_v52, 0.0  ;;  %v556_v63 = vmax.f32 %v514_v49, 0.0 }
 0x103   : > { %v559_v61 = vmax.f32 %v525_v53, 0.0  ;;  %v541_v0 = vmax.f32 %v453_v56, 0.0 }
 0x104   : > { %v557_v1 = vmax.f32 %v517_v57, 0.0  ;;  %v925_v2 = vpack.c.bf16 %v543_v60, %v542_v58 }
 0x105   : > { %v965_v3 = vpack.c.bf16 %v559_v61, %v558_v59  ;;  %v920_v4 = vpack.c.bf16 %v541_v0, %v540_v62 }
 0x106   : > { %v960_v5 = vpack.c.bf16 %v557_v1, %v556_v63  ;;  %973 = vst [vmem:[%s1179_s29 + $0x38] sm:$0xff] %v925_v2  }
 0x107   : > { %981 = vst [vmem:[%s1179_s29 + $0x78] sm:$0xff] %v965_v3   ;;  %972 = vst [vmem:[%s1179_s29 + $0x30] sm:$0xff] %v920_v4  }
 0x108   : > { %980 = vst [vmem:[%s1179_s29 + $0x70] sm:$0xff] %v960_v5  }
 0x109 PF: > { %s13_s12 = sadd.s32 1, %s1080_s12  }
 0x10a   : > { %p10_p4 = scmp.ge.s32.totalorder %s13_s12, 4  }
 0x10c   :  { %12 = sbr.rel (!%p10_p4) target bundleno = 1 (0x1), region = 62 }

// kernel: model_c_forward.11
= control target key start
LH: loop header
LB: loop body
LE: loop exit
PB: predicated region body
PF: predicated region fallthrough
CT: control target
= control target key end

     0   :  { %s3950_s12 = smov 0   ;;  %s4730_s0 = inlined_call_operand.vmem [shape: bf16[512,1152], index: 0, kind: input, shape index: {}]   ;;  %s4731_s1 = inlined_call_operand.vmem [shape: bf16[1152,128], index: 1, kind: input, shape index: {}]   ;;  %s4732_s2 = inlined_call_operand.vmem [shape: f32[1,128], index: 2, kind: input, shape index: {}]   ;;  %s4733_s3 = inlined_call_operand.vmem [shape: bf16[512,128], index: 3, kind: output, shape index: {}]  }
   0x1 LB: > { %s2710_s13 = sadd.s32 4294967295, %s3928_s12   ;;  %p2714_p0 = scmp.ge.s32.totalorder %s3928_s12, 1  ;;  %s3928_s12 = sphi %s3950_s12, %s13_s12  }
   0x2   : > { %p139_p1 = scmp.lt.s32.totalorder %s3928_s12, 3 }
   0x4   : > { %p140_p2 = pnand %p2714_p0, %p139_p1 }
   0x5   : > { %v3642_v0 = vld [vmem:[%s4731_s1 + $0x40] sm:$0xff] (!%p140_p2)   ;;  %s2715_s16 = sshll.u32 (!%p140_p2), %s2710_s13, 5  ;;  %v3644_v2 = vld [vmem:[%s4731_s1 + $0x48] sm:$0xff] (!%p140_p2)   ;;  %v3646_v4 = vld [vmem:[%s4731_s1 + $0x50] sm:$0xff] (!%p140_p2)  }
   0x6   : > { %143 = sbr.rel (%p140_p2) target bundleno = 544 (0x220), region = 32  ;;  %v3643_v1 = vld [vmem:[%s4731_s1] sm:$0xff] (!%p140_p2)   ;;  %3097 = vmatprep.subr.bf16.mxu0 (!%p140_p2), %v3642_v0  ;;  %3617 = vmatprep.subr.bf16.mxu1 (!%p140_p2), %v3642_v0  ;;  %p165_p3 = scmp.lt.s32.totalorder (!%p140_p2), %s2715_s16, 63  ;;  %v3645_v3 = vld [vmem:[%s4731_s1 + $0x8] sm:$0xff] (!%p140_p2)   ;;  %v3647_v5 = vld [vmem:[%s4731_s1 + $0x10] sm:$0xff] (!%p140_p2)  }
   0x7   : > { %3098 = vmatpush3.bf16.msra.mxu0 (!%p140_p2), %v3643_v1  ;;  %3625 = vmatpush3.bf16.msra.mxu1 (!%p140_p2), %v3643_v1  ;;  %v3648_v6 = vld [vmem:[%s4731_s1 + $0x58] sm:$0xff] (!%p140_p2)   ;;  %v3650_v8 = vld [vmem:[%s4731_s1 + $0x60] sm:$0xff] (!%p140_p2)   ;;  %v3652_v10 = vld [vmem:[%s4731_s1 + $0x68] sm:$0xff] (!%p140_p2)  }
   0x8   : > { %3099 = vmatprep.subr.bf16.mxu0 (!%p140_p2), %v3644_v2  ;;  %3618 = vmatprep.subr.bf16.mxu1 (!%p140_p2), %v3644_v2  ;;  %v3649_v7 = vld [vmem:[%s4731_s1 + $0x18] sm:$0xff] (!%p140_p2)   ;;  %v3651_v9 = vld [vmem:[%s4731_s1 + $0x20] sm:$0xff] (!%p140_p2)   ;;  %v3653_v13 = vld [vmem:[%s4731_s1 + $0x28] sm:$0xff] (!%p140_p2)  }
   0x9   : > { %v3654_v14 = vld [vmem:[%s4731_s1 + $0x70] sm:$0xff] (!%p140_p2)   ;;  %v3656_v16 = vld [vmem:[%s4731_s1 + $0x78] sm:$0xff] (!%p140_p2)   ;;  %v3664_v18 = vld [vmem:[%s4731_s1 + $0xc0] sm:$0xff] (!%p140_p2)  }
   0xa   : > { %v3655_v15 = vld [vmem:[%s4731_s1 + $0x30] sm:$0xff] (!%p140_p2)   ;;  %v3657_v17 = vld [vmem:[%s4731_s1 + $0x38] sm:$0xff] (!%p140_p2)   ;;  %v3667_v21 = vld [vmem:[%s4731_s1 + $0x140] sm:$0xff] (!%p140_p2)  }
   0xb   : > { %3100 = vmatpush3.bf16.msra.mxu0 (!%p140_p2), %v3645_v3  ;;  %3626 = vmatpush3.bf16.msra.mxu1 (!%p140_p2), %v3645_v3  ;;  %v3665_v22 = vld [vmem:[%s4731_s1 + $0x80] sm:$0xff] (!%p140_p2)   ;;  %v3666_v23 = vld [vmem:[%s4731_s1 + $0xc8] sm:$0xff] (!%p140_p2)   ;;  %v3676_v31 = vld [vmem:[%s4731_s1 + $0xd0] sm:$0xff] (!%p140_p2)  }
   0xc   : > { %3101 = vmatprep.subr.bf16.mxu0 (!%p140_p2), %v3646_v4  ;;  %3619 = vmatprep.subr.bf16.mxu1 (!%p140_p2), %v3646_v4  ;;  %v3669_v24 = vld [vmem:[%s4731_s1 + $0x100] sm:$0xff] (!%p140_p2)   ;;  %v3668_v27 = vld [vmem:[%s4731_s1 + $0x88] sm:$0xff] (!%p140_p2)   ;;  %v3677_v32 = vld [vmem:[%s4731_s1 + $0x90] sm:$0xff] (!%p140_p2)  }
   0xd   : > { %s4735_s16 = smov (!%p165_p3, %s2715_s16), 63  ;;  %v3687_v28 = vld [vmem:[%s4731_s1 + $0x148] sm:$0xff]   ;;  %v3678_v34 = vld [vmem:[%s4731_s1 + $0xd8] sm:$0xff]   ;;  %v3686_v40 = vld [vmem:[%s4731_s1 + $0xe0] sm:$0xff]  }
   0xe   : > { %s3633_s29 = smul.u32 36, %s4735_s16  ;;  %v3689_v33 = vld [vmem:[%s4731_s1 + $0x108] sm:$0xff]   ;;  %v3679_v37 = vld [vmem:[%s4731_s1 + $0x98] sm:$0xff]   ;;  %v3688_v41 = vld [vmem:[%s4731_s1 + $0xa0] sm:$0xff]  }
   0xf   : > { %3102 = vmatpush3.bf16.msra.mxu0 %v3647_v5  ;;  %3627 = vmatpush3.bf16.msra.mxu1 %v3647_v5  ;;  %v3690_v42 = vld [vmem:[%s4731_s1 + $0xe8] sm:$0xff]   ;;  %v3701_v43 = vld [vmem:[%s4731_s1 + $0x150] sm:$0xff]   ;;  %v3700_v52 = vld [vmem:[%s4731_s1 + $0xf8] sm:$0xff]  }
  0x10   : > { %3103 = vmatprep.subr.bf16.mxu0 %v3648_v6  ;;  %3620 = vmatprep.subr.bf16.mxu1 %v3648_v6  ;;  %s3991_s9 = scalar_lea.vmem %s4730_s0, %s3633_s29  ;;  %v3703_v46 = vld [vmem:[%s4731_s1 + $0x110] sm:$0xff]   ;;  %v3691_v47 = vld [vmem:[%s4731_s1 + $0xa8] sm:$0xff]   ;;  %v3718_v55 = vld [vmem:[%s4731_s1 + $0x158] sm:$0xff]  }
  0x11   : > { %v3660_v11 = vld [vmem:[%s3991_s9 + $0x4] ss:$36 sps:$4 sm:$0xff]   ;;  %v3670_v25 = vld [vmem:[%s3991_s9 + $0x4c] ss:$36 sps:$4 sm:$0xff]   ;;  %v3680_v35 = vld [vmem:[%s3991_s9 + $0x94] ss:$36 sps:$4 sm:$0xff]  }
  0x12   : > { %v3663_v12 = vld [vmem:[%s3991_s9 + $0x364] ss:$36 sps:$4 sm:$0xff]   ;;  %1689 = vmatprep.mubr.bf16.mxu0 %v3660_v11  ;;  %v3672_v26 = vld [vmem:[%s3991_s9 + $0x3ac] ss:$36 sps:$4 sm:$0xff]   ;;  %v3682_v36 = vld [vmem:[%s3991_s9 + $0x3f4] ss:$36 sps:$4 sm:$0xff]  }
  0x13   : > { %3104 = vmatpush3.bf16.msra.mxu0 %v3649_v7  ;;  %3628 = vmatpush3.bf16.msra.mxu1 %v3649_v7  ;;  %v3658_v19 = vld [vmem:[%s3991_s9] ss:$36 sps:$4 sm:$0xff]   ;;  %v3674_v29 = vld [vmem:[%s3991_s9 + $0x48] ss:$36 sps:$4 sm:$0xff]   ;;  %v3684_v38 = vld [vmem:[%s3991_s9 + $0x90] ss:$36 sps:$4 sm:$0xff]  }
  0x14   : > { %3105 = vmatprep.subr.bf16.mxu0 %v3650_v8  ;;  %3621 = vmatprep.subr.bf16.mxu1 %v3650_v8  ;;  %v3661_v20 = vld [vmem:[%s3991_s9 + $0x360] ss:$36 sps:$4 sm:$0xff]   ;;  %v3675_v30 = vld [vmem:[%s3991_s9 + $0x3a8] ss:$36 sps:$4 sm:$0xff]   ;;  %v3685_v39 = vld [vmem:[%s3991_s9 + $0x3f0] ss:$36 sps:$4 sm:$0xff]  }
  0x15   : > { %1785 = vmatprep.mubr.bf16.mxu1 %v3663_v12  ;;  %v3692_v44 = vld [vmem:[%s3991_s9 + $0xdc] ss:$36 sps:$4 sm:$0xff]   ;;  %v3698_v48 = vld [vmem:[%s4731_s1 + $0xf0] sm:$0xff]   ;;  %v3704_v53 = vld [vmem:[%s3991_s9 + $0x124] ss:$36 sps:$4 sm:$0xff]  }
  0x16   : > { %v3694_v45 = vld [vmem:[%s3991_s9 + $0x43c] ss:$36 sps:$4 sm:$0xff]   ;;  %v3699_v51 = vld [vmem:[%s4731_s1 + $0xb0] sm:$0xff]   ;;  %v3706_v58 = vld [vmem:[%s3991_s9 + $0x8] ss:$36 sps:$4 sm:$0xff]  }
  0x17   : > { %3106 = vmatpush3.bf16.msra.mxu0 %v3651_v9  ;;  %3629 = vmatpush3.bf16.msra.mxu1 %v3651_v9  ;;  %v3696_v49 = vld [vmem:[%s3991_s9 + $0xd8] ss:$36 sps:$4 sm:$0xff]   ;;  %v3708_v54 = vld [vmem:[%s3991_s9 + $0xc] ss:$36 sps:$4 sm:$0xff]   ;;  %v3709_v59 = vld [vmem:[%s3991_s9 + $0x120] ss:$36 sps:$4 sm:$0xff]  }
  0x18   : > { %3107 = vmatprep.subr.bf16.mxu0 %v3652_v10  ;;  %3622 = vmatprep.subr.bf16.mxu1 %v3652_v10  ;;  %v3697_v50 = vld [vmem:[%s3991_s9 + $0x438] ss:$36 sps:$4 sm:$0xff]   ;;  %v3710_v60 = vld [vmem:[%s4731_s1 + $0x1c0] sm:$0xff]   ;;  %v3712_v62 = vld [vmem:[%s3991_s9 + $0x16c] ss:$36 sps:$4 sm:$0xff]  }
  0x19   : > { %v3719_v56 = vld [vmem:[%s4731_s1 + $0x118] sm:$0xff]   ;;  %v3711_v61 = vld [vmem:[%s4731_s1 + $0x180] sm:$0xff]   ;;  %v3726_v1 = vld [vmem:[%s4731_s1 + $0x1c8] sm:$0xff]  }
  0x1a   : > { %v3702_v57 = vld [vmem:[%s4731_s1 + $0xb8] sm:$0xff]   ;;  %v3728_v0 = vld [vmem:[%s4731_s1 + $0x160] sm:$0xff]   ;;  %v3727_v3 = vld [vmem:[%s4731_s1 + $0x188] sm:$0xff]  }
  0x1b   : > { %3108 = vmatpush3.bf16.msra.mxu0 %v3653_v13  ;;  %3630 = vmatpush3.bf16.msra.mxu1 %v3653_v13  ;;  %v3714_v63 = vld [vmem:[%s3991_s9 + $0x54] ss:$36 sps:$4 sm:$0xff]   ;;  %v3729_v2 = vld [vmem:[%s4731_s1 + $0x120] sm:$0xff]   ;;  %v3716_v4 = vld [vmem:[%s3991_s9 + $0x168] ss:$36 sps:$4 sm:$0xff]  }
  0x1c   : > { %3109 = vmatprep.subr.bf16.mxu0 %v3654_v14  ;;  %3623 = vmatprep.subr.bf16.mxu1 %v3654_v14  ;;  %v3717_v5 = vld [vmem:[%s3991_s9 + $0x50] ss:$36 sps:$4 sm:$0xff]   ;;  %v3722_v7 = vld [vmem:[%s3991_s9 + $0x9c] ss:$36 sps:$4 sm:$0xff]   ;;  %v3742_v8 = vld [vmem:[%s4731_s1 + $0x168] sm:$0xff]  }
  0x1d   : > { %v3720_v6 = vld [vmem:[%s3991_s9 + $0x1b4] ss:$36 sps:$4 sm:$0xff]   ;;  %v3744_v10 = vld [vmem:[%s4731_s1 + $0x128] sm:$0xff]   ;;  %v3730_v14 = vld [vmem:[%s3991_s9 + $0x1fc] ss:$36 sps:$4 sm:$0xff]  }
  0x1e   : > { %v3743_v9 = vld [vmem:[%s4731_s1 + $0x1d0] sm:$0xff]   ;;  %v3725_v13 = vld [vmem:[%s3991_s9 + $0x98] ss:$36 sps:$4 sm:$0xff]  }
  0x1f   : > { %3110 = vmatpush3.bf16.msra.mxu0 %v3655_v15  ;;  %3631 = vmatpush3.bf16.msra.mxu1 %v3655_v15  ;;  %v3745_v11 = vld [vmem:[%s4731_s1 + $0x190] sm:$0xff]  }
  0x20   : > { %3111 = vmatprep.subr.bf16.mxu0 %v3656_v16  ;;  %3624 = vmatprep.subr.bf16.mxu1 %v3656_v16  ;;  %v3724_v12 = vld [vmem:[%s3991_s9 + $0x1b0] ss:$36 sps:$4 sm:$0xff]  }
  0x21   : > { %v3752_v15 = vld [vmem:[%s4731_s1 + $0x170] sm:$0xff]  }
  0x22   : > { %v3753_v16 = vld [vmem:[%s4731_s1 + $0x130] sm:$0xff]  }
  0x23   : > { %3112 = vmatpush3.bf16.msra.mxu0 %v3657_v17  ;;  %3632 = vmatpush3.bf16.msra.mxu1 %v3657_v17  ;;  %v3732_v17 = vld [vmem:[%s3991_s9 + $0xe4] ss:$36 sps:$4 sm:$0xff]  }
  0x24   : > { %3209 = vmatprep.subr.bf16.mxu1 %v3664_v18  ;;  %3321 = vmatprep.subr.bf16.mxu0 %v3667_v21  ;;  %v3760_v18 = vld [vmem:[%s4731_s1 + $0x1d8] sm:$0xff]   ;;  %v3735_v21 = vld [vmem:[%s3991_s9 + $0xe0] ss:$36 sps:$4 sm:$0xff]  }
  0x26   : > { %1690 = vmatmul.mubr.bf16.vlgmr.msra.gmra.mrb[0].mxu0 %v3658_v19  ;;  %1786 = vmatmul.mubr.bf16.vlgmr.msra.gmra.mrb[0].mxu1 %v3661_v20  ;;  %v3761_v19 = vld [vmem:[%s4731_s1 + $0x198] sm:$0xff]  }
  0x27   : > { %3210 = vmatpush3.bf16.msra.mxu1 %v3665_v22  ;;  %3322 = vmatpush3.bf16.msra.mxu0 %v3669_v24  ;;  %v3734_v20 = vld [vmem:[%s3991_s9 + $0x1f8] ss:$36 sps:$4 sm:$0xff]   ;;  %v3736_v22 = vld [vmem:[%s3991_s9 + $0x244] ss:$36 sps:$4 sm:$0xff]  }
  0x28   : > { %3211 = vmatprep.subr.bf16.mxu1 %v3666_v23  ;;  %1697 = vmatprep.mubr.bf16.mxu0 %v3670_v25  ;;  %v3738_v23 = vld [vmem:[%s3991_s9 + $0x12c] ss:$36 sps:$4 sm:$0xff]   ;;  %v3768_v24 = vld [vmem:[%s4731_s1 + $0x178] sm:$0xff]  }
  0x29   : > { %1793 = vmatprep.mubr.bf16.mxu1 %v3672_v26  ;;  %3323 = vmatprep.subr.bf16.mxu0 %v3687_v28  ;;  %v3769_v25 = vld [vmem:[%s4731_s1 + $0x138] sm:$0xff]   ;;  %v3776_v26 = vld [vmem:[%s4731_s1 + $0x1e0] sm:$0xff]  }
  0x2a   : > { %v3777_v28 = vld [vmem:[%s4731_s1 + $0x1a0] sm:$0xff]  }
  0x2b   : > { %3212 = vmatpush3.bf16.msra.mxu1 %v3668_v27  ;;  %3324 = vmatpush3.bf16.msra.mxu0 %v3689_v33  ;;  %v3740_v27 = vld [vmem:[%s3991_s9 + $0x240] ss:$36 sps:$4 sm:$0xff]   ;;  %v3791_v33 = vld [vmem:[%s4731_s1 + $0x1e8] sm:$0xff]  }
  0x2c   : > { %3213 = vmatprep.subr.bf16.mxu1 %v3676_v31  ;;  %3325 = vmatprep.subr.bf16.mxu0 %v3701_v43  ;;  %v3746_v31 = vld [vmem:[%s3991_s9 + $0x28c] ss:$36 sps:$4 sm:$0xff]   ;;  %v3762_v43 = vld [vmem:[%s3991_s9 + $0x31c] ss:$36 sps:$4 sm:$0xff]  }
  0x2e   : > { %1698 = vmatmul.mubr.bf16.gmra.mrb[4].mxu0 %v3674_v29  ;;  %1794 = vmatmul.mubr.bf16.gmra.mrb[4].mxu1 %v3675_v30  ;;  %v3778_v29 = vld [vmem:[%s4731_s1 + $0x200] sm:$0xff]   ;;  %v3741_v30 = vld [vmem:[%s3991_s9 + $0x128] ss:$36 sps:$4 sm:$0xff]  }
  0x2f   : > { %3214 = vmatpush3.bf16.msra.mxu1 %v3677_v32  ;;  %1705 = vmatprep.mubr.bf16.mxu0 %v3680_v35  ;;  %v3748_v32 = vld [vmem:[%s3991_s9 + $0x174] ss:$36 sps:$4 sm:$0xff]   ;;  %v3792_v35 = vld [vmem:[%s4731_s1 + $0x1a8] sm:$0xff]  }
  0x30   : > { %3215 = vmatprep.subr.bf16.mxu1 %v3678_v34  ;;  %1801 = vmatprep.mubr.bf16.mxu1 %v3682_v36  ;;  %v3750_v34 = vld [vmem:[%s3991_s9 + $0x288] ss:$36 sps:$4 sm:$0xff]   ;;  %v3751_v36 = vld [vmem:[%s3991_s9 + $0x170] ss:$36 sps:$4 sm:$0xff]  }
  0x31   : > { %3326 = vmatpush3.bf16.msra.mxu0 %v3703_v46  ;;  %v3767_v46 = vld [vmem:[%s3991_s9 + $0x200] ss:$36 sps:$4 sm:$0xff]  }
  0x32   : > { %3327 = vmatprep.subr.bf16.mxu0 %v3718_v55  ;;  %v3793_v55 = vld [vmem:[%s4731_s1 + $0x208] sm:$0xff]  }
  0x33   : > { %3216 = vmatpush3.bf16.msra.mxu1 %v3679_v37  ;;  %v3754_v37 = vld [vmem:[%s3991_s9 + $0x2d4] ss:$36 sps:$4 sm:$0xff]  }
  0x34   : > { %3217 = vmatprep.subr.bf16.mxu1 %v3686_v40  ;;  %v3759_v40 = vld [vmem:[%s3991_s9 + $0x1b8] ss:$36 sps:$4 sm:$0xff]  }
  0x35   : > { %3328 = vmatpush3.bf16.msra.mxu0 %v3719_v56  ;;  %v3808_v56 = vld [vmem:[%s4731_s1 + $0x210] sm:$0xff]  }
  0x36   : > { %1706 = vmatmul.mubr.bf16.gmra.mrb[8].mxu0 %v3684_v38  ;;  %1802 = vmatmul.mubr.bf16.gmra.mrb[8].mxu1 %v3685_v39  ;;  %v3756_v38 = vld [vmem:[%s3991_s9 + $0x1bc] ss:$36 sps:$4 sm:$0xff]   ;;  %v3758_v39 = vld [vmem:[%s3991_s9 + $0x2d0] ss:$36 sps:$4 sm:$0xff]  }
  0x37   : > { %3218 = vmatpush3.bf16.msra.mxu1 %v3688_v41  ;;  %1713 = vmatprep.mubr.bf16.mxu0 %v3692_v44  ;;  %v3806_v41 = vld [vmem:[%s4731_s1 + $0x1f0] sm:$0xff]   ;;  %v3764_v44 = vld [vmem:[%s3991_s9 + $0x204] ss:$36 sps:$4 sm:$0xff]  }
  0x38   : > { %3219 = vmatprep.subr.bf16.mxu1 %v3690_v42  ;;  %1809 = vmatprep.mubr.bf16.mxu1 %v3694_v45  ;;  %v3807_v42 = vld [vmem:[%s4731_s1 + $0x1b0] sm:$0xff]   ;;  %v3766_v45 = vld [vmem:[%s3991_s9 + $0x318] ss:$36 sps:$4 sm:$0xff]  }
  0x39   : > { %3329 = vmatprep.subr.bf16.mxu0 %v3728_v0  ;;  %v3790_v0 = vld [vmem:[%s3991_s9 + $0xa0] ss:$36 sps:$4 sm:$0xff]  }
  0x3a   : > { %3330 = vmatpush3.bf16.msra.mxu0 %v3729_v2  ;;  %v3796_v2 = vld [vmem:[%s3991_s9 + $0xec] ss:$36 sps:$4 sm:$0xff]  }
  0x3b   : > { %3220 = vmatpush3.bf16.msra.mxu1 %v3691_v47  ;;  %3331 = vmatprep.subr.bf16.mxu0 %v3742_v8  ;;  %v3821_v47 = vld [vmem:[%s4731_s1 + $0x1f8] sm:$0xff]  }
  0x3c   : > { %3221 = vmatprep.subr.bf16.mxu1 %v3698_v48  ;;  %v3822_v48 = vld [vmem:[%s4731_s1 + $0x1b8] sm:$0xff]  }
  0x3d   : > { %v3802_v8 = vld [vmem:[%s3991_s9 + $0x134] ss:$36 sps:$4 sm:$0xff]  }
  0x3e   : > { %1714 = vmatmul.mubr.bf16.gmra.mrb[12].mxu0 %v3696_v49  ;;  %1810 = vmatmul.mubr.bf16.gmra.mrb[12].mxu1 %v3697_v50  ;;  %v3770_v49 = vld [vmem:[%s3991_s9 + $0x24c] ss:$36 sps:$4 sm:$0xff]   ;;  %v3774_v50 = vld [vmem:[%s3991_s9 + $0x14] ss:$36 sps:$4 sm:$0xff]  }
  0x3f   : > { %3222 = vmatpush3.bf16.msra.mxu1 %v3699_v51  ;;  %1721 = vmatprep.mubr.bf16.mxu0 %v3704_v53  ;;  %v3772_v51 = vld [vmem:[%s3991_s9 + $0x10] ss:$36 sps:$4 sm:$0xff]  }
  0x40   : > { %3223 = vmatprep.subr.bf16.mxu1 %v3700_v52  ;;  %1850 = vmatprep.mubr.bf16.mxu1 %v3708_v54  ;;  %v3775_v52 = vld [vmem:[%s3991_s9 + $0x248] ss:$36 sps:$4 sm:$0xff]   ;;  %v3779_v53 = vld [vmem:[%s3991_s9 + $0x294] ss:$36 sps:$4 sm:$0xff]   ;;  %v3781_v54 = vld [vmem:[%s3991_s9 + $0x5c] ss:$36 sps:$4 sm:$0xff]  }
  0x41   : > { %3332 = vmatpush3.bf16.msra.mxu0 %v3744_v10  ;;  %v3804_v10 = vld [vmem:[%s3991_s9 + $0x368] ss:$36 sps:$4 sm:$0xff]  }
  0x42   : > { %3333 = vmatprep.subr.bf16.mxu0 %v3752_v15  ;;  %v3814_v15 = vld [vmem:[%s3991_s9 + $0x178] ss:$36 sps:$4 sm:$0xff]  }
  0x43   : > { %3224 = vmatpush3.bf16.msra.mxu1 %v3702_v57  ;;  %v3783_v57 = vld [vmem:[%s3991_s9 + $0x290] ss:$36 sps:$4 sm:$0xff]  }
  0x44   : > { %3433 = vmatprep.subr.bf16.mxu1 %v3710_v60  ;;  %v3787_v60 = vld [vmem:[%s3991_s9 + $0xa4] ss:$36 sps:$4 sm:$0xff]  }
  0x45   : > { %3334 = vmatpush3.bf16.msra.mxu0 %v3753_v16  ;;  %v3815_v16 = vld [vmem:[%s3991_s9 + $0x3fc] ss:$36 sps:$4 sm:$0xff]  }
  0x46   : > { %1722 = vmatmul.mubr.bf16.gmra.mrb[16].mxu0 %v3709_v59  ;;  %1851 = vmatmul.mubr.bf16.vlgmr.msra.gmra.mrb[16].mxu1 %v3706_v58  ;;  %v3784_v58 = vld [vmem:[%s3991_s9 + $0x58] ss:$36 sps:$4 sm:$0xff]  }
  0x47   : > { %3434 = vmatpush3.bf16.msra.mxu1 %v3711_v61  ;;  %1729 = vmatprep.mubr.bf16.mxu0 %v3712_v62  ;;  %v3785_v59 = vld [vmem:[%s3991_s9 + $0x2dc] ss:$36 sps:$4 sm:$0xff]  }
  0x48   : > { %1858 = vmatprep.mubr.bf16.mxu1 %v3714_v63  ;;  %3435 = vmatprep.subr.bf16.mxu1 %v3726_v1  ;;  %v3823_v61 = vld [vmem:[%s4731_s1 + $0x218] sm:$0xff]   ;;  %v3836_v62 = vld [vmem:[%s4731_s1 + $0x220] sm:$0xff]  }
  0x49   : > { %3335 = vmatprep.subr.bf16.mxu0 %v3768_v24  ;;  %v3789_v63 = vld [vmem:[%s3991_s9 + $0x2d8] ss:$36 sps:$4 sm:$0xff]   ;;  %v3794_v1 = vld [vmem:[%s3991_s9 + $0x324] ss:$36 sps:$4 sm:$0xff]  }
  0x4a   : > { %3336 = vmatpush3.bf16.msra.mxu0 %v3769_v25  ;;  %v3830_v24 = vld [vmem:[%s3991_s9 + $0x254] ss:$36 sps:$4 sm:$0xff]   ;;  %v3834_v25 = vld [vmem:[%s3991_s9 + $0x1c] ss:$36 sps:$4 sm:$0xff]  }
  0x4b   : > { %3436 = vmatpush3.bf16.msra.mxu1 %v3727_v3  ;;  %3569 = vmatprep.subr.bf16.mxu0 %v3778_v29  ;;  %v3849_v3 = vld [vmem:[%s4731_s1 + $0x228] sm:$0xff]  }
  0x4c   : > { %3437 = vmatprep.subr.bf16.mxu1 %v3743_v9  ;;  %v3875_v9 = vld [vmem:[%s4731_s1 + $0x238] sm:$0xff]  }
  0x4e   : > { %1730 = vmatmul.mubr.bf16.gmra.mrb[20].mxu0 %v3716_v4  ;;  %1859 = vmatmul.mubr.bf16.gmra.mrb[20].mxu1 %v3717_v5  ;;  %v3798_v4 = vld [vmem:[%s3991_s9 + $0x320] ss:$36 sps:$4 sm:$0xff]   ;;  %v3799_v5 = vld [vmem:[%s3991_s9 + $0xe8] ss:$36 sps:$4 sm:$0xff]  }
  0x4f   : > { %1737 = vmatprep.mubr.bf16.mxu0 %v3720_v6  ;;  %1866 = vmatprep.mubr.bf16.mxu1 %v3722_v7  ;;  %v3862_v6 = vld [vmem:[%s4731_s1 + $0x230] sm:$0xff]  }
  0x50   : > { %3438 = vmatpush3.bf16.msra.mxu1 %v3745_v11  ;;  %v3800_v7 = vld [vmem:[%s3991_s9 + $0x36c] ss:$36 sps:$4 sm:$0xff]  }
  0x51   : > { %3439 = vmatprep.subr.bf16.mxu1 %v3760_v18  ;;  %v3805_v11 = vld [vmem:[%s3991_s9 + $0x130] ss:$36 sps:$4 sm:$0xff]   ;;  %v3819_v18 = vld [vmem:[%s3991_s9 + $0x3f8] ss:$36 sps:$4 sm:$0xff]  }
  0x54   : > { %3440 = vmatpush3.bf16.msra.mxu1 %v3761_v19  ;;  %v3820_v19 = vld [vmem:[%s3991_s9 + $0x1c0] ss:$36 sps:$4 sm:$0xff]  }
  0x55   : > { %3441 = vmatprep.subr.bf16.mxu1 %v3776_v26  ;;  %v3832_v26 = vld [vmem:[%s3991_s9 + $0x18] ss:$36 sps:$4 sm:$0xff]  }
  0x56   : > { %1738 = vmatmul.mubr.bf16.gmra.mrb[24].mxu0 %v3724_v12  ;;  %1867 = vmatmul.mubr.bf16.gmra.mrb[24].mxu1 %v3725_v13  ;;  %v3809_v12 = vld [vmem:[%s3991_s9 + $0x3b4] ss:$36 sps:$4 sm:$0xff]   ;;  %v3811_v13 = vld [vmem:[%s3991_s9 + $0x17c] ss:$36 sps:$4 sm:$0xff]  }
  0x57   : > { %1745 = vmatprep.mubr.bf16.mxu0 %v3730_v14  ;;  %1874 = vmatprep.mubr.bf16.mxu1 %v3732_v17  ;;  %v3813_v14 = vld [vmem:[%s3991_s9 + $0x3b0] ss:$36 sps:$4 sm:$0xff]   ;;  %v3817_v17 = vld [vmem:[%s3991_s9 + $0x1c4] ss:$36 sps:$4 sm:$0xff]  }
  0x58   : > { %3442 = vmatpush3.bf16.msra.mxu1 %v3777_v28  ;;  %v3837_v28 = vld [vmem:[%s3991_s9 + $0x29c] ss:$36 sps:$4 sm:$0xff]  }
  0x59   : > { %3443 = vmatprep.subr.bf16.mxu1 %v3791_v33  ;;  %v3845_v33 = vld [vmem:[%s3991_s9 + $0xac] ss:$36 sps:$4 sm:$0xff]  }
  0x5c   : > { %3444 = vmatpush3.bf16.msra.mxu1 %v3792_v35  ;;  %v3848_v35 = vld [vmem:[%s3991_s9 + $0xa8] ss:$36 sps:$4 sm:$0xff]  }
  0x5d   : > { %3445 = vmatprep.subr.bf16.mxu1 %v3806_v41  ;;  %v3858_v41 = vld [vmem:[%s3991_s9 + $0x13c] ss:$36 sps:$4 sm:$0xff]  }
  0x5e   : > { %1746 = vmatmul.mubr.bf16.gmra.mrb[28].mxu0 %v3734_v20  ;;  %1875 = vmatmul.mubr.bf16.gmra.mrb[28].mxu1 %v3735_v21  ;;  %v3824_v20 = vld [vmem:[%s3991_s9 + $0x444] ss:$36 sps:$4 sm:$0xff]   ;;  %v3826_v21 = vld [vmem:[%s3991_s9 + $0x20c] ss:$36 sps:$4 sm:$0xff]  }
  0x5f   : > { %1753 = vmatprep.mubr.bf16.mxu0 %v3736_v22  ;;  %1882 = vmatprep.mubr.bf16.mxu1 %v3738_v23  ;;  %v3828_v22 = vld [vmem:[%s3991_s9 + $0x440] ss:$36 sps:$4 sm:$0xff]   ;;  %v3829_v23 = vld [vmem:[%s3991_s9 + $0x208] ss:$36 sps:$4 sm:$0xff]  }
  0x60   : > { %3446 = vmatpush3.bf16.msra.mxu1 %v3807_v42  ;;  %v3860_v42 = vld [vmem:[%s3991_s9 + $0x370] ss:$36 sps:$4 sm:$0xff]  }
  0x61   : > { %3447 = vmatprep.subr.bf16.mxu1 %v3821_v47  ;;  %v3868_v47 = vld [vmem:[%s3991_s9 + $0x180] ss:$36 sps:$4 sm:$0xff]  }
  0x64   : > { %3448 = vmatpush3.bf16.msra.mxu1 %v3822_v48  ;;  %v3869_v48 = vld [vmem:[%s3991_s9 + $0x404] ss:$36 sps:$4 sm:$0xff]  }
  0x66   : > { %1754 = vmatmul.mubr.bf16.gmra.mrb[32].mxu0 %v3740_v27  ;;  %1883 = vmatmul.mubr.bf16.gmra.mrb[32].mxu1 %v3741_v30  ;;  %v3835_v27 = vld [vmem:[%s3991_s9 + $0x250] ss:$36 sps:$4 sm:$0xff]   ;;  %v3841_v30 = vld [vmem:[%s3991_s9 + $0x298] ss:$36 sps:$4 sm:$0xff]  }
  0x67   : > { %1761 = vmatprep.mubr.bf16.mxu0 %v3746_v31  ;;  %1890 = vmatprep.mubr.bf16.mxu1 %v3748_v32  ;;  %v3842_v31 = vld [vmem:[%s3991_s9 + $0x60] ss:$36 sps:$4 sm:$0xff]  }
  0x68   : > { %v3843_v32 = vld [vmem:[%s3991_s9 + $0x2e4] ss:$36 sps:$4 sm:$0xff]  }
  0x6e   : > { %1762 = vmatmul.mubr.bf16.gmra.mrb[36].mxu0 %v3750_v34  ;;  %1891 = vmatmul.mubr.bf16.gmra.mrb[36].mxu1 %v3751_v36  ;;  %v3847_v34 = vld [vmem:[%s3991_s9 + $0x2e0] ss:$36 sps:$4 sm:$0xff]   ;;  %v3850_v36 = vld [vmem:[%s3991_s9 + $0x32c] ss:$36 sps:$4 sm:$0xff]  }
  0x6f   : > { %1769 = vmatprep.mubr.bf16.mxu0 %v3754_v37  ;;  %1898 = vmatprep.mubr.bf16.mxu1 %v3756_v38  ;;  %v3852_v37 = vld [vmem:[%s3991_s9 + $0xf4] ss:$36 sps:$4 sm:$0xff]   ;;  %v3854_v38 = vld [vmem:[%s3991_s9 + $0x328] ss:$36 sps:$4 sm:$0xff]  }
  0x76   : > { %1770 = vmatmul.mubr.bf16.gmra.mrb[40].mxu0 %v3758_v39  ;;  %1899 = vmatmul.mubr.bf16.gmra.mrb[40].mxu1 %v3759_v40  ;;  %v3855_v39 = vld [vmem:[%s3991_s9 + $0xf0] ss:$36 sps:$4 sm:$0xff]  }
  0x77   : > { %1777 = vmatprep.mubr.bf16.mxu0 %v3762_v43  ;;  %1906 = vmatprep.mubr.bf16.mxu1 %v3764_v44  ;;  %v3856_v40 = vld [vmem:[%s3991_s9 + $0x374] ss:$36 sps:$4 sm:$0xff]   ;;  %v3863_v44 = vld [vmem:[%s3991_s9 + $0x3bc] ss:$36 sps:$4 sm:$0xff]  }
  0x78   : > { %v3861_v43 = vld [vmem:[%s3991_s9 + $0x138] ss:$36 sps:$4 sm:$0xff]  }
  0x7e   : > { %1778 = vmatmul.mubr.bf16.gmra.mrb[44].mxu0 %v3766_v45  ;;  %1907 = vmatmul.mubr.bf16.gmra.mrb[44].mxu1 %v3767_v46  ;;  %v3865_v45 = vld [vmem:[%s3991_s9 + $0x184] ss:$36 sps:$4 sm:$0xff]   ;;  %v3867_v46 = vld [vmem:[%s3991_s9 + $0x3b8] ss:$36 sps:$4 sm:$0xff]  }
  0x7f   : > { %1914 = vmatprep.mubr.bf16.mxu1 %v3770_v49  ;;  %2011 = vmatprep.mubr.bf16.mxu0 %v3774_v50  ;;  %v3871_v49 = vld [vmem:[%s3991_s9 + $0x1cc] ss:$36 sps:$4 sm:$0xff]   ;;  %v3873_v50 = vld [vmem:[%s3991_s9 + $0x400] ss:$36 sps:$4 sm:$0xff]  }
  0x86   : > { %1915 = vmatmul.mubr.bf16.gmra.mrb[48].mxu1 %v3775_v52  ;;  %2012 = vmatmul.mubr.bf16.vlgmr.msra.gmra.mrb[48].mxu0 %v3772_v51  ;;  %v3874_v51 = vld [vmem:[%s3991_s9 + $0x1c8] ss:$36 sps:$4 sm:$0xff]  }
  0x87   : > { %3570 = vmatpush3.bf16.msra.mxu0 %v3778_v29  ;;  %1922 = vmatprep.mubr.bf16.mxu1 %v3779_v53  ;;  %v3839_v29 = vld [vmem:[%s3991_s9 + $0x64] ss:$36 sps:$4 sm:$0xff]   ;;  %v3876_v52 = vld [vmem:[%s3991_s9 + $0x44c] ss:$36 sps:$4 sm:$0xff]   ;;  %v3878_v53 = vld [vmem:[%s3991_s9 + $0x214] ss:$36 sps:$4 sm:$0xff]  }
  0x88   : > { %2019 = vmatprep.mubr.bf16.mxu0 %v3781_v54  ;;  %3571 = vmatprep.subr.bf16.mxu0 %v3793_v55 }
  0x8b   : > { %3572 = vmatpush3.bf16.msra.mxu0 %v3793_v55 }
  0x8c   : > { %3573 = vmatprep.subr.bf16.mxu0 %v3808_v56 }
  0x8e   : > { %1923 = vmatmul.mubr.bf16.gmra.mrb[52].mxu1 %v3783_v57  ;;  %2020 = vmatmul.mubr.bf16.gmra.mrb[52].mxu0 %v3784_v58  ;;  %v3880_v58 = vld [vmem:[%s3991_s9 + $0x448] ss:$36 sps:$4 sm:$0xff]  }
  0x8f   : > { %1930 = vmatprep.mubr.bf16.mxu1 %v3785_v59  ;;  %2027 = vmatprep.mubr.bf16.mxu0 %v3787_v60  ;;  %v3881_v59 = vld [vmem:[%s3991_s9 + $0x210] ss:$36 sps:$4 sm:$0xff]  }
  0x90   : > { %3574 = vmatpush3.bf16.msra.mxu0 %v3808_v56 }
  0x91   : > { %3575 = vmatprep.subr.bf16.mxu0 %v3823_v61 }
  0x94   : > { %3576 = vmatpush3.bf16.msra.mxu0 %v3823_v61 }
  0x95   : > { %3577 = vmatprep.subr.bf16.mxu0 %v3836_v62 }
  0x96   : > { %1931 = vmatmul.mubr.bf16.gmra.mrb[56].mxu1 %v3789_v63  ;;  %2028 = vmatmul.mubr.bf16.gmra.mrb[56].mxu0 %v3790_v0  ;;  %v3882_v0 = vld [vmem:[%s3991_s9 + $0x25c] ss:$36 sps:$4 sm:$0xff]  }
  0x97   : > { %1938 = vmatprep.mubr.bf16.mxu1 %v3794_v1  ;;  %2035 = vmatprep.mubr.bf16.mxu0 %v3796_v2  ;;  %v3884_v1 = vld [vmem:[%s3991_s9 + $0x20] ss:$36 sps:$4 sm:$0xff]  }
  0x98   : > { %3578 = vmatpush3.bf16.msra.mxu0 %v3836_v62 }
  0x99   : > { %3579 = vmatprep.subr.bf16.mxu0 %v3849_v3 }
  0x9c   : > { %3580 = vmatpush3.bf16.msra.mxu0 %v3849_v3 }
  0x9d   : > { %3581 = vmatprep.subr.bf16.mxu0 %v3862_v6 }
  0x9e   : > { %1939 = vmatmul.mubr.bf16.gmra.mrb[60].mxu1 %v3798_v4  ;;  %2036 = vmatmul.mubr.bf16.gmra.mrb[60].mxu0 %v3799_v5 }
  0x9f   : > { %1946 = vmatprep.mubr.bf16.mxu1 %v3800_v7  ;;  %2043 = vmatprep.mubr.bf16.mxu0 %v3802_v8 }
  0xa0   : > { %3582 = vmatpush3.bf16.msra.mxu0 %v3862_v6 }
  0xa1   : > { %3583 = vmatprep.subr.bf16.mxu0 %v3875_v9 }
  0xa4   : > { %3584 = vmatpush3.bf16.msra.mxu0 %v3875_v9 }
  0xa6   : > { %1947 = vmatmul.mubr.bf16.gmra.mrb[64].mxu1 %v3804_v10  ;;  %2044 = vmatmul.mubr.bf16.gmra.mrb[64].mxu0 %v3805_v11  ;;  %v3885_v10 = vld [vmem:[%s3991_s9 + $0x258] ss:$36 sps:$4 sm:$0xff]   ;;  %v3886_v11 = vld [vmem:[%s3991_s9 + $0x68] ss:$36 sps:$4 sm:$0xff]  }
  0xa7   : > { %1954 = vmatprep.mubr.bf16.mxu1 %v3809_v12  ;;  %2051 = vmatprep.mubr.bf16.mxu0 %v3811_v13 }
  0xae   : > { %1955 = vmatmul.mubr.bf16.gmra.mrb[68].mxu1 %v3813_v14  ;;  %2052 = vmatmul.mubr.bf16.gmra.mrb[68].mxu0 %v3814_v15 }
  0xaf   : > { %1962 = vmatprep.mubr.bf16.mxu1 %v3815_v16  ;;  %2059 = vmatprep.mubr.bf16.mxu0 %v3817_v17  ;;  %v3887_v16 = vld [vmem:[%s3991_s9 + $0x2a4] ss:$36 sps:$4 sm:$0xff]   ;;  %v3889_v17 = vld [vmem:[%s3991_s9 + $0xb0] ss:$36 sps:$4 sm:$0xff]  }
  0xb6   : > { %1963 = vmatmul.mubr.bf16.gmra.mrb[72].mxu1 %v3819_v18  ;;  %2060 = vmatmul.mubr.bf16.gmra.mrb[72].mxu0 %v3820_v19 }
  0xb7   : > { %1970 = vmatprep.mubr.bf16.mxu1 %v3824_v20  ;;  %2067 = vmatprep.mubr.bf16.mxu0 %v3826_v21 }
  0xbe   : > { %1971 = vmatmul.mubr.bf16.gmra.mrb[76].mxu1 %v3828_v22  ;;  %2068 = vmatmul.mubr.bf16.gmra.mrb[76].mxu0 %v3829_v23 }
  0xbf   : > { %2075 = vmatprep.mubr.bf16.mxu0 %v3830_v24  ;;  %2172 = vmatprep.mubr.bf16.mxu1 %v3834_v25 }
  0xc6   : > { %2076 = vmatmul.mubr.bf16.gmra.mrb[80].mxu0 %v3835_v27  ;;  %2173 = vmatmul.mubr.bf16.vlgmr.msra.gmra.mrb[80].mxu1 %v3832_v26  ;;  %v3890_v26 = vld [vmem:[%s3991_s9 + $0x2a0] ss:$36 sps:$4 sm:$0xff]   ;;  %v3891_v27 = vld [vmem:[%s3991_s9 + $0xf8] ss:$36 sps:$4 sm:$0xff]  }
  0xc7   : > { %2083 = vmatprep.mubr.bf16.mxu0 %v3837_v28  ;;  %2180 = vmatprep.mubr.bf16.mxu1 %v3839_v29 }
  0xce   : > { %2084 = vmatmul.mubr.bf16.gmra.mrb[84].mxu0 %v3841_v30  ;;  %2181 = vmatmul.mubr.bf16.gmra.mrb[84].mxu1 %v3842_v31 }
  0xcf   : > { %2091 = vmatprep.mubr.bf16.mxu0 %v3843_v32  ;;  %2188 = vmatprep.mubr.bf16.mxu1 %v3845_v33  ;;  %v3892_v32 = vld [vmem:[%s3991_s9 + $0x2ec] ss:$36 sps:$4 sm:$0xff]   ;;  %v3894_v33 = vld [vmem:[%s3991_s9 + $0x140] ss:$36 sps:$4 sm:$0xff]  }
  0xd6   : > { %2092 = vmatmul.mubr.bf16.gmra.mrb[88].mxu0 %v3847_v34  ;;  %2189 = vmatmul.mubr.bf16.gmra.mrb[88].mxu1 %v3848_v35 }
  0xd7   : > { %2099 = vmatprep.mubr.bf16.mxu0 %v3850_v36  ;;  %2196 = vmatprep.mubr.bf16.mxu1 %v3852_v37 }
  0xde   : > { %2100 = vmatmul.mubr.bf16.gmra.mrb[92].mxu0 %v3854_v38  ;;  %2197 = vmatmul.mubr.bf16.gmra.mrb[92].mxu1 %v3855_v39 }
  0xdf   : > { %2107 = vmatprep.mubr.bf16.mxu0 %v3856_v40  ;;  %2204 = vmatprep.mubr.bf16.mxu1 %v3858_v41 }
  0xe6   : > { %2108 = vmatmul.mubr.bf16.gmra.mrb[96].mxu0 %v3860_v42  ;;  %2205 = vmatmul.mubr.bf16.gmra.mrb[96].mxu1 %v3861_v43  ;;  %v3895_v42 = vld [vmem:[%s3991_s9 + $0x2e8] ss:$36 sps:$4 sm:$0xff]  }
  0xe7   : > { %2115 = vmatprep.mubr.bf16.mxu0 %v3863_v44  ;;  %2212 = vmatprep.mubr.bf16.mxu1 %v3865_v45  ;;  %v3896_v43 = vld [vmem:[%s3991_s9 + $0x188] ss:$36 sps:$4 sm:$0xff]  }
  0xee   : > { %2116 = vmatmul.mubr.bf16.gmra.mrb[100].mxu0 %v3867_v46  ;;  %2213 = vmatmul.mubr.bf16.gmra.mrb[100].mxu1 %v3868_v47 }
  0xef   : > { %2123 = vmatprep.mubr.bf16.mxu0 %v3869_v48  ;;  %2220 = vmatprep.mubr.bf16.mxu1 %v3871_v49  ;;  %v3897_v48 = vld [vmem:[%s3991_s9 + $0x334] ss:$36 sps:$4 sm:$0xff]  }
  0xf0   : > { %v3899_v49 = vld [vmem:[%s3991_s9 + $0x1d0] ss:$36 sps:$4 sm:$0xff]  }
  0xf6   : > { %2124 = vmatmul.mubr.bf16.gmra.mrb[104].mxu0 %v3873_v50  ;;  %2221 = vmatmul.mubr.bf16.gmra.mrb[104].mxu1 %v3874_v51 }
  0xf7   : > { %2131 = vmatprep.mubr.bf16.mxu0 %v3876_v52  ;;  %2228 = vmatprep.mubr.bf16.mxu1 %v3878_v53 }
  0xf9   : > { %v3185_v54 = vpop.f32.mrb[0].mxu1  ;;  %v3113_v55 = vpop.f32.mrb[0].mxu0 }
  0xfa   : > { %v3186_v56 = vpop.f32.mrb[1].mxu1  ;;  %v3114_v57 = vpop.f32.mrb[1].mxu0 }
  0xfb   : > { %v4294_v60 = vadd.f32 %v3186_v56, %v3185_v54  ;;  %v3188_v61 = vpop.f32.mrb[2].mxu1  ;;  %v4296_v62 = vadd.f32 %v3114_v57, %v3113_v55  ;;  %v3116_v63 = vpop.f32.mrb[2].mxu0  ;;  %v4343_v54 = vld [vmem:[%s4732_s2] ss:$0 sm:$0xff] }
  0xfc   : > { %v3189_v2 = vpop.f32.mrb[3].mxu1  ;;  %v3117_v3 = vpop.f32.mrb[3].mxu0 }
  0xfd   : > { %v4300_v4 = vadd.f32 %v3189_v2, %v3188_v61  ;;  %v4302_v5 = vadd.f32 %v3117_v3, %v3116_v63  ;;  %v3901_v61 = vld [vmem:[%s3991_s9 + $0x218] ss:$36 sps:$4 sm:$0xff]   ;;  %v1692_v63 = vadd.f32 %v4296_v62, %v4343_v54 }
  0xfe   : > { %2132 = vmatmul.mubr.bf16.gmra.mrb[108].mxu0 %v3880_v58  ;;  %2229 = vmatmul.mubr.bf16.gmra.mrb[108].mxu1 %v3881_v59  ;;  %v3900_v59 = vld [vmem:[%s3991_s9 + $0x330] ss:$36 sps:$4 sm:$0xff]  }
  0xff   : > { %2236 = vmatprep.mubr.bf16.mxu1 %v3882_v0  ;;  %3585 = vmatprep.mubr.bf16.mxu0 %v3884_v1 }
 0x101   : > { %v3191_v6 = vpop.f32.mrb[4].mxu1  ;;  %v3119_v7 = vpop.f32.mrb[4].mxu0 }
 0x102   : > { %v3192_v8 = vpop.f32.mrb[5].mxu1  ;;  %v3120_v9 = vpop.f32.mrb[5].mxu0 }
 0x103   : > { %v4306_v12 = vadd.f32 %v3192_v8, %v3191_v6  ;;  %v3194_v13 = vpop.f32.mrb[6].mxu1  ;;  %v4308_v14 = vadd.f32 %v3120_v9, %v3119_v7  ;;  %v3122_v15 = vpop.f32.mrb[6].mxu0  ;;  %v3902_v6 = vld [vmem:[%s3991_s9 + $0x37c] ss:$36 sps:$4 sm:$0xff]  }
 0x104   : > { %v3195_v18 = vpop.f32.mrb[7].mxu1  ;;  %v3123_v19 = vpop.f32.mrb[7].mxu0  ;;  %v3904_v7 = vld [vmem:[%s3991_s9 + $0x260] ss:$36 sps:$4 sm:$0xff]  }
 0x105   : > { %v4312_v20 = vadd.f32 %v3195_v18, %v3194_v13  ;;  %v4314_v21 = vadd.f32 %v3123_v19, %v3122_v15 }
 0x106   : > { %2237 = vmatmul.mubr.bf16.gmra.mrb[112].mxu1 %v3885_v10  ;;  %3586 = vmatmul.mubr.bf16.vlgmr.msra.gmra.mrb[112].mxu0 %v3886_v11  ;;  %v1695_v10 = vadd.f32 %v4302_v5, %v4343_v54  ;;  %v1700_v5 = vadd.f32 %v4308_v14, %v4343_v54 }
 0x107   : > { %2244 = vmatprep.mubr.bf16.mxu1 %v3887_v16  ;;  %3589 = vmatprep.mubr.bf16.mxu0 %v3889_v17 }
 0x109   : > { %v3197_v22 = vpop.f32.mrb[8].mxu1  ;;  %v3125_v23 = vpop.f32.mrb[8].mxu0 }
 0x10a   : > { %v3198_v24 = vpop.f32.mrb[9].mxu1  ;;  %v3126_v25 = vpop.f32.mrb[9].mxu0 }
 0x10b   : > { %v4318_v28 = vadd.f32 %v3198_v24, %v3197_v22  ;;  %v3200_v29 = vpop.f32.mrb[10].mxu1  ;;  %v4320_v30 = vadd.f32 %v3126_v25, %v3125_v23  ;;  %v3128_v31 = vpop.f32.mrb[10].mxu0  ;;  %v3905_v22 = vld [vmem:[%s3991_s9 + $0x378] ss:$36 sps:$4 sm:$0xff]   ;;  %v3906_v23 = vld [vmem:[%s3991_s9 + $0x2a8] ss:$36 sps:$4 sm:$0xff]  }
 0x10c   : > { %v3201_v34 = vpop.f32.mrb[11].mxu1  ;;  %v3129_v35 = vpop.f32.mrb[11].mxu0 }
 0x10d   : > { %v4324_v36 = vadd.f32 %v3201_v34, %v3200_v29  ;;  %v4326_v37 = vadd.f32 %v3129_v35, %v3128_v31  ;;  %v3907_v29 = vld [vmem:[%s3991_s9 + $0x3c4] ss:$36 sps:$4 sm:$0xff]   ;;  %v3909_v31 = vld [vmem:[%s3991_s9 + $0x2f0] ss:$36 sps:$4 sm:$0xff]   ;;  %v1703_v34 = vadd.f32 %v4314_v21, %v4343_v54  ;;  %v1708_v21 = vadd.f32 %v4320_v30, %v4343_v54 }
 0x10e   : > { %2245 = vmatmul.mubr.bf16.gmra.mrb[116].mxu1 %v3890_v26  ;;  %3590 = vmatmul.mubr.bf16.gmra.mrb[116].mxu0 %v3891_v27 }
 0x10f   : > { %2252 = vmatprep.mubr.bf16.mxu1 %v3892_v32  ;;  %3593 = vmatprep.mubr.bf16.mxu0 %v3894_v33 }
 0x111   : > { %v3203_v38 = vpop.f32.mrb[12].mxu1  ;;  %v3131_v39 = vpop.f32.mrb[12].mxu0 }
 0x112   : > { %v3204_v40 = vpop.f32.mrb[13].mxu1  ;;  %v3132_v41 = vpop.f32.mrb[13].mxu0 }
 0x113   : > { %v4330_v44 = vadd.f32 %v3204_v40, %v3203_v38  ;;  %v3206_v45 = vpop.f32.mrb[14].mxu1  ;;  %v4332_v46 = vadd.f32 %v3132_v41, %v3131_v39  ;;  %v3134_v47 = vpop.f32.mrb[14].mxu0 }
 0x114   : > { %v3207_v50 = vpop.f32.mrb[15].mxu1  ;;  %v3135_v51 = vpop.f32.mrb[15].mxu0 }
 0x115   : > { %v4336_v52 = vadd.f32 %v3207_v50, %v3206_v45  ;;  %v4338_v53 = vadd.f32 %v3135_v51, %v3134_v47  ;;  %v3910_v45 = vld [vmem:[%s3991_s9 + $0x3c0] ss:$36 sps:$4 sm:$0xff]   ;;  %v3911_v47 = vld [vmem:[%s3991_s9 + $0x338] ss:$36 sps:$4 sm:$0xff]  }
 0x116   : > { %2253 = vmatmul.mubr.bf16.gmra.mrb[120].mxu1 %v3895_v42  ;;  %3594 = vmatmul.mubr.bf16.gmra.mrb[120].mxu0 %v3896_v43 }
 0x117   : > { %2260 = vmatprep.mubr.bf16.mxu1 %v3897_v48  ;;  %3597 = vmatprep.mubr.bf16.mxu0 %v3899_v49 }
 0x119   : > { %v3225_v55 = vpop.f32.mrb[16].mxu1  ;;  %v3137_v56 = vpop.f32.mrb[16].mxu0 }
 0x11a   : > { %v3226_v57 = vpop.f32.mrb[17].mxu1  ;;  %v3138_v58 = vpop.f32.mrb[17].mxu0 }
 0x11b   : > { %v3227_v0 = vadd.f32 %v3226_v57, %v3225_v55  ;;  %v3228_v1 = vpop.f32.mrb[18].mxu1  ;;  %v4349_v2 = vadd.f32 %v3138_v58, %v3137_v56  ;;  %v3140_v3 = vpop.f32.mrb[18].mxu0  ;;  %v3912_v55 = vld [vmem:[%s3991_s9 + $0x40c] ss:$36 sps:$4 sm:$0xff]   ;;  %v3914_v56 = vld [vmem:[%s3991_s9 + $0x380] ss:$36 sps:$4 sm:$0xff]  }
 0x11c   : > { %v3229_v8 = vpop.f32.mrb[19].mxu1  ;;  %v3141_v9 = vpop.f32.mrb[19].mxu0 }
 0x11d   : > { %v4355_v11 = vadd.f32 %v3227_v0, %v1692_v63  ;;  %v3230_v13 = vadd.f32 %v3229_v8, %v3228_v1  ;;  %v4357_v15 = vadd.f32 %v3141_v9, %v3140_v3  ;;  %v3915_v8 = vld [vmem:[%s3991_s9 + $0x408] ss:$36 sps:$4 sm:$0xff]  }
 0x11e   : > { %2261 = vmatmul.mubr.bf16.gmra.mrb[124].mxu1 %v3900_v59  ;;  %3598 = vmatmul.mubr.bf16.gmra.mrb[124].mxu0 %v3901_v61  ;;  %v1711_v59 = vadd.f32 %v4326_v37, %v4343_v54  ;;  %v3916_v9 = vld [vmem:[%s3991_s9 + $0x3c8] ss:$36 sps:$4 sm:$0xff]   ;;  %v1716_v37 = vadd.f32 %v4332_v46, %v4343_v54 }
 0x11f   : > { %v4359_v62 = vadd.f32 %v3230_v13, %v1695_v10  ;;  %2268 = vmatprep.mubr.bf16.mxu1 %v3902_v6  ;;  %3601 = vmatprep.mubr.bf16.mxu0 %v3904_v7 }
 0x121   : > { %v3231_v16 = vpop.f32.mrb[20].mxu1  ;;  %v3143_v17 = vpop.f32.mrb[20].mxu0 }
 0x122   : > { %v3232_v18 = vpop.f32.mrb[21].mxu1  ;;  %v3144_v19 = vpop.f32.mrb[21].mxu0 }
 0x123   : > { %v3233_v24 = vadd.f32 %v3232_v18, %v3231_v16  ;;  %v3234_v25 = vpop.f32.mrb[22].mxu1  ;;  %v4365_v26 = vadd.f32 %v3144_v19, %v3143_v17  ;;  %v3146_v27 = vpop.f32.mrb[22].mxu0  ;;  %v3917_v18 = vld [vmem:[%s3991_s9 + $0x454] ss:$36 sps:$4 sm:$0xff]  }
 0x124   : > { %v3235_v32 = vpop.f32.mrb[23].mxu1  ;;  %v3147_v33 = vpop.f32.mrb[23].mxu0  ;;  %v3919_v19 = vld [vmem:[%s3991_s9 + $0x410] ss:$36 sps:$4 sm:$0xff]  }
 0x125   : > { %v4371_v35 = vadd.f32 %v3233_v24, %v1700_v5  ;;  %v3236_v38 = vadd.f32 %v3235_v32, %v3234_v25  ;;  %v4373_v39 = vadd.f32 %v3147_v33, %v3146_v27  ;;  %v1719_v5 = vadd.f32 %v4338_v53, %v4343_v54 }
 0x126   : > { %2269 = vmatmul.mubr.bf16.gmra.mrb[128].mxu1 %v3905_v22  ;;  %3602 = vmatmul.mubr.bf16.gmra.mrb[128].mxu0 %v3906_v23  ;;  %v1724_v53 = vadd.f32 %v4349_v2, %v4343_v54 }
 0x127   : > { %v4375_v14 = vadd.f32 %v3236_v38, %v1703_v34  ;;  %2276 = vmatprep.mubr.bf16.mxu1 %v3907_v29  ;;  %3605 = vmatprep.mubr.bf16.mxu0 %v3909_v31  ;;  %v3920_v34 = vld [vmem:[%s3991_s9 + $0x450] ss:$36 sps:$4 sm:$0xff]   ;;  %v3921_v38 = vld [vmem:[%s3991_s9 + $0x458] ss:$36 sps:$4 sm:$0xff]   ;;  %s2718_s9 = sshll.u32 %s4735_s16, 2 }
 0x128   : > { %s4672_s22 = scalar_lea.vmem %s4733_s3, %s2718_s9 }
 0x129   : > { %v3237_v40 = vpop.f32.mrb[24].mxu1  ;;  %v3149_v41 = vpop.f32.mrb[24].mxu0 }
 0x12a   : > { %v3238_v42 = vpop.f32.mrb[25].mxu1  ;;  %v3150_v43 = vpop.f32.mrb[25].mxu0 }
 0x12b   : > { %v3239_v48 = vadd.f32 %v3238_v42, %v3237_v40  ;;  %v3240_v49 = vpop.f32.mrb[26].mxu1  ;;  %v4381_v50 = vadd.f32 %v3150_v43, %v3149_v41  ;;  %v3152_v51 = vpop.f32.mrb[26].mxu0 }
 0x12c   : > { %v3241_v57 = vpop.f32.mrb[27].mxu1  ;;  %v3153_v58 = vpop.f32.mrb[27].mxu0 }
 0x12d   : > { %v4387_v61 = vadd.f32 %v3239_v48, %v1708_v21  ;;  %v3242_v63 = vadd.f32 %v3241_v57, %v3240_v49  ;;  %v4389_v0 = vadd.f32 %v3153_v58, %v3152_v51  ;;  %v1727_v21 = vadd.f32 %v4357_v15, %v4343_v54 }
 0x12e   : > { %2277 = vmatmul.mubr.bf16.gmra.mrb[132].mxu1 %v3910_v45  ;;  %3606 = vmatmul.mubr.bf16.gmra.mrb[132].mxu0 %v3911_v47 }
 0x12f   : > { %v4391_v30 = vadd.f32 %v3242_v63, %v1711_v59  ;;  %2284 = vmatprep.mubr.bf16.mxu1 %v3912_v55  ;;  %3609 = vmatprep.mubr.bf16.mxu0 %v3914_v56  ;;  %v1732_v59 = vadd.f32 %v4365_v26, %v4343_v54 }
 0x131   : > { %v3243_v1 = vpop.f32.mrb[28].mxu1  ;;  %v3155_v3 = vpop.f32.mrb[28].mxu0 }
 0x132   : > { %v3244_v6 = vpop.f32.mrb[29].mxu1  ;;  %v3156_v7 = vpop.f32.mrb[29].mxu0 }
 0x133   : > { %v3245_v10 = vadd.f32 %v3244_v6, %v3243_v1  ;;  %v3246_v13 = vpop.f32.mrb[30].mxu1  ;;  %v4397_v16 = vadd.f32 %v3156_v7, %v3155_v3  ;;  %v3158_v17 = vpop.f32.mrb[30].mxu0 }
 0x134   : > { %v3247_v22 = vpop.f32.mrb[31].mxu1  ;;  %v3159_v23 = vpop.f32.mrb[31].mxu0 }
 0x135   : > { %v4403_v24 = vadd.f32 %v3245_v10, %v1716_v37  ;;  %v3248_v25 = vadd.f32 %v3247_v22, %v3246_v13  ;;  %v4405_v27 = vadd.f32 %v3159_v23, %v3158_v17  ;;  %v1740_v22 = vadd.f32 %v4381_v50, %v4343_v54 }
 0x136   : > { %2285 = vmatmul.mubr.bf16.gmra.mrb[136].mxu1 %v3915_v8  ;;  %3610 = vmatmul.mubr.bf16.gmra.mrb[136].mxu0 %v3916_v9  ;;  %v1735_v8 = vadd.f32 %v4373_v39, %v4343_v54 }
 0x137   : > { %v4407_v46 = vadd.f32 %v3248_v25, %v1719_v5  ;;  %2292 = vmatprep.mubr.bf16.mxu1 %v3917_v18  ;;  %3613 = vmatprep.mubr.bf16.mxu0 %v3919_v19 }
 0x139   : > { %v3249_v29 = vpop.f32.mrb[32].mxu1  ;;  %v3161_v31 = vpop.f32.mrb[32].mxu0 }
 0x13a   : > { %v3250_v32 = vpop.f32.mrb[33].mxu1  ;;  %v3162_v33 = vpop.f32.mrb[33].mxu0 }
 0x13b   : > { %v3251_v40 = vadd.f32 %v3250_v32, %v3249_v29  ;;  %v3252_v41 = vpop.f32.mrb[34].mxu1  ;;  %v4413_v42 = vadd.f32 %v3162_v33, %v3161_v31  ;;  %v3164_v43 = vpop.f32.mrb[34].mxu0  ;;  %v1743_v32 = vadd.f32 %v4389_v0, %v4343_v54 }
 0x13c   : > { %v3253_v45 = vpop.f32.mrb[35].mxu1  ;;  %v3165_v47 = vpop.f32.mrb[35].mxu0 }
 0x13d   : > { %v4417_v48 = vadd.f32 %v3251_v40, %v1724_v53  ;;  %v3254_v49 = vadd.f32 %v3253_v45, %v3252_v41  ;;  %v3166_v51 = vadd.f32 %v3165_v47, %v3164_v43  ;;  %v1748_v45 = vadd.f32 %v4397_v16, %v4343_v54 }
 0x13e   : > { %2293 = vmatmul.mubr.bf16.gmra.mrb[140].mxu1 %v3920_v34  ;;  %3614 = vmatmul.mubr.bf16.gmra.mrb[140].mxu0 %v3921_v38 }
 0x13f   : > { %v4419_v55 = vadd.f32 %v3254_v49, %v1727_v21 }
 0x141   : > { %v3255_v56 = vpop.f32.mrb[36].mxu1  ;;  %v3167_v2 = vpop.f32.mrb[36].mxu0 }
 0x142   : > { %v3256_v57 = vpop.f32.mrb[37].mxu1  ;;  %v3168_v58 = vpop.f32.mrb[37].mxu0 }
 0x143   : > { %v3257_v63 = vadd.f32 %v3256_v57, %v3255_v56  ;;  %v3258_v1 = vpop.f32.mrb[38].mxu1  ;;  %v4423_v3 = vadd.f32 %v3168_v58, %v3167_v2  ;;  %v3170_v15 = vpop.f32.mrb[38].mxu0  ;;  %v1751_v57 = vadd.f32 %v4405_v27, %v4343_v54  ;;  %v1759_v27 = vadd.f32 %v3166_v51, %v4343_v54 }
 0x144   : > { %v3259_v6 = vpop.f32.mrb[39].mxu1  ;;  %v3171_v7 = vpop.f32.mrb[39].mxu0 }
 0x145   : > { %v4427_v9 = vadd.f32 %v3257_v63, %v1732_v59  ;;  %v3260_v37 = vadd.f32 %v3259_v6, %v3258_v1  ;;  %v3172_v10 = vadd.f32 %v3171_v7, %v3170_v15  ;;  %v1764_v51 = vadd.f32 %v4423_v3, %v4343_v54 }
 0x147   : > { %v4429_v13 = vadd.f32 %v3260_v37, %v1735_v8  ;;  %v1756_v8 = vadd.f32 %v4413_v42, %v4343_v54 }
 0x149   : > { %v3261_v17 = vpop.f32.mrb[40].mxu1  ;;  %v3173_v18 = vpop.f32.mrb[40].mxu0 }
 0x14a   : > { %v3262_v19 = vpop.f32.mrb[41].mxu1  ;;  %v3174_v26 = vpop.f32.mrb[41].mxu0 }
 0x14b   : > { %v3263_v23 = vadd.f32 %v3262_v19, %v3261_v17  ;;  %v3264_v5 = vpop.f32.mrb[42].mxu1  ;;  %v4433_v25 = vadd.f32 %v3174_v26, %v3173_v18  ;;  %v3176_v29 = vpop.f32.mrb[42].mxu0 }
 0x14c   : > { %v3265_v31 = vpop.f32.mrb[43].mxu1  ;;  %v3177_v39 = vpop.f32.mrb[43].mxu0 }
 0x14d   : > { %v4437_v33 = vadd.f32 %v3263_v23, %v1740_v22  ;;  %v3266_v34 = vadd.f32 %v3265_v31, %v3264_v5  ;;  %v4439_v38 = vadd.f32 %v3177_v39, %v3176_v29 }
 0x14f   : > { %v4441_v53 = vadd.f32 %v3266_v34, %v1743_v32 }
 0x151   : > { %v3267_v40 = vpop.f32.mrb[44].mxu1  ;;  %v3179_v41 = vpop.f32.mrb[44].mxu0 }
 0x152   : > { %v3268_v50 = vpop.f32.mrb[45].mxu1  ;;  %v3180_v43 = vpop.f32.mrb[45].mxu0 }
 0x153   : > { %v3269_v47 = vadd.f32 %v3268_v50, %v3267_v40  ;;  %v3270_v21 = vpop.f32.mrb[46].mxu1  ;;  %v4445_v49 = vadd.f32 %v3180_v43, %v3179_v41  ;;  %v3182_v56 = vpop.f32.mrb[46].mxu0 }
 0x154   : > { %v3271_v0 = vpop.f32.mrb[47].mxu1  ;;  %v3183_v2 = vpop.f32.mrb[47].mxu0 }
 0x155   : > { %v4449_v58 = vadd.f32 %v3269_v47, %v1748_v45  ;;  %v3272_v59 = vadd.f32 %v3271_v0, %v3270_v21  ;;  %v4451_v63 = vadd.f32 %v3183_v2, %v3182_v56 }
 0x157   : > { %v4453_v1 = vadd.f32 %v3272_v59, %v1751_v57 }
 0x159   : > { %v3273_v15 = vpop.f32.mrb[48].mxu1  ;;  %v3337_v6 = vpop.f32.mrb[48].mxu0 }
 0x15a   : > { %v3274_v16 = vpop.f32.mrb[49].mxu1  ;;  %v3338_v7 = vpop.f32.mrb[49].mxu0 }
 0x15b   : > { %v3275_v37 = vadd.f32 %v3274_v16, %v3273_v15  ;;  %v3339_v17 = vadd.f32 %v3338_v7, %v3337_v6  ;;  %v3276_v18 = vpop.f32.mrb[50].mxu1  ;;  %v3340_v19 = vpop.f32.mrb[50].mxu0 }
 0x15c   : > { %v3277_v26 = vpop.f32.mrb[51].mxu1  ;;  %v3341_v22 = vpop.f32.mrb[51].mxu0 }
 0x15d   : > { %v4458_v23 = vadd.f32 %v3275_v37, %v1756_v8  ;;  %v4461_v5 = vadd.f32 %v3339_v17, %v4355_v11  ;;  %v3278_v29 = vadd.f32 %v3277_v26, %v3276_v18  ;;  %v3342_v31 = vadd.f32 %v3341_v22, %v3340_v19 }
 0x15e   : > { %v1767_v11 = vadd.f32 %v3172_v10, %v4343_v54  ;;  %v1772_v10 = vadd.f32 %v4433_v25, %v4343_v54 }
 0x15f   : > { %v4463_v39 = vadd.f32 %v3278_v29, %v1759_v27  ;;  %v4466_v32 = vadd.f32 %v3342_v31, %v4359_v62 }
 0x161   : > { %v3279_v42 = vpop.f32.mrb[52].mxu1  ;;  %v3343_v34 = vpop.f32.mrb[52].mxu0 }
 0x162   : > { %v3280_v40 = vpop.f32.mrb[53].mxu1  ;;  %v3344_v41 = vpop.f32.mrb[53].mxu0 }
 0x163   : > { %v3281_v50 = vadd.f32 %v3280_v40, %v3279_v42  ;;  %v3345_v43 = vadd.f32 %v3344_v41, %v3343_v34  ;;  %v3282_v45 = vpop.f32.mrb[54].mxu1  ;;  %v3346_v47 = vpop.f32.mrb[54].mxu0 }
 0x164   : > { %v3283_v21 = vpop.f32.mrb[55].mxu1  ;;  %v3347_v56 = vpop.f32.mrb[55].mxu0 }
 0x165   : > { %v4471_v0 = vadd.f32 %v3281_v50, %v1764_v51  ;;  %v4474_v62 = vadd.f32 %v3345_v43, %v4371_v35  ;;  %v3284_v2 = vadd.f32 %v3283_v21, %v3282_v45  ;;  %v3348_v57 = vadd.f32 %v3347_v56, %v3346_v47 }
 0x166   : > { %v1775_v35 = vadd.f32 %v4439_v38, %v4343_v54  ;;  %v1780_v38 = vadd.f32 %v4445_v49, %v4343_v54 }
 0x167   : > { %v4476_v59 = vadd.f32 %v3284_v2, %v1767_v11  ;;  %v4479_v15 = vadd.f32 %v3348_v57, %v4375_v14 }
 0x169   : > { %v3285_v3 = vpop.f32.mrb[56].mxu1  ;;  %v3349_v6 = vpop.f32.mrb[56].mxu0 }
 0x16a   : > { %v3286_v16 = vpop.f32.mrb[57].mxu1  ;;  %v3350_v7 = vpop.f32.mrb[57].mxu0 }
 0x16b   : > { %v3287_v8 = vadd.f32 %v3286_v16, %v3285_v3  ;;  %v3351_v37 = vadd.f32 %v3350_v7, %v3349_v6  ;;  %v3288_v17 = vpop.f32.mrb[58].mxu1  ;;  %v3352_v18 = vpop.f32.mrb[58].mxu0 }
 0x16c   : > { %v3289_v19 = vpop.f32.mrb[59].mxu1  ;;  %v3353_v27 = vpop.f32.mrb[59].mxu0 }
 0x16d   : > { %v4485_v26 = vadd.f32 %v3287_v8, %v1772_v10  ;;  %v4488_v14 = vadd.f32 %v3351_v37, %v4387_v61  ;;  %v3290_v22 = vadd.f32 %v3289_v19, %v3288_v17  ;;  %v3354_v29 = vadd.f32 %v3353_v27, %v3352_v18 }
 0x16e   : > { %v1783_v61 = vadd.f32 %v4451_v63, %v4343_v54  ;;  %v1788_v63 = vadd.f32 %v4294_v60, %v4343_v54 }
 0x16f   : > { %v4490_v31 = vadd.f32 %v3290_v22, %v1775_v35  ;;  %v4493_v25 = vadd.f32 %v3354_v29, %v4391_v30 }
 0x171   : > { %v3291_v42 = vpop.f32.mrb[60].mxu1  ;;  %v3355_v34 = vpop.f32.mrb[60].mxu0 }
 0x172   : > { %v3292_v40 = vpop.f32.mrb[61].mxu1  ;;  %v3356_v41 = vpop.f32.mrb[61].mxu0 }
 0x173   : > { %v3293_v51 = vadd.f32 %v3292_v40, %v3291_v42  ;;  %v3357_v50 = vadd.f32 %v3356_v41, %v3355_v34  ;;  %v3294_v43 = vpop.f32.mrb[62].mxu1  ;;  %v3358_v45 = vpop.f32.mrb[62].mxu0 }
 0x174   : > { %v3295_v47 = vpop.f32.mrb[63].mxu1  ;;  %v3359_v11 = vpop.f32.mrb[63].mxu0 }
 0x175   : > { %v4499_v21 = vadd.f32 %v3293_v51, %v1780_v38  ;;  %v4502_v30 = vadd.f32 %v3357_v50, %v4403_v24  ;;  %v3296_v56 = vadd.f32 %v3295_v47, %v3294_v43  ;;  %v3360_v2 = vadd.f32 %v3359_v11, %v3358_v45 }
 0x176   : > { %v1791_v24 = vadd.f32 %v4300_v4, %v4343_v54  ;;  %v1796_v4 = vadd.f32 %v4306_v12, %v4343_v54 }
 0x177   : > { %v4504_v57 = vadd.f32 %v3296_v56, %v1783_v61  ;;  %v4507_v49 = vadd.f32 %v3360_v2, %v4407_v46 }
 0x179   : > { %v3297_v3 = vpop.f32.mrb[64].mxu1  ;;  %v3361_v6 = vpop.f32.mrb[64].mxu0 }
 0x17a   : > { %v3298_v16 = vpop.f32.mrb[65].mxu1  ;;  %v3362_v7 = vpop.f32.mrb[65].mxu0 }
 0x17b   : > { %v3299_v10 = vadd.f32 %v3298_v16, %v3297_v3  ;;  %v3363_v8 = vadd.f32 %v3362_v7, %v3361_v6  ;;  %v3300_v37 = vpop.f32.mrb[66].mxu1  ;;  %v3364_v17 = vpop.f32.mrb[66].mxu0 }
 0x17c   : > { %v3301_v18 = vpop.f32.mrb[67].mxu1  ;;  %v3365_v35 = vpop.f32.mrb[67].mxu0 }
 0x17d   : > { %v4513_v19 = vadd.f32 %v3299_v10, %v1788_v63  ;;  %v4516_v46 = vadd.f32 %v3363_v8, %v4417_v48  ;;  %v3302_v27 = vadd.f32 %v3301_v18, %v3300_v37  ;;  %v3366_v22 = vadd.f32 %v3365_v35, %v3364_v17 }
 0x17e   : > { %v1799_v48 = vadd.f32 %v4312_v20, %v4343_v54  ;;  %v1804_v20 = vadd.f32 %v4318_v28, %v4343_v54 }
 0x17f   : > { %v4518_v29 = vadd.f32 %v3302_v27, %v1791_v24  ;;  %v4521_v60 = vadd.f32 %v3366_v22, %v4419_v55 }
 0x181   : > { %v3303_v42 = vpop.f32.mrb[68].mxu1  ;;  %v3367_v34 = vpop.f32.mrb[68].mxu0 }
 0x182   : > { %v3304_v40 = vpop.f32.mrb[69].mxu1  ;;  %v3368_v41 = vpop.f32.mrb[69].mxu0 }
 0x183   : > { %v3305_v38 = vadd.f32 %v3304_v40, %v3303_v42  ;;  %v3369_v51 = vadd.f32 %v3368_v41, %v3367_v34  ;;  %v3306_v50 = vpop.f32.mrb[70].mxu1  ;;  %v3370_v43 = vpop.f32.mrb[70].mxu0 }
 0x184   : > { %v3307_v45 = vpop.f32.mrb[71].mxu1  ;;  %v3371_v61 = vpop.f32.mrb[71].mxu0 }
 0x185   : > { %v4527_v47 = vadd.f32 %v3305_v38, %v1796_v4  ;;  %v4530_v55 = vadd.f32 %v3369_v51, %v4427_v9  ;;  %v3308_v11 = vadd.f32 %v3307_v45, %v3306_v50  ;;  %v3372_v56 = vadd.f32 %v3371_v61, %v3370_v43 }
 0x186   : > { %v1807_v9 = vadd.f32 %v4324_v36, %v4343_v54  ;;  %v1812_v36 = vadd.f32 %v4330_v44, %v4343_v54 }
 0x187   : > { %v4532_v2 = vadd.f32 %v3308_v11, %v1799_v48  ;;  %v4535_v12 = vadd.f32 %v3372_v56, %v4429_v13 }
 0x189   : > { %v3309_v3 = vpop.f32.mrb[72].mxu1  ;;  %v3373_v6 = vpop.f32.mrb[72].mxu0 }
 0x18a   : > { %v3310_v16 = vpop.f32.mrb[73].mxu1  ;;  %v3374_v7 = vpop.f32.mrb[73].mxu0 }
 0x18b   : > { %v3311_v63 = vadd.f32 %v3310_v16, %v3309_v3  ;;  %v3375_v10 = vadd.f32 %v3374_v7, %v3373_v6  ;;  %v3312_v8 = vpop.f32.mrb[74].mxu1  ;;  %v3376_v37 = vpop.f32.mrb[74].mxu0 }
 0x18c   : > { %v3313_v17 = vpop.f32.mrb[75].mxu1  ;;  %v3377_v24 = vpop.f32.mrb[75].mxu0 }
 0x18d   : > { %v4541_v18 = vadd.f32 %v3311_v63, %v1804_v20  ;;  %v4544_v13 = vadd.f32 %v3375_v10, %v4437_v33  ;;  %v3314_v35 = vadd.f32 %v3313_v17, %v3312_v8  ;;  %v3378_v27 = vadd.f32 %v3377_v24, %v3376_v37 }
 0x18e   : > { %v1815_v33 = vadd.f32 %v4336_v52, %v4343_v54 }
 0x18f   : > { %v4546_v22 = vadd.f32 %v3314_v35, %v1807_v9  ;;  %v4549_v28 = vadd.f32 %v3378_v27, %v4441_v53 }
 0x191   : > { %v3315_v42 = vpop.f32.mrb[76].mxu1  ;;  %v3379_v34 = vpop.f32.mrb[76].mxu0 }
 0x192   : > { %v3316_v40 = vpop.f32.mrb[77].mxu1  ;;  %v3380_v41 = vpop.f32.mrb[77].mxu0 }
 0x193   : > { %v3317_v4 = vadd.f32 %v3316_v40, %v3315_v42  ;;  %v3381_v38 = vadd.f32 %v3380_v41, %v3379_v34  ;;  %v3318_v51 = vpop.f32.mrb[78].mxu1  ;;  %v3382_v50 = vpop.f32.mrb[78].mxu0 }
 0x194   : > { %v3319_v43 = vpop.f32.mrb[79].mxu1  ;;  %v3383_v48 = vpop.f32.mrb[79].mxu0 }
 0x195   : > { %v4555_v45 = vadd.f32 %v3317_v4, %v1812_v36  ;;  %v4558_v53 = vadd.f32 %v3381_v38, %v4449_v58  ;;  %v3320_v61 = vadd.f32 %v3319_v43, %v3318_v51  ;;  %v3384_v11 = vadd.f32 %v3383_v48, %v3382_v50 }
 0x197   : > { %v4560_v56 = vadd.f32 %v3320_v61, %v1815_v33  ;;  %v4563_v44 = vadd.f32 %v3384_v11, %v4453_v1 }
 0x199   : > { %v3385_v3 = vpop.f32.mrb[80].mxu0  ;;  %v3449_v6 = vpop.f32.mrb[80].mxu1 }
 0x19a   : > { %v3386_v16 = vpop.f32.mrb[81].mxu0  ;;  %v3450_v7 = vpop.f32.mrb[81].mxu1 }
 0x19b   : > { %v3387_v20 = vadd.f32 %v3386_v16, %v3385_v3  ;;  %v3451_v52 = vadd.f32 %v3450_v7, %v3449_v6  ;;  %v3388_v54 = vpop.f32.mrb[82].mxu0  ;;  %v3452_v63 = vpop.f32.mrb[82].mxu1 }
 0x19c   : > { %v3389_v10 = vpop.f32.mrb[83].mxu0  ;;  %v3453_v8 = vpop.f32.mrb[83].mxu1 }
 0x19d   : > { %v4566_v58 = vadd.f32 %v3387_v20, %v4458_v23  ;;  %v3390_v37 = vadd.f32 %v3389_v10, %v3388_v54  ;;  %v3454_v9 = vadd.f32 %v3453_v8, %v3452_v63  ;;  %v4569_v17 = vadd.f32 %v3451_v52, %v4461_v5 }
 0x19f   : > { %v4572_v1 = vadd.f32 %v3390_v37, %v4463_v39  ;;  %v4575_v24 = vadd.f32 %v3454_v9, %v4466_v32 }
 0x1a1   : > { %v3391_v35 = vpop.f32.mrb[84].mxu0  ;;  %v3455_v27 = vpop.f32.mrb[84].mxu1 }
 0x1a2   : > { %v3392_v42 = vpop.f32.mrb[85].mxu0  ;;  %v3456_v34 = vpop.f32.mrb[85].mxu1 }
 0x1a3   : > { %v3393_v40 = vadd.f32 %v3392_v42, %v3391_v35  ;;  %v3457_v41 = vadd.f32 %v3456_v34, %v3455_v27  ;;  %v3394_v36 = vpop.f32.mrb[86].mxu0  ;;  %v3458_v23 = vpop.f32.mrb[86].mxu1 }
 0x1a4   : > { %v3395_v4 = vpop.f32.mrb[87].mxu0  ;;  %v3459_v38 = vpop.f32.mrb[87].mxu1 }
 0x1a5   : > { %v4578_v51 = vadd.f32 %v3393_v40, %v4471_v0  ;;  %v3396_v5 = vadd.f32 %v3395_v4, %v3394_v36  ;;  %v3460_v50 = vadd.f32 %v3459_v38, %v3458_v23  ;;  %v4581_v39 = vadd.f32 %v3457_v41, %v4474_v62 }
 0x1a7   : > { %v4584_v32 = vadd.f32 %v3396_v5, %v4476_v59  ;;  %v4587_v33 = vadd.f32 %v3460_v50, %v4479_v15 }
 0x1a9   : > { %v3397_v43 = vpop.f32.mrb[88].mxu0  ;;  %v3461_v48 = vpop.f32.mrb[88].mxu1 }
 0x1aa   : > { %v3398_v61 = vpop.f32.mrb[89].mxu0  ;;  %v3462_v11 = vpop.f32.mrb[89].mxu1 }
 0x1ab   : > { %v3399_v3 = vadd.f32 %v3398_v61, %v3397_v43  ;;  %v3463_v6 = vadd.f32 %v3462_v11, %v3461_v48  ;;  %v3400_v16 = vpop.f32.mrb[90].mxu0  ;;  %v3464_v0 = vpop.f32.mrb[90].mxu1 }
 0x1ac   : > { %v3401_v7 = vpop.f32.mrb[91].mxu0  ;;  %v3465_v20 = vpop.f32.mrb[91].mxu1 }
 0x1ad   : > { %v4590_v52 = vadd.f32 %v3399_v3, %v4485_v26  ;;  %v3402_v62 = vadd.f32 %v3401_v7, %v3400_v16  ;;  %v3466_v54 = vadd.f32 %v3465_v20, %v3464_v0  ;;  %v4593_v59 = vadd.f32 %v3463_v6, %v4488_v14 }
 0x1af   : > { %v4596_v15 = vadd.f32 %v3402_v62, %v4490_v31  ;;  %v4599_v63 = vadd.f32 %v3466_v54, %v4493_v25 }
 0x1b1   : > { %v3403_v10 = vpop.f32.mrb[92].mxu0  ;;  %v3467_v8 = vpop.f32.mrb[92].mxu1 }
 0x1b2   : > { %v3404_v37 = vpop.f32.mrb[93].mxu0  ;;  %v3468_v9 = vpop.f32.mrb[93].mxu1 }
 0x1b3   : > { %v3405_v35 = vadd.f32 %v3404_v37, %v3403_v10  ;;  %v3469_v27 = vadd.f32 %v3468_v9, %v3467_v8  ;;  %v3406_v42 = vpop.f32.mrb[94].mxu0  ;;  %v3470_v26 = vpop.f32.mrb[94].mxu1 }
 0x1b4   : > { %v3407_v34 = vpop.f32.mrb[95].mxu0  ;;  %v3471_v40 = vpop.f32.mrb[95].mxu1 }
 0x1b5   : > { %v4602_v41 = vadd.f32 %v3405_v35, %v4499_v21  ;;  %v3408_v14 = vadd.f32 %v3407_v34, %v3406_v42  ;;  %v3472_v36 = vadd.f32 %v3471_v40, %v3470_v26  ;;  %v4605_v31 = vadd.f32 %v3469_v27, %v4502_v30 }
 0x1b7   : > { %v4608_v25 = vadd.f32 %v3408_v14, %v4504_v57  ;;  %v4611_v23 = vadd.f32 %v3472_v36, %v4507_v49 }
 0x1b9   : > { %v3409_v4 = vpop.f32.mrb[96].mxu0  ;;  %v3473_v38 = vpop.f32.mrb[96].mxu1 }
 0x1ba   : > { %v3410_v5 = vpop.f32.mrb[97].mxu0  ;;  %v3474_v50 = vpop.f32.mrb[97].mxu1 }
 0x1bb   : > { %v3411_v43 = vadd.f32 %v3410_v5, %v3409_v4  ;;  %v3475_v48 = vadd.f32 %v3474_v50, %v3473_v38  ;;  %v3412_v61 = vpop.f32.mrb[98].mxu0  ;;  %v3476_v21 = vpop.f32.mrb[98].mxu1 }
 0x1bc   : > { %v3413_v11 = vpop.f32.mrb[99].mxu0  ;;  %v3477_v3 = vpop.f32.mrb[99].mxu1 }
 0x1bd   : > { %v4614_v6 = vadd.f32 %v3411_v43, %v4513_v19  ;;  %v3414_v30 = vadd.f32 %v3413_v11, %v3412_v61  ;;  %v3478_v16 = vadd.f32 %v3477_v3, %v3476_v21  ;;  %v4617_v57 = vadd.f32 %v3475_v48, %v4516_v46 }
 0x1bf   : > { %v4620_v49 = vadd.f32 %v3414_v30, %v4518_v29  ;;  %v4623_v0 = vadd.f32 %v3478_v16, %v4521_v60 }
 0x1c1   : > { %v3415_v7 = vpop.f32.mrb[100].mxu0  ;;  %v3479_v20 = vpop.f32.mrb[100].mxu1 }
 0x1c2   : > { %v3416_v62 = vpop.f32.mrb[101].mxu0  ;;  %v3480_v54 = vpop.f32.mrb[101].mxu1 }
 0x1c3   : > { %v3417_v10 = vadd.f32 %v3416_v62, %v3415_v7  ;;  %v3481_v8 = vadd.f32 %v3480_v54, %v3479_v20  ;;  %v3418_v37 = vpop.f32.mrb[102].mxu0  ;;  %v3482_v19 = vpop.f32.mrb[102].mxu1 }
 0x1c4   : > { %v3419_v9 = vpop.f32.mrb[103].mxu0  ;;  %v3483_v35 = vpop.f32.mrb[103].mxu1 }
 0x1c5   : > { %v4626_v27 = vadd.f32 %v3417_v10, %v4527_v47  ;;  %v3420_v46 = vadd.f32 %v3419_v9, %v3418_v37  ;;  %v3484_v42 = vadd.f32 %v3483_v35, %v3482_v19  ;;  %v4629_v29 = vadd.f32 %v3481_v8, %v4530_v55 }
 0x1c7   : > { %v4632_v60 = vadd.f32 %v3420_v46, %v4532_v2  ;;  %v4635_v26 = vadd.f32 %v3484_v42, %v4535_v12 }
 0x1c9   : > { %v3421_v34 = vpop.f32.mrb[104].mxu0  ;;  %v3485_v40 = vpop.f32.mrb[104].mxu1 }
 0x1ca   : > { %v3422_v14 = vpop.f32.mrb[105].mxu0  ;;  %v3486_v36 = vpop.f32.mrb[105].mxu1 }
 0x1cb   : > { %v3423_v4 = vadd.f32 %v3422_v14, %v3421_v34  ;;  %v3487_v38 = vadd.f32 %v3486_v36, %v3485_v40  ;;  %v3424_v5 = vpop.f32.mrb[106].mxu0  ;;  %v3488_v47 = vpop.f32.mrb[106].mxu1 }
 0x1cc   : > { %v3425_v50 = vpop.f32.mrb[107].mxu0  ;;  %v3489_v43 = vpop.f32.mrb[107].mxu1 }
 0x1cd   : > { %v4638_v48 = vadd.f32 %v3423_v4, %v4541_v18  ;;  %v3426_v55 = vadd.f32 %v3425_v50, %v3424_v5  ;;  %v3490_v61 = vadd.f32 %v3489_v43, %v3488_v47  ;;  %v4641_v2 = vadd.f32 %v3487_v38, %v4544_v13 }
 0x1cf   : > { %v4644_v12 = vadd.f32 %v3426_v55, %v4546_v22  ;;  %v4647_v21 = vadd.f32 %v3490_v61, %v4549_v28 }
 0x1d1   : > { %v3427_v11 = vpop.f32.mrb[108].mxu0  ;;  %v3491_v3 = vpop.f32.mrb[108].mxu1 }
 0x1d2   : > { %v3428_v30 = vpop.f32.mrb[109].mxu0  ;;  %v3492_v16 = vpop.f32.mrb[109].mxu1 }
 0x1d3   : > { %v3429_v7 = vadd.f32 %v3428_v30, %v3427_v11  ;;  %v3493_v20 = vadd.f32 %v3492_v16, %v3491_v3  ;;  %v3430_v62 = vpop.f32.mrb[110].mxu0  ;;  %v3494_v18 = vpop.f32.mrb[110].mxu1 }
 0x1d4   : > { %v3431_v54 = vpop.f32.mrb[111].mxu0  ;;  %v3495_v10 = vpop.f32.mrb[111].mxu1 }
 0x1d5   : > { %v4650_v13 = vadd.f32 %v3429_v7, %v4555_v45  ;;  %v3432_v8 = vadd.f32 %v3431_v54, %v3430_v62  ;;  %v3496_v22 = vadd.f32 %v3495_v10, %v3494_v18  ;;  %v4653_v37 = vadd.f32 %v3493_v20, %v4558_v53 }
 0x1d7   : > { %v4656_v28 = vadd.f32 %v3432_v8, %v4560_v56  ;;  %v4659_v19 = vadd.f32 %v3496_v22, %v4563_v44 }
 0x1d9   : > { %v3497_v9 = vpop.f32.mrb[112].mxu1  ;;  %v3587_v35 = vpop.f32.mrb[112].mxu0 }
 0x1da   : > { %v2344_v46 = vadd.f32 %v3587_v35, %v4581_v39  ;;  %v3498_v42 = vpop.f32.mrb[113].mxu1  ;;  %v2335_v34 = vpop.f32.mrb[113].mxu0 }
 0x1db   : > { %v3499_v40 = vadd.f32 %v3498_v42, %v3497_v9  ;;  %v2336_v45 = vadd.f32 %v2335_v34, %v4569_v17  ;;  %v3500_v14 = vpop.f32.mrb[114].mxu1  ;;  %v3588_v36 = vpop.f32.mrb[114].mxu0 }
 0x1dc   : > { %v2347_v53 = vadd.f32 %v3588_v36, %v4587_v33  ;;  %v3501_v4 = vpop.f32.mrb[115].mxu1  ;;  %v2338_v56 = vpop.f32.mrb[115].mxu0  ;;  %v2464_v47 = vmax.f32 %v2344_v46, 0.0 }
 0x1dd   : > { %v3502_v38 = vadd.f32 %v3501_v4, %v3500_v14  ;;  %v2339_v44 = vadd.f32 %v2338_v56, %v4575_v24  ;;  %v4667_v5 = vadd.f32 %v3499_v40, %v4566_v58  ;;  %v2462_v50 = vmax.f32 %v2336_v45, 0.0 }
 0x1de   : > { %v2465_v39 = vmax.f32 %v2347_v53, 0.0 }
 0x1df   : > { %v2463_v17 = vmax.f32 %v2339_v44, 0.0  ;;  %v4675_v33 = vadd.f32 %v3502_v38, %v4572_v1 }
 0x1e0   : > { %v3010_v43 = vpack.c.bf16 %v2465_v39, %v2464_v47 }
 0x1e1   : > { %v3005_v55 = vpack.c.bf16 %v2463_v17, %v2462_v50  ;;  %v3503_v24 = vpop.f32.mrb[116].mxu1  ;;  %v3591_v61 = vpop.f32.mrb[116].mxu0 }
 0x1e2   : > { %3082 = vst [vmem:[%s4672_s22 + $0x8] sm:$0xff] %v3010_v43   ;;  %v2360_v58 = vadd.f32 %v3591_v61, %v4605_v31  ;;  %v3504_v11 = vpop.f32.mrb[117].mxu1  ;;  %v2351_v3 = vpop.f32.mrb[117].mxu0 }
 0x1e3   : > { %3006 = vst [vmem:[%s4672_s22] sm:$0xff] %v3005_v55   ;;  %v3505_v30 = vadd.f32 %v3504_v11, %v3503_v24  ;;  %v2352_v16 = vadd.f32 %v2351_v3, %v4593_v59  ;;  %v3506_v7 = vpop.f32.mrb[118].mxu1  ;;  %v3592_v20 = vpop.f32.mrb[118].mxu0 }
 0x1e4   : > { %v2363_v62 = vadd.f32 %v3592_v20, %v4611_v23  ;;  %v3507_v1 = vpop.f32.mrb[119].mxu1  ;;  %v2354_v18 = vpop.f32.mrb[119].mxu0  ;;  %v2468_v31 = vmax.f32 %v2360_v58, 0.0 }
 0x1e5   : > { %v3508_v54 = vadd.f32 %v3507_v1, %v3506_v7  ;;  %v2355_v10 = vadd.f32 %v2354_v18, %v4599_v63  ;;  %v2247_v8 = vadd.f32 %v3505_v30, %v4578_v51  ;;  %v2466_v9 = vmax.f32 %v2352_v16, 0.0 }
 0x1e6   : > { %v2469_v22 = vmax.f32 %v2363_v62, 0.0 }
 0x1e7   : > { %v2467_v35 = vmax.f32 %v2355_v10, 0.0  ;;  %v2250_v46 = vadd.f32 %v3508_v54, %v4584_v32 }
 0x1e8   : > { %v3020_v59 = vpack.c.bf16 %v2469_v22, %v2468_v31 }
 0x1e9   : > { %v3015_v42 = vpack.c.bf16 %v2467_v35, %v2466_v9  ;;  %v3509_v34 = vpop.f32.mrb[120].mxu1  ;;  %v3595_v40 = vpop.f32.mrb[120].mxu0 }
 0x1ea   : > { %3084 = vst [vmem:[%s4672_s22 + $0x18] sm:$0xff] %v3020_v59   ;;  %v2376_v23 = vadd.f32 %v3595_v40, %v4629_v29  ;;  %v3510_v45 = vpop.f32.mrb[121].mxu1  ;;  %v2367_v14 = vpop.f32.mrb[121].mxu0 }
 0x1eb   : > { %3083 = vst [vmem:[%s4672_s22 + $0x10] sm:$0xff] %v3015_v42   ;;  %v3511_v36 = vadd.f32 %v3510_v45, %v3509_v34  ;;  %v2368_v63 = vadd.f32 %v2367_v14, %v4617_v57  ;;  %v3512_v51 = vpop.f32.mrb[122].mxu1  ;;  %v3596_v53 = vpop.f32.mrb[122].mxu0 }
 0x1ec   : > { %v2379_v4 = vadd.f32 %v3596_v53, %v4635_v26  ;;  %v3513_v56 = vpop.f32.mrb[123].mxu1  ;;  %v2370_v32 = vpop.f32.mrb[123].mxu0  ;;  %v2472_v29 = vmax.f32 %v2376_v23, 0.0 }
 0x1ed   : > { %v3514_v38 = vadd.f32 %v3513_v56, %v3512_v51  ;;  %v2371_v44 = vadd.f32 %v2370_v32, %v4623_v0  ;;  %v4692_v47 = vadd.f32 %v3511_v36, %v4590_v52  ;;  %v2470_v50 = vmax.f32 %v2368_v63, 0.0 }
 0x1ee   : > { %v2473_v39 = vmax.f32 %v2379_v4, 0.0 }
 0x1ef   : > { %v2471_v17 = vmax.f32 %v2371_v44, 0.0  ;;  %v4695_v57 = vadd.f32 %v3514_v38, %v4596_v15 }
 0x1f0   : > { %v3030_v43 = vpack.c.bf16 %v2473_v39, %v2472_v29 }
 0x1f1   : > { %v3025_v55 = vpack.c.bf16 %v2471_v17, %v2470_v50  ;;  %v3515_v24 = vpop.f32.mrb[124].mxu1  ;;  %v3599_v26 = vpop.f32.mrb[124].mxu0 }
 0x1f2   : > { %3086 = vst [vmem:[%s4672_s22 + $0x28] sm:$0xff] %v3030_v43   ;;  %v2392_v61 = vadd.f32 %v3599_v26, %v4653_v37  ;;  %v3516_v58 = vpop.f32.mrb[125].mxu1  ;;  %v2383_v11 = vpop.f32.mrb[125].mxu0 }
 0x1f3   : > { %3085 = vst [vmem:[%s4672_s22 + $0x20] sm:$0xff] %v3025_v55   ;;  %v3517_v0 = vadd.f32 %v3516_v58, %v3515_v24  ;;  %v2384_v52 = vadd.f32 %v2383_v11, %v4641_v2  ;;  %v3518_v3 = vpop.f32.mrb[126].mxu1  ;;  %v3600_v30 = vpop.f32.mrb[126].mxu0 }
 0x1f4   : > { %v2395_v16 = vadd.f32 %v3600_v30, %v4659_v19  ;;  %v3519_v15 = vpop.f32.mrb[127].mxu1  ;;  %v2386_v7 = vpop.f32.mrb[127].mxu0  ;;  %v2476_v37 = vmax.f32 %v2392_v61, 0.0 }
 0x1f5   : > { %v3520_v20 = vadd.f32 %v3519_v15, %v3518_v3  ;;  %v2387_v62 = vadd.f32 %v2386_v7, %v4647_v21  ;;  %v2263_v1 = vadd.f32 %v3517_v0, %v4602_v41  ;;  %v2474_v54 = vmax.f32 %v2384_v52, 0.0 }
 0x1f6   : > { %v2477_v18 = vmax.f32 %v2395_v16, 0.0 }
 0x1f7   : > { %v2475_v10 = vmax.f32 %v2387_v62, 0.0  ;;  %v2266_v31 = vadd.f32 %v3520_v20, %v4608_v25 }
 0x1f8   : > { %v3040_v2 = vpack.c.bf16 %v2477_v18, %v2476_v37 }
 0x1f9   : > { %v3035_v22 = vpack.c.bf16 %v2475_v10, %v2474_v54  ;;  %v3521_v9 = vpop.f32.mrb[128].mxu1  ;;  %v3603_v35 = vpop.f32.mrb[128].mxu0 }
 0x1fa   : > { %3088 = vst [vmem:[%s4672_s22 + $0x38] sm:$0xff] %v3040_v2   ;;  %v2408_v19 = vadd.f32 %v3603_v35, %v2247_v8  ;;  %v3522_v59 = vpop.f32.mrb[129].mxu1  ;;  %v2399_v42 = vpop.f32.mrb[129].mxu0 }
 0x1fb   : > { %3087 = vst [vmem:[%s4672_s22 + $0x30] sm:$0xff] %v3035_v22   ;;  %v3523_v34 = vadd.f32 %v3522_v59, %v3521_v9  ;;  %v2400_v21 = vadd.f32 %v2399_v42, %v4667_v5  ;;  %v3524_v40 = vpop.f32.mrb[130].mxu1  ;;  %v3604_v41 = vpop.f32.mrb[130].mxu0 }
 0x1fc   : > { %v2411_v23 = vadd.f32 %v3604_v41, %v2250_v46  ;;  %v3525_v45 = vpop.f32.mrb[131].mxu1  ;;  %v2402_v14 = vpop.f32.mrb[131].mxu0  ;;  %v2480_v51 = vmax.f32 %v2408_v19, 0.0 }
 0x1fd   : > { %v3526_v36 = vadd.f32 %v3525_v45, %v3524_v40  ;;  %v2403_v25 = vadd.f32 %v2402_v14, %v4675_v33  ;;  %v2271_v63 = vadd.f32 %v3523_v34, %v4614_v6  ;;  %v2478_v53 = vmax.f32 %v2400_v21, 0.0 }
 0x1fe   : > { %v2481_v8 = vmax.f32 %v2411_v23, 0.0 }
 0x1ff   : > { %v2479_v4 = vmax.f32 %v2403_v25, 0.0  ;;  %v2274_v56 = vadd.f32 %v3526_v36, %v4620_v49 }
 0x200   : > { %v3050_v32 = vpack.c.bf16 %v2481_v8, %v2480_v51 }
 0x201   : > { %v3045_v5 = vpack.c.bf16 %v2479_v4, %v2478_v53  ;;  %v3527_v38 = vpop.f32.mrb[132].mxu1  ;;  %v3607_v44 = vpop.f32.mrb[132].mxu0 }
 0x202   : > { %3090 = vst [vmem:[%s4672_s22 + $0x48] sm:$0xff] %v3050_v32   ;;  %v2424_v46 = vadd.f32 %v3607_v44, %v2263_v1  ;;  %v3528_v29 = vpop.f32.mrb[133].mxu1  ;;  %v2415_v39 = vpop.f32.mrb[133].mxu0 }
 0x203   : > { %3089 = vst [vmem:[%s4672_s22 + $0x40] sm:$0xff] %v3045_v5   ;;  %v3529_v50 = vadd.f32 %v3528_v29, %v3527_v38  ;;  %v2416_v33 = vadd.f32 %v2415_v39, %v4692_v47  ;;  %v3530_v17 = vpop.f32.mrb[134].mxu1  ;;  %v3608_v6 = vpop.f32.mrb[134].mxu0 }
 0x204   : > { %v2427_v43 = vadd.f32 %v3608_v6, %v2266_v31  ;;  %v3531_v55 = vpop.f32.mrb[135].mxu1  ;;  %v2418_v24 = vpop.f32.mrb[135].mxu0  ;;  %v2484_v58 = vmax.f32 %v2424_v46, 0.0 }
 0x205   : > { %v3532_v26 = vadd.f32 %v3531_v55, %v3530_v17  ;;  %v2419_v49 = vadd.f32 %v2418_v24, %v4695_v57  ;;  %v2279_v61 = vadd.f32 %v3529_v50, %v4626_v27  ;;  %v2482_v0 = vmax.f32 %v2416_v33, 0.0 }
 0x206   : > { %v2485_v11 = vmax.f32 %v2427_v43, 0.0 }
 0x207   : > { %v2483_v52 = vmax.f32 %v2419_v49, 0.0  ;;  %v2282_v3 = vadd.f32 %v3532_v26, %v4632_v60 }
 0x208   : > { %v3060_v30 = vpack.c.bf16 %v2485_v11, %v2484_v58 }
 0x209   : > { %v3055_v47 = vpack.c.bf16 %v2483_v52, %v2482_v0  ;;  %v3533_v16 = vpop.f32.mrb[136].mxu1  ;;  %v3611_v15 = vpop.f32.mrb[136].mxu0 }
 0x20a   : > { %3092 = vst [vmem:[%s4672_s22 + $0x58] sm:$0xff] %v3060_v30   ;;  %v2440_v7 = vadd.f32 %v3611_v15, %v2279_v61  ;;  %v3534_v20 = vpop.f32.mrb[137].mxu1  ;;  %v2431_v62 = vpop.f32.mrb[137].mxu0 }
 0x20b   : > { %3091 = vst [vmem:[%s4672_s22 + $0x50] sm:$0xff] %v3055_v47   ;;  %v3535_v1 = vadd.f32 %v3534_v20, %v3533_v16  ;;  %v2432_v37 = vadd.f32 %v2431_v62, %v2271_v63  ;;  %v3536_v57 = vpop.f32.mrb[138].mxu1  ;;  %v3612_v18 = vpop.f32.mrb[138].mxu0 }
 0x20c   : > { %v2443_v27 = vadd.f32 %v3612_v18, %v2282_v3  ;;  %v3537_v54 = vpop.f32.mrb[139].mxu1  ;;  %v2434_v10 = vpop.f32.mrb[139].mxu0  ;;  %v2488_v22 = vmax.f32 %v2440_v7, 0.0 }
 0x20d   : > { %v3538_v31 = vadd.f32 %v3537_v54, %v3536_v57  ;;  %v2435_v60 = vadd.f32 %v2434_v10, %v2274_v56  ;;  %v2287_v2 = vadd.f32 %v3535_v1, %v4638_v48  ;;  %v2486_v35 = vmax.f32 %v2432_v37, 0.0 }
 0x20e   : > { %v2489_v9 = vmax.f32 %v2443_v27, 0.0 }
 0x20f   : > { %v2487_v19 = vmax.f32 %v2435_v60, 0.0  ;;  %v2290_v59 = vadd.f32 %v3538_v31, %v4644_v12 }
 0x210   : > { %v3070_v42 = vpack.c.bf16 %v2489_v9, %v2488_v22 }
 0x211   : > { %v3065_v34 = vpack.c.bf16 %v2487_v19, %v2486_v35  ;;  %v3539_v21 = vpop.f32.mrb[140].mxu1  ;;  %v3615_v40 = vpop.f32.mrb[140].mxu0 }
 0x212   : > { %3094 = vst [vmem:[%s4672_s22 + $0x68] sm:$0xff] %v3070_v42   ;;  %v3540_v41 = vpop.f32.mrb[141].mxu1  ;;  %v2447_v23 = vpop.f32.mrb[141].mxu0 }
 0x213   : > { %3093 = vst [vmem:[%s4672_s22 + $0x60] sm:$0xff] %v3065_v34   ;;  %v3541_v45 = vadd.f32 %v3540_v41, %v3539_v21  ;;  %v2448_v14 = vadd.f32 %v2447_v23, %v2287_v2  ;;  %v3542_v36 = vpop.f32.mrb[142].mxu1  ;;  %v3616_v25 = vpop.f32.mrb[142].mxu0 }
 0x214   : > { %v3543_v48 = vpop.f32.mrb[143].mxu1  ;;  %v2450_v63 = vpop.f32.mrb[143].mxu0 }
 0x215   : > { %v2295_v51 = vadd.f32 %v3541_v45, %v4650_v13  ;;  %v3544_v8 = vadd.f32 %v3543_v48, %v3542_v36  ;;  %v2451_v12 = vadd.f32 %v2450_v63, %v2290_v59  ;;  %v2490_v4 = vmax.f32 %v2448_v14, 0.0 }
 0x217   : > { %v2456_v53 = vadd.f32 %v3615_v40, %v2295_v51  ;;  %v2298_v56 = vadd.f32 %v3544_v8, %v4656_v28  ;;  %v2491_v32 = vmax.f32 %v2451_v12, 0.0 }
 0x219   : > { %v2459_v5 = vadd.f32 %v3616_v25, %v2298_v56  ;;  %v3075_v38 = vpack.c.bf16 %v2491_v32, %v2490_v4  ;;  %v2492_v44 = vmax.f32 %v2456_v53, 0.0 }
 0x21b   : > { %v2493_v46 = vmax.f32 %v2459_v5, 0.0  ;;  %3095 = vst [vmem:[%s4672_s22 + $0x70] sm:$0xff] %v3075_v38  }
 0x21d   : > { %v3080_v29 = vpack.c.bf16 %v2493_v46, %v2492_v44 }
 0x21f   : > { %3096 = vst [vmem:[%s4672_s22 + $0x78] sm:$0xff] %v3080_v29  }
 0x220 PF: > { %s13_s12 = sadd.s32 1, %s3928_s12  }
 0x221   : > { %p10_p4 = scmp.ge.s32.totalorder %s13_s12, 4  }
 0x223   :  { %12 = sbr.rel (!%p10_p4) target bundleno = 1 (0x1), region = 62 }

// kernel: model_c_forward.12
= control target key start
LH: loop header
LB: loop body
LE: loop exit
PB: predicated region body
PF: predicated region fallthrough
CT: control target
= control target key end

     0   :  { %s2926_s1 = inlined_call_operand.vmem [shape: bf16[1152,128], index: 1, kind: input, shape index: {}]   ;;  %s2927_s0 = inlined_call_operand.vmem [shape: bf16[128,1152], index: 0, kind: input, shape index: {}]   ;;  %s2928_s2 = inlined_call_operand.vmem [shape: f32[1,128], index: 2, kind: input, shape index: {}]   ;;  %s2929_s3 = inlined_call_operand.vmem [shape: bf16[128,128], index: 3, kind: output, shape index: {}]  }
   0x1   :  { %v2175_v0 = vld [vmem:[%s2926_s1 + $0x40] sm:$0xff]   ;;  %v2179_v4 = vld [vmem:[%s2926_s1 + $0x48] sm:$0xff]   ;;  %v2183_v8 = vld [vmem:[%s2926_s1 + $0x50] sm:$0xff]  }
   0x2   :  { %v2176_v1 = vld [vmem:[%s2926_s1 + $0xc0] sm:$0xff]   ;;  %1855 = vmatprep.subr.bf16.mxu0 %v2175_v0  ;;  %v2180_v5 = vld [vmem:[%s2926_s1 + $0xc8] sm:$0xff]   ;;  %v2184_v9 = vld [vmem:[%s2926_s1 + $0xd0] sm:$0xff]  }
   0x3   :  { %v2177_v2 = vld [vmem:[%s2926_s1] sm:$0xff]   ;;  %1919 = vmatprep.subr.bf16.mxu1 %v2176_v1  ;;  %v2181_v6 = vld [vmem:[%s2926_s1 + $0x8] sm:$0xff]   ;;  %v2185_v10 = vld [vmem:[%s2926_s1 + $0x10] sm:$0xff]  }
   0x4   :  { %v2178_v3 = vld [vmem:[%s2926_s1 + $0x80] sm:$0xff]   ;;  %1856 = vmatpush3.bf16.msra.mxu0 %v2177_v2  ;;  %v2182_v7 = vld [vmem:[%s2926_s1 + $0x88] sm:$0xff]   ;;  %v2186_v11 = vld [vmem:[%s2926_s1 + $0x90] sm:$0xff]  }
   0x5   :  { %1920 = vmatpush3.bf16.msra.mxu1 %v2178_v3  ;;  %1857 = vmatprep.subr.bf16.mxu0 %v2179_v4  ;;  %v2187_v12 = vld [vmem:[%s2926_s1 + $0x58] sm:$0xff]   ;;  %v2191_v16 = vld [vmem:[%s2926_s1 + $0x60] sm:$0xff]   ;;  %v2195_v20 = vld [vmem:[%s2926_s1 + $0x68] sm:$0xff]  }
   0x6   :  { %1921 = vmatprep.subr.bf16.mxu1 %v2180_v5  ;;  %v2188_v13 = vld [vmem:[%s2926_s1 + $0xd8] sm:$0xff]   ;;  %v2192_v17 = vld [vmem:[%s2926_s1 + $0xe0] sm:$0xff]   ;;  %v2196_v21 = vld [vmem:[%s2926_s1 + $0xe8] sm:$0xff]  }
   0x7   :  { %v2189_v14 = vld [vmem:[%s2926_s1 + $0x18] sm:$0xff]   ;;  %v2193_v18 = vld [vmem:[%s2926_s1 + $0x20] sm:$0xff]   ;;  %v2197_v22 = vld [vmem:[%s2926_s1 + $0x28] sm:$0xff]  }
   0x8   :  { %1858 = vmatpush3.bf16.msra.mxu0 %v2181_v6  ;;  %v2190_v15 = vld [vmem:[%s2926_s1 + $0x98] sm:$0xff]   ;;  %v2194_v19 = vld [vmem:[%s2926_s1 + $0xa0] sm:$0xff]   ;;  %v2198_v23 = vld [vmem:[%s2926_s1 + $0xa8] sm:$0xff]  }
   0x9   :  { %1922 = vmatpush3.bf16.msra.mxu1 %v2182_v7  ;;  %1859 = vmatprep.subr.bf16.mxu0 %v2183_v8  ;;  %v2199_v24 = vld [vmem:[%s2926_s1 + $0x70] sm:$0xff]   ;;  %v2203_v28 = vld [vmem:[%s2926_s1 + $0x78] sm:$0xff]   ;;  %v2207_v32 = vld [vmem:[%s2927_s0] ss:$36 sps:$4 sm:$0xff]  }
   0xa   :  { %1923 = vmatprep.subr.bf16.mxu1 %v2184_v9  ;;  %v2200_v25 = vld [vmem:[%s2926_s1 + $0xf0] sm:$0xff]   ;;  %v2204_v29 = vld [vmem:[%s2926_s1 + $0xf8] sm:$0xff]   ;;  %v2209_v33 = vld [vmem:[%s2927_s0 + $0x4] ss:$36 sps:$4 sm:$0xff]  }
   0xb   :  { %v2201_v26 = vld [vmem:[%s2926_s1 + $0x30] sm:$0xff]   ;;  %v2205_v30 = vld [vmem:[%s2926_s1 + $0x38] sm:$0xff]   ;;  %v2210_v34 = vld [vmem:[%s2927_s0 + $0x8] ss:$36 sps:$4 sm:$0xff]   ;;  %1078 = vmatprep.mubr.bf16.mxu0 %v2209_v33 }
   0xc   :  { %1860 = vmatpush3.bf16.msra.mxu0 %v2185_v10  ;;  %v2202_v27 = vld [vmem:[%s2926_s1 + $0xb0] sm:$0xff]   ;;  %v2206_v31 = vld [vmem:[%s2926_s1 + $0xb8] sm:$0xff]   ;;  %v2213_v36 = vld [vmem:[%s2926_s1 + $0x140] sm:$0xff]  }
   0xd   :  { %1924 = vmatpush3.bf16.msra.mxu1 %v2186_v11  ;;  %1861 = vmatprep.subr.bf16.mxu0 %v2187_v12  ;;  %v2212_v35 = vld [vmem:[%s2927_s0 + $0xc] ss:$36 sps:$4 sm:$0xff]   ;;  %v2214_v37 = vld [vmem:[%s2926_s1 + $0x1c0] sm:$0xff]   ;;  %v2219_v41 = vld [vmem:[%s2927_s0 + $0x54] ss:$36 sps:$4 sm:$0xff]  }
   0xe   :  { %1925 = vmatprep.subr.bf16.mxu1 %v2188_v13  ;;  %1175 = vmatprep.mubr.bf16.mxu1 %v2212_v35  ;;  %v2215_v38 = vld [vmem:[%s2926_s1 + $0x100] sm:$0xff]   ;;  %v2217_v40 = vld [vmem:[%s2927_s0 + $0x4c] ss:$36 sps:$4 sm:$0xff]   ;;  %v2227_v48 = vld [vmem:[%s2927_s0 + $0x94] ss:$36 sps:$4 sm:$0xff]  }
   0xf   :  { %v2216_v39 = vld [vmem:[%s2926_s1 + $0x180] sm:$0xff]   ;;  %v2221_v42 = vld [vmem:[%s2927_s0 + $0x48] ss:$36 sps:$4 sm:$0xff]   ;;  %v2222_v43 = vld [vmem:[%s2927_s0 + $0x50] ss:$36 sps:$4 sm:$0xff]  }
  0x10   :  { %1862 = vmatpush3.bf16.msra.mxu0 %v2189_v14  ;;  %v2223_v44 = vld [vmem:[%s2926_s1 + $0x148] sm:$0xff]   ;;  %v2229_v49 = vld [vmem:[%s2927_s0 + $0x9c] ss:$36 sps:$4 sm:$0xff]   ;;  %v2231_v50 = vld [vmem:[%s2927_s0 + $0x90] ss:$36 sps:$4 sm:$0xff]  }
  0x11   :  { %1926 = vmatpush3.bf16.msra.mxu1 %v2190_v15  ;;  %1863 = vmatprep.subr.bf16.mxu0 %v2191_v16  ;;  %v2224_v45 = vld [vmem:[%s2926_s1 + $0x1c8] sm:$0xff]   ;;  %v2232_v51 = vld [vmem:[%s2927_s0 + $0x98] ss:$36 sps:$4 sm:$0xff]   ;;  %v2233_v52 = vld [vmem:[%s2926_s1 + $0x150] sm:$0xff]  }
  0x12   :  { %1927 = vmatprep.subr.bf16.mxu1 %v2192_v17  ;;  %v2225_v46 = vld [vmem:[%s2926_s1 + $0x108] sm:$0xff]   ;;  %v2234_v53 = vld [vmem:[%s2926_s1 + $0x1d0] sm:$0xff]   ;;  %v2237_v56 = vld [vmem:[%s2927_s0 + $0xdc] ss:$36 sps:$4 sm:$0xff]  }
  0x13   :  { %v2226_v47 = vld [vmem:[%s2926_s1 + $0x188] sm:$0xff]   ;;  %v2235_v54 = vld [vmem:[%s2926_s1 + $0x110] sm:$0xff]   ;;  %v2241_v58 = vld [vmem:[%s2927_s0 + $0xd8] ss:$36 sps:$4 sm:$0xff]  }
  0x14   :  { %1864 = vmatpush3.bf16.msra.mxu0 %v2193_v18  ;;  %v2236_v55 = vld [vmem:[%s2926_s1 + $0x190] sm:$0xff]   ;;  %v2239_v57 = vld [vmem:[%s2927_s0 + $0xe4] ss:$36 sps:$4 sm:$0xff]   ;;  %v2243_v60 = vld [vmem:[%s2926_s1 + $0x158] sm:$0xff]  }
  0x15   :  { %1928 = vmatpush3.bf16.msra.mxu1 %v2194_v19  ;;  %1865 = vmatprep.subr.bf16.mxu0 %v2195_v20  ;;  %v2242_v59 = vld [vmem:[%s2927_s0 + $0xe0] ss:$36 sps:$4 sm:$0xff]   ;;  %v2244_v61 = vld [vmem:[%s2926_s1 + $0x1d8] sm:$0xff]   ;;  %v2249_v1 = vld [vmem:[%s2927_s0 + $0x12c] ss:$36 sps:$4 sm:$0xff]  }
  0x16   :  { %1929 = vmatprep.subr.bf16.mxu1 %v2196_v21  ;;  %v2245_v62 = vld [vmem:[%s2926_s1 + $0x118] sm:$0xff]   ;;  %v2247_v0 = vld [vmem:[%s2927_s0 + $0x124] ss:$36 sps:$4 sm:$0xff]   ;;  %v2257_v8 = vld [vmem:[%s2927_s0 + $0x16c] ss:$36 sps:$4 sm:$0xff]  }
  0x17   :  { %v2246_v63 = vld [vmem:[%s2926_s1 + $0x198] sm:$0xff]   ;;  %v2251_v2 = vld [vmem:[%s2927_s0 + $0x120] ss:$36 sps:$4 sm:$0xff]   ;;  %v2252_v4 = vld [vmem:[%s2927_s0 + $0x128] ss:$36 sps:$4 sm:$0xff]  }
  0x18   :  { %1866 = vmatpush3.bf16.msra.mxu0 %v2197_v22  ;;  %v2253_v3 = vld [vmem:[%s2926_s1 + $0x160] sm:$0xff]   ;;  %v2259_v9 = vld [vmem:[%s2927_s0 + $0x174] ss:$36 sps:$4 sm:$0xff]   ;;  %v2263_v10 = vld [vmem:[%s2926_s1 + $0x168] sm:$0xff]  }
  0x19   :  { %1930 = vmatpush3.bf16.msra.mxu1 %v2198_v23  ;;  %1867 = vmatprep.subr.bf16.mxu0 %v2199_v24  ;;  %v2254_v5 = vld [vmem:[%s2926_s1 + $0x1e0] sm:$0xff]   ;;  %v2264_v11 = vld [vmem:[%s2926_s1 + $0x1e8] sm:$0xff]   ;;  %v2262_v15 = vld [vmem:[%s2927_s0 + $0x170] ss:$36 sps:$4 sm:$0xff]  }
  0x1a   :  { %1931 = vmatprep.subr.bf16.mxu1 %v2200_v25  ;;  %v2255_v6 = vld [vmem:[%s2926_s1 + $0x120] sm:$0xff]   ;;  %v2261_v12 = vld [vmem:[%s2927_s0 + $0x168] ss:$36 sps:$4 sm:$0xff]   ;;  %v2267_v16 = vld [vmem:[%s2927_s0 + $0x1b4] ss:$36 sps:$4 sm:$0xff]  }
  0x1b   :  { %v2256_v7 = vld [vmem:[%s2926_s1 + $0x1a0] sm:$0xff]   ;;  %v2265_v13 = vld [vmem:[%s2926_s1 + $0x128] sm:$0xff]   ;;  %v2273_v18 = vld [vmem:[%s2926_s1 + $0x170] sm:$0xff]  }
  0x1c   :  { %1868 = vmatpush3.bf16.msra.mxu0 %v2201_v26  ;;  %v2266_v14 = vld [vmem:[%s2926_s1 + $0x1a8] sm:$0xff]   ;;  %v2269_v17 = vld [vmem:[%s2927_s0 + $0x1bc] ss:$36 sps:$4 sm:$0xff]   ;;  %v2274_v19 = vld [vmem:[%s2926_s1 + $0x1f0] sm:$0xff]  }
  0x1d   :  { %1932 = vmatpush3.bf16.msra.mxu1 %v2202_v27  ;;  %1869 = vmatprep.subr.bf16.mxu0 %v2203_v28  ;;  %v2275_v20 = vld [vmem:[%s2926_s1 + $0x130] sm:$0xff]   ;;  %v2272_v23 = vld [vmem:[%s2927_s0 + $0x1b8] ss:$36 sps:$4 sm:$0xff]   ;;  %v2279_v25 = vld [vmem:[%s2927_s0 + $0x204] ss:$36 sps:$4 sm:$0xff]  }
  0x1e   :  { %1933 = vmatprep.subr.bf16.mxu1 %v2204_v29  ;;  %v2276_v21 = vld [vmem:[%s2926_s1 + $0x1b0] sm:$0xff]   ;;  %v2277_v24 = vld [vmem:[%s2927_s0 + $0x1fc] ss:$36 sps:$4 sm:$0xff]  }
  0x1f   :  { %v2271_v22 = vld [vmem:[%s2927_s0 + $0x1b0] ss:$36 sps:$4 sm:$0xff]   ;;  %v2283_v26 = vld [vmem:[%s2926_s1 + $0x178] sm:$0xff]  }
  0x20   :  { %1870 = vmatpush3.bf16.msra.mxu0 %v2205_v30  ;;  %v2284_v27 = vld [vmem:[%s2926_s1 + $0x1f8] sm:$0xff]   ;;  %v2287_v35 = vld [vmem:[%s2927_s0 + $0x10] ss:$36 sps:$4 sm:$0xff]  }
  0x21   :  { %1934 = vmatpush3.bf16.msra.mxu1 %v2206_v31  ;;  %1983 = vmatprep.subr.bf16.mxu0 %v2213_v36  ;;  %v2285_v28 = vld [vmem:[%s2926_s1 + $0x138] sm:$0xff]   ;;  %v2282_v31 = vld [vmem:[%s2927_s0 + $0x200] ss:$36 sps:$4 sm:$0xff]  }
  0x22   :  { %2047 = vmatprep.subr.bf16.mxu1 %v2214_v37  ;;  %v2286_v29 = vld [vmem:[%s2926_s1 + $0x1b8] sm:$0xff]  }
  0x23   :  { %1079 = vmatmul.mubr.bf16.vlgmr.msra.gmra.mrb[0].mxu0 %v2207_v32  ;;  %v2281_v30 = vld [vmem:[%s2927_s0 + $0x1f8] ss:$36 sps:$4 sm:$0xff]   ;;  %v2293_v32 = vld [vmem:[%s2926_s1 + $0x200] sm:$0xff]  }
  0x24   :  { %1176 = vmatmul.mubr.bf16.vlgmr.msra.gmra.mrb[0].mxu1 %v2210_v34  ;;  %1984 = vmatpush3.bf16.msra.mxu0 %v2215_v38  ;;  %v2289_v33 = vld [vmem:[%s2927_s0 + $0x14] ss:$36 sps:$4 sm:$0xff]   ;;  %v2292_v34 = vld [vmem:[%s2927_s0 + $0x1c] ss:$36 sps:$4 sm:$0xff]   ;;  %v2296_v38 = vld [vmem:[%s2927_s0 + $0x64] ss:$36 sps:$4 sm:$0xff]  }
  0x25   :  { %2048 = vmatpush3.bf16.msra.mxu1 %v2216_v39  ;;  %1086 = vmatprep.mubr.bf16.mxu0 %v2217_v40  ;;  %v2290_v36 = vld [vmem:[%s2927_s0 + $0x18] ss:$36 sps:$4 sm:$0xff]   ;;  %v2300_v39 = vld [vmem:[%s2926_s1 + $0x208] sm:$0xff]   ;;  %v2307_v40 = vld [vmem:[%s2926_s1 + $0x210] sm:$0xff]  }
  0x26   :  { %1183 = vmatprep.mubr.bf16.mxu1 %v2219_v41  ;;  %1985 = vmatprep.subr.bf16.mxu0 %v2223_v44  ;;  %v2294_v37 = vld [vmem:[%s2927_s0 + $0x5c] ss:$36 sps:$4 sm:$0xff]   ;;  %v2303_v44 = vld [vmem:[%s2927_s0 + $0xac] ss:$36 sps:$4 sm:$0xff]  }
  0x27   :  { %2049 = vmatprep.subr.bf16.mxu1 %v2224_v45  ;;  %v2298_v41 = vld [vmem:[%s2927_s0 + $0x58] ss:$36 sps:$4 sm:$0xff]  }
  0x28   :  { %1986 = vmatpush3.bf16.msra.mxu0 %v2225_v46  ;;  %v2314_v45 = vld [vmem:[%s2926_s1 + $0x218] sm:$0xff]   ;;  %v2321_v46 = vld [vmem:[%s2926_s1 + $0x220] sm:$0xff]  }
  0x29   :  { %2050 = vmatpush3.bf16.msra.mxu1 %v2226_v47  ;;  %1987 = vmatprep.subr.bf16.mxu0 %v2233_v52  ;;  %v2305_v47 = vld [vmem:[%s2927_s0 + $0xa0] ss:$36 sps:$4 sm:$0xff]   ;;  %v2312_v52 = vld [vmem:[%s2927_s0 + $0xe8] ss:$36 sps:$4 sm:$0xff]  }
  0x2a   :  { %2051 = vmatprep.subr.bf16.mxu1 %v2234_v53  ;;  %v2335_v53 = vld [vmem:[%s2926_s1 + $0x230] sm:$0xff]  }
  0x2b   :  { %1087 = vmatmul.mubr.bf16.gmra.mrb[4].mxu0 %v2221_v42  ;;  %v2299_v42 = vld [vmem:[%s2927_s0 + $0x60] ss:$36 sps:$4 sm:$0xff]  }
  0x2c   :  { %1184 = vmatmul.mubr.bf16.gmra.mrb[4].mxu1 %v2222_v43  ;;  %1094 = vmatprep.mubr.bf16.mxu0 %v2227_v48  ;;  %v2301_v43 = vld [vmem:[%s2927_s0 + $0xa4] ss:$36 sps:$4 sm:$0xff]  }
  0x2d   :  { %1191 = vmatprep.mubr.bf16.mxu1 %v2229_v49  ;;  %1988 = vmatpush3.bf16.msra.mxu0 %v2235_v54  ;;  %v2306_v48 = vld [vmem:[%s2927_s0 + $0xa8] ss:$36 sps:$4 sm:$0xff]   ;;  %v2313_v54 = vld [vmem:[%s2927_s0 + $0xf0] ss:$36 sps:$4 sm:$0xff]  }
  0x2e   :  { %2052 = vmatpush3.bf16.msra.mxu1 %v2236_v55  ;;  %1989 = vmatprep.subr.bf16.mxu0 %v2243_v60  ;;  %v2308_v49 = vld [vmem:[%s2927_s0 + $0xec] ss:$36 sps:$4 sm:$0xff]   ;;  %v2315_v55 = vld [vmem:[%s2927_s0 + $0x134] ss:$36 sps:$4 sm:$0xff]   ;;  %v2322_v60 = vld [vmem:[%s2927_s0 + $0x17c] ss:$36 sps:$4 sm:$0xff]  }
  0x2f   :  { %2053 = vmatprep.subr.bf16.mxu1 %v2244_v61  ;;  %v2324_v61 = vld [vmem:[%s2927_s0 + $0x184] ss:$36 sps:$4 sm:$0xff]  }
  0x31   :  { %1990 = vmatpush3.bf16.msra.mxu0 %v2245_v62  ;;  %v2326_v62 = vld [vmem:[%s2927_s0 + $0x178] ss:$36 sps:$4 sm:$0xff]  }
  0x32   :  { %2054 = vmatpush3.bf16.msra.mxu1 %v2246_v63  ;;  %1991 = vmatprep.subr.bf16.mxu0 %v2253_v3  ;;  %v2327_v63 = vld [vmem:[%s2927_s0 + $0x180] ss:$36 sps:$4 sm:$0xff]   ;;  %v2334_v3 = vld [vmem:[%s2927_s0 + $0x1c8] ss:$36 sps:$4 sm:$0xff]  }
  0x33   :  { %1095 = vmatmul.mubr.bf16.gmra.mrb[8].mxu0 %v2231_v50  ;;  %2055 = vmatprep.subr.bf16.mxu1 %v2254_v5  ;;  %v2310_v50 = vld [vmem:[%s2927_s0 + $0xf4] ss:$36 sps:$4 sm:$0xff]  }
  0x34   :  { %1192 = vmatmul.mubr.bf16.gmra.mrb[8].mxu1 %v2232_v51  ;;  %1102 = vmatprep.mubr.bf16.mxu0 %v2237_v56  ;;  %v2328_v51 = vld [vmem:[%s2926_s1 + $0x228] sm:$0xff]   ;;  %v2317_v56 = vld [vmem:[%s2927_s0 + $0x13c] ss:$36 sps:$4 sm:$0xff]   ;;  %v2338_v5 = vld [vmem:[%s2927_s0 + $0x214] ss:$36 sps:$4 sm:$0xff]  }
  0x35   :  { %1199 = vmatprep.mubr.bf16.mxu1 %v2239_v57  ;;  %1992 = vmatpush3.bf16.msra.mxu0 %v2255_v6  ;;  %v2342_v57 = vld [vmem:[%s2926_s1 + $0x238] sm:$0xff]   ;;  %v2340_v6 = vld [vmem:[%s2927_s0 + $0x208] ss:$36 sps:$4 sm:$0xff]  }
  0x36   :  { %2056 = vmatpush3.bf16.msra.mxu1 %v2256_v7  ;;  %1993 = vmatprep.subr.bf16.mxu0 %v2263_v10  ;;  %v2341_v7 = vld [vmem:[%s2927_s0 + $0x210] ss:$36 sps:$4 sm:$0xff]   ;;  %v2345_v10 = vld [vmem:[%s2927_s0 + $0x68] ss:$36 sps:$4 sm:$0xff]  }
  0x37   :  { %2057 = vmatprep.subr.bf16.mxu1 %v2264_v11  ;;  %v2346_v11 = vld [vmem:[%s2927_s0 + $0x188] ss:$36 sps:$4 sm:$0xff]  }
  0x39   :  { %1994 = vmatpush3.bf16.msra.mxu0 %v2265_v13  ;;  %v2348_v13 = vld [vmem:[%s2927_s0 + $0x1d0] ss:$36 sps:$4 sm:$0xff]  }
  0x3a   :  { %2058 = vmatpush3.bf16.msra.mxu1 %v2266_v14  ;;  %1995 = vmatprep.subr.bf16.mxu0 %v2273_v18  ;;  %v2349_v14 = vld [vmem:[%s2927_s0 + $0xf8] ss:$36 sps:$4 sm:$0xff]   ;;  %v2806_v18 = vld [vmem:[%s2928_s2] ss:$0 sm:$0xff] }
  0x3b   :  { %1103 = vmatmul.mubr.bf16.gmra.mrb[12].mxu0 %v2241_v58  ;;  %2059 = vmatprep.subr.bf16.mxu1 %v2274_v19  ;;  %v2319_v58 = vld [vmem:[%s2927_s0 + $0x130] ss:$36 sps:$4 sm:$0xff]  }
  0x3c   :  { %1200 = vmatmul.mubr.bf16.gmra.mrb[12].mxu1 %v2242_v59  ;;  %1110 = vmatprep.mubr.bf16.mxu0 %v2247_v0  ;;  %v2320_v59 = vld [vmem:[%s2927_s0 + $0x138] ss:$36 sps:$4 sm:$0xff]   ;;  %v2329_v0 = vld [vmem:[%s2927_s0 + $0x1c4] ss:$36 sps:$4 sm:$0xff]  }
  0x3d   :  { %1207 = vmatprep.mubr.bf16.mxu1 %v2249_v1  ;;  %1996 = vmatpush3.bf16.msra.mxu0 %v2275_v20  ;;  %v2331_v1 = vld [vmem:[%s2927_s0 + $0x1cc] ss:$36 sps:$4 sm:$0xff]  }
  0x3e   :  { %2060 = vmatpush3.bf16.msra.mxu1 %v2276_v21  ;;  %1997 = vmatprep.subr.bf16.mxu0 %v2283_v26 }
  0x3f   :  { %2061 = vmatprep.subr.bf16.mxu1 %v2284_v27 }
  0x41   :  { %1998 = vmatpush3.bf16.msra.mxu0 %v2285_v28 }
  0x42   :  { %2062 = vmatpush3.bf16.msra.mxu1 %v2286_v29  ;;  %2127 = vmatprep.subr.bf16.mxu0 %v2293_v32 }
  0x43   :  { %1111 = vmatmul.mubr.bf16.gmra.mrb[16].mxu0 %v2251_v2  ;;  %2159 = vmatprep.subr.bf16.mxu1 %v2293_v32  ;;  %v2333_v2 = vld [vmem:[%s2927_s0 + $0x1c0] ss:$36 sps:$4 sm:$0xff]  }
  0x44   :  { %1208 = vmatmul.mubr.bf16.gmra.mrb[16].mxu1 %v2252_v4  ;;  %1118 = vmatprep.mubr.bf16.mxu0 %v2257_v8  ;;  %v2336_v4 = vld [vmem:[%s2927_s0 + $0x20c] ss:$36 sps:$4 sm:$0xff]   ;;  %v2343_v8 = vld [vmem:[%s2927_s0 + $0x20] ss:$36 sps:$4 sm:$0xff]  }
  0x45   :  { %1215 = vmatprep.mubr.bf16.mxu1 %v2259_v9  ;;  %v2344_v9 = vld [vmem:[%s2927_s0 + $0x140] ss:$36 sps:$4 sm:$0xff]  }
  0x4b   :  { %1119 = vmatmul.mubr.bf16.gmra.mrb[20].mxu0 %v2261_v12  ;;  %v2347_v12 = vld [vmem:[%s2927_s0 + $0xb0] ss:$36 sps:$4 sm:$0xff]  }
  0x4c   :  { %1216 = vmatmul.mubr.bf16.gmra.mrb[20].mxu1 %v2262_v15  ;;  %1126 = vmatprep.mubr.bf16.mxu0 %v2267_v16  ;;  %v2350_v15 = vld [vmem:[%s2927_s0 + $0x218] ss:$36 sps:$4 sm:$0xff]  }
  0x4d   :  { %1223 = vmatprep.mubr.bf16.mxu1 %v2269_v17 }
  0x53   :  { %1127 = vmatmul.mubr.bf16.gmra.mrb[24].mxu0 %v2271_v22 }
  0x54   :  { %1224 = vmatmul.mubr.bf16.gmra.mrb[24].mxu1 %v2272_v23  ;;  %1134 = vmatprep.mubr.bf16.mxu0 %v2277_v24 }
  0x55   :  { %1231 = vmatprep.mubr.bf16.mxu1 %v2279_v25 }
  0x5b   :  { %1135 = vmatmul.mubr.bf16.gmra.mrb[28].mxu0 %v2281_v30 }
  0x5c   :  { %1232 = vmatmul.mubr.bf16.gmra.mrb[28].mxu1 %v2282_v31  ;;  %1272 = vmatprep.mubr.bf16.mxu0 %v2289_v33 }
  0x5d   :  { %1369 = vmatprep.mubr.bf16.mxu1 %v2292_v34 }
  0x63   :  { %1273 = vmatmul.mubr.bf16.vlgmr.msra.gmra.mrb[32].mxu0 %v2287_v35 }
  0x64   :  { %1370 = vmatmul.mubr.bf16.vlgmr.msra.gmra.mrb[32].mxu1 %v2290_v36  ;;  %2128 = vmatpush3.bf16.msra.mxu0 %v2293_v32 }
  0x65   :  { %2167 = vmatpush3.bf16.msra.mxu1 %v2293_v32  ;;  %1280 = vmatprep.mubr.bf16.mxu0 %v2294_v37 }
  0x66   :  { %1377 = vmatprep.mubr.bf16.mxu1 %v2296_v38  ;;  %2129 = vmatprep.subr.bf16.mxu0 %v2300_v39 }
  0x67   :  { %2160 = vmatprep.subr.bf16.mxu1 %v2300_v39 }
  0x68   :  { %2130 = vmatpush3.bf16.msra.mxu0 %v2300_v39 }
  0x69   :  { %2168 = vmatpush3.bf16.msra.mxu1 %v2300_v39  ;;  %2131 = vmatprep.subr.bf16.mxu0 %v2307_v40 }
  0x6a   :  { %2161 = vmatprep.subr.bf16.mxu1 %v2307_v40 }
  0x6b   :  { %1281 = vmatmul.mubr.bf16.gmra.mrb[36].mxu0 %v2298_v41 }
  0x6c   :  { %1378 = vmatmul.mubr.bf16.gmra.mrb[36].mxu1 %v2299_v42  ;;  %1288 = vmatprep.mubr.bf16.mxu0 %v2301_v43 }
  0x6d   :  { %1385 = vmatprep.mubr.bf16.mxu1 %v2303_v44  ;;  %2132 = vmatpush3.bf16.msra.mxu0 %v2307_v40 }
  0x6e   :  { %2169 = vmatpush3.bf16.msra.mxu1 %v2307_v40  ;;  %2133 = vmatprep.subr.bf16.mxu0 %v2314_v45 }
  0x6f   :  { %2162 = vmatprep.subr.bf16.mxu1 %v2314_v45 }
  0x71   :  { %2134 = vmatpush3.bf16.msra.mxu0 %v2314_v45 }
  0x72   :  { %2170 = vmatpush3.bf16.msra.mxu1 %v2314_v45  ;;  %2135 = vmatprep.subr.bf16.mxu0 %v2321_v46 }
  0x73   :  { %1289 = vmatmul.mubr.bf16.gmra.mrb[40].mxu0 %v2305_v47  ;;  %2163 = vmatprep.subr.bf16.mxu1 %v2321_v46 }
  0x74   :  { %1386 = vmatmul.mubr.bf16.gmra.mrb[40].mxu1 %v2306_v48  ;;  %1296 = vmatprep.mubr.bf16.mxu0 %v2308_v49 }
  0x75   :  { %1393 = vmatprep.mubr.bf16.mxu1 %v2310_v50  ;;  %2136 = vmatpush3.bf16.msra.mxu0 %v2321_v46 }
  0x76   :  { %2171 = vmatpush3.bf16.msra.mxu1 %v2321_v46  ;;  %2137 = vmatprep.subr.bf16.mxu0 %v2328_v51 }
  0x77   :  { %2164 = vmatprep.subr.bf16.mxu1 %v2328_v51 }
  0x79   :  { %2138 = vmatpush3.bf16.msra.mxu0 %v2328_v51 }
  0x7a   :  { %2172 = vmatpush3.bf16.msra.mxu1 %v2328_v51  ;;  %2139 = vmatprep.subr.bf16.mxu0 %v2335_v53 }
  0x7b   :  { %1297 = vmatmul.mubr.bf16.gmra.mrb[44].mxu0 %v2312_v52  ;;  %2165 = vmatprep.subr.bf16.mxu1 %v2335_v53 }
  0x7c   :  { %1394 = vmatmul.mubr.bf16.gmra.mrb[44].mxu1 %v2313_v54  ;;  %1304 = vmatprep.mubr.bf16.mxu0 %v2315_v55 }
  0x7d   :  { %1401 = vmatprep.mubr.bf16.mxu1 %v2317_v56  ;;  %2140 = vmatpush3.bf16.msra.mxu0 %v2335_v53 }
  0x7e   :  { %2173 = vmatpush3.bf16.msra.mxu1 %v2335_v53  ;;  %2141 = vmatprep.subr.bf16.mxu0 %v2342_v57 }
  0x7f   :  { %2166 = vmatprep.subr.bf16.mxu1 %v2342_v57 }
  0x81   :  { %2142 = vmatpush3.bf16.msra.mxu0 %v2342_v57 }
  0x82   :  { %2174 = vmatpush3.bf16.msra.mxu1 %v2342_v57 }
  0x83   :  { %1305 = vmatmul.mubr.bf16.gmra.mrb[48].mxu0 %v2319_v58 }
  0x84   :  { %1402 = vmatmul.mubr.bf16.gmra.mrb[48].mxu1 %v2320_v59  ;;  %1312 = vmatprep.mubr.bf16.mxu0 %v2322_v60 }
  0x85   :  { %1409 = vmatprep.mubr.bf16.mxu1 %v2324_v61 }
  0x8b   :  { %1313 = vmatmul.mubr.bf16.gmra.mrb[52].mxu0 %v2326_v62 }
  0x8c   :  { %1410 = vmatmul.mubr.bf16.gmra.mrb[52].mxu1 %v2327_v63  ;;  %1320 = vmatprep.mubr.bf16.mxu0 %v2329_v0 }
  0x8d   :  { %1417 = vmatprep.mubr.bf16.mxu1 %v2331_v1 }
  0x93   :  { %1321 = vmatmul.mubr.bf16.gmra.mrb[56].mxu0 %v2333_v2 }
  0x94   :  { %1418 = vmatmul.mubr.bf16.gmra.mrb[56].mxu1 %v2334_v3  ;;  %1328 = vmatprep.mubr.bf16.mxu0 %v2336_v4 }
  0x95   :  { %1425 = vmatprep.mubr.bf16.mxu1 %v2338_v5 }
  0x9b   :  { %1329 = vmatmul.mubr.bf16.gmra.mrb[60].mxu0 %v2340_v6 }
  0x9c   :  { %1426 = vmatmul.mubr.bf16.gmra.mrb[60].mxu1 %v2341_v7  ;;  %2143 = vmatprep.mubr.bf16.mxu0 %v2343_v8 }
  0x9d   :  { %2151 = vmatprep.mubr.bf16.mxu1 %v2344_v9 }
  0xa3   :  { %2144 = vmatmul.mubr.bf16.vlgmr.msra.gmra.mrb[64].mxu0 %v2345_v10 }
  0xa4   :  { %2152 = vmatmul.mubr.bf16.vlgmr.msra.gmra.mrb[64].mxu1 %v2346_v11  ;;  %2147 = vmatprep.mubr.bf16.mxu0 %v2347_v12 }
  0xa5   :  { %2155 = vmatprep.mubr.bf16.mxu1 %v2348_v13 }
  0xab   :  { %2148 = vmatmul.mubr.bf16.gmra.mrb[68].mxu0 %v2349_v14 }
  0xac   :  { %2156 = vmatmul.mubr.bf16.gmra.mrb[68].mxu1 %v2350_v15 }
  0xf6   :  { %v1871_v16 = vpop.f32.mrb[0].mxu0 }
  0xf7   :  { %v1935_v17 = vpop.f32.mrb[0].mxu1  ;;  %v1872_v19 = vpop.f32.mrb[1].mxu0 }
  0xf8   :  { %v1873_v20 = vadd.f32 %v1872_v19, %v1871_v16  ;;  %v1936_v21 = vpop.f32.mrb[1].mxu1  ;;  %v1874_v22 = vpop.f32.mrb[2].mxu0 }
  0xf9   :  { %v1937_v23 = vadd.f32 %v1936_v21, %v1935_v17  ;;  %v1938_v24 = vpop.f32.mrb[2].mxu1  ;;  %v1875_v25 = vpop.f32.mrb[3].mxu0 }
  0xfa   :  { %v1081_v26 = vadd.f32 %v1873_v20, %v2806_v18  ;;  %v1876_v27 = vadd.f32 %v1875_v25, %v1874_v22  ;;  %v1939_v28 = vpop.f32.mrb[3].mxu1 }
  0xfb   :  { %v1940_v29 = vadd.f32 %v1939_v28, %v1938_v24 }
  0xfc   :  { %v2809_v30 = vadd.f32 %v1937_v23, %v1081_v26  ;;  %v1084_v31 = vadd.f32 %v1876_v27, %v2806_v18 }
  0xfe   :  { %v2812_v32 = vadd.f32 %v1940_v29, %v1084_v31  ;;  %v1877_v33 = vpop.f32.mrb[4].mxu0 }
  0xff   :  { %v1941_v34 = vpop.f32.mrb[4].mxu1  ;;  %v1878_v35 = vpop.f32.mrb[5].mxu0 }
 0x100   :  { %v1879_v36 = vadd.f32 %v1878_v35, %v1877_v33  ;;  %v1942_v37 = vpop.f32.mrb[5].mxu1  ;;  %v1880_v38 = vpop.f32.mrb[6].mxu0 }
 0x101   :  { %v1943_v39 = vadd.f32 %v1942_v37, %v1941_v34  ;;  %v1944_v40 = vpop.f32.mrb[6].mxu1  ;;  %v1881_v41 = vpop.f32.mrb[7].mxu0 }
 0x102   :  { %v1089_v42 = vadd.f32 %v1879_v36, %v2806_v18  ;;  %v1882_v43 = vadd.f32 %v1881_v41, %v1880_v38  ;;  %v1945_v44 = vpop.f32.mrb[7].mxu1 }
 0x103   :  { %v1946_v45 = vadd.f32 %v1945_v44, %v1944_v40 }
 0x104   :  { %v2815_v46 = vadd.f32 %v1943_v39, %v1089_v42  ;;  %v1092_v47 = vadd.f32 %v1882_v43, %v2806_v18 }
 0x106   :  { %v2818_v48 = vadd.f32 %v1946_v45, %v1092_v47  ;;  %v1883_v49 = vpop.f32.mrb[8].mxu0 }
 0x107   :  { %v1947_v50 = vpop.f32.mrb[8].mxu1  ;;  %v1884_v51 = vpop.f32.mrb[9].mxu0 }
 0x108   :  { %v1885_v52 = vadd.f32 %v1884_v51, %v1883_v49  ;;  %v1948_v53 = vpop.f32.mrb[9].mxu1  ;;  %v1886_v54 = vpop.f32.mrb[10].mxu0 }
 0x109   :  { %v1949_v55 = vadd.f32 %v1948_v53, %v1947_v50  ;;  %v1950_v56 = vpop.f32.mrb[10].mxu1  ;;  %v1887_v57 = vpop.f32.mrb[11].mxu0 }
 0x10a   :  { %v1097_v58 = vadd.f32 %v1885_v52, %v2806_v18  ;;  %v1888_v59 = vadd.f32 %v1887_v57, %v1886_v54  ;;  %v1951_v60 = vpop.f32.mrb[11].mxu1 }
 0x10b   :  { %v1952_v61 = vadd.f32 %v1951_v60, %v1950_v56 }
 0x10c   :  { %v2821_v62 = vadd.f32 %v1949_v55, %v1097_v58  ;;  %v1100_v63 = vadd.f32 %v1888_v59, %v2806_v18 }
 0x10e   :  { %v2824_v0 = vadd.f32 %v1952_v61, %v1100_v63  ;;  %v1889_v1 = vpop.f32.mrb[12].mxu0 }
 0x10f   :  { %v1953_v2 = vpop.f32.mrb[12].mxu1  ;;  %v1890_v3 = vpop.f32.mrb[13].mxu0 }
 0x110   :  { %v1891_v4 = vadd.f32 %v1890_v3, %v1889_v1  ;;  %v1954_v5 = vpop.f32.mrb[13].mxu1  ;;  %v1892_v6 = vpop.f32.mrb[14].mxu0 }
 0x111   :  { %v1955_v7 = vadd.f32 %v1954_v5, %v1953_v2  ;;  %v1956_v8 = vpop.f32.mrb[14].mxu1  ;;  %v1893_v9 = vpop.f32.mrb[15].mxu0 }
 0x112   :  { %v1105_v10 = vadd.f32 %v1891_v4, %v2806_v18  ;;  %v1894_v11 = vadd.f32 %v1893_v9, %v1892_v6  ;;  %v1957_v12 = vpop.f32.mrb[15].mxu1 }
 0x113   :  { %v1958_v13 = vadd.f32 %v1957_v12, %v1956_v8 }
 0x114   :  { %v2827_v14 = vadd.f32 %v1955_v7, %v1105_v10  ;;  %v1108_v15 = vadd.f32 %v1894_v11, %v2806_v18 }
 0x116   :  { %v2830_v16 = vadd.f32 %v1958_v13, %v1108_v15  ;;  %v1895_v17 = vpop.f32.mrb[16].mxu0 }
 0x117   :  { %v1959_v19 = vpop.f32.mrb[16].mxu1  ;;  %v1896_v20 = vpop.f32.mrb[17].mxu0 }
 0x118   :  { %v1897_v21 = vadd.f32 %v1896_v20, %v1895_v17  ;;  %v1960_v22 = vpop.f32.mrb[17].mxu1  ;;  %v1898_v23 = vpop.f32.mrb[18].mxu0 }
 0x119   :  { %v1961_v24 = vadd.f32 %v1960_v22, %v1959_v19  ;;  %v1962_v25 = vpop.f32.mrb[18].mxu1  ;;  %v1899_v26 = vpop.f32.mrb[19].mxu0 }
 0x11a   :  { %v1113_v27 = vadd.f32 %v1897_v21, %v2806_v18  ;;  %v1900_v28 = vadd.f32 %v1899_v26, %v1898_v23  ;;  %v1963_v29 = vpop.f32.mrb[19].mxu1 }
 0x11b   :  { %v1964_v31 = vadd.f32 %v1963_v29, %v1962_v25 }
 0x11c   :  { %v2833_v33 = vadd.f32 %v1961_v24, %v1113_v27  ;;  %v1116_v34 = vadd.f32 %v1900_v28, %v2806_v18 }
 0x11e   :  { %v2836_v35 = vadd.f32 %v1964_v31, %v1116_v34  ;;  %v1901_v36 = vpop.f32.mrb[20].mxu0 }
 0x11f   :  { %v1965_v37 = vpop.f32.mrb[20].mxu1  ;;  %v1902_v38 = vpop.f32.mrb[21].mxu0 }
 0x120   :  { %v1903_v39 = vadd.f32 %v1902_v38, %v1901_v36  ;;  %v1966_v40 = vpop.f32.mrb[21].mxu1  ;;  %v1904_v41 = vpop.f32.mrb[22].mxu0 }
 0x121   :  { %v1967_v42 = vadd.f32 %v1966_v40, %v1965_v37  ;;  %v1968_v43 = vpop.f32.mrb[22].mxu1  ;;  %v1905_v44 = vpop.f32.mrb[23].mxu0 }
 0x122   :  { %v1121_v45 = vadd.f32 %v1903_v39, %v2806_v18  ;;  %v1906_v47 = vadd.f32 %v1905_v44, %v1904_v41  ;;  %v1969_v49 = vpop.f32.mrb[23].mxu1 }
 0x123   :  { %v1970_v50 = vadd.f32 %v1969_v49, %v1968_v43 }
 0x124   :  { %v2839_v51 = vadd.f32 %v1967_v42, %v1121_v45  ;;  %v1124_v52 = vadd.f32 %v1906_v47, %v2806_v18 }
 0x126   :  { %v2842_v53 = vadd.f32 %v1970_v50, %v1124_v52  ;;  %v1907_v54 = vpop.f32.mrb[24].mxu0 }
 0x127   :  { %v1971_v55 = vpop.f32.mrb[24].mxu1  ;;  %v1908_v56 = vpop.f32.mrb[25].mxu0 }
 0x128   :  { %v1909_v57 = vadd.f32 %v1908_v56, %v1907_v54  ;;  %v1972_v58 = vpop.f32.mrb[25].mxu1  ;;  %v1910_v59 = vpop.f32.mrb[26].mxu0 }
 0x129   :  { %v1973_v60 = vadd.f32 %v1972_v58, %v1971_v55  ;;  %v1974_v61 = vpop.f32.mrb[26].mxu1  ;;  %v1911_v63 = vpop.f32.mrb[27].mxu0 }
 0x12a   :  { %v1129_v1 = vadd.f32 %v1909_v57, %v2806_v18  ;;  %v1912_v2 = vadd.f32 %v1911_v63, %v1910_v59  ;;  %v1975_v3 = vpop.f32.mrb[27].mxu1 }
 0x12b   :  { %v1976_v4 = vadd.f32 %v1975_v3, %v1974_v61 }
 0x12c   :  { %v2845_v5 = vadd.f32 %v1973_v60, %v1129_v1  ;;  %v1132_v6 = vadd.f32 %v1912_v2, %v2806_v18 }
 0x12e   :  { %v2848_v7 = vadd.f32 %v1976_v4, %v1132_v6  ;;  %v1913_v8 = vpop.f32.mrb[28].mxu0 }
 0x12f   :  { %v1977_v9 = vpop.f32.mrb[28].mxu1  ;;  %v1914_v10 = vpop.f32.mrb[29].mxu0 }
 0x130   :  { %v1915_v11 = vadd.f32 %v1914_v10, %v1913_v8  ;;  %v1978_v12 = vpop.f32.mrb[29].mxu1  ;;  %v1916_v13 = vpop.f32.mrb[30].mxu0 }
 0x131   :  { %v1979_v15 = vadd.f32 %v1978_v12, %v1977_v9  ;;  %v1980_v17 = vpop.f32.mrb[30].mxu1  ;;  %v1917_v19 = vpop.f32.mrb[31].mxu0 }
 0x132   :  { %v1137_v20 = vadd.f32 %v1915_v11, %v2806_v18  ;;  %v1918_v21 = vadd.f32 %v1917_v19, %v1916_v13  ;;  %v1981_v22 = vpop.f32.mrb[31].mxu1 }
 0x133   :  { %v1982_v23 = vadd.f32 %v1981_v22, %v1980_v17 }
 0x134   :  { %v2851_v24 = vadd.f32 %v1979_v15, %v1137_v20  ;;  %v1140_v25 = vadd.f32 %v1918_v21, %v2806_v18 }
 0x136   :  { %v2854_v26 = vadd.f32 %v1982_v23, %v1140_v25  ;;  %v1999_v27 = vpop.f32.mrb[32].mxu0 }
 0x137   :  { %v2063_v28 = vpop.f32.mrb[32].mxu1  ;;  %v2000_v29 = vpop.f32.mrb[33].mxu0 }
 0x138   :  { %v2001_v31 = vadd.f32 %v2000_v29, %v1999_v27  ;;  %v2064_v34 = vpop.f32.mrb[33].mxu1  ;;  %v2002_v36 = vpop.f32.mrb[34].mxu0 }
 0x139   :  { %v2065_v37 = vadd.f32 %v2064_v34, %v2063_v28  ;;  %v2066_v38 = vpop.f32.mrb[34].mxu1  ;;  %v2003_v39 = vpop.f32.mrb[35].mxu0 }
 0x13a   :  { %v1275_v40 = vadd.f32 %v2001_v31, %v2809_v30  ;;  %v2004_v41 = vadd.f32 %v2003_v39, %v2002_v36  ;;  %v2067_v42 = vpop.f32.mrb[35].mxu1 }
 0x13b   :  { %v2068_v43 = vadd.f32 %v2067_v42, %v2066_v38 }
 0x13c   :  { %v1278_v44 = vadd.f32 %v2004_v41, %v2812_v32  ;;  %v2858_v45 = vadd.f32 %v2065_v37, %v1275_v40 }
 0x13e   :  { %v2005_v18 = vpop.f32.mrb[36].mxu0  ;;  %v2860_v47 = vadd.f32 %v2068_v43, %v1278_v44 }
 0x13f   :  { %v2069_v49 = vpop.f32.mrb[36].mxu1  ;;  %v2006_v50 = vpop.f32.mrb[37].mxu0 }
 0x140   :  { %v2007_v52 = vadd.f32 %v2006_v50, %v2005_v18  ;;  %v2070_v54 = vpop.f32.mrb[37].mxu1  ;;  %v2008_v55 = vpop.f32.mrb[38].mxu0 }
 0x141   :  { %v2071_v56 = vadd.f32 %v2070_v54, %v2069_v49  ;;  %v2072_v57 = vpop.f32.mrb[38].mxu1  ;;  %v2009_v58 = vpop.f32.mrb[39].mxu0 }
 0x142   :  { %v1283_v30 = vadd.f32 %v2007_v52, %v2815_v46  ;;  %v2010_v59 = vadd.f32 %v2009_v58, %v2008_v55  ;;  %v2073_v60 = vpop.f32.mrb[39].mxu1 }
 0x143   :  { %v2074_v61 = vadd.f32 %v2073_v60, %v2072_v57 }
 0x144   :  { %v1286_v32 = vadd.f32 %v2010_v59, %v2818_v48  ;;  %v2864_v63 = vadd.f32 %v2071_v56, %v1283_v30 }
 0x146   :  { %v2011_v1 = vpop.f32.mrb[40].mxu0  ;;  %v2866_v2 = vadd.f32 %v2074_v61, %v1286_v32 }
 0x147   :  { %v2075_v3 = vpop.f32.mrb[40].mxu1  ;;  %v2012_v4 = vpop.f32.mrb[41].mxu0 }
 0x148   :  { %v2013_v6 = vadd.f32 %v2012_v4, %v2011_v1  ;;  %v2076_v8 = vpop.f32.mrb[41].mxu1  ;;  %v2014_v9 = vpop.f32.mrb[42].mxu0 }
 0x149   :  { %v2077_v10 = vadd.f32 %v2076_v8, %v2075_v3  ;;  %v2078_v11 = vpop.f32.mrb[42].mxu1  ;;  %v2015_v12 = vpop.f32.mrb[43].mxu0 }
 0x14a   :  { %v1291_v46 = vadd.f32 %v2013_v6, %v2821_v62  ;;  %v2016_v13 = vadd.f32 %v2015_v12, %v2014_v9  ;;  %v2079_v15 = vpop.f32.mrb[43].mxu1 }
 0x14b   :  { %v2080_v17 = vadd.f32 %v2079_v15, %v2078_v11 }
 0x14c   :  { %v1294_v48 = vadd.f32 %v2016_v13, %v2824_v0  ;;  %v2870_v19 = vadd.f32 %v2077_v10, %v1291_v46 }
 0x14e   :  { %v2017_v20 = vpop.f32.mrb[44].mxu0  ;;  %v2872_v21 = vadd.f32 %v2080_v17, %v1294_v48 }
 0x14f   :  { %v2081_v22 = vpop.f32.mrb[44].mxu1  ;;  %v2018_v23 = vpop.f32.mrb[45].mxu0 }
 0x150   :  { %v2019_v25 = vadd.f32 %v2018_v23, %v2017_v20  ;;  %v2082_v27 = vpop.f32.mrb[45].mxu1  ;;  %v2020_v28 = vpop.f32.mrb[46].mxu0 }
 0x151   :  { %v2083_v29 = vadd.f32 %v2082_v27, %v2081_v22  ;;  %v2084_v31 = vpop.f32.mrb[46].mxu1  ;;  %v2021_v34 = vpop.f32.mrb[47].mxu0 }
 0x152   :  { %v1299_v62 = vadd.f32 %v2019_v25, %v2827_v14  ;;  %v2022_v36 = vadd.f32 %v2021_v34, %v2020_v28  ;;  %v2085_v37 = vpop.f32.mrb[47].mxu1 }
 0x153   :  { %v2086_v38 = vadd.f32 %v2085_v37, %v2084_v31 }
 0x154   :  { %v1302_v0 = vadd.f32 %v2022_v36, %v2830_v16  ;;  %v2876_v39 = vadd.f32 %v2083_v29, %v1299_v62 }
 0x156   :  { %v2023_v40 = vpop.f32.mrb[48].mxu0  ;;  %v2878_v41 = vadd.f32 %v2086_v38, %v1302_v0 }
 0x157   :  { %v2087_v42 = vpop.f32.mrb[48].mxu1  ;;  %v2024_v43 = vpop.f32.mrb[49].mxu0 }
 0x158   :  { %v2025_v44 = vadd.f32 %v2024_v43, %v2023_v40  ;;  %v2088_v18 = vpop.f32.mrb[49].mxu1  ;;  %v2026_v49 = vpop.f32.mrb[50].mxu0 }
 0x159   :  { %v2089_v50 = vadd.f32 %v2088_v18, %v2087_v42  ;;  %v2090_v52 = vpop.f32.mrb[50].mxu1  ;;  %v2027_v54 = vpop.f32.mrb[51].mxu0 }
 0x15a   :  { %v1307_v14 = vadd.f32 %v2025_v44, %v2833_v33  ;;  %v2028_v55 = vadd.f32 %v2027_v54, %v2026_v49  ;;  %v2091_v56 = vpop.f32.mrb[51].mxu1 }
 0x15b   :  { %v2092_v57 = vadd.f32 %v2091_v56, %v2090_v52 }
 0x15c   :  { %v1310_v16 = vadd.f32 %v2028_v55, %v2836_v35  ;;  %v1404_v58 = vadd.f32 %v2089_v50, %v1307_v14 }
 0x15e   :  { %v2029_v30 = vpop.f32.mrb[52].mxu0  ;;  %v2882_v59 = vadd.f32 %v2092_v57, %v1310_v16 }
 0x15f   :  { %v2093_v60 = vpop.f32.mrb[52].mxu1  ;;  %v2030_v61 = vpop.f32.mrb[53].mxu0 }
 0x160   :  { %v2031_v32 = vadd.f32 %v2030_v61, %v2029_v30  ;;  %v2094_v1 = vpop.f32.mrb[53].mxu1  ;;  %v2032_v3 = vpop.f32.mrb[54].mxu0 }
 0x161   :  { %v2095_v4 = vadd.f32 %v2094_v1, %v2093_v60  ;;  %v2096_v6 = vpop.f32.mrb[54].mxu1  ;;  %v2033_v8 = vpop.f32.mrb[55].mxu0 }
 0x162   :  { %v1315_v9 = vadd.f32 %v2031_v32, %v2839_v51  ;;  %v2034_v33 = vadd.f32 %v2033_v8, %v2032_v3  ;;  %v2097_v10 = vpop.f32.mrb[55].mxu1 }
 0x163   :  { %v2098_v11 = vadd.f32 %v2097_v10, %v2096_v6 }
 0x164   :  { %v1318_v12 = vadd.f32 %v2034_v33, %v2842_v53  ;;  %v1412_v35 = vadd.f32 %v2095_v4, %v1315_v9 }
 0x166   :  { %v2035_v46 = vpop.f32.mrb[56].mxu0  ;;  %v1415_v13 = vadd.f32 %v2098_v11, %v1318_v12 }
 0x167   :  { %v2099_v15 = vpop.f32.mrb[56].mxu1  ;;  %v2036_v17 = vpop.f32.mrb[57].mxu0 }
 0x168   :  { %v2037_v48 = vadd.f32 %v2036_v17, %v2035_v46  ;;  %v2100_v20 = vpop.f32.mrb[57].mxu1  ;;  %v2038_v22 = vpop.f32.mrb[58].mxu0 }
 0x169   :  { %v2101_v23 = vadd.f32 %v2100_v20, %v2099_v15  ;;  %v2102_v25 = vpop.f32.mrb[58].mxu1  ;;  %v2039_v27 = vpop.f32.mrb[59].mxu0 }
 0x16a   :  { %v1323_v28 = vadd.f32 %v2037_v48, %v2845_v5  ;;  %v2040_v29 = vadd.f32 %v2039_v27, %v2038_v22  ;;  %v2103_v51 = vpop.f32.mrb[59].mxu1 }
 0x16b   :  { %v2104_v31 = vadd.f32 %v2103_v51, %v2102_v25 }
 0x16c   :  { %v1326_v34 = vadd.f32 %v2040_v29, %v2848_v7  ;;  %v1420_v62 = vadd.f32 %v2101_v23, %v1323_v28 }
 0x16e   :  { %v2041_v53 = vpop.f32.mrb[60].mxu0  ;;  %v2888_v36 = vadd.f32 %v2104_v31, %v1326_v34 }
 0x16f   :  { %v2105_v37 = vpop.f32.mrb[60].mxu1  ;;  %v2042_v38 = vpop.f32.mrb[61].mxu0 }
 0x170   :  { %v2043_v0 = vadd.f32 %v2042_v38, %v2041_v53  ;;  %v2106_v40 = vpop.f32.mrb[61].mxu1  ;;  %v2044_v42 = vpop.f32.mrb[62].mxu0 }
 0x171   :  { %v2107_v43 = vadd.f32 %v2106_v40, %v2105_v37  ;;  %v2108_v44 = vpop.f32.mrb[62].mxu1  ;;  %v2045_v18 = vpop.f32.mrb[63].mxu0 }
 0x172   :  { %v1331_v49 = vadd.f32 %v2043_v0, %v2851_v24  ;;  %v2046_v5 = vadd.f32 %v2045_v18, %v2044_v42  ;;  %v2109_v50 = vpop.f32.mrb[63].mxu1 }
 0x173   :  { %v2110_v52 = vadd.f32 %v2109_v50, %v2108_v44 }
 0x174   :  { %v1334_v54 = vadd.f32 %v2046_v5, %v2854_v26  ;;  %v1428_v7 = vadd.f32 %v2107_v43, %v1331_v49 }
 0x176   :  { %v2145_v14 = vpop.f32.mrb[64].mxu0  ;;  %v1431_v55 = vadd.f32 %v2110_v52, %v1334_v54 }
 0x177   :  { %v1477_v56 = vadd.f32 %v2145_v14, %v2864_v63  ;;  %v2153_v57 = vpop.f32.mrb[64].mxu1  ;;  %v1468_v16 = vpop.f32.mrb[65].mxu0 }
 0x178   :  { %v1509_v30 = vadd.f32 %v2153_v57, %v1412_v35  ;;  %v1469_v60 = vadd.f32 %v1468_v16, %v2858_v45  ;;  %v1500_v61 = vpop.f32.mrb[65].mxu1  ;;  %v2146_v32 = vpop.f32.mrb[66].mxu0 }
 0x179   :  { %v1501_v1 = vadd.f32 %v1500_v61, %v1404_v58  ;;  %v1480_v24 = vadd.f32 %v2146_v32, %v2866_v2  ;;  %v2154_v3 = vpop.f32.mrb[66].mxu1  ;;  %v1471_v4 = vpop.f32.mrb[67].mxu0  ;;  %v1533_v9 = vmax.f32 %v1477_v56, 0.0 }
 0x17a   :  { %v1512_v6 = vadd.f32 %v2154_v3, %v1415_v13  ;;  %v1472_v26 = vadd.f32 %v1471_v4, %v2860_v47  ;;  %v1503_v8 = vpop.f32.mrb[67].mxu1  ;;  %v1541_v10 = vmax.f32 %v1509_v30, 0.0  ;;  %v1531_v11 = vmax.f32 %v1469_v60, 0.0 }
 0x17b   :  { %v1534_v33 = vmax.f32 %v1480_v24, 0.0  ;;  %v1504_v63 = vadd.f32 %v1503_v8, %v2882_v59  ;;  %v1539_v45 = vmax.f32 %v1501_v1, 0.0 }
 0x17c   :  { %v1542_v12 = vmax.f32 %v1512_v6, 0.0  ;;  %v1532_v35 = vmax.f32 %v1472_v26, 0.0 }
 0x17d   :  { %v1816_v46 = vpack.c.bf16 %v1534_v33, %v1533_v9  ;;  %v1540_v15 = vmax.f32 %v1504_v63, 0.0 }
 0x17e   :  { %v1836_v58 = vpack.c.bf16 %v1542_v12, %v1541_v10  ;;  %v1811_v17 = vpack.c.bf16 %v1532_v35, %v1531_v11  ;;  %v2149_v2 = vpop.f32.mrb[68].mxu0 }
 0x17f   :  { %1848 = vst [vmem:[%s2929_s3 + $0x8] sm:$0xff] %v1816_v46   ;;  %v1831_v47 = vpack.c.bf16 %v1540_v15, %v1539_v45  ;;  %v1493_v13 = vadd.f32 %v2149_v2, %v2876_v39  ;;  %v2157_v48 = vpop.f32.mrb[68].mxu1  ;;  %v1484_v20 = vpop.f32.mrb[69].mxu0 }
 0x180   :  { %1852 = vst [vmem:[%s2929_s3 + $0x28] sm:$0xff] %v1836_v58   ;;  %1812 = vst [vmem:[%s2929_s3] sm:$0xff] %v1811_v17   ;;  %v1525_v59 = vadd.f32 %v2157_v48, %v1428_v7  ;;  %v1485_v22 = vadd.f32 %v1484_v20, %v2870_v19  ;;  %v1516_v23 = vpop.f32.mrb[69].mxu1  ;;  %v2150_v25 = vpop.f32.mrb[70].mxu0 }
 0x181   :  { %1851 = vst [vmem:[%s2929_s3 + $0x20] sm:$0xff] %v1831_v47   ;;  %v1517_v39 = vadd.f32 %v1516_v23, %v1420_v62  ;;  %v1496_v27 = vadd.f32 %v2150_v25, %v2878_v41  ;;  %v2158_v28 = vpop.f32.mrb[70].mxu1  ;;  %v1487_v29 = vpop.f32.mrb[71].mxu0  ;;  %v1537_v53 = vmax.f32 %v1493_v13, 0.0 }
 0x182   :  { %v1528_v51 = vadd.f32 %v2158_v28, %v1431_v55  ;;  %v1488_v31 = vadd.f32 %v1487_v29, %v2872_v21  ;;  %v1519_v34 = vpop.f32.mrb[71].mxu1  ;;  %v1545_v19 = vmax.f32 %v1525_v59, 0.0  ;;  %v1535_v0 = vmax.f32 %v1485_v22, 0.0 }
 0x183   :  { %v1538_v37 = vmax.f32 %v1496_v27, 0.0  ;;  %v1520_v38 = vadd.f32 %v1519_v34, %v2888_v36  ;;  %v1543_v43 = vmax.f32 %v1517_v39, 0.0 }
 0x184   :  { %v1546_v40 = vmax.f32 %v1528_v51, 0.0  ;;  %v1536_v42 = vmax.f32 %v1488_v31, 0.0 }
 0x185   :  { %v1826_v44 = vpack.c.bf16 %v1538_v37, %v1537_v53  ;;  %v1544_v18 = vmax.f32 %v1520_v38, 0.0 }
 0x186   :  { %v1846_v62 = vpack.c.bf16 %v1546_v40, %v1545_v19  ;;  %v1821_v49 = vpack.c.bf16 %v1536_v42, %v1535_v0 }
 0x187   :  { %1850 = vst [vmem:[%s2929_s3 + $0x18] sm:$0xff] %v1826_v44   ;;  %v1841_v41 = vpack.c.bf16 %v1544_v18, %v1543_v43 }
 0x188   :  { %1854 = vst [vmem:[%s2929_s3 + $0x38] sm:$0xff] %v1846_v62   ;;  %1849 = vst [vmem:[%s2929_s3 + $0x10] sm:$0xff] %v1821_v49  }
 0x189   :  { %1853 = vst [vmem:[%s2929_s3 + $0x30] sm:$0xff] %v1841_v41  }

// kernel: model_c_forward.13
= control target key start
LH: loop header
LB: loop body
LE: loop exit
PB: predicated region body
PF: predicated region fallthrough
CT: control target
= control target key end

     0   :  { %vm2032_vm0 = vcmask 1043456   ;;  %vm2033_vm1 = vcmask 523268   ;;  %s3862_s1 = inlined_call_operand.vmem [shape: bf16[1152,192], index: 1, kind: input, shape index: {}]   ;;  %s3863_s0 = inlined_call_operand.vmem [shape: bf16[128,1152], index: 0, kind: input, shape index: {}]   ;;  %s3864_s2 = inlined_call_operand.vmem [shape: f32[1,192], index: 2, kind: input, shape index: {}]   ;;  %s3865_s3 = inlined_call_operand.vmem [shape: bf16[128,192], index: 3, kind: output, shape index: {}]  }
   0x1   :  { %v2496_v0 = vld [vmem:[%s3862_s1 + $0x4] ss:$8 sps:$4 sm:$0xff]   ;;  %v2500_v2 = vld [vmem:[%s3862_s1] ss:$8 sps:$4 sm:$0xff]   ;;  %v2502_v4 = vld [vmem:[%s3862_s1 + $0x14] ss:$8 sps:$4 sm:$0xff]  }
   0x2   :  { %v2498_v1 = vld [vmem:[%s3862_s1 + $0x204] ss:$8 sps:$4 sm:$0xff]   ;;  %1339 = vmatprep.subr.bf16.mxu1 %v2496_v0  ;;  %v2501_v3 = vld [vmem:[%s3862_s1 + $0x200] ss:$8 sps:$4 sm:$0xff]   ;;  %v2504_v5 = vld [vmem:[%s3862_s1 + $0x214] ss:$8 sps:$4 sm:$0xff]  }
   0x3   :  { %1565 = vmatprep.subr.bf16.mxu0 %v2498_v1  ;;  %1340 = vmatpush1.bf16.msra.mxu1 %v2500_v2  ;;  %v2506_v6 = vld [vmem:[%s3862_s1 + $0x10] ss:$8 sps:$4 sm:$0xff]   ;;  %v2508_v8 = vld [vmem:[%s3862_s1 + $0x24] ss:$8 sps:$4 sm:$0xff]   ;;  %v2512_v10 = vld [vmem:[%s3862_s1 + $0x20] ss:$8 sps:$4 sm:$0xff]  }
   0x4   :  { %1566 = vmatpush1.bf16.msra.mxu0 %v2501_v3  ;;  %1341 = vmatprep.subr.bf16.mxu1 %v2502_v4  ;;  %v2507_v7 = vld [vmem:[%s3862_s1 + $0x210] ss:$8 sps:$4 sm:$0xff]   ;;  %v2510_v9 = vld [vmem:[%s3862_s1 + $0x224] ss:$8 sps:$4 sm:$0xff]   ;;  %v2513_v11 = vld [vmem:[%s3862_s1 + $0x220] ss:$8 sps:$4 sm:$0xff]  }
   0x5   :  { %1567 = vmatprep.subr.bf16.mxu0 %v2504_v5  ;;  %v2514_v12 = vld [vmem:[%s3862_s1 + $0x34] ss:$8 sps:$4 sm:$0xff]   ;;  %v2518_v14 = vld [vmem:[%s3862_s1 + $0x30] ss:$8 sps:$4 sm:$0xff]   ;;  %v2520_v16 = vld [vmem:[%s3862_s1 + $0x44] ss:$8 sps:$4 sm:$0xff]  }
   0x6   :  { %v2516_v13 = vld [vmem:[%s3862_s1 + $0x234] ss:$8 sps:$4 sm:$0xff]   ;;  %v2519_v15 = vld [vmem:[%s3862_s1 + $0x230] ss:$8 sps:$4 sm:$0xff]   ;;  %v2522_v17 = vld [vmem:[%s3862_s1 + $0x244] ss:$8 sps:$4 sm:$0xff]  }
   0x7   :  { %1342 = vmatpush1.bf16.msra.mxu1 %v2506_v6  ;;  %v2524_v18 = vld [vmem:[%s3862_s1 + $0x40] ss:$8 sps:$4 sm:$0xff]   ;;  %v2526_v20 = vld [vmem:[%s3862_s1 + $0x54] ss:$8 sps:$4 sm:$0xff]   ;;  %v2530_v22 = vld [vmem:[%s3862_s1 + $0x50] ss:$8 sps:$4 sm:$0xff]  }
   0x8   :  { %1568 = vmatpush1.bf16.msra.mxu0 %v2507_v7  ;;  %1343 = vmatprep.subr.bf16.mxu1 %v2508_v8  ;;  %v2525_v19 = vld [vmem:[%s3862_s1 + $0x240] ss:$8 sps:$4 sm:$0xff]   ;;  %v2528_v21 = vld [vmem:[%s3862_s1 + $0x254] ss:$8 sps:$4 sm:$0xff]   ;;  %v2531_v23 = vld [vmem:[%s3862_s1 + $0x250] ss:$8 sps:$4 sm:$0xff]  }
   0x9   :  { %1569 = vmatprep.subr.bf16.mxu0 %v2510_v9  ;;  %v2532_v24 = vld [vmem:[%s3862_s1 + $0x64] ss:$8 sps:$4 sm:$0xff]   ;;  %v2536_v26 = vld [vmem:[%s3862_s1 + $0x60] ss:$8 sps:$4 sm:$0xff]   ;;  %v2538_v28 = vld [vmem:[%s3862_s1 + $0x74] ss:$8 sps:$4 sm:$0xff]  }
   0xa   :  { %v2534_v25 = vld [vmem:[%s3862_s1 + $0x264] ss:$8 sps:$4 sm:$0xff]   ;;  %v2537_v27 = vld [vmem:[%s3862_s1 + $0x260] ss:$8 sps:$4 sm:$0xff]   ;;  %v2540_v29 = vld [vmem:[%s3862_s1 + $0x274] ss:$8 sps:$4 sm:$0xff]  }
   0xb   :  { %1344 = vmatpush1.bf16.msra.mxu1 %v2512_v10  ;;  %v2542_v30 = vld [vmem:[%s3862_s1 + $0x70] ss:$8 sps:$4 sm:$0xff]   ;;  %v2544_v32 = vld [vmem:[%s3862_s1 + $0x84] ss:$8 sps:$4 sm:$0xff]   ;;  %v2548_v34 = vld [vmem:[%s3862_s1 + $0x80] ss:$8 sps:$4 sm:$0xff]  }
   0xc   :  { %1570 = vmatpush1.bf16.msra.mxu0 %v2513_v11  ;;  %1345 = vmatprep.subr.bf16.mxu1 %v2514_v12  ;;  %v2543_v31 = vld [vmem:[%s3862_s1 + $0x270] ss:$8 sps:$4 sm:$0xff]   ;;  %v2546_v33 = vld [vmem:[%s3862_s1 + $0x284] ss:$8 sps:$4 sm:$0xff]   ;;  %v2549_v35 = vld [vmem:[%s3862_s1 + $0x280] ss:$8 sps:$4 sm:$0xff]  }
   0xd   :  { %1571 = vmatprep.subr.bf16.mxu0 %v2516_v13  ;;  %v2550_v36 = vld [vmem:[%s3862_s1 + $0x94] ss:$8 sps:$4 sm:$0xff]   ;;  %v2554_v38 = vld [vmem:[%s3862_s1 + $0x90] ss:$8 sps:$4 sm:$0xff]   ;;  %v2556_v40 = vld [vmem:[%s3862_s1 + $0xa4] ss:$8 sps:$4 sm:$0xff]  }
   0xe   :  { %v2552_v37 = vld [vmem:[%s3862_s1 + $0x294] ss:$8 sps:$4 sm:$0xff]   ;;  %v2555_v39 = vld [vmem:[%s3862_s1 + $0x290] ss:$8 sps:$4 sm:$0xff]   ;;  %v2558_v41 = vld [vmem:[%s3862_s1 + $0x2a4] ss:$8 sps:$4 sm:$0xff]  }
   0xf   :  { %1346 = vmatpush1.bf16.msra.mxu1 %v2518_v14  ;;  %v2560_v42 = vld [vmem:[%s3862_s1 + $0xa0] ss:$8 sps:$4 sm:$0xff]   ;;  %v2562_v44 = vld [vmem:[%s3862_s1 + $0xb4] ss:$8 sps:$4 sm:$0xff]   ;;  %v2566_v46 = vld [vmem:[%s3862_s1 + $0xb0] ss:$8 sps:$4 sm:$0xff]  }
  0x10   :  { %1572 = vmatpush1.bf16.msra.mxu0 %v2519_v15  ;;  %1347 = vmatprep.subr.bf16.mxu1 %v2520_v16  ;;  %v2561_v43 = vld [vmem:[%s3862_s1 + $0x2a0] ss:$8 sps:$4 sm:$0xff]   ;;  %v2564_v45 = vld [vmem:[%s3862_s1 + $0x2b4] ss:$8 sps:$4 sm:$0xff]   ;;  %v2567_v47 = vld [vmem:[%s3862_s1 + $0x2b0] ss:$8 sps:$4 sm:$0xff]  }
  0x11   :  { %1573 = vmatprep.subr.bf16.mxu0 %v2522_v17  ;;  %v2568_v48 = vld [vmem:[%s3862_s1 + $0xc4] ss:$8 sps:$4 sm:$0xff]   ;;  %v2597_v51 = vld [vmem:[%s3863_s0 + $0x14] ss:$36 sps:$4 sm:$0xff]   ;;  %v2572_v52 = vld [vmem:[%s3862_s1 + $0xc0] ss:$8 sps:$4 sm:$0xff]  }
  0x12   :  { %v2594_v49 = vld [vmem:[%s3863_s0 + $0x4] ss:$36 sps:$4 sm:$0xff]   ;;  %1597 = vmatprep.mubr.bf16.mxu0 %v2597_v51  ;;  %v2574_v54 = vld [vmem:[%s3862_s1 + $0xd4] ss:$8 sps:$4 sm:$0xff]   ;;  %v2578_v56 = vld [vmem:[%s3862_s1 + $0xd0] ss:$8 sps:$4 sm:$0xff]  }
  0x13   :  { %1348 = vmatpush1.bf16.msra.mxu1 %v2524_v18  ;;  %v2570_v50 = vld [vmem:[%s3862_s1 + $0x2c4] ss:$8 sps:$4 sm:$0xff]   ;;  %1371 = vmatprep.mubr.bf16.mxu1 %v2594_v49  ;;  %v2573_v53 = vld [vmem:[%s3862_s1 + $0x2c0] ss:$8 sps:$4 sm:$0xff]   ;;  %v2576_v55 = vld [vmem:[%s3862_s1 + $0x2d4] ss:$8 sps:$4 sm:$0xff]  }
  0x14   :  { %1574 = vmatpush1.bf16.msra.mxu0 %v2525_v19  ;;  %1349 = vmatprep.subr.bf16.mxu1 %v2526_v20  ;;  %v2579_v57 = vld [vmem:[%s3862_s1 + $0x2d0] ss:$8 sps:$4 sm:$0xff]   ;;  %v2580_v58 = vld [vmem:[%s3862_s1 + $0xe4] ss:$8 sps:$4 sm:$0xff]   ;;  %v2584_v60 = vld [vmem:[%s3862_s1 + $0xe0] ss:$8 sps:$4 sm:$0xff]  }
  0x15   :  { %1575 = vmatprep.subr.bf16.mxu0 %v2528_v21  ;;  %v2582_v59 = vld [vmem:[%s3862_s1 + $0x2e4] ss:$8 sps:$4 sm:$0xff]   ;;  %v2585_v61 = vld [vmem:[%s3862_s1 + $0x2e0] ss:$8 sps:$4 sm:$0xff]   ;;  %v2586_v62 = vld [vmem:[%s3862_s1 + $0xf4] ss:$8 sps:$4 sm:$0xff]  }
  0x16   :  { %v2588_v63 = vld [vmem:[%s3862_s1 + $0x2f4] ss:$8 sps:$4 sm:$0xff]   ;;  %v2590_v0 = vld [vmem:[%s3862_s1 + $0xf0] ss:$8 sps:$4 sm:$0xff]   ;;  %v2600_v2 = vld [vmem:[%s3862_s1 + $0x104] ss:$8 sps:$4 sm:$0xff]  }
  0x17   :  { %1350 = vmatpush1.bf16.msra.mxu1 %v2530_v22  ;;  %v2591_v1 = vld [vmem:[%s3862_s1 + $0x2f0] ss:$8 sps:$4 sm:$0xff]   ;;  %v3041_v3 = vld [vmem:[%s3862_s1 + $0x304] ss:$8 sps:$4 sm:$0xff]   ;;  %v2598_v6 = vld [vmem:[%s3862_s1 + $0x100] ss:$8 sps:$4 sm:$0xff]  }
  0x18   :  { %1576 = vmatpush1.bf16.msra.mxu0 %v2531_v23  ;;  %1351 = vmatprep.subr.bf16.mxu1 %v2532_v24  ;;  %v2592_v4 = vld [vmem:[%s3863_s0] ss:$36 sps:$4 sm:$0xff]   ;;  %v2595_v5 = vld [vmem:[%s3863_s0 + $0x10] ss:$36 sps:$4 sm:$0xff]   ;;  %v2614_v16 = vld [vmem:[%s3863_s0 + $0x48] ss:$36 sps:$4 sm:$0xff]  }
  0x19   :  { %1577 = vmatprep.subr.bf16.mxu0 %v2534_v25  ;;  %v3055_v7 = vld [vmem:[%s3862_s1 + $0x300] ss:$8 sps:$4 sm:$0xff]   ;;  %v2606_v8 = vld [vmem:[%s3862_s1 + $0x114] ss:$8 sps:$4 sm:$0xff]   ;;  %v2610_v10 = vld [vmem:[%s3863_s0 + $0x4c] ss:$36 sps:$4 sm:$0xff]  }
  0x1a   :  { %v3064_v9 = vld [vmem:[%s3862_s1 + $0x314] ss:$8 sps:$4 sm:$0xff]   ;;  %v2604_v12 = vld [vmem:[%s3862_s1 + $0x110] ss:$8 sps:$4 sm:$0xff]   ;;  %v2617_v14 = vld [vmem:[%s3862_s1 + $0x124] ss:$8 sps:$4 sm:$0xff]  }
  0x1b   :  { %1352 = vmatpush1.bf16.msra.mxu1 %v2536_v26  ;;  %v2612_v11 = vld [vmem:[%s3863_s0 + $0x5c] ss:$36 sps:$4 sm:$0xff]   ;;  %v3079_v13 = vld [vmem:[%s3862_s1 + $0x310] ss:$8 sps:$4 sm:$0xff]   ;;  %v3088_v15 = vld [vmem:[%s3862_s1 + $0x324] ss:$8 sps:$4 sm:$0xff]  }
  0x1c   :  { %1578 = vmatpush1.bf16.msra.mxu0 %v2537_v27  ;;  %1353 = vmatprep.subr.bf16.mxu1 %v2538_v28  ;;  %v2615_v17 = vld [vmem:[%s3862_s1 + $0x120] ss:$8 sps:$4 sm:$0xff]   ;;  %v2618_v18 = vld [vmem:[%s3863_s0 + $0x58] ss:$36 sps:$4 sm:$0xff]   ;;  %v2635_v26 = vld [vmem:[%s3862_s1 + $0x144] ss:$8 sps:$4 sm:$0xff]  }
  0x1d   :  { %1579 = vmatprep.subr.bf16.mxu0 %v2540_v29  ;;  %v3102_v19 = vld [vmem:[%s3862_s1 + $0x320] ss:$8 sps:$4 sm:$0xff]   ;;  %v2624_v20 = vld [vmem:[%s3862_s1 + $0x134] ss:$8 sps:$4 sm:$0xff]   ;;  %v2622_v24 = vld [vmem:[%s3862_s1 + $0x130] ss:$8 sps:$4 sm:$0xff]  }
  0x1e   :  { %v3112_v21 = vld [vmem:[%s3862_s1 + $0x334] ss:$8 sps:$4 sm:$0xff]   ;;  %v2630_v23 = vld [vmem:[%s3863_s0 + $0xa4] ss:$36 sps:$4 sm:$0xff]   ;;  %v3127_v25 = vld [vmem:[%s3862_s1 + $0x330] ss:$8 sps:$4 sm:$0xff]  }
  0x1f   :  { %1354 = vmatpush1.bf16.msra.mxu1 %v2542_v30  ;;  %v2628_v22 = vld [vmem:[%s3863_s0 + $0x94] ss:$36 sps:$4 sm:$0xff]   ;;  %v3136_v27 = vld [vmem:[%s3862_s1 + $0x344] ss:$8 sps:$4 sm:$0xff]   ;;  %v2633_v29 = vld [vmem:[%s3862_s1 + $0x140] ss:$8 sps:$4 sm:$0xff]  }
  0x20   :  { %1580 = vmatpush1.bf16.msra.mxu0 %v2543_v31  ;;  %1355 = vmatprep.subr.bf16.mxu1 %v2544_v32  ;;  %v2632_v28 = vld [vmem:[%s3863_s0 + $0x90] ss:$36 sps:$4 sm:$0xff]   ;;  %v2636_v30 = vld [vmem:[%s3863_s0 + $0xa0] ss:$36 sps:$4 sm:$0xff]   ;;  %vm3688_vm2 = vmor %vm2033_vm1, %vm2032_vm0 }
  0x21   :  { %1581 = vmatprep.subr.bf16.mxu0 %v2546_v33  ;;  %v3150_v31 = vld [vmem:[%s3862_s1 + $0x340] ss:$8 sps:$4 sm:$0xff]   ;;  %v2642_v32 = vld [vmem:[%s3862_s1 + $0x154] ss:$8 sps:$4 sm:$0xff]   ;;  %v3223_v49 = vld [vmem:[%s3862_s1 + $0x370] ss:$8 sps:$4 sm:$0xff]  }
  0x22   :  { %v3160_v33 = vld [vmem:[%s3862_s1 + $0x354] ss:$8 sps:$4 sm:$0xff]   ;;  %v3232_v51 = vld [vmem:[%s3862_s1 + $0x384] ss:$8 sps:$4 sm:$0xff]  }
  0x23   :  { %1356 = vmatpush1.bf16.msra.mxu1 %v2548_v34  ;;  %v2646_v34 = vld [vmem:[%s3863_s0 + $0xdc] ss:$36 sps:$4 sm:$0xff]  }
  0x24   :  { %1582 = vmatpush1.bf16.msra.mxu0 %v2549_v35  ;;  %1357 = vmatprep.subr.bf16.mxu1 %v2550_v36  ;;  %v2648_v35 = vld [vmem:[%s3863_s0 + $0xec] ss:$36 sps:$4 sm:$0xff]  }
  0x25   :  { %1583 = vmatprep.subr.bf16.mxu0 %v2552_v37  ;;  %v2640_v36 = vld [vmem:[%s3862_s1 + $0x150] ss:$8 sps:$4 sm:$0xff]  }
  0x26   :  { %v3175_v37 = vld [vmem:[%s3862_s1 + $0x350] ss:$8 sps:$4 sm:$0xff]  }
  0x27   :  { %1358 = vmatpush1.bf16.msra.mxu1 %v2554_v38  ;;  %v2653_v38 = vld [vmem:[%s3862_s1 + $0x164] ss:$8 sps:$4 sm:$0xff]  }
  0x28   :  { %1584 = vmatpush1.bf16.msra.mxu0 %v2555_v39  ;;  %1359 = vmatprep.subr.bf16.mxu1 %v2556_v40  ;;  %v3184_v39 = vld [vmem:[%s3862_s1 + $0x364] ss:$8 sps:$4 sm:$0xff]   ;;  %v2650_v40 = vld [vmem:[%s3863_s0 + $0xd8] ss:$36 sps:$4 sm:$0xff]  }
  0x29   :  { %1585 = vmatprep.subr.bf16.mxu0 %v2558_v41  ;;  %v2651_v41 = vld [vmem:[%s3862_s1 + $0x160] ss:$8 sps:$4 sm:$0xff]  }
  0x2b   :  { %1360 = vmatpush1.bf16.msra.mxu1 %v2560_v42  ;;  %v2654_v42 = vld [vmem:[%s3863_s0 + $0xe8] ss:$36 sps:$4 sm:$0xff]  }
  0x2c   :  { %1586 = vmatpush1.bf16.msra.mxu0 %v2561_v43  ;;  %1361 = vmatprep.subr.bf16.mxu1 %v2562_v44  ;;  %v3198_v43 = vld [vmem:[%s3862_s1 + $0x360] ss:$8 sps:$4 sm:$0xff]   ;;  %v2660_v44 = vld [vmem:[%s3862_s1 + $0x174] ss:$8 sps:$4 sm:$0xff]  }
  0x2d   :  { %1587 = vmatprep.subr.bf16.mxu0 %v2564_v45  ;;  %v3208_v45 = vld [vmem:[%s3862_s1 + $0x374] ss:$8 sps:$4 sm:$0xff]  }
  0x2f   :  { %1362 = vmatpush1.bf16.msra.mxu1 %v2566_v46  ;;  %v2664_v46 = vld [vmem:[%s3863_s0 + $0x124] ss:$36 sps:$4 sm:$0xff]  }
  0x30   :  { %1588 = vmatpush1.bf16.msra.mxu0 %v2567_v47  ;;  %1363 = vmatprep.subr.bf16.mxu1 %v2568_v48  ;;  %v2666_v47 = vld [vmem:[%s3863_s0 + $0x134] ss:$36 sps:$4 sm:$0xff]  }
  0x31   :  { %1589 = vmatprep.subr.bf16.mxu0 %v2570_v50  ;;  %v2658_v48 = vld [vmem:[%s3862_s1 + $0x170] ss:$8 sps:$4 sm:$0xff]   ;;  %v2671_v50 = vld [vmem:[%s3862_s1 + $0x184] ss:$8 sps:$4 sm:$0xff]  }
  0x33   :  { %1364 = vmatpush1.bf16.msra.mxu1 %v2572_v52  ;;  %v2668_v52 = vld [vmem:[%s3863_s0 + $0x120] ss:$36 sps:$4 sm:$0xff]  }
  0x34   :  { %1590 = vmatpush1.bf16.msra.mxu0 %v2573_v53  ;;  %1365 = vmatprep.subr.bf16.mxu1 %v2574_v54  ;;  %v2669_v53 = vld [vmem:[%s3862_s1 + $0x180] ss:$8 sps:$4 sm:$0xff]   ;;  %v2672_v54 = vld [vmem:[%s3863_s0 + $0x130] ss:$36 sps:$4 sm:$0xff]  }
  0x35   :  { %1591 = vmatprep.subr.bf16.mxu0 %v2576_v55  ;;  %v3246_v55 = vld [vmem:[%s3862_s1 + $0x380] ss:$8 sps:$4 sm:$0xff]  }
  0x37   :  { %1366 = vmatpush1.bf16.msra.mxu1 %v2578_v56  ;;  %v2678_v56 = vld [vmem:[%s3862_s1 + $0x194] ss:$8 sps:$4 sm:$0xff]  }
  0x38   :  { %1592 = vmatpush1.bf16.msra.mxu0 %v2579_v57  ;;  %1367 = vmatprep.subr.bf16.mxu1 %v2580_v58  ;;  %v3256_v57 = vld [vmem:[%s3862_s1 + $0x394] ss:$8 sps:$4 sm:$0xff]   ;;  %v2682_v58 = vld [vmem:[%s3863_s0 + $0x16c] ss:$36 sps:$4 sm:$0xff]  }
  0x39   :  { %1593 = vmatprep.subr.bf16.mxu0 %v2582_v59  ;;  %v2684_v59 = vld [vmem:[%s3863_s0 + $0x17c] ss:$36 sps:$4 sm:$0xff]  }
  0x3b   :  { %1368 = vmatpush1.bf16.msra.mxu1 %v2584_v60  ;;  %v2676_v60 = vld [vmem:[%s3862_s1 + $0x190] ss:$8 sps:$4 sm:$0xff]  }
  0x3c   :  { %1594 = vmatpush1.bf16.msra.mxu0 %v2585_v61  ;;  %1369 = vmatprep.subr.bf16.mxu1 %v2586_v62  ;;  %v3271_v61 = vld [vmem:[%s3862_s1 + $0x390] ss:$8 sps:$4 sm:$0xff]   ;;  %v2689_v62 = vld [vmem:[%s3862_s1 + $0x1a4] ss:$8 sps:$4 sm:$0xff]  }
  0x3d   :  { %1595 = vmatprep.subr.bf16.mxu0 %v2588_v63  ;;  %v3280_v63 = vld [vmem:[%s3862_s1 + $0x3a4] ss:$8 sps:$4 sm:$0xff]  }
  0x3f   :  { %1370 = vmatpush1.bf16.msra.mxu1 %v2590_v0  ;;  %v2686_v0 = vld [vmem:[%s3863_s0 + $0x168] ss:$36 sps:$4 sm:$0xff]  }
  0x40   :  { %1596 = vmatpush1.bf16.msra.mxu0 %v2591_v1  ;;  %1452 = vmatprep.subr.bf16.mxu1 %v2600_v2  ;;  %v2687_v1 = vld [vmem:[%s3862_s1 + $0x1a0] ss:$8 sps:$4 sm:$0xff]   ;;  %v2690_v2 = vld [vmem:[%s3863_s0 + $0x178] ss:$36 sps:$4 sm:$0xff]  }
  0x41   :  { %1678 = vmatprep.subr.bf16.mxu0 %v3041_v3 }
  0x42   :  { %1372 = vmatmul.mubr.bf16.vlgmr.msra.gmra.mrb[0].mxu1 %v2592_v4  ;;  %v3294_v4 = vld [vmem:[%s3862_s1 + $0x3a0] ss:$8 sps:$4 sm:$0xff]  }
  0x43   :  { %1598 = vmatmul.mubr.bf16.vlgmr.msra.gmra.mrb[0].mxu0 %v2595_v5  ;;  %1453 = vmatpush1.bf16.msra.mxu1 %v2598_v6  ;;  %v2696_v5 = vld [vmem:[%s3862_s1 + $0x1b4] ss:$8 sps:$4 sm:$0xff]  }
  0x44   :  { %1679 = vmatpush1.bf16.msra.mxu0 %v3055_v7  ;;  %1454 = vmatprep.subr.bf16.mxu1 %v2606_v8  ;;  %v3304_v6 = vld [vmem:[%s3862_s1 + $0x3b4] ss:$8 sps:$4 sm:$0xff]  }
  0x45   :  { %1680 = vmatprep.subr.bf16.mxu0 %v3064_v9  ;;  %1381 = vmatprep.mubr.bf16.mxu1 %v2610_v10  ;;  %v2700_v8 = vld [vmem:[%s3863_s0 + $0x1b4] ss:$36 sps:$4 sm:$0xff]   ;;  %v2702_v10 = vld [vmem:[%s3863_s0 + $0x1c4] ss:$36 sps:$4 sm:$0xff]  }
  0x46   :  { %1607 = vmatprep.mubr.bf16.mxu0 %v2612_v11  ;;  %v2694_v11 = vld [vmem:[%s3862_s1 + $0x1b0] ss:$8 sps:$4 sm:$0xff]  }
  0x47   :  { %1455 = vmatpush1.bf16.msra.mxu1 %v2604_v12  ;;  %v3318_v12 = vld [vmem:[%s3862_s1 + $0x3b0] ss:$8 sps:$4 sm:$0xff]  }
  0x48   :  { %1681 = vmatpush1.bf16.msra.mxu0 %v3079_v13  ;;  %1456 = vmatprep.subr.bf16.mxu1 %v2617_v14  ;;  %v2707_v14 = vld [vmem:[%s3862_s1 + $0x1c4] ss:$8 sps:$4 sm:$0xff]  }
  0x49   :  { %1682 = vmatprep.subr.bf16.mxu0 %v3088_v15 }
  0x4a   :  { %1382 = vmatmul.mubr.bf16.gmra.mrb[4].mxu1 %v2614_v16  ;;  %v3328_v16 = vld [vmem:[%s3862_s1 + $0x3c4] ss:$8 sps:$4 sm:$0xff]  }
  0x4b   :  { %1608 = vmatmul.mubr.bf16.gmra.mrb[4].mxu0 %v2618_v18  ;;  %1457 = vmatpush1.bf16.msra.mxu1 %v2615_v17  ;;  %v2704_v17 = vld [vmem:[%s3863_s0 + $0x1b0] ss:$36 sps:$4 sm:$0xff]   ;;  %v2705_v18 = vld [vmem:[%s3862_s1 + $0x1c0] ss:$8 sps:$4 sm:$0xff]  }
  0x4c   :  { %1683 = vmatpush1.bf16.msra.mxu0 %v3102_v19  ;;  %1458 = vmatprep.subr.bf16.mxu1 %v2624_v20  ;;  %v2708_v20 = vld [vmem:[%s3863_s0 + $0x1c0] ss:$36 sps:$4 sm:$0xff]  }
  0x4d   :  { %1684 = vmatprep.subr.bf16.mxu0 %v3112_v21  ;;  %1391 = vmatprep.mubr.bf16.mxu1 %v2628_v22  ;;  %v3342_v22 = vld [vmem:[%s3862_s1 + $0x3c0] ss:$8 sps:$4 sm:$0xff]  }
  0x4e   :  { %1617 = vmatprep.mubr.bf16.mxu0 %v2630_v23  ;;  %v2714_v23 = vld [vmem:[%s3862_s1 + $0x1d4] ss:$8 sps:$4 sm:$0xff]  }
  0x4f   :  { %1459 = vmatpush1.bf16.msra.mxu1 %v2622_v24  ;;  %v3352_v24 = vld [vmem:[%s3862_s1 + $0x3d4] ss:$8 sps:$4 sm:$0xff]  }
  0x50   :  { %1685 = vmatpush1.bf16.msra.mxu0 %v3127_v25  ;;  %1460 = vmatprep.subr.bf16.mxu1 %v2635_v26  ;;  %v2718_v26 = vld [vmem:[%s3863_s0 + $0x1fc] ss:$36 sps:$4 sm:$0xff]  }
  0x51   :  { %1686 = vmatprep.subr.bf16.mxu0 %v3136_v27 }
  0x52   :  { %1392 = vmatmul.mubr.bf16.gmra.mrb[8].mxu1 %v2632_v28  ;;  %v2720_v28 = vld [vmem:[%s3863_s0 + $0x20c] ss:$36 sps:$4 sm:$0xff]  }
  0x53   :  { %1618 = vmatmul.mubr.bf16.gmra.mrb[8].mxu0 %v2636_v30  ;;  %1461 = vmatpush1.bf16.msra.mxu1 %v2633_v29  ;;  %v2712_v29 = vld [vmem:[%s3862_s1 + $0x1d0] ss:$8 sps:$4 sm:$0xff]  }
  0x54   :  { %1687 = vmatpush1.bf16.msra.mxu0 %v3150_v31  ;;  %1462 = vmatprep.subr.bf16.mxu1 %v2642_v32  ;;  %v3366_v30 = vld [vmem:[%s3862_s1 + $0x3d0] ss:$8 sps:$4 sm:$0xff]   ;;  %v2725_v32 = vld [vmem:[%s3862_s1 + $0x1e4] ss:$8 sps:$4 sm:$0xff]  }
  0x55   :  { %1688 = vmatprep.subr.bf16.mxu0 %v3160_v33  ;;  %1401 = vmatprep.mubr.bf16.mxu1 %v2646_v34  ;;  %v3376_v34 = vld [vmem:[%s3862_s1 + $0x3e4] ss:$8 sps:$4 sm:$0xff]  }
  0x56   :  { %1627 = vmatprep.mubr.bf16.mxu0 %v2648_v35  ;;  %v2722_v35 = vld [vmem:[%s3863_s0 + $0x1f8] ss:$36 sps:$4 sm:$0xff]  }
  0x57   :  { %1463 = vmatpush1.bf16.msra.mxu1 %v2640_v36  ;;  %v2723_v36 = vld [vmem:[%s3862_s1 + $0x1e0] ss:$8 sps:$4 sm:$0xff]  }
  0x58   :  { %1689 = vmatpush1.bf16.msra.mxu0 %v3175_v37  ;;  %1464 = vmatprep.subr.bf16.mxu1 %v2653_v38  ;;  %v2726_v38 = vld [vmem:[%s3863_s0 + $0x208] ss:$36 sps:$4 sm:$0xff]  }
  0x59   :  { %1690 = vmatprep.subr.bf16.mxu0 %v3184_v39 }
  0x5a   :  { %1402 = vmatmul.mubr.bf16.gmra.mrb[12].mxu1 %v2650_v40  ;;  %v3390_v40 = vld [vmem:[%s3862_s1 + $0x3e0] ss:$8 sps:$4 sm:$0xff]  }
  0x5b   :  { %1628 = vmatmul.mubr.bf16.gmra.mrb[12].mxu0 %v2654_v42  ;;  %1465 = vmatpush1.bf16.msra.mxu1 %v2651_v41  ;;  %v2732_v41 = vld [vmem:[%s3862_s1 + $0x1f4] ss:$8 sps:$4 sm:$0xff]  }
  0x5c   :  { %1691 = vmatpush1.bf16.msra.mxu0 %v3198_v43  ;;  %1466 = vmatprep.subr.bf16.mxu1 %v2660_v44  ;;  %v3400_v42 = vld [vmem:[%s3862_s1 + $0x3f4] ss:$8 sps:$4 sm:$0xff]   ;;  %v2738_v44 = vld [vmem:[%s3863_s0 + $0xc] ss:$36 sps:$4 sm:$0xff]  }
  0x5d   :  { %1692 = vmatprep.subr.bf16.mxu0 %v3208_v45  ;;  %1411 = vmatprep.mubr.bf16.mxu1 %v2664_v46  ;;  %v2741_v46 = vld [vmem:[%s3863_s0 + $0x1c] ss:$36 sps:$4 sm:$0xff]  }
  0x5e   :  { %1637 = vmatprep.mubr.bf16.mxu0 %v2666_v47  ;;  %v2730_v47 = vld [vmem:[%s3862_s1 + $0x1f0] ss:$8 sps:$4 sm:$0xff]  }
  0x5f   :  { %1467 = vmatpush1.bf16.msra.mxu1 %v2658_v48  ;;  %v3415_v48 = vld [vmem:[%s3862_s1 + $0x3f0] ss:$8 sps:$4 sm:$0xff]  }
  0x60   :  { %1693 = vmatpush1.bf16.msra.mxu0 %v3223_v49  ;;  %1468 = vmatprep.subr.bf16.mxu1 %v2671_v50  ;;  %v2744_v50 = vld [vmem:[%s3862_s1 + $0x404] ss:$8 sps:$4 sm:$0xff]  }
  0x61   :  { %1694 = vmatprep.subr.bf16.mxu0 %v3232_v51 }
  0x62   :  { %1412 = vmatmul.mubr.bf16.gmra.mrb[16].mxu1 %v2668_v52  ;;  %v2736_v52 = vld [vmem:[%s3863_s0 + $0x8] ss:$36 sps:$4 sm:$0xff]  }
  0x63   :  { %1638 = vmatmul.mubr.bf16.gmra.mrb[16].mxu0 %v2672_v54  ;;  %1469 = vmatpush1.bf16.msra.mxu1 %v2669_v53  ;;  %v2739_v53 = vld [vmem:[%s3863_s0 + $0x18] ss:$36 sps:$4 sm:$0xff]   ;;  %v2742_v54 = vld [vmem:[%s3862_s1 + $0x400] ss:$8 sps:$4 sm:$0xff]  }
  0x64   :  { %1695 = vmatpush1.bf16.msra.mxu0 %v3246_v55  ;;  %1470 = vmatprep.subr.bf16.mxu1 %v2678_v56  ;;  %v2747_v56 = vld [vmem:[%s3862_s1 + $0x414] ss:$8 sps:$4 sm:$0xff]  }
  0x65   :  { %1696 = vmatprep.subr.bf16.mxu0 %v3256_v57  ;;  %1421 = vmatprep.mubr.bf16.mxu1 %v2682_v58  ;;  %v2748_v58 = vld [vmem:[%s3863_s0 + $0x54] ss:$36 sps:$4 sm:$0xff]  }
  0x66   :  { %1647 = vmatprep.mubr.bf16.mxu0 %v2684_v59  ;;  %v2750_v59 = vld [vmem:[%s3863_s0 + $0x64] ss:$36 sps:$4 sm:$0xff]  }
  0x67   :  { %1471 = vmatpush1.bf16.msra.mxu1 %v2676_v60  ;;  %v2745_v60 = vld [vmem:[%s3862_s1 + $0x410] ss:$8 sps:$4 sm:$0xff]  }
  0x68   :  { %1697 = vmatpush1.bf16.msra.mxu0 %v3271_v61  ;;  %1472 = vmatprep.subr.bf16.mxu1 %v2689_v62  ;;  %v2752_v62 = vld [vmem:[%s3863_s0 + $0x50] ss:$36 sps:$4 sm:$0xff]  }
  0x69   :  { %1698 = vmatprep.subr.bf16.mxu0 %v3280_v63 }
  0x6a   :  { %1422 = vmatmul.mubr.bf16.gmra.mrb[20].mxu1 %v2686_v0  ;;  %v2759_v0 = vld [vmem:[%s3862_s1 + $0x434] ss:$8 sps:$4 sm:$0xff]  }
  0x6b   :  { %1648 = vmatmul.mubr.bf16.gmra.mrb[20].mxu0 %v2690_v2  ;;  %1473 = vmatpush1.bf16.msra.mxu1 %v2687_v1  ;;  %v2760_v1 = vld [vmem:[%s3863_s0 + $0x9c] ss:$36 sps:$4 sm:$0xff]   ;;  %v2768_v2 = vld [vmem:[%s3862_s1 + $0x444] ss:$8 sps:$4 sm:$0xff]  }
  0x6c   :  { %1699 = vmatpush1.bf16.msra.mxu0 %v3294_v4  ;;  %1474 = vmatprep.subr.bf16.mxu1 %v2696_v5  ;;  %v2764_v5 = vld [vmem:[%s3863_s0 + $0x98] ss:$36 sps:$4 sm:$0xff]  }
  0x6d   :  { %1700 = vmatprep.subr.bf16.mxu0 %v3304_v6  ;;  %1431 = vmatprep.mubr.bf16.mxu1 %v2700_v8  ;;  %v2771_v8 = vld [vmem:[%s3862_s1 + $0x454] ss:$8 sps:$4 sm:$0xff]  }
  0x6e   :  { %1657 = vmatprep.mubr.bf16.mxu0 %v2702_v10  ;;  %v2772_v10 = vld [vmem:[%s3863_s0 + $0xe4] ss:$36 sps:$4 sm:$0xff]  }
  0x6f   :  { %1475 = vmatpush1.bf16.msra.mxu1 %v2694_v11  ;;  %v2780_v11 = vld [vmem:[%s3862_s1 + $0x464] ss:$8 sps:$4 sm:$0xff]  }
  0x70   :  { %1701 = vmatpush1.bf16.msra.mxu0 %v3318_v12  ;;  %1476 = vmatprep.subr.bf16.mxu1 %v2707_v14  ;;  %v2776_v14 = vld [vmem:[%s3863_s0 + $0xe0] ss:$36 sps:$4 sm:$0xff]  }
  0x71   :  { %1702 = vmatprep.subr.bf16.mxu0 %v3328_v16 }
  0x72   :  { %1432 = vmatmul.mubr.bf16.gmra.mrb[24].mxu1 %v2704_v17  ;;  %v2783_v17 = vld [vmem:[%s3862_s1 + $0x474] ss:$8 sps:$4 sm:$0xff]  }
  0x73   :  { %1658 = vmatmul.mubr.bf16.gmra.mrb[24].mxu0 %v2708_v20  ;;  %1477 = vmatpush1.bf16.msra.mxu1 %v2705_v18  ;;  %v2784_v18 = vld [vmem:[%s3863_s0 + $0x12c] ss:$36 sps:$4 sm:$0xff]  }
  0x74   :  { %1703 = vmatpush1.bf16.msra.mxu0 %v3342_v22  ;;  %1478 = vmatprep.subr.bf16.mxu1 %v2714_v23  ;;  %v2786_v20 = vld [vmem:[%s3863_s0 + $0x128] ss:$36 sps:$4 sm:$0xff]  }
  0x75   :  { %1704 = vmatprep.subr.bf16.mxu0 %v3352_v24  ;;  %1441 = vmatprep.mubr.bf16.mxu1 %v2718_v26  ;;  %v2791_v23 = vld [vmem:[%s3863_s0 + $0x68] ss:$36 sps:$4 sm:$0xff]  }
  0x76   :  { %1667 = vmatprep.mubr.bf16.mxu0 %v2720_v28  ;;  %v2807_v26 = vld [vmem:[%s3863_s0 + $0x188] ss:$36 sps:$4 sm:$0xff]  }
  0x77   :  { %1479 = vmatpush1.bf16.msra.mxu1 %v2712_v29  ;;  %v2808_v28 = vld [vmem:[%s3863_s0 + $0x1cc] ss:$36 sps:$4 sm:$0xff]  }
  0x78   :  { %1705 = vmatpush1.bf16.msra.mxu0 %v3366_v30  ;;  %1480 = vmatprep.subr.bf16.mxu1 %v2725_v32  ;;  %v2810_v29 = vld [vmem:[%s3863_s0 + $0x1c8] ss:$36 sps:$4 sm:$0xff]   ;;  %v2812_v32 = vld [vmem:[%s3863_s0 + $0x214] ss:$36 sps:$4 sm:$0xff]  }
  0x79   :  { %1706 = vmatprep.subr.bf16.mxu0 %v3376_v34 }
  0x7a   :  { %1442 = vmatmul.mubr.bf16.gmra.mrb[28].mxu1 %v2722_v35  ;;  %v2815_v35 = vld [vmem:[%s3863_s0 + $0x218] ss:$36 sps:$4 sm:$0xff]  }
  0x7b   :  { %1668 = vmatmul.mubr.bf16.gmra.mrb[28].mxu0 %v2726_v38  ;;  %1481 = vmatpush1.bf16.msra.mxu1 %v2723_v36 }
  0x7c   :  { %1707 = vmatpush1.bf16.msra.mxu0 %v3390_v40  ;;  %1482 = vmatprep.subr.bf16.mxu1 %v2732_v41 }
  0x7d   :  { %1708 = vmatprep.subr.bf16.mxu0 %v3400_v42  ;;  %1484 = vmatprep.mubr.bf16.mxu1 %v2738_v44 }
  0x7e   :  { %1710 = vmatprep.mubr.bf16.mxu0 %v2741_v46 }
  0x7f   :  { %1483 = vmatpush1.bf16.msra.mxu1 %v2730_v47 }
  0x80   :  { %1709 = vmatpush1.bf16.msra.mxu0 %v3415_v48  ;;  %2303 = vmatprep.subr.bf16.mxu1 %v3041_v3  ;;  %v2756_v3 = vld [vmem:[%s3862_s1 + $0x424] ss:$8 sps:$4 sm:$0xff]  }
  0x81   :  { %1791 = vmatprep.subr.bf16.mxu0 %v2744_v50 }
  0x82   :  { %1485 = vmatmul.mubr.bf16.vlgmr.msra.gmra.mrb[0].mxu1 %v2736_v52 }
  0x83   :  { %1711 = vmatmul.mubr.bf16.vlgmr.msra.gmra.mrb[0].mxu0 %v2739_v53  ;;  %2319 = vmatpush1.bf16.msra.mxu1 %v3055_v7  ;;  %v2753_v7 = vld [vmem:[%s3863_s0 + $0x60] ss:$36 sps:$4 sm:$0xff]  }
  0x84   :  { %1792 = vmatpush1.bf16.msra.mxu0 %v2742_v54  ;;  %2304 = vmatprep.subr.bf16.mxu1 %v3064_v9  ;;  %v2754_v9 = vld [vmem:[%s3862_s1 + $0x420] ss:$8 sps:$4 sm:$0xff]  }
  0x85   :  { %1793 = vmatprep.subr.bf16.mxu0 %v2747_v56  ;;  %1494 = vmatprep.mubr.bf16.mxu1 %v2748_v58 }
  0x86   :  { %1720 = vmatprep.mubr.bf16.mxu0 %v2750_v59 }
  0x87   :  { %2320 = vmatpush1.bf16.msra.mxu1 %v3079_v13  ;;  %v2762_v13 = vld [vmem:[%s3863_s0 + $0xac] ss:$36 sps:$4 sm:$0xff]  }
  0x88   :  { %1794 = vmatpush1.bf16.msra.mxu0 %v2745_v60  ;;  %2305 = vmatprep.subr.bf16.mxu1 %v3088_v15  ;;  %v2757_v15 = vld [vmem:[%s3862_s1 + $0x430] ss:$8 sps:$4 sm:$0xff]  }
  0x89   :  { %1795 = vmatprep.subr.bf16.mxu0 %v2756_v3 }
  0x8a   :  { %1495 = vmatmul.mubr.bf16.gmra.mrb[4].mxu1 %v2752_v62 }
  0x8b   :  { %1721 = vmatmul.mubr.bf16.gmra.mrb[4].mxu0 %v2753_v7  ;;  %2321 = vmatpush1.bf16.msra.mxu1 %v3102_v19  ;;  %v2765_v19 = vld [vmem:[%s3863_s0 + $0xa8] ss:$36 sps:$4 sm:$0xff]  }
  0x8c   :  { %1796 = vmatpush1.bf16.msra.mxu0 %v2754_v9  ;;  %2306 = vmatprep.subr.bf16.mxu1 %v3112_v21  ;;  %v2766_v21 = vld [vmem:[%s3862_s1 + $0x440] ss:$8 sps:$4 sm:$0xff]  }
  0x8d   :  { %1797 = vmatprep.subr.bf16.mxu0 %v2759_v0  ;;  %1504 = vmatprep.mubr.bf16.mxu1 %v2760_v1 }
  0x8e   :  { %1730 = vmatprep.mubr.bf16.mxu0 %v2762_v13 }
  0x8f   :  { %2322 = vmatpush1.bf16.msra.mxu1 %v3127_v25  ;;  %v2774_v25 = vld [vmem:[%s3863_s0 + $0xf4] ss:$36 sps:$4 sm:$0xff]  }
  0x90   :  { %1798 = vmatpush1.bf16.msra.mxu0 %v2757_v15  ;;  %2307 = vmatprep.subr.bf16.mxu1 %v3136_v27  ;;  %v2769_v27 = vld [vmem:[%s3862_s1 + $0x450] ss:$8 sps:$4 sm:$0xff]   ;;  %v241_v15 = vlaneseq }
  0x91   :  { %1799 = vmatprep.subr.bf16.mxu0 %v2768_v2 }
  0x92   :  { %1505 = vmatmul.mubr.bf16.gmra.mrb[8].mxu1 %v2764_v5 }
  0x93   :  { %1731 = vmatmul.mubr.bf16.gmra.mrb[8].mxu0 %v2765_v19  ;;  %2323 = vmatpush1.bf16.msra.mxu1 %v3150_v31  ;;  %v2777_v31 = vld [vmem:[%s3863_s0 + $0xf0] ss:$36 sps:$4 sm:$0xff]  }
  0x94   :  { %1800 = vmatpush1.bf16.msra.mxu0 %v2766_v21  ;;  %2308 = vmatprep.subr.bf16.mxu1 %v3160_v33  ;;  %v2778_v33 = vld [vmem:[%s3862_s1 + $0x460] ss:$8 sps:$4 sm:$0xff]   ;;  %v242_v21 = vshrl.u32 %v241_v15, 7 }
  0x95   :  { %1801 = vmatprep.subr.bf16.mxu0 %v2771_v8  ;;  %1514 = vmatprep.mubr.bf16.mxu1 %v2772_v10 }
  0x96   :  { %1740 = vmatprep.mubr.bf16.mxu0 %v2774_v25  ;;  %v243_v10 = vsub.s32 0, %v242_v21  ;;  %v239_v25 = vld [vmem:[%s3864_s2] sm:$0x3] }
  0x97   :  { %2324 = vmatpush1.bf16.msra.mxu1 %v3175_v37  ;;  %v2781_v37 = vld [vmem:[%s3862_s1 + $0x470] ss:$8 sps:$4 sm:$0xff]  }
  0x98   :  { %1802 = vmatpush1.bf16.msra.mxu0 %v2769_v27  ;;  %2309 = vmatprep.subr.bf16.mxu1 %v3184_v39  ;;  %v2816_v39 = vmov 0   ;;  %v247_v27 = vsub.s32 1, %v242_v21 }
  0x99   :  { %1803 = vmatprep.subr.bf16.mxu0 %v2780_v11 }
  0x9a   :  { %1515 = vmatmul.mubr.bf16.gmra.mrb[12].mxu1 %v2776_v14 }
  0x9b   :  { %1741 = vmatmul.mubr.bf16.gmra.mrb[12].mxu0 %v2777_v31  ;;  %2325 = vmatpush1.bf16.msra.mxu1 %v3198_v43  ;;  %v2787_v43 = vld [vmem:[%s3863_s0 + $0x20] ss:$36 sps:$4 sm:$0xff]  }
  0x9c   :  { %1804 = vmatpush1.bf16.msra.mxu0 %v2778_v33  ;;  %2310 = vmatprep.subr.bf16.mxu1 %v3208_v45  ;;  %v2788_v45 = vld [vmem:[%s3863_s0 + $0x174] ss:$36 sps:$4 sm:$0xff]   ;;  %v3668_v33 = vrot.slane %v239_v25, %v243_v10 }
  0x9d   :  { %1805 = vmatprep.subr.bf16.mxu0 %v2783_v17  ;;  %1524 = vmatprep.mubr.bf16.mxu1 %v2784_v18  ;;  %v3672_v18 = vrot.slane %v239_v25, %v247_v27 }
  0x9e   :  { %1823 = vmatprep.mubr.bf16.mxu0 %v2816_v39 }
  0x9f   :  { %2326 = vmatpush1.bf16.msra.mxu1 %v3223_v49  ;;  %v2790_v49 = vld [vmem:[%s3863_s0 + $0x170] ss:$36 sps:$4 sm:$0xff]  }
  0xa0   :  { %1806 = vmatpush1.bf16.msra.mxu0 %v2781_v37  ;;  %2311 = vmatprep.subr.bf16.mxu1 %v3232_v51  ;;  %v2792_v51 = vld [vmem:[%s3863_s0 + $0x1bc] ss:$36 sps:$4 sm:$0xff]  }
  0xa2   :  { %1525 = vmatmul.mubr.bf16.gmra.mrb[16].mxu1 %v2786_v20 }
  0xa3   :  { %1824 = vmatmul.mubr.bf16.vlgmr.msra.gmra.mrb[0].mxu0 %v2787_v43  ;;  %2327 = vmatpush1.bf16.msra.mxu1 %v3246_v55  ;;  %v2794_v55 = vld [vmem:[%s3863_s0 + $0x1b8] ss:$36 sps:$4 sm:$0xff]  }
  0xa4   :  { %1534 = vmatprep.mubr.bf16.mxu1 %v2788_v45  ;;  %2312 = vmatprep.subr.bf16.mxu1 %v3256_v57  ;;  %v2795_v57 = vld [vmem:[%s3863_s0 + $0xb0] ss:$36 sps:$4 sm:$0xff]  }
  0xa5   :  { %1833 = vmatprep.mubr.bf16.mxu0 %v2816_v39 }
  0xa7   :  { %2328 = vmatpush1.bf16.msra.mxu1 %v3271_v61  ;;  %v2796_v61 = vld [vmem:[%s3863_s0 + $0x204] ss:$36 sps:$4 sm:$0xff]  }
  0xa8   :  { %2313 = vmatprep.subr.bf16.mxu1 %v3280_v63  ;;  %v2798_v63 = vld [vmem:[%s3863_s0 + $0x200] ss:$36 sps:$4 sm:$0xff]  }
  0xaa   :  { %1535 = vmatmul.mubr.bf16.gmra.mrb[20].mxu1 %v2790_v49 }
  0xab   :  { %1834 = vmatmul.mubr.bf16.gmra.mrb[4].mxu0 %v2791_v23  ;;  %2329 = vmatpush1.bf16.msra.mxu1 %v3294_v4  ;;  %v2799_v4 = vld [vmem:[%s3863_s0 + $0xf8] ss:$36 sps:$4 sm:$0xff]  }
  0xac   :  { %1544 = vmatprep.mubr.bf16.mxu1 %v2792_v51  ;;  %2314 = vmatprep.subr.bf16.mxu1 %v3304_v6  ;;  %v2802_v6 = vld [vmem:[%s3863_s0 + $0x13c] ss:$36 sps:$4 sm:$0xff]  }
  0xad   :  { %1843 = vmatprep.mubr.bf16.mxu0 %v2816_v39 }
  0xaf   :  { %2330 = vmatpush1.bf16.msra.mxu1 %v3318_v12  ;;  %v2800_v12 = vld [vmem:[%s3863_s0 + $0x138] ss:$36 sps:$4 sm:$0xff]  }
  0xb0   :  { %2315 = vmatprep.subr.bf16.mxu1 %v3328_v16  ;;  %v2803_v16 = vld [vmem:[%s3863_s0 + $0x140] ss:$36 sps:$4 sm:$0xff]  }
  0xb2   :  { %1545 = vmatmul.mubr.bf16.gmra.mrb[24].mxu1 %v2794_v55 }
  0xb3   :  { %1844 = vmatmul.mubr.bf16.gmra.mrb[8].mxu0 %v2795_v57  ;;  %2331 = vmatpush1.bf16.msra.mxu1 %v3342_v22  ;;  %v2804_v22 = vld [vmem:[%s3863_s0 + $0x184] ss:$36 sps:$4 sm:$0xff]  }
  0xb4   :  { %1554 = vmatprep.mubr.bf16.mxu1 %v2796_v61  ;;  %2316 = vmatprep.subr.bf16.mxu1 %v3352_v24  ;;  %v2806_v24 = vld [vmem:[%s3863_s0 + $0x180] ss:$36 sps:$4 sm:$0xff]  }
  0xb5   :  { %1853 = vmatprep.mubr.bf16.mxu0 %v2816_v39 }
  0xb7   :  { %2332 = vmatpush1.bf16.msra.mxu1 %v3366_v30  ;;  %v2811_v30 = vld [vmem:[%s3863_s0 + $0x1d0] ss:$36 sps:$4 sm:$0xff]  }
  0xb8   :  { %2317 = vmatprep.subr.bf16.mxu1 %v3376_v34  ;;  %v2814_v34 = vld [vmem:[%s3863_s0 + $0x210] ss:$36 sps:$4 sm:$0xff]  }
  0xba   :  { %1555 = vmatmul.mubr.bf16.gmra.mrb[28].mxu1 %v2798_v63 }
  0xbb   :  { %1854 = vmatmul.mubr.bf16.gmra.mrb[12].mxu0 %v2799_v4  ;;  %2333 = vmatpush1.bf16.msra.mxu1 %v3390_v40 }
  0xbc   :  { %1750 = vmatprep.mubr.bf16.mxu1 %v2802_v6  ;;  %2318 = vmatprep.subr.bf16.mxu1 %v3400_v42 }
  0xbd   :  { %1863 = vmatprep.mubr.bf16.mxu0 %v2816_v39 }
  0xbf   :  { %2334 = vmatpush1.bf16.msra.mxu1 %v3415_v48 }
  0xc2   :  { %1751 = vmatmul.mubr.bf16.vlgmr.msra.gmra.mrb[32].mxu1 %v2800_v12 }
  0xc3   :  { %1864 = vmatmul.mubr.bf16.gmra.mrb[32].mxu0 %v2803_v16  ;;  %1760 = vmatprep.mubr.bf16.mxu1 %v2804_v22 }
  0xc4   :  { %1873 = vmatprep.mubr.bf16.mxu0 %v2816_v39 }
  0xca   :  { %1761 = vmatmul.mubr.bf16.gmra.mrb[36].mxu1 %v2806_v24 }
  0xcb   :  { %1874 = vmatmul.mubr.bf16.gmra.mrb[36].mxu0 %v2807_v26  ;;  %1770 = vmatprep.mubr.bf16.mxu1 %v2808_v28 }
  0xcc   :  { %1883 = vmatprep.mubr.bf16.mxu0 %v2816_v39 }
  0xd2   :  { %1771 = vmatmul.mubr.bf16.gmra.mrb[40].mxu1 %v2810_v29 }
  0xd3   :  { %1884 = vmatmul.mubr.bf16.gmra.mrb[40].mxu0 %v2811_v30  ;;  %1780 = vmatprep.mubr.bf16.mxu1 %v2812_v32 }
  0xd4   :  { %1893 = vmatprep.mubr.bf16.mxu0 %v2816_v39 }
  0xda   :  { %1781 = vmatmul.mubr.bf16.gmra.mrb[44].mxu1 %v2814_v34 }
  0xdb   :  { %1894 = vmatmul.mubr.bf16.gmra.mrb[44].mxu0 %v2815_v35 }
 0x136   :  { %v1639_v36 = vpop.f32.mrb[16].mxu0 }
 0x137   :  { %v3621_v38 = vpop.f32.mrb[17].mxu0 }
 0x138   :  { %v3623_v40 = vpop.f32.mrb[18].mxu0 }
 0x139   :  { %v3625_v41 = vpop.f32.mrb[19].mxu0 }
 0x13e   :  { %v3627_v42 = vpop.f32.mrb[20].mxu0 }
 0x13f   :  { %v3629_v44 = vpop.f32.mrb[21].mxu0 }
 0x140   :  { %v3631_v46 = vpop.f32.mrb[22].mxu0 }
 0x141   :  { %v3633_v47 = vpop.f32.mrb[23].mxu0 }
 0x146   :  { %v3635_v48 = vpop.f32.mrb[24].mxu0 }
 0x147   :  { %v3637_v50 = vpop.f32.mrb[25].mxu0 }
 0x148   :  { %v3639_v52 = vpop.f32.mrb[26].mxu0 }
 0x149   :  { %v3641_v53 = vpop.f32.mrb[27].mxu0 }
 0x14e   :  { %v3643_v54 = vpop.f32.mrb[28].mxu0 }
 0x14f   :  { %v3645_v56 = vpop.f32.mrb[29].mxu0 }
 0x150   :  { %v3647_v58 = vpop.f32.mrb[30].mxu0 }
 0x151   :  { %v3649_v59 = vpop.f32.mrb[31].mxu0 }
 0x155   :  { %v1486_v60 = vpop.f32.mrb[0].mxu1 }
 0x156   :  { %v1488_v3 = vpop.f32.mrb[1].mxu1  ;;  %v2335_v37 = vadd.f32 %v1486_v60, %v3668_v33 }
 0x157   :  { %v1490_v62 = vpop.f32.mrb[2].mxu1  ;;  %v2337_v39 = vadd.f32 %v1488_v3, %v3672_v18 }
 0x158   :  { %v1492_v7 = vpop.f32.mrb[3].mxu1  ;;  %v2339_v45 = vadd.f32 %v1490_v62, %v3668_v33 }
 0x159   :  { %v2341_v57 = vadd.f32 %v1492_v7, %v3672_v18 }
 0x15d   :  { %v1496_v9 = vpop.f32.mrb[4].mxu1 }
 0x15e   :  { %v1498_v0 = vpop.f32.mrb[5].mxu1  ;;  %v2343_v15 = vadd.f32 %v1496_v9, %v3668_v33 }
 0x15f   :  { %v1500_v1 = vpop.f32.mrb[6].mxu1  ;;  %v2345_v21 = vadd.f32 %v1498_v0, %v3672_v18 }
 0x160   :  { %v1502_v13 = vpop.f32.mrb[7].mxu1 }
 0x161   :  { %v2349_v9 = vadd.f32 %v1502_v13, %v3672_v18 }
 0x165   :  { %v3651_v2 = vpop.f32.mrb[8].mxu1 }
 0x166   :  { %v3653_v5 = vpop.f32.mrb[9].mxu1 }
 0x167   :  { %v3655_v19 = vpop.f32.mrb[10].mxu1 }
 0x168   :  { %v3657_v8 = vpop.f32.mrb[11].mxu1 }
 0x16d   :  { %v3662_v11 = vpop.f32.mrb[12].mxu1 }
 0x16e   :  { %v3664_v14 = vpop.f32.mrb[13].mxu1 }
 0x16f   :  { %v3666_v31 = vpop.f32.mrb[14].mxu1 }
 0x170   :  { %v3670_v17 = vpop.f32.mrb[15].mxu1 }
 0x175   :  { %v1526_v20 = vpop.f32.mrb[16].mxu1 }
 0x176   :  { %v1825_v43 = vpop.f32.mrb[0].mxu0  ;;  %v2367_v49 = vadd.f32 %v1526_v20, %v3668_v33  ;;  %v1528_v51 = vpop.f32.mrb[17].mxu1 }
 0x177   :  { %v2336_v23 = vadd.f32 %v2335_v37, %v1825_v43  ;;  %v1827_v55 = vpop.f32.mrb[1].mxu0  ;;  %v2371_v61 = vadd.f32 %v1528_v51, %v3672_v18  ;;  %v1530_v4 = vpop.f32.mrb[18].mxu1 }
 0x178   :  { %v2338_v63 = vadd.f32 %v2337_v39, %v1827_v55  ;;  %v1829_v6 = vpop.f32.mrb[2].mxu0  ;;  %v2375_v16 = vadd.f32 %v1530_v4, %v3668_v33  ;;  %v1532_v24 = vpop.f32.mrb[19].mxu1  ;;  %v3681_v28 = vadd.f32 %v2367_v49, %v1639_v36 }
 0x179   :  { %v1904_v12 = vmax.f32 %v2336_v23, 0.0  ;;  %v2340_v22 = vadd.f32 %v2339_v45, %v1829_v6  ;;  %v1831_v26 = vpop.f32.mrb[3].mxu0  ;;  %v2379_v30 = vadd.f32 %v1532_v24, %v3672_v18  ;;  %v3685_v34 = vadd.f32 %v2371_v61, %v3621_v38 }
 0x17a   :  { %v1905_v29 = vmax.f32 %v2338_v63, 0.0  ;;  %v2342_v32 = vadd.f32 %v2341_v57, %v1831_v26  ;;  %v3693_v3 = vadd.f32 %v2375_v16, %v3623_v40  ;;  %v2347_v40 = vadd.f32 %v1500_v1, %v3668_v33 }
 0x17b   :  { %v1906_v60 = vmax.f32 %v2340_v22, 0.0  ;;  %v3696_v36 = vadd.f32 %v2379_v30, %v3625_v41  ;;  %v2353_v26 = vadd.f32 %v3653_v5, %v3672_v18  ;;  %v2355_v30 = vadd.f32 %v3655_v19, %v3668_v33 }
 0x17c   :  { %v2287_v62 = vpack.c.bf16 %v1905_v29, %v1904_v12  ;;  %v1907_v7 = vmax.f32 %v2342_v32, 0.0  ;;  %v2357_v5 = vadd.f32 %v3657_v8, %v3672_v18 }
 0x17d   :  { %v1536_v10 = vpop.f32.mrb[20].mxu1 }
 0x17e   :  { %2035 = vst.msk [vmem:[%s3865_s3] sm:$0xff] %vm3688_vm2, %v2287_v62  ;;  %v2288_v38 = vpack.c.bf16 %v1907_v7, %v1906_v60  ;;  %v1835_v25 = vpop.f32.mrb[4].mxu0  ;;  %v2383_v27 = vadd.f32 %v1536_v10, %v3668_v33  ;;  %v1538_v41 = vpop.f32.mrb[21].mxu1 }
 0x17f   :  { %v2344_v37 = vadd.f32 %v2343_v15, %v1835_v25  ;;  %v1837_v39 = vpop.f32.mrb[5].mxu0  ;;  %v2387_v0 = vadd.f32 %v1538_v41, %v3672_v18  ;;  %v1540_v43 = vpop.f32.mrb[22].mxu1 }
 0x180   :  { %2036 = vst.msk [vmem:[%s3865_s3 + $0x8] sm:$0xff] %vm3688_vm2, %v2288_v38  ;;  %v2346_v20 = vadd.f32 %v2345_v21, %v1837_v39  ;;  %v1839_v45 = vpop.f32.mrb[6].mxu0  ;;  %v2391_v1 = vadd.f32 %v1540_v43, %v3668_v33  ;;  %v1542_v51 = vpop.f32.mrb[23].mxu1  ;;  %v3716_v57 = vadd.f32 %v2383_v27, %v3627_v42  ;;  %v2351_v42 = vadd.f32 %v3651_v2, %v3668_v33 }
 0x181   :  { %v1908_v49 = vmax.f32 %v2344_v37, 0.0  ;;  %v2348_v23 = vadd.f32 %v2347_v40, %v1839_v45  ;;  %v1841_v55 = vpop.f32.mrb[7].mxu0  ;;  %v2395_v61 = vadd.f32 %v1542_v51, %v3672_v18  ;;  %v3720_v4 = vadd.f32 %v2387_v0, %v3629_v44 }
 0x182   :  { %v1909_v13 = vmax.f32 %v2346_v20, 0.0  ;;  %v2350_v63 = vadd.f32 %v2349_v9, %v1841_v55  ;;  %v3723_v12 = vadd.f32 %v2391_v1, %v3631_v46 }
 0x183   :  { %v1910_v6 = vmax.f32 %v2348_v23, 0.0  ;;  %v3726_v24 = vadd.f32 %v2395_v61, %v3633_v47  ;;  %v2363_v23 = vadd.f32 %v3666_v31, %v3668_v33 }
 0x184   :  { %v2289_v16 = vpack.c.bf16 %v1909_v13, %v1908_v49  ;;  %v1911_v22 = vmax.f32 %v2350_v63, 0.0  ;;  %v2361_v49 = vadd.f32 %v3664_v14, %v3672_v18  ;;  %v2365_v14 = vadd.f32 %v3670_v17, %v3672_v18 }
 0x185   :  { %v1546_v46 = vpop.f32.mrb[24].mxu1 }
 0x186   :  { %2037 = vst.msk [vmem:[%s3865_s3 + $0x10] sm:$0xff] %vm3688_vm2, %v2289_v16  ;;  %v2290_v44 = vpack.c.bf16 %v1911_v22, %v1910_v6  ;;  %v1845_v29 = vpop.f32.mrb[8].mxu0  ;;  %v2399_v47 = vadd.f32 %v1546_v46, %v3668_v33  ;;  %v1548_v60 = vpop.f32.mrb[25].mxu1 }
 0x187   :  { %v2352_v32 = vadd.f32 %v2351_v42, %v1845_v29  ;;  %v1847_v2 = vpop.f32.mrb[9].mxu0  ;;  %v2403_v62 = vadd.f32 %v1548_v60, %v3672_v18  ;;  %v1550_v15 = vpop.f32.mrb[26].mxu1 }
 0x188   :  { %2038 = vst.msk [vmem:[%s3865_s3 + $0x18] sm:$0xff] %vm3688_vm2, %v2290_v44  ;;  %v2354_v7 = vadd.f32 %v2353_v26, %v1847_v2  ;;  %v1849_v21 = vpop.f32.mrb[10].mxu0  ;;  %v2407_v38 = vadd.f32 %v1550_v15, %v3668_v33  ;;  %v1552_v25 = vpop.f32.mrb[27].mxu1  ;;  %v3750_v27 = vadd.f32 %v2399_v47, %v3635_v48  ;;  %v2359_v48 = vadd.f32 %v3662_v11, %v3668_v33 }
 0x189   :  { %v1912_v19 = vmax.f32 %v2352_v32, 0.0  ;;  %v2356_v10 = vadd.f32 %v2355_v30, %v1849_v21  ;;  %v1851_v40 = vpop.f32.mrb[11].mxu0  ;;  %v2411_v37 = vadd.f32 %v1552_v25, %v3672_v18  ;;  %v3754_v39 = vadd.f32 %v2403_v62, %v3637_v50 }
 0x18a   :  { %v1913_v8 = vmax.f32 %v2354_v7, 0.0  ;;  %v2358_v41 = vadd.f32 %v2357_v5, %v1851_v40  ;;  %v3757_v0 = vadd.f32 %v2407_v38, %v3639_v52 }
 0x18b   :  { %v1914_v9 = vmax.f32 %v2356_v10, 0.0  ;;  %v3760_v45 = vadd.f32 %v2411_v37, %v3641_v53 }
 0x18c   :  { %v2291_v20 = vpack.c.bf16 %v1913_v8, %v1912_v19  ;;  %v1915_v43 = vmax.f32 %v2358_v41, 0.0 }
 0x18d   :  { %v1556_v52 = vpop.f32.mrb[28].mxu1 }
 0x18e   :  { %2039 = vst.msk [vmem:[%s3865_s3 + $0x20] sm:$0xff] %vm3688_vm2, %v2291_v20  ;;  %v2292_v50 = vpack.c.bf16 %v1915_v43, %v1914_v9  ;;  %v1855_v1 = vpop.f32.mrb[12].mxu0  ;;  %v2415_v53 = vadd.f32 %v1556_v52, %v3668_v33  ;;  %v1558_v55 = vpop.f32.mrb[29].mxu1 }
 0x18f   :  { %v2360_v51 = vadd.f32 %v2359_v48, %v1855_v1  ;;  %v1857_v11 = vpop.f32.mrb[13].mxu0  ;;  %v2419_v13 = vadd.f32 %v1558_v55, %v3672_v18  ;;  %v1560_v63 = vpop.f32.mrb[30].mxu1 }
 0x190   :  { %2040 = vst.msk [vmem:[%s3865_s3 + $0x28] sm:$0xff] %vm3688_vm2, %v2292_v50  ;;  %v2362_v61 = vadd.f32 %v2361_v49, %v1857_v11  ;;  %v1859_v6 = vpop.f32.mrb[14].mxu0  ;;  %v2423_v16 = vadd.f32 %v1560_v63, %v3668_v33  ;;  %v1562_v42 = vpop.f32.mrb[31].mxu1  ;;  %v3784_v44 = vadd.f32 %v2415_v53, %v3643_v54 }
 0x191   :  { %v1916_v31 = vmax.f32 %v2360_v51, 0.0  ;;  %v2364_v22 = vadd.f32 %v2363_v23, %v1859_v6  ;;  %v1861_v26 = vpop.f32.mrb[15].mxu0  ;;  %v2427_v46 = vadd.f32 %v1562_v42, %v3672_v18  ;;  %v3788_v30 = vadd.f32 %v2419_v13, %v3645_v56 }
 0x192   :  { %v1917_v17 = vmax.f32 %v2362_v61, 0.0  ;;  %v2366_v29 = vadd.f32 %v2365_v14, %v1861_v26  ;;  %v3791_v32 = vadd.f32 %v2423_v16, %v3647_v58 }
 0x193   :  { %v1918_v47 = vmax.f32 %v2364_v22, 0.0  ;;  %v3794_v33 = vadd.f32 %v2427_v46, %v3649_v59 }
 0x194   :  { %v2293_v60 = vpack.c.bf16 %v1917_v17, %v1916_v31  ;;  %v1919_v2 = vmax.f32 %v2366_v29, 0.0 }
 0x195   :  { %v1752_v18 = vpop.f32.mrb[32].mxu1 }
 0x196   :  { %2041 = vst.msk [vmem:[%s3865_s3 + $0x30] sm:$0xff] %vm3688_vm2, %v2293_v60  ;;  %v2294_v54 = vpack.c.bf16 %v1919_v2, %v1918_v47  ;;  %v1865_v5 = vpop.f32.mrb[32].mxu0  ;;  %v2369_v56 = vadd.f32 %v3681_v28, %v1752_v18  ;;  %v1754_v62 = vpop.f32.mrb[33].mxu1 }
 0x197   :  { %v1867_v7 = vpop.f32.mrb[33].mxu0  ;;  %v2373_v58 = vadd.f32 %v3685_v34, %v1754_v62  ;;  %v1756_v59 = vpop.f32.mrb[34].mxu1 }
 0x198   :  { %2042 = vst.msk [vmem:[%s3865_s3 + $0x38] sm:$0xff] %vm3688_vm2, %v2294_v54  ;;  %v1869_v15 = vpop.f32.mrb[34].mxu0  ;;  %v2370_v21 = vadd.f32 %v2369_v56, %v1865_v5  ;;  %v2377_v19 = vadd.f32 %v3693_v3, %v1756_v59  ;;  %v1758_v38 = vpop.f32.mrb[35].mxu1 }
 0x199   :  { %v1871_v10 = vpop.f32.mrb[35].mxu0  ;;  %v2374_v25 = vadd.f32 %v2373_v58, %v1867_v7  ;;  %v2381_v28 = vadd.f32 %v3696_v36, %v1758_v38 }
 0x19a   :  { %v1920_v40 = vmax.f32 %v2370_v21, 0.0  ;;  %v2378_v8 = vadd.f32 %v2377_v19, %v1869_v15 }
 0x19b   :  { %v1921_v37 = vmax.f32 %v2374_v25, 0.0  ;;  %v2382_v41 = vadd.f32 %v2381_v28, %v1871_v10 }
 0x19c   :  { %v1922_v9 = vmax.f32 %v2378_v8, 0.0 }
 0x19d   :  { %v2295_v20 = vpack.c.bf16 %v1921_v37, %v1920_v40  ;;  %v1923_v43 = vmax.f32 %v2382_v41, 0.0  ;;  %v1762_v48 = vpop.f32.mrb[36].mxu1 }
 0x19e   :  { %v1875_v49 = vpop.f32.mrb[36].mxu0  ;;  %v2385_v34 = vadd.f32 %v3716_v57, %v1762_v48  ;;  %v1764_v50 = vpop.f32.mrb[37].mxu1 }
 0x19f   :  { %v1877_v52 = vpop.f32.mrb[37].mxu0  ;;  %2043 = vst.msk [vmem:[%s3865_s3 + $0x40] sm:$0xff] %vm3688_vm2, %v2295_v20  ;;  %v2296_v3 = vpack.c.bf16 %v1923_v43, %v1922_v9  ;;  %v2389_v36 = vadd.f32 %v3720_v4, %v1764_v50  ;;  %v1766_v1 = vpop.f32.mrb[38].mxu1 }
 0x1a0   :  { %v1879_v23 = vpop.f32.mrb[38].mxu0  ;;  %v2386_v53 = vadd.f32 %v2385_v34, %v1875_v49  ;;  %v2393_v51 = vadd.f32 %v3723_v12, %v1766_v1  ;;  %v1768_v55 = vpop.f32.mrb[39].mxu1 }
 0x1a1   :  { %v1881_v11 = vpop.f32.mrb[39].mxu0  ;;  %2044 = vst.msk [vmem:[%s3865_s3 + $0x48] sm:$0xff] %vm3688_vm2, %v2296_v3  ;;  %v2390_v57 = vadd.f32 %v2389_v36, %v1877_v52  ;;  %v2397_v14 = vadd.f32 %v3726_v24, %v1768_v55 }
 0x1a2   :  { %v1924_v13 = vmax.f32 %v2386_v53, 0.0  ;;  %v2394_v61 = vadd.f32 %v2393_v51, %v1879_v23 }
 0x1a3   :  { %v1925_v63 = vmax.f32 %v2390_v57, 0.0  ;;  %v2398_v4 = vadd.f32 %v2397_v14, %v1881_v11 }
 0x1a4   :  { %v1926_v6 = vmax.f32 %v2394_v61, 0.0 }
 0x1a5   :  { %v2297_v31 = vpack.c.bf16 %v1925_v63, %v1924_v13  ;;  %v1927_v16 = vmax.f32 %v2398_v4, 0.0  ;;  %v1772_v22 = vpop.f32.mrb[40].mxu1 }
 0x1a6   :  { %v1885_v12 = vpop.f32.mrb[40].mxu0  ;;  %v2401_v42 = vadd.f32 %v3750_v27, %v1772_v22  ;;  %v1774_v26 = vpop.f32.mrb[41].mxu1 }
 0x1a7   :  { %v1887_v17 = vpop.f32.mrb[41].mxu0  ;;  %2045 = vst.msk [vmem:[%s3865_s3 + $0x50] sm:$0xff] %vm3688_vm2, %v2297_v31  ;;  %v2298_v24 = vpack.c.bf16 %v1927_v16, %v1926_v6  ;;  %v2405_v46 = vadd.f32 %v3754_v39, %v1774_v26  ;;  %v1776_v29 = vpop.f32.mrb[42].mxu1 }
 0x1a8   :  { %v1889_v47 = vpop.f32.mrb[42].mxu0  ;;  %v2402_v60 = vadd.f32 %v2401_v42, %v1885_v12  ;;  %v2409_v2 = vadd.f32 %v3757_v0, %v1776_v29  ;;  %v1778_v54 = vpop.f32.mrb[43].mxu1 }
 0x1a9   :  { %v1891_v18 = vpop.f32.mrb[43].mxu0  ;;  %2046 = vst.msk [vmem:[%s3865_s3 + $0x58] sm:$0xff] %vm3688_vm2, %v2298_v24  ;;  %v2406_v27 = vadd.f32 %v2405_v46, %v1887_v17  ;;  %v2413_v5 = vadd.f32 %v3760_v45, %v1778_v54 }
 0x1aa   :  { %v1928_v56 = vmax.f32 %v2402_v60, 0.0  ;;  %v2410_v62 = vadd.f32 %v2409_v2, %v1889_v47 }
 0x1ab   :  { %v1929_v7 = vmax.f32 %v2406_v27, 0.0  ;;  %v2414_v39 = vadd.f32 %v2413_v5, %v1891_v18 }
 0x1ac   :  { %v1930_v58 = vmax.f32 %v2410_v62, 0.0 }
 0x1ad   :  { %v2299_v59 = vpack.c.bf16 %v1929_v7, %v1928_v56  ;;  %v1931_v15 = vmax.f32 %v2414_v39, 0.0  ;;  %v1782_v21 = vpop.f32.mrb[44].mxu1 }
 0x1ae   :  { %v1895_v0 = vpop.f32.mrb[44].mxu0  ;;  %v2417_v19 = vadd.f32 %v3784_v44, %v1782_v21  ;;  %v1784_v38 = vpop.f32.mrb[45].mxu1 }
 0x1af   :  { %v1897_v10 = vpop.f32.mrb[45].mxu0  ;;  %2047 = vst.msk [vmem:[%s3865_s3 + $0x60] sm:$0xff] %vm3688_vm2, %v2299_v59  ;;  %v2300_v45 = vpack.c.bf16 %v1931_v15, %v1930_v58  ;;  %v2421_v25 = vadd.f32 %v3788_v30, %v1784_v38  ;;  %v1786_v28 = vpop.f32.mrb[46].mxu1 }
 0x1b0   :  { %v1899_v40 = vpop.f32.mrb[46].mxu0  ;;  %v2418_v8 = vadd.f32 %v2417_v19, %v1895_v0  ;;  %v2425_v37 = vadd.f32 %v3791_v32, %v1786_v28  ;;  %v1788_v41 = vpop.f32.mrb[47].mxu1 }
 0x1b1   :  { %v1901_v9 = vpop.f32.mrb[47].mxu0  ;;  %2048 = vst.msk [vmem:[%s3865_s3 + $0x68] sm:$0xff] %vm3688_vm2, %v2300_v45  ;;  %v2422_v44 = vadd.f32 %v2421_v25, %v1897_v10  ;;  %v2429_v20 = vadd.f32 %v3794_v33, %v1788_v41 }
 0x1b2   :  { %v1932_v43 = vmax.f32 %v2418_v8, 0.0  ;;  %v2426_v48 = vadd.f32 %v2425_v37, %v1899_v40 }
 0x1b3   :  { %v1933_v49 = vmax.f32 %v2422_v44, 0.0  ;;  %v2430_v30 = vadd.f32 %v2429_v20, %v1901_v9 }
 0x1b4   :  { %v1934_v34 = vmax.f32 %v2426_v48, 0.0 }
 0x1b5   :  { %v2301_v50 = vpack.c.bf16 %v1933_v49, %v1932_v43  ;;  %v1935_v52 = vmax.f32 %v2430_v30, 0.0 }
 0x1b7   :  { %2049 = vst.msk [vmem:[%s3865_s3 + $0x70] sm:$0xff] %vm3688_vm2, %v2301_v50  ;;  %v2302_v32 = vpack.c.bf16 %v1935_v52, %v1934_v34 }
 0x1b9   :  { %2050 = vst.msk [vmem:[%s3865_s3 + $0x78] sm:$0xff] %vm3688_vm2, %v2302_v32 }

// kernel: model_c_forward.14
= control target key start
LH: loop header
LB: loop body
LE: loop exit
PB: predicated region body
PF: predicated region fallthrough
CT: control target
= control target key end

     0   :  { %vm1987_vm0 = vcmask 523264   ;;  %vm2931_vm1 = vcmask 1043456   ;;  %vm2932_vm2 = vcmask 523268   ;;  %s5292_s1 = inlined_call_operand.vmem [shape: bf16[1728,192], index: 1, kind: input, shape index: {}]   ;;  %s5293_s0 = inlined_call_operand.vmem [shape: bf16[128,1728], index: 0, kind: input, shape index: {}]   ;;  %s5294_s2 = inlined_call_operand.vmem [shape: f32[1,192], index: 2, kind: input, shape index: {}]   ;;  %s5295_s3 = inlined_call_operand.vmem [shape: bf16[128,192], index: 3, kind: output, shape index: {}]  }
   0x1   :  { %v3570_v0 = vld [vmem:[%s5292_s1 + $0x4] ss:$8 sps:$4 sm:$0xff]   ;;  %v3574_v2 = vld [vmem:[%s5292_s1] ss:$8 sps:$4 sm:$0xff]   ;;  %v3576_v4 = vld [vmem:[%s5292_s1 + $0x14] ss:$8 sps:$4 sm:$0xff]  }
   0x2   :  { %v3572_v1 = vld [vmem:[%s5292_s1 + $0x304] ss:$8 sps:$4 sm:$0xff]   ;;  %2012 = vmatprep.subr.bf16.mxu1 %v3570_v0  ;;  %v3575_v3 = vld [vmem:[%s5292_s1 + $0x300] ss:$8 sps:$4 sm:$0xff]   ;;  %v3578_v5 = vld [vmem:[%s5292_s1 + $0x314] ss:$8 sps:$4 sm:$0xff]  }
   0x3   :  { %2351 = vmatprep.subr.bf16.mxu0 %v3572_v1  ;;  %2013 = vmatpush1.bf16.msra.mxu1 %v3574_v2  ;;  %v3580_v6 = vld [vmem:[%s5292_s1 + $0x10] ss:$8 sps:$4 sm:$0xff]   ;;  %v3582_v8 = vld [vmem:[%s5292_s1 + $0x24] ss:$8 sps:$4 sm:$0xff]   ;;  %v3586_v10 = vld [vmem:[%s5292_s1 + $0x20] ss:$8 sps:$4 sm:$0xff]  }
   0x4   :  { %2352 = vmatpush1.bf16.msra.mxu0 %v3575_v3  ;;  %2014 = vmatprep.subr.bf16.mxu1 %v3576_v4  ;;  %v3581_v7 = vld [vmem:[%s5292_s1 + $0x310] ss:$8 sps:$4 sm:$0xff]   ;;  %v3584_v9 = vld [vmem:[%s5292_s1 + $0x324] ss:$8 sps:$4 sm:$0xff]   ;;  %v3587_v11 = vld [vmem:[%s5292_s1 + $0x320] ss:$8 sps:$4 sm:$0xff]  }
   0x5   :  { %2353 = vmatprep.subr.bf16.mxu0 %v3578_v5  ;;  %v3588_v12 = vld [vmem:[%s5292_s1 + $0x34] ss:$8 sps:$4 sm:$0xff]   ;;  %v3592_v14 = vld [vmem:[%s5292_s1 + $0x30] ss:$8 sps:$4 sm:$0xff]   ;;  %v3594_v16 = vld [vmem:[%s5292_s1 + $0x44] ss:$8 sps:$4 sm:$0xff]  }
   0x6   :  { %v3590_v13 = vld [vmem:[%s5292_s1 + $0x334] ss:$8 sps:$4 sm:$0xff]   ;;  %v3593_v15 = vld [vmem:[%s5292_s1 + $0x330] ss:$8 sps:$4 sm:$0xff]   ;;  %v3596_v17 = vld [vmem:[%s5292_s1 + $0x344] ss:$8 sps:$4 sm:$0xff]  }
   0x7   :  { %2015 = vmatpush1.bf16.msra.mxu1 %v3580_v6  ;;  %v3598_v18 = vld [vmem:[%s5292_s1 + $0x40] ss:$8 sps:$4 sm:$0xff]   ;;  %v3600_v20 = vld [vmem:[%s5292_s1 + $0x54] ss:$8 sps:$4 sm:$0xff]   ;;  %v3604_v22 = vld [vmem:[%s5292_s1 + $0x50] ss:$8 sps:$4 sm:$0xff]  }
   0x8   :  { %2354 = vmatpush1.bf16.msra.mxu0 %v3581_v7  ;;  %2016 = vmatprep.subr.bf16.mxu1 %v3582_v8  ;;  %v3599_v19 = vld [vmem:[%s5292_s1 + $0x340] ss:$8 sps:$4 sm:$0xff]   ;;  %v3602_v21 = vld [vmem:[%s5292_s1 + $0x354] ss:$8 sps:$4 sm:$0xff]   ;;  %v3605_v23 = vld [vmem:[%s5292_s1 + $0x350] ss:$8 sps:$4 sm:$0xff]  }
   0x9   :  { %2355 = vmatprep.subr.bf16.mxu0 %v3584_v9  ;;  %v3606_v24 = vld [vmem:[%s5292_s1 + $0x64] ss:$8 sps:$4 sm:$0xff]   ;;  %v3610_v26 = vld [vmem:[%s5292_s1 + $0x60] ss:$8 sps:$4 sm:$0xff]   ;;  %v3612_v28 = vld [vmem:[%s5292_s1 + $0x74] ss:$8 sps:$4 sm:$0xff]  }
   0xa   :  { %v3608_v25 = vld [vmem:[%s5292_s1 + $0x364] ss:$8 sps:$4 sm:$0xff]   ;;  %v3611_v27 = vld [vmem:[%s5292_s1 + $0x360] ss:$8 sps:$4 sm:$0xff]   ;;  %v3614_v29 = vld [vmem:[%s5292_s1 + $0x374] ss:$8 sps:$4 sm:$0xff]  }
   0xb   :  { %2017 = vmatpush1.bf16.msra.mxu1 %v3586_v10  ;;  %v3616_v30 = vld [vmem:[%s5292_s1 + $0x70] ss:$8 sps:$4 sm:$0xff]   ;;  %v3618_v32 = vld [vmem:[%s5292_s1 + $0x84] ss:$8 sps:$4 sm:$0xff]   ;;  %v3622_v34 = vld [vmem:[%s5292_s1 + $0x80] ss:$8 sps:$4 sm:$0xff]  }
   0xc   :  { %2356 = vmatpush1.bf16.msra.mxu0 %v3587_v11  ;;  %2018 = vmatprep.subr.bf16.mxu1 %v3588_v12  ;;  %v3617_v31 = vld [vmem:[%s5292_s1 + $0x370] ss:$8 sps:$4 sm:$0xff]   ;;  %v3620_v33 = vld [vmem:[%s5292_s1 + $0x384] ss:$8 sps:$4 sm:$0xff]   ;;  %v3623_v35 = vld [vmem:[%s5292_s1 + $0x380] ss:$8 sps:$4 sm:$0xff]  }
   0xd   :  { %2357 = vmatprep.subr.bf16.mxu0 %v3590_v13  ;;  %v3624_v36 = vld [vmem:[%s5292_s1 + $0x94] ss:$8 sps:$4 sm:$0xff]   ;;  %v3628_v38 = vld [vmem:[%s5292_s1 + $0x90] ss:$8 sps:$4 sm:$0xff]   ;;  %v3630_v40 = vld [vmem:[%s5292_s1 + $0xa4] ss:$8 sps:$4 sm:$0xff]  }
   0xe   :  { %v3626_v37 = vld [vmem:[%s5292_s1 + $0x394] ss:$8 sps:$4 sm:$0xff]   ;;  %v3629_v39 = vld [vmem:[%s5292_s1 + $0x390] ss:$8 sps:$4 sm:$0xff]   ;;  %v3632_v41 = vld [vmem:[%s5292_s1 + $0x3a4] ss:$8 sps:$4 sm:$0xff]  }
   0xf   :  { %2019 = vmatpush1.bf16.msra.mxu1 %v3592_v14  ;;  %v3634_v42 = vld [vmem:[%s5292_s1 + $0xa0] ss:$8 sps:$4 sm:$0xff]   ;;  %v3636_v44 = vld [vmem:[%s5292_s1 + $0xb4] ss:$8 sps:$4 sm:$0xff]   ;;  %v3640_v46 = vld [vmem:[%s5292_s1 + $0xb0] ss:$8 sps:$4 sm:$0xff]  }
  0x10   :  { %2358 = vmatpush1.bf16.msra.mxu0 %v3593_v15  ;;  %2020 = vmatprep.subr.bf16.mxu1 %v3594_v16  ;;  %v3635_v43 = vld [vmem:[%s5292_s1 + $0x3a0] ss:$8 sps:$4 sm:$0xff]   ;;  %v3638_v45 = vld [vmem:[%s5292_s1 + $0x3b4] ss:$8 sps:$4 sm:$0xff]   ;;  %v3641_v47 = vld [vmem:[%s5292_s1 + $0x3b0] ss:$8 sps:$4 sm:$0xff]  }
  0x11   :  { %2359 = vmatprep.subr.bf16.mxu0 %v3596_v17  ;;  %v3642_v48 = vld [vmem:[%s5292_s1 + $0xc4] ss:$8 sps:$4 sm:$0xff]   ;;  %v3671_v51 = vld [vmem:[%s5293_s0 + $0x1c] ss:$56 sps:$4 sm:$0xff]   ;;  %v3646_v52 = vld [vmem:[%s5292_s1 + $0xc0] ss:$8 sps:$4 sm:$0xff]  }
  0x12   :  { %v3668_v49 = vld [vmem:[%s5293_s0 + $0x4] ss:$56 sps:$4 sm:$0xff]   ;;  %v3647_v53 = vld [vmem:[%s5292_s1 + $0x3c0] ss:$8 sps:$4 sm:$0xff]   ;;  %2383 = vmatprep.mubr.bf16.mxu0 %v3671_v51  ;;  %v3652_v56 = vld [vmem:[%s5292_s1 + $0xd0] ss:$8 sps:$4 sm:$0xff]  }
  0x13   :  { %2021 = vmatpush1.bf16.msra.mxu1 %v3598_v18  ;;  %v3644_v50 = vld [vmem:[%s5292_s1 + $0x3c4] ss:$8 sps:$4 sm:$0xff]   ;;  %2044 = vmatprep.mubr.bf16.mxu1 %v3668_v49  ;;  %v3648_v54 = vld [vmem:[%s5292_s1 + $0xd4] ss:$8 sps:$4 sm:$0xff]   ;;  %v3653_v57 = vld [vmem:[%s5292_s1 + $0x3d0] ss:$8 sps:$4 sm:$0xff]  }
  0x14   :  { %2360 = vmatpush1.bf16.msra.mxu0 %v3599_v19  ;;  %2022 = vmatprep.subr.bf16.mxu1 %v3600_v20  ;;  %v3650_v55 = vld [vmem:[%s5292_s1 + $0x3d4] ss:$8 sps:$4 sm:$0xff]   ;;  %v3654_v58 = vld [vmem:[%s5292_s1 + $0xe4] ss:$8 sps:$4 sm:$0xff]   ;;  %v3658_v60 = vld [vmem:[%s5292_s1 + $0xe0] ss:$8 sps:$4 sm:$0xff]  }
  0x15   :  { %2361 = vmatprep.subr.bf16.mxu0 %v3602_v21  ;;  %v3656_v59 = vld [vmem:[%s5292_s1 + $0x3e4] ss:$8 sps:$4 sm:$0xff]   ;;  %v3659_v61 = vld [vmem:[%s5292_s1 + $0x3e0] ss:$8 sps:$4 sm:$0xff]   ;;  %v3660_v62 = vld [vmem:[%s5292_s1 + $0xf4] ss:$8 sps:$4 sm:$0xff]  }
  0x16   :  { %v3662_v63 = vld [vmem:[%s5292_s1 + $0x3f4] ss:$8 sps:$4 sm:$0xff]   ;;  %v3664_v0 = vld [vmem:[%s5292_s1 + $0xf0] ss:$8 sps:$4 sm:$0xff]   ;;  %v3674_v2 = vld [vmem:[%s5292_s1 + $0x104] ss:$8 sps:$4 sm:$0xff]  }
  0x17   :  { %2023 = vmatpush1.bf16.msra.mxu1 %v3604_v22  ;;  %v3665_v1 = vld [vmem:[%s5292_s1 + $0x3f0] ss:$8 sps:$4 sm:$0xff]   ;;  %v3677_v3 = vld [vmem:[%s5292_s1 + $0x404] ss:$8 sps:$4 sm:$0xff]   ;;  %v3672_v6 = vld [vmem:[%s5292_s1 + $0x100] ss:$8 sps:$4 sm:$0xff]  }
  0x18   :  { %2362 = vmatpush1.bf16.msra.mxu0 %v3605_v23  ;;  %2024 = vmatprep.subr.bf16.mxu1 %v3606_v24  ;;  %v3666_v4 = vld [vmem:[%s5293_s0] ss:$56 sps:$4 sm:$0xff]   ;;  %v3680_v8 = vld [vmem:[%s5292_s1 + $0x114] ss:$8 sps:$4 sm:$0xff]   ;;  %v3686_v11 = vld [vmem:[%s5293_s0 + $0x8c] ss:$56 sps:$4 sm:$0xff]  }
  0x19   :  { %2363 = vmatprep.subr.bf16.mxu0 %v3608_v25  ;;  %v3669_v5 = vld [vmem:[%s5293_s0 + $0x18] ss:$56 sps:$4 sm:$0xff]   ;;  %v3675_v7 = vld [vmem:[%s5292_s1 + $0x400] ss:$8 sps:$4 sm:$0xff]   ;;  %v3683_v9 = vld [vmem:[%s5292_s1 + $0x414] ss:$8 sps:$4 sm:$0xff]  }
  0x1a   :  { %v3684_v10 = vld [vmem:[%s5293_s0 + $0x74] ss:$56 sps:$4 sm:$0xff]   ;;  %v3678_v12 = vld [vmem:[%s5292_s1 + $0x110] ss:$8 sps:$4 sm:$0xff]   ;;  %v3689_v17 = vld [vmem:[%s5292_s1 + $0x120] ss:$8 sps:$4 sm:$0xff]  }
  0x1b   :  { %2025 = vmatpush1.bf16.msra.mxu1 %v3610_v26  ;;  %v3681_v13 = vld [vmem:[%s5292_s1 + $0x410] ss:$8 sps:$4 sm:$0xff]   ;;  %v3691_v14 = vld [vmem:[%s5292_s1 + $0x124] ss:$8 sps:$4 sm:$0xff]   ;;  %v3692_v18 = vld [vmem:[%s5293_s0 + $0x88] ss:$56 sps:$4 sm:$0xff]  }
  0x1c   :  { %2364 = vmatpush1.bf16.msra.mxu0 %v3611_v27  ;;  %2026 = vmatprep.subr.bf16.mxu1 %v3612_v28  ;;  %v3695_v15 = vld [vmem:[%s5292_s1 + $0x424] ss:$8 sps:$4 sm:$0xff]   ;;  %v3688_v16 = vld [vmem:[%s5293_s0 + $0x70] ss:$56 sps:$4 sm:$0xff]   ;;  %v3698_v20 = vld [vmem:[%s5292_s1 + $0x134] ss:$8 sps:$4 sm:$0xff]  }
  0x1d   :  { %2365 = vmatprep.subr.bf16.mxu0 %v3614_v29  ;;  %v3693_v19 = vld [vmem:[%s5292_s1 + $0x420] ss:$8 sps:$4 sm:$0xff]   ;;  %v3701_v21 = vld [vmem:[%s5292_s1 + $0x434] ss:$8 sps:$4 sm:$0xff]   ;;  %v3696_v24 = vld [vmem:[%s5292_s1 + $0x130] ss:$8 sps:$4 sm:$0xff]  }
  0x1e   :  { %v3702_v22 = vld [vmem:[%s5293_s0 + $0xe4] ss:$56 sps:$4 sm:$0xff]   ;;  %v3699_v25 = vld [vmem:[%s5292_s1 + $0x430] ss:$8 sps:$4 sm:$0xff]   ;;  %v3707_v29 = vld [vmem:[%s5292_s1 + $0x140] ss:$8 sps:$4 sm:$0xff]  }
  0x1f   :  { %2027 = vmatpush1.bf16.msra.mxu1 %v3616_v30  ;;  %v3704_v23 = vld [vmem:[%s5293_s0 + $0xfc] ss:$56 sps:$4 sm:$0xff]   ;;  %v3709_v26 = vld [vmem:[%s5292_s1 + $0x144] ss:$8 sps:$4 sm:$0xff]   ;;  %v3706_v28 = vld [vmem:[%s5293_s0 + $0xe0] ss:$56 sps:$4 sm:$0xff]  }
  0x20   :  { %2366 = vmatpush1.bf16.msra.mxu0 %v3617_v31  ;;  %2028 = vmatprep.subr.bf16.mxu1 %v3618_v32  ;;  %v3713_v27 = vld [vmem:[%s5292_s1 + $0x444] ss:$8 sps:$4 sm:$0xff]   ;;  %v3710_v30 = vld [vmem:[%s5293_s0 + $0xf8] ss:$56 sps:$4 sm:$0xff]   ;;  %v3711_v31 = vld [vmem:[%s5292_s1 + $0x440] ss:$8 sps:$4 sm:$0xff]  }
  0x21   :  { %2367 = vmatprep.subr.bf16.mxu0 %v3620_v33  ;;  %v3716_v32 = vld [vmem:[%s5292_s1 + $0x154] ss:$8 sps:$4 sm:$0xff]   ;;  %v3735_v49 = vld [vmem:[%s5292_s1 + $0x470] ss:$8 sps:$4 sm:$0xff]   ;;  %v3749_v51 = vld [vmem:[%s5292_s1 + $0x484] ss:$8 sps:$4 sm:$0xff]  }
  0x22   :  { %v3719_v33 = vld [vmem:[%s5292_s1 + $0x454] ss:$8 sps:$4 sm:$0xff]   ;;  %vm5172_vm3 = vmor %vm2932_vm2, %vm2931_vm1 }
  0x23   :  { %2029 = vmatpush1.bf16.msra.mxu1 %v3622_v34  ;;  %v3720_v34 = vld [vmem:[%s5293_s0 + $0x154] ss:$56 sps:$4 sm:$0xff]  }
  0x24   :  { %2368 = vmatpush1.bf16.msra.mxu0 %v3623_v35  ;;  %2030 = vmatprep.subr.bf16.mxu1 %v3624_v36  ;;  %v3722_v35 = vld [vmem:[%s5293_s0 + $0x16c] ss:$56 sps:$4 sm:$0xff]   ;;  %v3714_v36 = vld [vmem:[%s5292_s1 + $0x150] ss:$8 sps:$4 sm:$0xff]  }
  0x25   :  { %2369 = vmatprep.subr.bf16.mxu0 %v3626_v37  ;;  %v3717_v37 = vld [vmem:[%s5292_s1 + $0x450] ss:$8 sps:$4 sm:$0xff]  }
  0x27   :  { %2031 = vmatpush1.bf16.msra.mxu1 %v3628_v38  ;;  %v3727_v38 = vld [vmem:[%s5292_s1 + $0x164] ss:$8 sps:$4 sm:$0xff]  }
  0x28   :  { %2370 = vmatpush1.bf16.msra.mxu0 %v3629_v39  ;;  %2032 = vmatprep.subr.bf16.mxu1 %v3630_v40  ;;  %v3731_v39 = vld [vmem:[%s5292_s1 + $0x464] ss:$8 sps:$4 sm:$0xff]   ;;  %v3724_v40 = vld [vmem:[%s5293_s0 + $0x150] ss:$56 sps:$4 sm:$0xff]  }
  0x29   :  { %2371 = vmatprep.subr.bf16.mxu0 %v3632_v41  ;;  %v3725_v41 = vld [vmem:[%s5292_s1 + $0x160] ss:$8 sps:$4 sm:$0xff]  }
  0x2b   :  { %2033 = vmatpush1.bf16.msra.mxu1 %v3634_v42  ;;  %v3728_v42 = vld [vmem:[%s5293_s0 + $0x168] ss:$56 sps:$4 sm:$0xff]  }
  0x2c   :  { %2372 = vmatpush1.bf16.msra.mxu0 %v3635_v43  ;;  %2034 = vmatprep.subr.bf16.mxu1 %v3636_v44  ;;  %v3729_v43 = vld [vmem:[%s5292_s1 + $0x460] ss:$8 sps:$4 sm:$0xff]   ;;  %v3734_v44 = vld [vmem:[%s5292_s1 + $0x174] ss:$8 sps:$4 sm:$0xff]  }
  0x2d   :  { %2373 = vmatprep.subr.bf16.mxu0 %v3638_v45  ;;  %v3737_v45 = vld [vmem:[%s5292_s1 + $0x474] ss:$8 sps:$4 sm:$0xff]  }
  0x2f   :  { %2035 = vmatpush1.bf16.msra.mxu1 %v3640_v46  ;;  %v3738_v46 = vld [vmem:[%s5293_s0 + $0x1c4] ss:$56 sps:$4 sm:$0xff]  }
  0x30   :  { %2374 = vmatpush1.bf16.msra.mxu0 %v3641_v47  ;;  %2036 = vmatprep.subr.bf16.mxu1 %v3642_v48  ;;  %v3740_v47 = vld [vmem:[%s5293_s0 + $0x1dc] ss:$56 sps:$4 sm:$0xff]   ;;  %v3732_v48 = vld [vmem:[%s5292_s1 + $0x170] ss:$8 sps:$4 sm:$0xff]  }
  0x31   :  { %2375 = vmatprep.subr.bf16.mxu0 %v3644_v50  ;;  %v3745_v50 = vld [vmem:[%s5292_s1 + $0x184] ss:$8 sps:$4 sm:$0xff]  }
  0x33   :  { %2037 = vmatpush1.bf16.msra.mxu1 %v3646_v52  ;;  %v3742_v52 = vld [vmem:[%s5293_s0 + $0x1c0] ss:$56 sps:$4 sm:$0xff]  }
  0x34   :  { %2376 = vmatpush1.bf16.msra.mxu0 %v3647_v53  ;;  %2038 = vmatprep.subr.bf16.mxu1 %v3648_v54  ;;  %v3743_v53 = vld [vmem:[%s5292_s1 + $0x180] ss:$8 sps:$4 sm:$0xff]   ;;  %v3746_v54 = vld [vmem:[%s5293_s0 + $0x1d8] ss:$56 sps:$4 sm:$0xff]  }
  0x35   :  { %2377 = vmatprep.subr.bf16.mxu0 %v3650_v55  ;;  %v3747_v55 = vld [vmem:[%s5292_s1 + $0x480] ss:$8 sps:$4 sm:$0xff]  }
  0x37   :  { %2039 = vmatpush1.bf16.msra.mxu1 %v3652_v56  ;;  %v3752_v56 = vld [vmem:[%s5292_s1 + $0x194] ss:$8 sps:$4 sm:$0xff]  }
  0x38   :  { %2378 = vmatpush1.bf16.msra.mxu0 %v3653_v57  ;;  %2040 = vmatprep.subr.bf16.mxu1 %v3654_v58  ;;  %v3755_v57 = vld [vmem:[%s5292_s1 + $0x494] ss:$8 sps:$4 sm:$0xff]  }
  0x39   :  { %2379 = vmatprep.subr.bf16.mxu0 %v3656_v59  ;;  %v3756_v58 = vld [vmem:[%s5293_s0 + $0x234] ss:$56 sps:$4 sm:$0xff]  }
  0x3a   :  { %v3758_v59 = vld [vmem:[%s5293_s0 + $0x24c] ss:$56 sps:$4 sm:$0xff]  }
  0x3b   :  { %2041 = vmatpush1.bf16.msra.mxu1 %v3658_v60  ;;  %v3750_v60 = vld [vmem:[%s5292_s1 + $0x190] ss:$8 sps:$4 sm:$0xff]  }
  0x3c   :  { %2380 = vmatpush1.bf16.msra.mxu0 %v3659_v61  ;;  %2042 = vmatprep.subr.bf16.mxu1 %v3660_v62  ;;  %v3753_v61 = vld [vmem:[%s5292_s1 + $0x490] ss:$8 sps:$4 sm:$0xff]   ;;  %v3763_v62 = vld [vmem:[%s5292_s1 + $0x1a4] ss:$8 sps:$4 sm:$0xff]  }
  0x3d   :  { %2381 = vmatprep.subr.bf16.mxu0 %v3662_v63  ;;  %v3767_v63 = vld [vmem:[%s5292_s1 + $0x4a4] ss:$8 sps:$4 sm:$0xff]  }
  0x3f   :  { %2043 = vmatpush1.bf16.msra.mxu1 %v3664_v0  ;;  %v3760_v0 = vld [vmem:[%s5293_s0 + $0x230] ss:$56 sps:$4 sm:$0xff]  }
  0x40   :  { %2382 = vmatpush1.bf16.msra.mxu0 %v3665_v1  ;;  %2125 = vmatprep.subr.bf16.mxu1 %v3674_v2  ;;  %v3761_v1 = vld [vmem:[%s5292_s1 + $0x1a0] ss:$8 sps:$4 sm:$0xff]  }
  0x41   :  { %2464 = vmatprep.subr.bf16.mxu0 %v3677_v3  ;;  %v3764_v2 = vld [vmem:[%s5293_s0 + $0x248] ss:$56 sps:$4 sm:$0xff]  }
  0x42   :  { %2045 = vmatmul.mubr.bf16.vlgmr.msra.gmra.mrb[0].mxu1 %v3666_v4  ;;  %v3765_v3 = vld [vmem:[%s5292_s1 + $0x4a0] ss:$8 sps:$4 sm:$0xff]   ;;  %v3770_v4 = vld [vmem:[%s5292_s1 + $0x1b4] ss:$8 sps:$4 sm:$0xff]  }
  0x43   :  { %2384 = vmatmul.mubr.bf16.vlgmr.msra.gmra.mrb[0].mxu0 %v3669_v5  ;;  %2126 = vmatpush1.bf16.msra.mxu1 %v3672_v6  ;;  %v3773_v5 = vld [vmem:[%s5292_s1 + $0x4b4] ss:$8 sps:$4 sm:$0xff]  }
  0x44   :  { %2465 = vmatpush1.bf16.msra.mxu0 %v3675_v7  ;;  %2127 = vmatprep.subr.bf16.mxu1 %v3680_v8  ;;  %v3774_v6 = vld [vmem:[%s5293_s0 + $0x2a4] ss:$56 sps:$4 sm:$0xff]   ;;  %v3768_v8 = vld [vmem:[%s5292_s1 + $0x1b0] ss:$8 sps:$4 sm:$0xff]  }
  0x45   :  { %2466 = vmatprep.subr.bf16.mxu0 %v3683_v9  ;;  %2054 = vmatprep.mubr.bf16.mxu1 %v3684_v10  ;;  %v3776_v7 = vld [vmem:[%s5293_s0 + $0x2bc] ss:$56 sps:$4 sm:$0xff]   ;;  %v3771_v9 = vld [vmem:[%s5292_s1 + $0x4b0] ss:$8 sps:$4 sm:$0xff]   ;;  %v3781_v10 = vld [vmem:[%s5292_s1 + $0x1c4] ss:$8 sps:$4 sm:$0xff]  }
  0x46   :  { %2393 = vmatprep.mubr.bf16.mxu0 %v3686_v11  ;;  %v3785_v11 = vld [vmem:[%s5292_s1 + $0x4c4] ss:$8 sps:$4 sm:$0xff]  }
  0x47   :  { %2128 = vmatpush1.bf16.msra.mxu1 %v3678_v12  ;;  %v3778_v12 = vld [vmem:[%s5293_s0 + $0x2a0] ss:$56 sps:$4 sm:$0xff]  }
  0x48   :  { %2467 = vmatpush1.bf16.msra.mxu0 %v3681_v13  ;;  %2129 = vmatprep.subr.bf16.mxu1 %v3691_v14  ;;  %v3779_v13 = vld [vmem:[%s5292_s1 + $0x1c0] ss:$8 sps:$4 sm:$0xff]   ;;  %v3782_v14 = vld [vmem:[%s5293_s0 + $0x2b8] ss:$56 sps:$4 sm:$0xff]  }
  0x49   :  { %2468 = vmatprep.subr.bf16.mxu0 %v3695_v15  ;;  %v3783_v15 = vld [vmem:[%s5292_s1 + $0x4c0] ss:$8 sps:$4 sm:$0xff]  }
  0x4a   :  { %2055 = vmatmul.mubr.bf16.gmra.mrb[4].mxu1 %v3688_v16  ;;  %v3788_v16 = vld [vmem:[%s5292_s1 + $0x1d4] ss:$8 sps:$4 sm:$0xff]  }
  0x4b   :  { %2394 = vmatmul.mubr.bf16.gmra.mrb[4].mxu0 %v3692_v18  ;;  %2130 = vmatpush1.bf16.msra.mxu1 %v3689_v17  ;;  %v3791_v17 = vld [vmem:[%s5292_s1 + $0x4d4] ss:$8 sps:$4 sm:$0xff]  }
  0x4c   :  { %2469 = vmatpush1.bf16.msra.mxu0 %v3693_v19  ;;  %2131 = vmatprep.subr.bf16.mxu1 %v3698_v20  ;;  %v3792_v18 = vld [vmem:[%s5293_s0 + $0x314] ss:$56 sps:$4 sm:$0xff]   ;;  %v3786_v20 = vld [vmem:[%s5292_s1 + $0x1d0] ss:$8 sps:$4 sm:$0xff]  }
  0x4d   :  { %2470 = vmatprep.subr.bf16.mxu0 %v3701_v21  ;;  %2064 = vmatprep.mubr.bf16.mxu1 %v3702_v22  ;;  %v3794_v19 = vld [vmem:[%s5293_s0 + $0x32c] ss:$56 sps:$4 sm:$0xff]   ;;  %v3789_v21 = vld [vmem:[%s5292_s1 + $0x4d0] ss:$8 sps:$4 sm:$0xff]  }
  0x4e   :  { %2403 = vmatprep.mubr.bf16.mxu0 %v3704_v23  ;;  %v3799_v22 = vld [vmem:[%s5292_s1 + $0x1e4] ss:$8 sps:$4 sm:$0xff]  }
  0x4f   :  { %2132 = vmatpush1.bf16.msra.mxu1 %v3696_v24  ;;  %v3803_v23 = vld [vmem:[%s5292_s1 + $0x4e4] ss:$8 sps:$4 sm:$0xff]   ;;  %v3796_v24 = vld [vmem:[%s5293_s0 + $0x310] ss:$56 sps:$4 sm:$0xff]  }
  0x50   :  { %2471 = vmatpush1.bf16.msra.mxu0 %v3699_v25  ;;  %2133 = vmatprep.subr.bf16.mxu1 %v3709_v26  ;;  %v3797_v25 = vld [vmem:[%s5292_s1 + $0x1e0] ss:$8 sps:$4 sm:$0xff]  }
  0x51   :  { %2472 = vmatprep.subr.bf16.mxu0 %v3713_v27  ;;  %v3800_v26 = vld [vmem:[%s5293_s0 + $0x328] ss:$56 sps:$4 sm:$0xff]  }
  0x52   :  { %2065 = vmatmul.mubr.bf16.gmra.mrb[8].mxu1 %v3706_v28  ;;  %v3801_v27 = vld [vmem:[%s5292_s1 + $0x4e0] ss:$8 sps:$4 sm:$0xff]   ;;  %v3806_v28 = vld [vmem:[%s5292_s1 + $0x1f4] ss:$8 sps:$4 sm:$0xff]  }
  0x53   :  { %2404 = vmatmul.mubr.bf16.gmra.mrb[8].mxu0 %v3710_v30  ;;  %2134 = vmatpush1.bf16.msra.mxu1 %v3707_v29  ;;  %v3809_v29 = vld [vmem:[%s5292_s1 + $0x4f4] ss:$8 sps:$4 sm:$0xff]   ;;  %v3812_v30 = vld [vmem:[%s5293_s0 + $0xc] ss:$56 sps:$4 sm:$0xff]  }
  0x54   :  { %2473 = vmatpush1.bf16.msra.mxu0 %v3711_v31  ;;  %2135 = vmatprep.subr.bf16.mxu1 %v3716_v32  ;;  %v3815_v31 = vld [vmem:[%s5293_s0 + $0x24] ss:$56 sps:$4 sm:$0xff]   ;;  %v3804_v32 = vld [vmem:[%s5292_s1 + $0x1f0] ss:$8 sps:$4 sm:$0xff]  }
  0x55   :  { %2474 = vmatprep.subr.bf16.mxu0 %v3719_v33  ;;  %2074 = vmatprep.mubr.bf16.mxu1 %v3720_v34  ;;  %v3807_v33 = vld [vmem:[%s5292_s1 + $0x4f0] ss:$8 sps:$4 sm:$0xff]   ;;  %v3818_v34 = vld [vmem:[%s5292_s1 + $0x204] ss:$8 sps:$4 sm:$0xff]  }
  0x56   :  { %2413 = vmatprep.mubr.bf16.mxu0 %v3722_v35  ;;  %v3821_v35 = vld [vmem:[%s5292_s1 + $0x504] ss:$8 sps:$4 sm:$0xff]  }
  0x57   :  { %2136 = vmatpush1.bf16.msra.mxu1 %v3714_v36  ;;  %v3810_v36 = vld [vmem:[%s5293_s0 + $0x8] ss:$56 sps:$4 sm:$0xff]  }
  0x58   :  { %2475 = vmatpush1.bf16.msra.mxu0 %v3717_v37  ;;  %2137 = vmatprep.subr.bf16.mxu1 %v3727_v38  ;;  %v3813_v37 = vld [vmem:[%s5293_s0 + $0x20] ss:$56 sps:$4 sm:$0xff]  }
  0x59   :  { %2476 = vmatprep.subr.bf16.mxu0 %v3731_v39  ;;  %v3816_v38 = vld [vmem:[%s5292_s1 + $0x200] ss:$8 sps:$4 sm:$0xff]  }
  0x5a   :  { %2075 = vmatmul.mubr.bf16.gmra.mrb[12].mxu1 %v3724_v40  ;;  %v3819_v39 = vld [vmem:[%s5292_s1 + $0x500] ss:$8 sps:$4 sm:$0xff]   ;;  %v3824_v40 = vld [vmem:[%s5292_s1 + $0x214] ss:$8 sps:$4 sm:$0xff]  }
  0x5b   :  { %2414 = vmatmul.mubr.bf16.gmra.mrb[12].mxu0 %v3728_v42  ;;  %2138 = vmatpush1.bf16.msra.mxu1 %v3725_v41  ;;  %v3827_v41 = vld [vmem:[%s5292_s1 + $0x514] ss:$8 sps:$4 sm:$0xff]  }
  0x5c   :  { %2477 = vmatpush1.bf16.msra.mxu0 %v3729_v43  ;;  %2139 = vmatprep.subr.bf16.mxu1 %v3734_v44  ;;  %v3828_v42 = vld [vmem:[%s5293_s0 + $0x7c] ss:$56 sps:$4 sm:$0xff]   ;;  %v3822_v44 = vld [vmem:[%s5292_s1 + $0x210] ss:$8 sps:$4 sm:$0xff]  }
  0x5d   :  { %2478 = vmatprep.subr.bf16.mxu0 %v3737_v45  ;;  %2084 = vmatprep.mubr.bf16.mxu1 %v3738_v46  ;;  %v3830_v43 = vld [vmem:[%s5293_s0 + $0x94] ss:$56 sps:$4 sm:$0xff]   ;;  %v3825_v45 = vld [vmem:[%s5292_s1 + $0x510] ss:$8 sps:$4 sm:$0xff]  }
  0x5e   :  { %2423 = vmatprep.mubr.bf16.mxu0 %v3740_v47  ;;  %v3835_v46 = vld [vmem:[%s5292_s1 + $0x224] ss:$8 sps:$4 sm:$0xff]  }
  0x5f   :  { %2140 = vmatpush1.bf16.msra.mxu1 %v3732_v48  ;;  %v3839_v47 = vld [vmem:[%s5292_s1 + $0x524] ss:$8 sps:$4 sm:$0xff]   ;;  %v3832_v48 = vld [vmem:[%s5293_s0 + $0x78] ss:$56 sps:$4 sm:$0xff]  }
  0x60   :  { %2479 = vmatpush1.bf16.msra.mxu0 %v3735_v49  ;;  %2141 = vmatprep.subr.bf16.mxu1 %v3745_v50  ;;  %v3833_v49 = vld [vmem:[%s5292_s1 + $0x220] ss:$8 sps:$4 sm:$0xff]  }
  0x61   :  { %2480 = vmatprep.subr.bf16.mxu0 %v3749_v51  ;;  %v3836_v50 = vld [vmem:[%s5293_s0 + $0x90] ss:$56 sps:$4 sm:$0xff]  }
  0x62   :  { %2085 = vmatmul.mubr.bf16.gmra.mrb[16].mxu1 %v3742_v52  ;;  %v3837_v51 = vld [vmem:[%s5292_s1 + $0x520] ss:$8 sps:$4 sm:$0xff]   ;;  %v3842_v52 = vld [vmem:[%s5292_s1 + $0x234] ss:$8 sps:$4 sm:$0xff]  }
  0x63   :  { %2424 = vmatmul.mubr.bf16.gmra.mrb[16].mxu0 %v3746_v54  ;;  %2142 = vmatpush1.bf16.msra.mxu1 %v3743_v53  ;;  %v3845_v53 = vld [vmem:[%s5292_s1 + $0x534] ss:$8 sps:$4 sm:$0xff]   ;;  %v3846_v54 = vld [vmem:[%s5293_s0 + $0xec] ss:$56 sps:$4 sm:$0xff]  }
  0x64   :  { %2481 = vmatpush1.bf16.msra.mxu0 %v3747_v55  ;;  %2143 = vmatprep.subr.bf16.mxu1 %v3752_v56  ;;  %v3848_v55 = vld [vmem:[%s5293_s0 + $0x104] ss:$56 sps:$4 sm:$0xff]   ;;  %v3840_v56 = vld [vmem:[%s5292_s1 + $0x230] ss:$8 sps:$4 sm:$0xff]  }
  0x65   :  { %2482 = vmatprep.subr.bf16.mxu0 %v3755_v57  ;;  %2094 = vmatprep.mubr.bf16.mxu1 %v3756_v58  ;;  %v3843_v57 = vld [vmem:[%s5292_s1 + $0x530] ss:$8 sps:$4 sm:$0xff]   ;;  %v3853_v58 = vld [vmem:[%s5292_s1 + $0x244] ss:$8 sps:$4 sm:$0xff]  }
  0x66   :  { %2433 = vmatprep.mubr.bf16.mxu0 %v3758_v59  ;;  %v3857_v59 = vld [vmem:[%s5292_s1 + $0x544] ss:$8 sps:$4 sm:$0xff]  }
  0x67   :  { %2144 = vmatpush1.bf16.msra.mxu1 %v3750_v60  ;;  %v3850_v60 = vld [vmem:[%s5293_s0 + $0xe8] ss:$56 sps:$4 sm:$0xff]  }
  0x68   :  { %2483 = vmatpush1.bf16.msra.mxu0 %v3753_v61  ;;  %2145 = vmatprep.subr.bf16.mxu1 %v3763_v62  ;;  %v3851_v61 = vld [vmem:[%s5292_s1 + $0x240] ss:$8 sps:$4 sm:$0xff]  }
  0x69   :  { %2484 = vmatprep.subr.bf16.mxu0 %v3767_v63  ;;  %v3854_v62 = vld [vmem:[%s5293_s0 + $0x100] ss:$56 sps:$4 sm:$0xff]  }
  0x6a   :  { %2095 = vmatmul.mubr.bf16.gmra.mrb[20].mxu1 %v3760_v0  ;;  %v3855_v63 = vld [vmem:[%s5292_s1 + $0x540] ss:$8 sps:$4 sm:$0xff]   ;;  %v3860_v0 = vld [vmem:[%s5292_s1 + $0x254] ss:$8 sps:$4 sm:$0xff]  }
  0x6b   :  { %2434 = vmatmul.mubr.bf16.gmra.mrb[20].mxu0 %v3764_v2  ;;  %2146 = vmatpush1.bf16.msra.mxu1 %v3761_v1  ;;  %v3863_v1 = vld [vmem:[%s5292_s1 + $0x554] ss:$8 sps:$4 sm:$0xff]  }
  0x6c   :  { %2485 = vmatpush1.bf16.msra.mxu0 %v3765_v3  ;;  %2147 = vmatprep.subr.bf16.mxu1 %v3770_v4  ;;  %v3864_v2 = vld [vmem:[%s5293_s0 + $0x15c] ss:$56 sps:$4 sm:$0xff]   ;;  %v3858_v4 = vld [vmem:[%s5292_s1 + $0x250] ss:$8 sps:$4 sm:$0xff]  }
  0x6d   :  { %2486 = vmatprep.subr.bf16.mxu0 %v3773_v5  ;;  %2104 = vmatprep.mubr.bf16.mxu1 %v3774_v6  ;;  %v3866_v3 = vld [vmem:[%s5293_s0 + $0x174] ss:$56 sps:$4 sm:$0xff]   ;;  %v3861_v5 = vld [vmem:[%s5292_s1 + $0x550] ss:$8 sps:$4 sm:$0xff]  }
  0x6e   :  { %2443 = vmatprep.mubr.bf16.mxu0 %v3776_v7  ;;  %v3871_v6 = vld [vmem:[%s5292_s1 + $0x264] ss:$8 sps:$4 sm:$0xff]  }
  0x6f   :  { %2148 = vmatpush1.bf16.msra.mxu1 %v3768_v8  ;;  %v3875_v7 = vld [vmem:[%s5292_s1 + $0x564] ss:$8 sps:$4 sm:$0xff]   ;;  %v3868_v8 = vld [vmem:[%s5293_s0 + $0x158] ss:$56 sps:$4 sm:$0xff]  }
  0x70   :  { %2487 = vmatpush1.bf16.msra.mxu0 %v3771_v9  ;;  %2149 = vmatprep.subr.bf16.mxu1 %v3781_v10  ;;  %v3869_v9 = vld [vmem:[%s5292_s1 + $0x260] ss:$8 sps:$4 sm:$0xff]  }
  0x71   :  { %2488 = vmatprep.subr.bf16.mxu0 %v3785_v11  ;;  %v3872_v10 = vld [vmem:[%s5293_s0 + $0x170] ss:$56 sps:$4 sm:$0xff]  }
  0x72   :  { %2105 = vmatmul.mubr.bf16.gmra.mrb[24].mxu1 %v3778_v12  ;;  %v3873_v11 = vld [vmem:[%s5292_s1 + $0x560] ss:$8 sps:$4 sm:$0xff]   ;;  %v3878_v12 = vld [vmem:[%s5292_s1 + $0x274] ss:$8 sps:$4 sm:$0xff]  }
  0x73   :  { %2444 = vmatmul.mubr.bf16.gmra.mrb[24].mxu0 %v3782_v14  ;;  %2150 = vmatpush1.bf16.msra.mxu1 %v3779_v13  ;;  %v3881_v13 = vld [vmem:[%s5292_s1 + $0x574] ss:$8 sps:$4 sm:$0xff]   ;;  %v3882_v14 = vld [vmem:[%s5293_s0 + $0x1cc] ss:$56 sps:$4 sm:$0xff]  }
  0x74   :  { %2489 = vmatpush1.bf16.msra.mxu0 %v3783_v15  ;;  %2151 = vmatprep.subr.bf16.mxu1 %v3788_v16  ;;  %v3884_v15 = vld [vmem:[%s5293_s0 + $0x1e4] ss:$56 sps:$4 sm:$0xff]   ;;  %v3876_v16 = vld [vmem:[%s5292_s1 + $0x270] ss:$8 sps:$4 sm:$0xff]  }
  0x75   :  { %2490 = vmatprep.subr.bf16.mxu0 %v3791_v17  ;;  %2114 = vmatprep.mubr.bf16.mxu1 %v3792_v18  ;;  %v3879_v17 = vld [vmem:[%s5292_s1 + $0x570] ss:$8 sps:$4 sm:$0xff]   ;;  %v3889_v18 = vld [vmem:[%s5292_s1 + $0x284] ss:$8 sps:$4 sm:$0xff]  }
  0x76   :  { %2453 = vmatprep.mubr.bf16.mxu0 %v3794_v19  ;;  %v3893_v19 = vld [vmem:[%s5292_s1 + $0x584] ss:$8 sps:$4 sm:$0xff]  }
  0x77   :  { %2152 = vmatpush1.bf16.msra.mxu1 %v3786_v20  ;;  %v3886_v20 = vld [vmem:[%s5293_s0 + $0x1c8] ss:$56 sps:$4 sm:$0xff]  }
  0x78   :  { %2491 = vmatpush1.bf16.msra.mxu0 %v3789_v21  ;;  %2153 = vmatprep.subr.bf16.mxu1 %v3799_v22  ;;  %v3887_v21 = vld [vmem:[%s5292_s1 + $0x280] ss:$8 sps:$4 sm:$0xff]  }
  0x79   :  { %2492 = vmatprep.subr.bf16.mxu0 %v3803_v23  ;;  %v3890_v22 = vld [vmem:[%s5293_s0 + $0x1e0] ss:$56 sps:$4 sm:$0xff]  }
  0x7a   :  { %2115 = vmatmul.mubr.bf16.gmra.mrb[28].mxu1 %v3796_v24  ;;  %v3891_v23 = vld [vmem:[%s5292_s1 + $0x580] ss:$8 sps:$4 sm:$0xff]   ;;  %v3896_v24 = vld [vmem:[%s5292_s1 + $0x294] ss:$8 sps:$4 sm:$0xff]  }
  0x7b   :  { %2454 = vmatmul.mubr.bf16.gmra.mrb[28].mxu0 %v3800_v26  ;;  %2154 = vmatpush1.bf16.msra.mxu1 %v3797_v25  ;;  %v3899_v25 = vld [vmem:[%s5292_s1 + $0x594] ss:$8 sps:$4 sm:$0xff]  }
  0x7c   :  { %2493 = vmatpush1.bf16.msra.mxu0 %v3801_v27  ;;  %2155 = vmatprep.subr.bf16.mxu1 %v3806_v28  ;;  %v3900_v26 = vld [vmem:[%s5293_s0 + $0x23c] ss:$56 sps:$4 sm:$0xff]   ;;  %v3894_v28 = vld [vmem:[%s5292_s1 + $0x290] ss:$8 sps:$4 sm:$0xff]  }
  0x7d   :  { %2494 = vmatprep.subr.bf16.mxu0 %v3809_v29  ;;  %2157 = vmatprep.mubr.bf16.mxu1 %v3812_v30  ;;  %v3902_v27 = vld [vmem:[%s5293_s0 + $0x254] ss:$56 sps:$4 sm:$0xff]   ;;  %v3897_v29 = vld [vmem:[%s5292_s1 + $0x590] ss:$8 sps:$4 sm:$0xff]  }
  0x7e   :  { %2496 = vmatprep.mubr.bf16.mxu0 %v3815_v31  ;;  %v3907_v30 = vld [vmem:[%s5292_s1 + $0x2a4] ss:$8 sps:$4 sm:$0xff]  }
  0x7f   :  { %2156 = vmatpush1.bf16.msra.mxu1 %v3804_v32  ;;  %v3911_v31 = vld [vmem:[%s5292_s1 + $0x5a4] ss:$8 sps:$4 sm:$0xff]   ;;  %v3904_v32 = vld [vmem:[%s5293_s0 + $0x238] ss:$56 sps:$4 sm:$0xff]  }
  0x80   :  { %2495 = vmatpush1.bf16.msra.mxu0 %v3807_v33  ;;  %2238 = vmatprep.subr.bf16.mxu1 %v3818_v34  ;;  %v3905_v33 = vld [vmem:[%s5292_s1 + $0x2a0] ss:$8 sps:$4 sm:$0xff]  }
  0x81   :  { %2577 = vmatprep.subr.bf16.mxu0 %v3821_v35  ;;  %v3908_v34 = vld [vmem:[%s5293_s0 + $0x250] ss:$56 sps:$4 sm:$0xff]  }
  0x82   :  { %2158 = vmatmul.mubr.bf16.vlgmr.msra.gmra.mrb[0].mxu1 %v3810_v36  ;;  %v3909_v35 = vld [vmem:[%s5292_s1 + $0x5a0] ss:$8 sps:$4 sm:$0xff]   ;;  %v3914_v36 = vld [vmem:[%s5292_s1 + $0x2b4] ss:$8 sps:$4 sm:$0xff]  }
  0x83   :  { %2497 = vmatmul.mubr.bf16.vlgmr.msra.gmra.mrb[0].mxu0 %v3813_v37  ;;  %2239 = vmatpush1.bf16.msra.mxu1 %v3816_v38  ;;  %v3917_v37 = vld [vmem:[%s5292_s1 + $0x5b4] ss:$8 sps:$4 sm:$0xff]   ;;  %v3918_v38 = vld [vmem:[%s5293_s0 + $0x2ac] ss:$56 sps:$4 sm:$0xff]  }
  0x84   :  { %2578 = vmatpush1.bf16.msra.mxu0 %v3819_v39  ;;  %2240 = vmatprep.subr.bf16.mxu1 %v3824_v40  ;;  %v3920_v39 = vld [vmem:[%s5293_s0 + $0x2c4] ss:$56 sps:$4 sm:$0xff]   ;;  %v3912_v40 = vld [vmem:[%s5292_s1 + $0x2b0] ss:$8 sps:$4 sm:$0xff]  }
  0x85   :  { %2579 = vmatprep.subr.bf16.mxu0 %v3827_v41  ;;  %2167 = vmatprep.mubr.bf16.mxu1 %v3828_v42  ;;  %v3915_v41 = vld [vmem:[%s5292_s1 + $0x5b0] ss:$8 sps:$4 sm:$0xff]   ;;  %v3925_v42 = vld [vmem:[%s5292_s1 + $0x2c4] ss:$8 sps:$4 sm:$0xff]  }
  0x86   :  { %2506 = vmatprep.mubr.bf16.mxu0 %v3830_v43  ;;  %v3929_v43 = vld [vmem:[%s5292_s1 + $0x5c4] ss:$8 sps:$4 sm:$0xff]  }
  0x87   :  { %2241 = vmatpush1.bf16.msra.mxu1 %v3822_v44  ;;  %v3922_v44 = vld [vmem:[%s5293_s0 + $0x2a8] ss:$56 sps:$4 sm:$0xff]  }
  0x88   :  { %2580 = vmatpush1.bf16.msra.mxu0 %v3825_v45  ;;  %2242 = vmatprep.subr.bf16.mxu1 %v3835_v46  ;;  %v3923_v45 = vld [vmem:[%s5292_s1 + $0x2c0] ss:$8 sps:$4 sm:$0xff]  }
  0x89   :  { %2581 = vmatprep.subr.bf16.mxu0 %v3839_v47  ;;  %v3926_v46 = vld [vmem:[%s5293_s0 + $0x2c0] ss:$56 sps:$4 sm:$0xff]  }
  0x8a   :  { %2168 = vmatmul.mubr.bf16.gmra.mrb[4].mxu1 %v3832_v48  ;;  %v3927_v47 = vld [vmem:[%s5292_s1 + $0x5c0] ss:$8 sps:$4 sm:$0xff]   ;;  %v3932_v48 = vld [vmem:[%s5292_s1 + $0x2d4] ss:$8 sps:$4 sm:$0xff]  }
  0x8b   :  { %2507 = vmatmul.mubr.bf16.gmra.mrb[4].mxu0 %v3836_v50  ;;  %2243 = vmatpush1.bf16.msra.mxu1 %v3833_v49  ;;  %v3935_v49 = vld [vmem:[%s5292_s1 + $0x5d4] ss:$8 sps:$4 sm:$0xff]  }
  0x8c   :  { %2582 = vmatpush1.bf16.msra.mxu0 %v3837_v51  ;;  %2244 = vmatprep.subr.bf16.mxu1 %v3842_v52  ;;  %v3936_v50 = vld [vmem:[%s5293_s0 + $0x31c] ss:$56 sps:$4 sm:$0xff]   ;;  %v3930_v52 = vld [vmem:[%s5292_s1 + $0x2d0] ss:$8 sps:$4 sm:$0xff]  }
  0x8d   :  { %2583 = vmatprep.subr.bf16.mxu0 %v3845_v53  ;;  %2177 = vmatprep.mubr.bf16.mxu1 %v3846_v54  ;;  %v3938_v51 = vld [vmem:[%s5293_s0 + $0x334] ss:$56 sps:$4 sm:$0xff]   ;;  %v3933_v53 = vld [vmem:[%s5292_s1 + $0x5d0] ss:$8 sps:$4 sm:$0xff]  }
  0x8e   :  { %2516 = vmatprep.mubr.bf16.mxu0 %v3848_v55  ;;  %v3943_v54 = vld [vmem:[%s5292_s1 + $0x2e4] ss:$8 sps:$4 sm:$0xff]   ;;  %v3940_v55 = vld [vmem:[%s5293_s0 + $0x318] ss:$56 sps:$4 sm:$0xff]  }
  0x8f   :  { %2245 = vmatpush1.bf16.msra.mxu1 %v3840_v56  ;;  %v3947_v56 = vld [vmem:[%s5292_s1 + $0x5e4] ss:$8 sps:$4 sm:$0xff]  }
  0x90   :  { %2584 = vmatpush1.bf16.msra.mxu0 %v3843_v57  ;;  %2246 = vmatprep.subr.bf16.mxu1 %v3853_v58  ;;  %v3941_v57 = vld [vmem:[%s5292_s1 + $0x2e0] ss:$8 sps:$4 sm:$0xff]  }
  0x91   :  { %2585 = vmatprep.subr.bf16.mxu0 %v3857_v59  ;;  %v3944_v58 = vld [vmem:[%s5293_s0 + $0x330] ss:$56 sps:$4 sm:$0xff]  }
  0x92   :  { %2178 = vmatmul.mubr.bf16.gmra.mrb[8].mxu1 %v3850_v60  ;;  %v3945_v59 = vld [vmem:[%s5292_s1 + $0x5e0] ss:$8 sps:$4 sm:$0xff]   ;;  %v3950_v60 = vld [vmem:[%s5292_s1 + $0x2f4] ss:$8 sps:$4 sm:$0xff]  }
  0x93   :  { %2517 = vmatmul.mubr.bf16.gmra.mrb[8].mxu0 %v3854_v62  ;;  %2247 = vmatpush1.bf16.msra.mxu1 %v3851_v61  ;;  %v3953_v61 = vld [vmem:[%s5292_s1 + $0x5f4] ss:$8 sps:$4 sm:$0xff]  }
  0x94   :  { %2586 = vmatpush1.bf16.msra.mxu0 %v3855_v63  ;;  %2248 = vmatprep.subr.bf16.mxu1 %v3860_v0  ;;  %v3956_v62 = vld [vmem:[%s5293_s0 + $0x14] ss:$56 sps:$4 sm:$0xff]   ;;  %v3948_v0 = vld [vmem:[%s5292_s1 + $0x2f0] ss:$8 sps:$4 sm:$0xff]  }
  0x95   :  { %2587 = vmatprep.subr.bf16.mxu0 %v3863_v1  ;;  %2187 = vmatprep.mubr.bf16.mxu1 %v3864_v2  ;;  %v3959_v63 = vld [vmem:[%s5293_s0 + $0x2c] ss:$56 sps:$4 sm:$0xff]   ;;  %v3951_v1 = vld [vmem:[%s5292_s1 + $0x5f0] ss:$8 sps:$4 sm:$0xff]  }
  0x96   :  { %2526 = vmatprep.mubr.bf16.mxu0 %v3866_v3  ;;  %v3962_v2 = vld [vmem:[%s5292_s1 + $0x604] ss:$8 sps:$4 sm:$0xff]   ;;  %v3954_v3 = vld [vmem:[%s5293_s0 + $0x10] ss:$56 sps:$4 sm:$0xff]  }
  0x97   :  { %2249 = vmatpush1.bf16.msra.mxu1 %v3858_v4  ;;  %v3957_v4 = vld [vmem:[%s5293_s0 + $0x28] ss:$56 sps:$4 sm:$0xff]  }
  0x98   :  { %2588 = vmatpush1.bf16.msra.mxu0 %v3861_v5  ;;  %2250 = vmatprep.subr.bf16.mxu1 %v3871_v6  ;;  %v3960_v5 = vld [vmem:[%s5292_s1 + $0x600] ss:$8 sps:$4 sm:$0xff]   ;;  %v3965_v6 = vld [vmem:[%s5292_s1 + $0x614] ss:$8 sps:$4 sm:$0xff]  }
  0x99   :  { %2589 = vmatprep.subr.bf16.mxu0 %v3875_v7  ;;  %v3966_v7 = vld [vmem:[%s5293_s0 + $0x84] ss:$56 sps:$4 sm:$0xff]  }
  0x9a   :  { %2188 = vmatmul.mubr.bf16.gmra.mrb[12].mxu1 %v3868_v8  ;;  %v3968_v8 = vld [vmem:[%s5293_s0 + $0x9c] ss:$56 sps:$4 sm:$0xff]  }
  0x9b   :  { %2527 = vmatmul.mubr.bf16.gmra.mrb[12].mxu0 %v3872_v10  ;;  %2251 = vmatpush1.bf16.msra.mxu1 %v3869_v9  ;;  %v3963_v9 = vld [vmem:[%s5292_s1 + $0x610] ss:$8 sps:$4 sm:$0xff]   ;;  %v3974_v10 = vld [vmem:[%s5292_s1 + $0x624] ss:$8 sps:$4 sm:$0xff]  }
  0x9c   :  { %2590 = vmatpush1.bf16.msra.mxu0 %v3873_v11  ;;  %2252 = vmatprep.subr.bf16.mxu1 %v3878_v12  ;;  %v3970_v11 = vld [vmem:[%s5293_s0 + $0x80] ss:$56 sps:$4 sm:$0xff]  }
  0x9d   :  { %2591 = vmatprep.subr.bf16.mxu0 %v3881_v13  ;;  %2197 = vmatprep.mubr.bf16.mxu1 %v3882_v14  ;;  %v3971_v12 = vld [vmem:[%s5293_s0 + $0x98] ss:$56 sps:$4 sm:$0xff]   ;;  %v3972_v13 = vld [vmem:[%s5292_s1 + $0x620] ss:$8 sps:$4 sm:$0xff]   ;;  %v3975_v14 = vld [vmem:[%s5293_s0 + $0xf4] ss:$56 sps:$4 sm:$0xff]  }
  0x9e   :  { %2536 = vmatprep.mubr.bf16.mxu0 %v3884_v15  ;;  %v3977_v15 = vld [vmem:[%s5293_s0 + $0x10c] ss:$56 sps:$4 sm:$0xff]  }
  0x9f   :  { %2253 = vmatpush1.bf16.msra.mxu1 %v3876_v16  ;;  %v3983_v16 = vld [vmem:[%s5292_s1 + $0x634] ss:$8 sps:$4 sm:$0xff]  }
  0xa0   :  { %2592 = vmatpush1.bf16.msra.mxu0 %v3879_v17  ;;  %2254 = vmatprep.subr.bf16.mxu1 %v3889_v18  ;;  %v3981_v17 = vld [vmem:[%s5292_s1 + $0x630] ss:$8 sps:$4 sm:$0xff]   ;;  %v3986_v18 = vld [vmem:[%s5292_s1 + $0x644] ss:$8 sps:$4 sm:$0xff]  }
  0xa1   :  { %2593 = vmatprep.subr.bf16.mxu0 %v3893_v19  ;;  %v3979_v19 = vld [vmem:[%s5293_s0 + $0xf0] ss:$56 sps:$4 sm:$0xff]  }
  0xa2   :  { %2198 = vmatmul.mubr.bf16.gmra.mrb[16].mxu1 %v3886_v20  ;;  %v3980_v20 = vld [vmem:[%s5293_s0 + $0x108] ss:$56 sps:$4 sm:$0xff]  }
  0xa3   :  { %2537 = vmatmul.mubr.bf16.gmra.mrb[16].mxu0 %v3890_v22  ;;  %2255 = vmatpush1.bf16.msra.mxu1 %v3887_v21  ;;  %v3987_v21 = vld [vmem:[%s5293_s0 + $0x164] ss:$56 sps:$4 sm:$0xff]  }
  0xa4   :  { %2594 = vmatpush1.bf16.msra.mxu0 %v3891_v23  ;;  %2256 = vmatprep.subr.bf16.mxu1 %v3896_v24  ;;  %v3989_v22 = vld [vmem:[%s5293_s0 + $0x17c] ss:$56 sps:$4 sm:$0xff]   ;;  %v3984_v23 = vld [vmem:[%s5292_s1 + $0x640] ss:$8 sps:$4 sm:$0xff]  }
  0xa5   :  { %2595 = vmatprep.subr.bf16.mxu0 %v3899_v25  ;;  %2207 = vmatprep.mubr.bf16.mxu1 %v3900_v26  ;;  %v3995_v24 = vld [vmem:[%s5292_s1 + $0x654] ss:$8 sps:$4 sm:$0xff]   ;;  %v3993_v25 = vld [vmem:[%s5292_s1 + $0x650] ss:$8 sps:$4 sm:$0xff]   ;;  %v4004_v26 = vld [vmem:[%s5292_s1 + $0x664] ss:$8 sps:$4 sm:$0xff]  }
  0xa6   :  { %2546 = vmatprep.mubr.bf16.mxu0 %v3902_v27  ;;  %v3991_v27 = vld [vmem:[%s5293_s0 + $0x160] ss:$56 sps:$4 sm:$0xff]  }
  0xa7   :  { %2257 = vmatpush1.bf16.msra.mxu1 %v3894_v28  ;;  %v3992_v28 = vld [vmem:[%s5293_s0 + $0x178] ss:$56 sps:$4 sm:$0xff]  }
  0xa8   :  { %2596 = vmatpush1.bf16.msra.mxu0 %v3897_v29  ;;  %2258 = vmatprep.subr.bf16.mxu1 %v3907_v30  ;;  %v3996_v29 = vld [vmem:[%s5293_s0 + $0x1d4] ss:$56 sps:$4 sm:$0xff]  }
  0xa9   :  { %2597 = vmatprep.subr.bf16.mxu0 %v3911_v31  ;;  %v3998_v30 = vld [vmem:[%s5293_s0 + $0x1ec] ss:$56 sps:$4 sm:$0xff]   ;;  %v4002_v31 = vld [vmem:[%s5292_s1 + $0x660] ss:$8 sps:$4 sm:$0xff]  }
  0xaa   :  { %2208 = vmatmul.mubr.bf16.gmra.mrb[20].mxu1 %v3904_v32  ;;  %v4007_v32 = vld [vmem:[%s5292_s1 + $0x674] ss:$8 sps:$4 sm:$0xff]  }
  0xab   :  { %2547 = vmatmul.mubr.bf16.gmra.mrb[20].mxu0 %v3908_v34  ;;  %2259 = vmatpush1.bf16.msra.mxu1 %v3905_v33  ;;  %v4005_v33 = vld [vmem:[%s5292_s1 + $0x670] ss:$8 sps:$4 sm:$0xff]   ;;  %v4016_v34 = vld [vmem:[%s5292_s1 + $0x684] ss:$8 sps:$4 sm:$0xff]  }
  0xac   :  { %2598 = vmatpush1.bf16.msra.mxu0 %v3909_v35  ;;  %2260 = vmatprep.subr.bf16.mxu1 %v3914_v36  ;;  %v4000_v35 = vld [vmem:[%s5293_s0 + $0x1d0] ss:$56 sps:$4 sm:$0xff]  }
  0xad   :  { %2599 = vmatprep.subr.bf16.mxu0 %v3917_v37  ;;  %2217 = vmatprep.mubr.bf16.mxu1 %v3918_v38  ;;  %v4001_v36 = vld [vmem:[%s5293_s0 + $0x1e8] ss:$56 sps:$4 sm:$0xff]   ;;  %v4008_v37 = vld [vmem:[%s5293_s0 + $0x244] ss:$56 sps:$4 sm:$0xff]  }
  0xae   :  { %2556 = vmatprep.mubr.bf16.mxu0 %v3920_v39  ;;  %v4010_v38 = vld [vmem:[%s5293_s0 + $0x25c] ss:$56 sps:$4 sm:$0xff]   ;;  %v4014_v39 = vld [vmem:[%s5292_s1 + $0x680] ss:$8 sps:$4 sm:$0xff]  }
  0xaf   :  { %2261 = vmatpush1.bf16.msra.mxu1 %v3912_v40  ;;  %v4025_v40 = vld [vmem:[%s5292_s1 + $0x694] ss:$8 sps:$4 sm:$0xff]  }
  0xb0   :  { %2600 = vmatpush1.bf16.msra.mxu0 %v3915_v41  ;;  %2262 = vmatprep.subr.bf16.mxu1 %v3925_v42  ;;  %v4023_v41 = vld [vmem:[%s5292_s1 + $0x690] ss:$8 sps:$4 sm:$0xff]   ;;  %v4028_v42 = vld [vmem:[%s5292_s1 + $0x6a4] ss:$8 sps:$4 sm:$0xff]  }
  0xb1   :  { %2601 = vmatprep.subr.bf16.mxu0 %v3929_v43  ;;  %v4012_v43 = vld [vmem:[%s5293_s0 + $0x240] ss:$56 sps:$4 sm:$0xff]  }
  0xb2   :  { %2218 = vmatmul.mubr.bf16.gmra.mrb[24].mxu1 %v3922_v44  ;;  %v4013_v44 = vld [vmem:[%s5293_s0 + $0x258] ss:$56 sps:$4 sm:$0xff]  }
  0xb3   :  { %2557 = vmatmul.mubr.bf16.gmra.mrb[24].mxu0 %v3926_v46  ;;  %2263 = vmatpush1.bf16.msra.mxu1 %v3923_v45  ;;  %v4017_v45 = vld [vmem:[%s5293_s0 + $0x2b4] ss:$56 sps:$4 sm:$0xff]  }
  0xb4   :  { %2602 = vmatpush1.bf16.msra.mxu0 %v3927_v47  ;;  %2264 = vmatprep.subr.bf16.mxu1 %v3932_v48  ;;  %v4019_v46 = vld [vmem:[%s5293_s0 + $0x2cc] ss:$56 sps:$4 sm:$0xff]   ;;  %v4026_v47 = vld [vmem:[%s5292_s1 + $0x6a0] ss:$8 sps:$4 sm:$0xff]   ;;  %v4037_v48 = vld [vmem:[%s5292_s1 + $0x6b4] ss:$8 sps:$4 sm:$0xff]  }
  0xb5   :  { %2603 = vmatprep.subr.bf16.mxu0 %v3935_v49  ;;  %2227 = vmatprep.mubr.bf16.mxu1 %v3936_v50  ;;  %v4035_v49 = vld [vmem:[%s5292_s1 + $0x6b0] ss:$8 sps:$4 sm:$0xff]  }
  0xb6   :  { %2566 = vmatprep.mubr.bf16.mxu0 %v3938_v51  ;;  %v4021_v50 = vld [vmem:[%s5293_s0 + $0x2b0] ss:$56 sps:$4 sm:$0xff]  }
  0xb7   :  { %2265 = vmatpush1.bf16.msra.mxu1 %v3930_v52  ;;  %v4022_v51 = vld [vmem:[%s5293_s0 + $0x2c8] ss:$56 sps:$4 sm:$0xff]   ;;  %v4029_v52 = vld [vmem:[%s5293_s0 + $0x324] ss:$56 sps:$4 sm:$0xff]  }
  0xb8   :  { %2604 = vmatpush1.bf16.msra.mxu0 %v3933_v53  ;;  %2266 = vmatprep.subr.bf16.mxu1 %v3943_v54  ;;  %v4031_v53 = vld [vmem:[%s5293_s0 + $0x33c] ss:$56 sps:$4 sm:$0xff]   ;;  %v4033_v54 = vld [vmem:[%s5293_s0 + $0x320] ss:$56 sps:$4 sm:$0xff]  }
  0xb9   :  { %2605 = vmatprep.subr.bf16.mxu0 %v3947_v56  ;;  %v4040_v56 = vld [vmem:[%s5293_s0 + $0x34] ss:$56 sps:$4 sm:$0xff]  }
  0xba   :  { %2228 = vmatmul.mubr.bf16.gmra.mrb[28].mxu1 %v3940_v55  ;;  %v4034_v55 = vld [vmem:[%s5293_s0 + $0x338] ss:$56 sps:$4 sm:$0xff]  }
  0xbb   :  { %2567 = vmatmul.mubr.bf16.gmra.mrb[28].mxu0 %v3944_v58  ;;  %2267 = vmatpush1.bf16.msra.mxu1 %v3941_v57  ;;  %v4043_v57 = vld [vmem:[%s5293_s0 + $0x1f4] ss:$56 sps:$4 sm:$0xff]   ;;  %v4038_v58 = vld [vmem:[%s5293_s0 + $0x30] ss:$56 sps:$4 sm:$0xff]  }
  0xbc   :  { %2606 = vmatpush1.bf16.msra.mxu0 %v3945_v59  ;;  %2268 = vmatprep.subr.bf16.mxu1 %v3950_v60  ;;  %v4041_v59 = vld [vmem:[%s5293_s0 + $0x1f0] ss:$56 sps:$4 sm:$0xff]   ;;  %v4044_v60 = vld [vmem:[%s5293_s0 + $0xa4] ss:$56 sps:$4 sm:$0xff]  }
  0xbd   :  { %2607 = vmatprep.subr.bf16.mxu0 %v3953_v61  ;;  %2270 = vmatprep.mubr.bf16.mxu1 %v3956_v62  ;;  %v4046_v61 = vld [vmem:[%s5293_s0 + $0x264] ss:$56 sps:$4 sm:$0xff]   ;;  %v4048_v62 = vld [vmem:[%s5293_s0 + $0xa0] ss:$56 sps:$4 sm:$0xff]  }
  0xbe   :  { %2609 = vmatprep.mubr.bf16.mxu0 %v3959_v63  ;;  %v4049_v63 = vld [vmem:[%s5293_s0 + $0x260] ss:$56 sps:$4 sm:$0xff]  }
  0xbf   :  { %2269 = vmatpush1.bf16.msra.mxu1 %v3948_v0  ;;  %v4050_v0 = vld [vmem:[%s5293_s0 + $0x114] ss:$56 sps:$4 sm:$0xff]  }
  0xc0   :  { %2608 = vmatpush1.bf16.msra.mxu0 %v3951_v1  ;;  %3322 = vmatprep.subr.bf16.mxu1 %v3962_v2  ;;  %v4052_v1 = vld [vmem:[%s5293_s0 + $0x2d4] ss:$56 sps:$4 sm:$0xff]  }
  0xc1   :  { %2690 = vmatprep.subr.bf16.mxu0 %v3962_v2  ;;  %v4054_v2 = vld [vmem:[%s5293_s0 + $0x110] ss:$56 sps:$4 sm:$0xff]  }
  0xc2   :  { %2271 = vmatmul.mubr.bf16.vlgmr.msra.gmra.mrb[0].mxu1 %v3954_v3  ;;  %v4055_v3 = vld [vmem:[%s5293_s0 + $0x2d0] ss:$56 sps:$4 sm:$0xff]  }
  0xc3   :  { %2610 = vmatmul.mubr.bf16.vlgmr.msra.gmra.mrb[0].mxu0 %v3957_v4  ;;  %3334 = vmatpush1.bf16.msra.mxu1 %v3960_v5  ;;  %v4056_v4 = vld [vmem:[%s5293_s0 + $0x184] ss:$56 sps:$4 sm:$0xff]  }
  0xc4   :  { %2691 = vmatpush1.bf16.msra.mxu0 %v3960_v5  ;;  %3323 = vmatprep.subr.bf16.mxu1 %v3965_v6  ;;  %v4058_v5 = vld [vmem:[%s5293_s0 + $0x344] ss:$56 sps:$4 sm:$0xff]  }
  0xc5   :  { %2692 = vmatprep.subr.bf16.mxu0 %v3965_v6  ;;  %2280 = vmatprep.mubr.bf16.mxu1 %v3966_v7  ;;  %v4060_v6 = vld [vmem:[%s5293_s0 + $0x180] ss:$56 sps:$4 sm:$0xff]  }
  0xc6   :  { %2619 = vmatprep.mubr.bf16.mxu0 %v3968_v8  ;;  %v4061_v7 = vld [vmem:[%s5293_s0 + $0x340] ss:$56 sps:$4 sm:$0xff]  }
  0xc7   :  { %3335 = vmatpush1.bf16.msra.mxu1 %v3963_v9 }
  0xc8   :  { %2693 = vmatpush1.bf16.msra.mxu0 %v3963_v9  ;;  %3324 = vmatprep.subr.bf16.mxu1 %v3974_v10 }
  0xc9   :  { %2694 = vmatprep.subr.bf16.mxu0 %v3974_v10 }
  0xca   :  { %2281 = vmatmul.mubr.bf16.gmra.mrb[4].mxu1 %v3970_v11 }
  0xcb   :  { %2620 = vmatmul.mubr.bf16.gmra.mrb[4].mxu0 %v3971_v12  ;;  %3336 = vmatpush1.bf16.msra.mxu1 %v3972_v13 }
  0xcc   :  { %2695 = vmatpush1.bf16.msra.mxu0 %v3972_v13  ;;  %2290 = vmatprep.mubr.bf16.mxu1 %v3975_v14 }
  0xcd   :  { %2629 = vmatprep.mubr.bf16.mxu0 %v3977_v15  ;;  %2696 = vmatprep.subr.bf16.mxu0 %v3983_v16 }
  0xce   :  { %3325 = vmatprep.subr.bf16.mxu1 %v3983_v16 }
  0xcf   :  { %3337 = vmatpush1.bf16.msra.mxu1 %v3981_v17 }
  0xd0   :  { %2697 = vmatpush1.bf16.msra.mxu0 %v3981_v17  ;;  %3326 = vmatprep.subr.bf16.mxu1 %v3986_v18 }
  0xd1   :  { %2698 = vmatprep.subr.bf16.mxu0 %v3986_v18 }
  0xd2   :  { %2291 = vmatmul.mubr.bf16.gmra.mrb[8].mxu1 %v3979_v19  ;;  %v345_v19 = vlaneseq }
  0xd3   :  { %2630 = vmatmul.mubr.bf16.gmra.mrb[8].mxu0 %v3980_v20  ;;  %2300 = vmatprep.mubr.bf16.mxu1 %v3987_v21 }
  0xd4   :  { %2639 = vmatprep.mubr.bf16.mxu0 %v3989_v22  ;;  %2699 = vmatpush1.bf16.msra.mxu0 %v3984_v23  ;;  %v346_v21 = vshrl.u32 %v345_v19, 7 }
  0xd5   :  { %3338 = vmatpush1.bf16.msra.mxu1 %v3984_v23  ;;  %2700 = vmatprep.subr.bf16.mxu0 %v3995_v24 }
  0xd6   :  { %3327 = vmatprep.subr.bf16.mxu1 %v3995_v24 }
  0xd8   :  { %2701 = vmatpush1.bf16.msra.mxu0 %v3993_v25 }
  0xd9   :  { %3339 = vmatpush1.bf16.msra.mxu1 %v3993_v25  ;;  %2702 = vmatprep.subr.bf16.mxu0 %v4004_v26  ;;  %v347_v25 = vsub.s32 0, %v346_v21 }
  0xda   :  { %3328 = vmatprep.subr.bf16.mxu1 %v4004_v26  ;;  %2301 = vmatmul.mubr.bf16.gmra.mrb[12].mxu1 %v3991_v27  ;;  %v343_v27 = vld [vmem:[%s5294_s2] sm:$0x3] }
  0xdb   :  { %2640 = vmatmul.mubr.bf16.gmra.mrb[12].mxu0 %v3992_v28  ;;  %2310 = vmatprep.mubr.bf16.mxu1 %v3996_v29  ;;  %v351_v28 = vsub.s32 1, %v346_v21  ;;  %v5109_v29 = vrot.slane %v343_v27, %v347_v25 }
  0xdc   :  { %2649 = vmatprep.mubr.bf16.mxu0 %v3998_v30  ;;  %2703 = vmatpush1.bf16.msra.mxu0 %v4002_v31 }
  0xdd   :  { %3340 = vmatpush1.bf16.msra.mxu1 %v4002_v31  ;;  %2704 = vmatprep.subr.bf16.mxu0 %v4007_v32  ;;  %v5111_v30 = vrot.slane %v343_v27, %v351_v28 }
  0xde   :  { %3329 = vmatprep.subr.bf16.mxu1 %v4007_v32 }
  0xe0   :  { %2705 = vmatpush1.bf16.msra.mxu0 %v4005_v33 }
  0xe1   :  { %3341 = vmatpush1.bf16.msra.mxu1 %v4005_v33  ;;  %2706 = vmatprep.subr.bf16.mxu0 %v4016_v34 }
  0xe2   :  { %3330 = vmatprep.subr.bf16.mxu1 %v4016_v34  ;;  %2311 = vmatmul.mubr.bf16.gmra.mrb[16].mxu1 %v4000_v35 }
  0xe3   :  { %2650 = vmatmul.mubr.bf16.gmra.mrb[16].mxu0 %v4001_v36  ;;  %2320 = vmatprep.mubr.bf16.mxu1 %v4008_v37 }
  0xe4   :  { %2659 = vmatprep.mubr.bf16.mxu0 %v4010_v38  ;;  %2707 = vmatpush1.bf16.msra.mxu0 %v4014_v39 }
  0xe5   :  { %3342 = vmatpush1.bf16.msra.mxu1 %v4014_v39  ;;  %2708 = vmatprep.subr.bf16.mxu0 %v4025_v40 }
  0xe6   :  { %3331 = vmatprep.subr.bf16.mxu1 %v4025_v40 }
  0xe8   :  { %2709 = vmatpush1.bf16.msra.mxu0 %v4023_v41 }
  0xe9   :  { %3343 = vmatpush1.bf16.msra.mxu1 %v4023_v41  ;;  %2710 = vmatprep.subr.bf16.mxu0 %v4028_v42 }
  0xea   :  { %3332 = vmatprep.subr.bf16.mxu1 %v4028_v42  ;;  %2321 = vmatmul.mubr.bf16.gmra.mrb[20].mxu1 %v4012_v43 }
  0xeb   :  { %2660 = vmatmul.mubr.bf16.gmra.mrb[20].mxu0 %v4013_v44  ;;  %2330 = vmatprep.mubr.bf16.mxu1 %v4017_v45 }
  0xec   :  { %2669 = vmatprep.mubr.bf16.mxu0 %v4019_v46  ;;  %2711 = vmatpush1.bf16.msra.mxu0 %v4026_v47 }
  0xed   :  { %3344 = vmatpush1.bf16.msra.mxu1 %v4026_v47  ;;  %2712 = vmatprep.subr.bf16.mxu0 %v4037_v48 }
  0xee   :  { %3333 = vmatprep.subr.bf16.mxu1 %v4037_v48 }
  0xf0   :  { %2713 = vmatpush1.bf16.msra.mxu0 %v4035_v49 }
  0xf1   :  { %3345 = vmatpush1.bf16.msra.mxu1 %v4035_v49 }
  0xf2   :  { %2331 = vmatmul.mubr.bf16.gmra.mrb[24].mxu1 %v4021_v50 }
  0xf3   :  { %2670 = vmatmul.mubr.bf16.gmra.mrb[24].mxu0 %v4022_v51  ;;  %2340 = vmatprep.mubr.bf16.mxu1 %v4029_v52 }
  0xf4   :  { %2679 = vmatprep.mubr.bf16.mxu0 %v4031_v53 }
  0xfa   :  { %2341 = vmatmul.mubr.bf16.gmra.mrb[28].mxu1 %v4033_v54 }
  0xfb   :  { %2680 = vmatmul.mubr.bf16.gmra.mrb[28].mxu0 %v4034_v55  ;;  %3286 = vmatprep.mubr.msk.bf16.mxu1 %vm1987_vm0, %v4043_v57 }
  0xfc   :  { %3282 = vmatprep.mubr.msk.bf16.mxu0 %vm1987_vm0, %v4040_v56 }
 0x102   :  { %2763 = vmatmul.mubr.bf16.vlgmr.msra.gmra.mrb[32].mxu1 %v4041_v59 }
 0x103   :  { %2723 = vmatmul.mubr.bf16.vlgmr.msra.gmra.mrb[0].mxu0 %v4038_v58  ;;  %3287 = vmatprep.mubr.msk.bf16.mxu1 %vm1987_vm0, %v4046_v61 }
 0x104   :  { %3283 = vmatprep.mubr.msk.bf16.mxu0 %vm1987_vm0, %v4044_v60 }
 0x10a   :  { %2773 = vmatmul.mubr.bf16.gmra.mrb[36].mxu1 %v4049_v63 }
 0x10b   :  { %2733 = vmatmul.mubr.bf16.gmra.mrb[4].mxu0 %v4048_v62  ;;  %3288 = vmatprep.mubr.msk.bf16.mxu1 %vm1987_vm0, %v4052_v1 }
 0x10c   :  { %3284 = vmatprep.mubr.msk.bf16.mxu0 %vm1987_vm0, %v4050_v0 }
 0x112   :  { %2783 = vmatmul.mubr.bf16.gmra.mrb[40].mxu1 %v4055_v3 }
 0x113   :  { %2743 = vmatmul.mubr.bf16.gmra.mrb[8].mxu0 %v4054_v2  ;;  %3289 = vmatprep.mubr.msk.bf16.mxu1 %vm1987_vm0, %v4058_v5 }
 0x114   :  { %3285 = vmatprep.mubr.msk.bf16.mxu0 %vm1987_vm0, %v4056_v4 }
 0x11a   :  { %2793 = vmatmul.mubr.bf16.gmra.mrb[44].mxu1 %v4061_v7 }
 0x11b   :  { %2753 = vmatmul.mubr.bf16.gmra.mrb[12].mxu0 %v4060_v6 }
 0x195   :  { %v5074_v8 = vpop.f32.mrb[0].mxu1 }
 0x196   :  { %v5076_v9 = vpop.f32.mrb[1].mxu1 }
 0x197   :  { %v5078_v10 = vpop.f32.mrb[2].mxu1 }
 0x198   :  { %v5080_v11 = vpop.f32.mrb[3].mxu1 }
 0x19d   :  { %v5082_v12 = vpop.f32.mrb[4].mxu1 }
 0x19e   :  { %v5084_v13 = vpop.f32.mrb[5].mxu1 }
 0x19f   :  { %v5086_v14 = vpop.f32.mrb[6].mxu1 }
 0x1a0   :  { %v5088_v15 = vpop.f32.mrb[7].mxu1 }
 0x1a5   :  { %v5090_v16 = vpop.f32.mrb[8].mxu1 }
 0x1a6   :  { %v5092_v17 = vpop.f32.mrb[9].mxu1 }
 0x1a7   :  { %v5094_v18 = vpop.f32.mrb[10].mxu1 }
 0x1a8   :  { %v5096_v20 = vpop.f32.mrb[11].mxu1 }
 0x1ad   :  { %v5098_v22 = vpop.f32.mrb[12].mxu1 }
 0x1ae   :  { %v5100_v23 = vpop.f32.mrb[13].mxu1 }
 0x1af   :  { %v5102_v24 = vpop.f32.mrb[14].mxu1 }
 0x1b0   :  { %v5104_v26 = vpop.f32.mrb[15].mxu1 }
 0x1b5   :  { %v2312_v31 = vpop.f32.mrb[16].mxu1 }
 0x1b6   :  { %v2651_v32 = vpop.f32.mrb[16].mxu0  ;;  %v3378_v33 = vadd.f32 %v2312_v31, %v5109_v29  ;;  %v2314_v34 = vpop.f32.mrb[17].mxu1 }
 0x1b7   :  { %v2653_v35 = vpop.f32.mrb[17].mxu0  ;;  %v3381_v36 = vadd.f32 %v2314_v34, %v5111_v30  ;;  %v2316_v37 = vpop.f32.mrb[18].mxu1 }
 0x1b8   :  { %v2655_v38 = vpop.f32.mrb[18].mxu0  ;;  %v3379_v39 = vadd.f32 %v3378_v33, %v2651_v32  ;;  %v3384_v40 = vadd.f32 %v2316_v37, %v5109_v29  ;;  %v2318_v41 = vpop.f32.mrb[19].mxu1 }
 0x1b9   :  { %v2657_v42 = vpop.f32.mrb[19].mxu0  ;;  %v5116_v43 = vadd.f32 %v3381_v36, %v2653_v35  ;;  %v3387_v44 = vadd.f32 %v2318_v41, %v5111_v30 }
 0x1ba   :  { %v5119_v45 = vadd.f32 %v3384_v40, %v2655_v38 }
 0x1bb   :  { %v5121_v46 = vadd.f32 %v3387_v44, %v2657_v42 }
 0x1bd   :  { %v2322_v47 = vpop.f32.mrb[20].mxu1 }
 0x1be   :  { %v2661_v48 = vpop.f32.mrb[20].mxu0  ;;  %v3390_v49 = vadd.f32 %v2322_v47, %v5109_v29  ;;  %v2324_v50 = vpop.f32.mrb[21].mxu1 }
 0x1bf   :  { %v2663_v51 = vpop.f32.mrb[21].mxu0  ;;  %v3393_v52 = vadd.f32 %v2324_v50, %v5111_v30  ;;  %v2326_v53 = vpop.f32.mrb[22].mxu1 }
 0x1c0   :  { %v2665_v54 = vpop.f32.mrb[22].mxu0  ;;  %v5125_v55 = vadd.f32 %v3390_v49, %v2661_v48  ;;  %v3396_v56 = vadd.f32 %v2326_v53, %v5109_v29  ;;  %v2328_v57 = vpop.f32.mrb[23].mxu1  ;;  %v3346_v53 = vadd.f32 %v5074_v8, %v5109_v29 }
 0x1c1   :  { %v2667_v58 = vpop.f32.mrb[23].mxu0  ;;  %v5128_v59 = vadd.f32 %v3393_v52, %v2663_v51  ;;  %v3399_v60 = vadd.f32 %v2328_v57, %v5111_v30 }
 0x1c2   :  { %v5131_v61 = vadd.f32 %v3396_v56, %v2665_v54  ;;  %v3348_v54 = vadd.f32 %v5076_v9, %v5111_v30 }
 0x1c3   :  { %v5133_v62 = vadd.f32 %v3399_v60, %v2667_v58  ;;  %v3350_v58 = vadd.f32 %v5078_v10, %v5109_v29 }
 0x1c5   :  { %v2332_v63 = vpop.f32.mrb[24].mxu1 }
 0x1c6   :  { %v2671_v0 = vpop.f32.mrb[24].mxu0  ;;  %v3402_v1 = vadd.f32 %v2332_v63, %v5109_v29  ;;  %v2334_v2 = vpop.f32.mrb[25].mxu1 }
 0x1c7   :  { %v2673_v3 = vpop.f32.mrb[25].mxu0  ;;  %v3405_v4 = vadd.f32 %v2334_v2, %v5111_v30  ;;  %v2336_v5 = vpop.f32.mrb[26].mxu1  ;;  %v3352_v2 = vadd.f32 %v5080_v11, %v5111_v30 }
 0x1c8   :  { %v2675_v6 = vpop.f32.mrb[26].mxu0  ;;  %v5137_v7 = vadd.f32 %v3402_v1, %v2671_v0  ;;  %v3408_v19 = vadd.f32 %v2336_v5, %v5109_v29  ;;  %v2338_v21 = vpop.f32.mrb[27].mxu1 }
 0x1c9   :  { %v2677_v25 = vpop.f32.mrb[27].mxu0  ;;  %v5140_v27 = vadd.f32 %v3405_v4, %v2673_v3  ;;  %v3411_v28 = vadd.f32 %v2338_v21, %v5111_v30 }
 0x1ca   :  { %v5143_v31 = vadd.f32 %v3408_v19, %v2675_v6 }
 0x1cb   :  { %v5145_v32 = vadd.f32 %v3411_v28, %v2677_v25 }
 0x1cd   :  { %v2342_v33 = vpop.f32.mrb[28].mxu1 }
 0x1ce   :  { %v2681_v34 = vpop.f32.mrb[28].mxu0  ;;  %v3414_v35 = vadd.f32 %v2342_v33, %v5109_v29  ;;  %v2344_v36 = vpop.f32.mrb[29].mxu1 }
 0x1cf   :  { %v2683_v37 = vpop.f32.mrb[29].mxu0  ;;  %v3417_v38 = vadd.f32 %v2344_v36, %v5111_v30  ;;  %v2346_v40 = vpop.f32.mrb[30].mxu1 }
 0x1d0   :  { %v2685_v41 = vpop.f32.mrb[30].mxu0  ;;  %v5149_v42 = vadd.f32 %v3414_v35, %v2681_v34  ;;  %v3420_v44 = vadd.f32 %v2346_v40, %v5109_v29  ;;  %v2348_v47 = vpop.f32.mrb[31].mxu1 }
 0x1d1   :  { %v2687_v48 = vpop.f32.mrb[31].mxu0  ;;  %v5152_v49 = vadd.f32 %v3417_v38, %v2683_v37  ;;  %v3423_v50 = vadd.f32 %v2348_v47, %v5111_v30 }
 0x1d2   :  { %v5155_v51 = vadd.f32 %v3420_v44, %v2685_v41  ;;  %v3356_v41 = vadd.f32 %v5084_v13, %v5111_v30 }
 0x1d3   :  { %v5157_v52 = vadd.f32 %v3423_v50, %v2687_v48 }
 0x1d5   :  { %v2764_v57 = vpop.f32.mrb[32].mxu1 }
 0x1d6   :  { %v2724_v56 = vpop.f32.mrb[0].mxu0  ;;  %v3380_v63 = vadd.f32 %v3379_v39, %v2764_v57  ;;  %v2766_v1 = vpop.f32.mrb[33].mxu1 }
 0x1d7   :  { %v3347_v60 = vadd.f32 %v3346_v53, %v2724_v56  ;;  %v2726_v0 = vpop.f32.mrb[1].mxu0  ;;  %v3383_v8 = vadd.f32 %v5116_v43, %v2766_v1  ;;  %v2768_v5 = vpop.f32.mrb[34].mxu1  ;;  %v3360_v56 = vadd.f32 %v5088_v15, %v5111_v30 }
 0x1d8   :  { %v3349_v3 = vadd.f32 %v3348_v54, %v2726_v0  ;;  %v2728_v4 = vpop.f32.mrb[2].mxu0  ;;  %v2819_v6 = vmax.f32 %v3380_v63, 0.0  ;;  %v3386_v21 = vadd.f32 %v5119_v45, %v2768_v5  ;;  %v2770_v25 = vpop.f32.mrb[35].mxu1  ;;  %v3354_v45 = vadd.f32 %v5082_v12, %v5109_v29 }
 0x1d9   :  { %v2803_v9 = vmax.f32 %v3347_v60, 0.0  ;;  %v3351_v19 = vadd.f32 %v3350_v58, %v2728_v4  ;;  %v2730_v10 = vpop.f32.mrb[3].mxu0  ;;  %v2820_v28 = vmax.f32 %v3383_v8, 0.0  ;;  %v3389_v34 = vadd.f32 %v5121_v46, %v2770_v25 }
 0x1da   :  { %v2804_v39 = vmax.f32 %v3349_v3, 0.0  ;;  %v3353_v33 = vadd.f32 %v3352_v2, %v2730_v10  ;;  %v2821_v35 = vmax.f32 %v3386_v21, 0.0  ;;  %v3358_v12 = vadd.f32 %v5086_v14, %v5109_v29 }
 0x1db   :  { %v2805_v43 = vmax.f32 %v3351_v19, 0.0  ;;  %v3314_v37 = vpack.c.bf16 %v2820_v28, %v2819_v6  ;;  %v2822_v40 = vmax.f32 %v3389_v34, 0.0  ;;  %v3362_v25 = vadd.f32 %v5090_v16, %v5109_v29 }
 0x1dc   :  { %v3306_v36 = vpack.c.bf16 %v2804_v39, %v2803_v9  ;;  %v2806_v38 = vmax.f32 %v3353_v33, 0.0  ;;  %v3364_v39 = vadd.f32 %v5092_v17, %v5111_v30  ;;  %v3366_v16 = vadd.f32 %v5094_v18, %v5109_v29 }
 0x1dd   :  { %2942 = vst.msk [vmem:[%s5295_s3 + $0x40] sm:$0xff] %vm5172_vm3, %v3314_v37  ;;  %v3315_v44 = vpack.c.bf16 %v2822_v40, %v2821_v35  ;;  %v2774_v48 = vpop.f32.mrb[36].mxu1 }
 0x1de   :  { %2934 = vst.msk [vmem:[%s5295_s3] sm:$0xff] %vm5172_vm3, %v3306_v36  ;;  %v3307_v46 = vpack.c.bf16 %v2806_v38, %v2805_v43  ;;  %v2734_v47 = vpop.f32.mrb[4].mxu0  ;;  %v3392_v50 = vadd.f32 %v5125_v55, %v2774_v48  ;;  %v2776_v54 = vpop.f32.mrb[37].mxu1  ;;  %v3368_v36 = vadd.f32 %v5096_v20, %v5111_v30 }
 0x1df   :  { %v3355_v13 = vadd.f32 %v3354_v45, %v2734_v47  ;;  %v2736_v53 = vpop.f32.mrb[5].mxu0  ;;  %2943 = vst.msk [vmem:[%s5295_s3 + $0x48] sm:$0xff] %vm5172_vm3, %v3315_v44  ;;  %v3395_v55 = vadd.f32 %v5128_v59, %v2776_v54  ;;  %v2778_v58 = vpop.f32.mrb[38].mxu1 }
 0x1e0   :  { %2935 = vst.msk [vmem:[%s5295_s3 + $0x8] sm:$0xff] %vm5172_vm3, %v3307_v46  ;;  %v3357_v14 = vadd.f32 %v3356_v41, %v2736_v53  ;;  %v2738_v57 = vpop.f32.mrb[6].mxu0  ;;  %v2823_v63 = vmax.f32 %v3392_v50, 0.0  ;;  %v3398_v0 = vadd.f32 %v5131_v61, %v2778_v58  ;;  %v2780_v2 = vpop.f32.mrb[39].mxu1 }
 0x1e1   :  { %v2807_v60 = vmax.f32 %v3355_v13, 0.0  ;;  %v3359_v15 = vadd.f32 %v3358_v12, %v2738_v57  ;;  %v2740_v1 = vpop.f32.mrb[7].mxu0  ;;  %v2824_v8 = vmax.f32 %v3395_v55, 0.0  ;;  %v3401_v5 = vadd.f32 %v5133_v62, %v2780_v2 }
 0x1e2   :  { %v2808_v3 = vmax.f32 %v3357_v14, 0.0  ;;  %v3361_v4 = vadd.f32 %v3360_v56, %v2740_v1  ;;  %v2825_v6 = vmax.f32 %v3398_v0, 0.0  ;;  %v3370_v55 = vadd.f32 %v5098_v22, %v5109_v29 }
 0x1e3   :  { %v2809_v9 = vmax.f32 %v3359_v15, 0.0  ;;  %v3316_v21 = vpack.c.bf16 %v2824_v8, %v2823_v63  ;;  %v2826_v59 = vmax.f32 %v3401_v5, 0.0  ;;  %v3372_v57 = vadd.f32 %v5100_v23, %v5111_v30 }
 0x1e4   :  { %v3308_v19 = vpack.c.bf16 %v2808_v3, %v2807_v60  ;;  %v2810_v10 = vmax.f32 %v3361_v4, 0.0  ;;  %v3374_v22 = vadd.f32 %v5102_v24, %v5109_v29  ;;  %v3376_v1 = vadd.f32 %v5104_v26, %v5111_v30 }
 0x1e5   :  { %2944 = vst.msk [vmem:[%s5295_s3 + $0x50] sm:$0xff] %vm5172_vm3, %v3316_v21  ;;  %v3317_v62 = vpack.c.bf16 %v2826_v59, %v2825_v6  ;;  %v2784_v33 = vpop.f32.mrb[40].mxu1 }
 0x1e6   :  { %2936 = vst.msk [vmem:[%s5295_s3 + $0x10] sm:$0xff] %vm5172_vm3, %v3308_v19  ;;  %v3309_v61 = vpack.c.bf16 %v2810_v10, %v2809_v9  ;;  %v2744_v28 = vpop.f32.mrb[8].mxu0  ;;  %v3404_v34 = vadd.f32 %v5137_v7, %v2784_v33  ;;  %v2786_v35 = vpop.f32.mrb[41].mxu1 }
 0x1e7   :  { %v3363_v17 = vadd.f32 %v3362_v25, %v2744_v28  ;;  %v2746_v43 = vpop.f32.mrb[9].mxu0  ;;  %2945 = vst.msk [vmem:[%s5295_s3 + $0x58] sm:$0xff] %vm5172_vm3, %v3317_v62  ;;  %v3407_v7 = vadd.f32 %v5140_v27, %v2786_v35  ;;  %v2788_v38 = vpop.f32.mrb[42].mxu1 }
 0x1e8   :  { %2937 = vst.msk [vmem:[%s5295_s3 + $0x18] sm:$0xff] %vm5172_vm3, %v3309_v61  ;;  %v3365_v18 = vadd.f32 %v3364_v39, %v2746_v43  ;;  %v2748_v37 = vpop.f32.mrb[10].mxu0  ;;  %v2827_v45 = vmax.f32 %v3404_v34, 0.0  ;;  %v3410_v41 = vadd.f32 %v5143_v31, %v2788_v38  ;;  %v2790_v44 = vpop.f32.mrb[43].mxu1 }
 0x1e9   :  { %v2811_v40 = vmax.f32 %v3363_v17, 0.0  ;;  %v3367_v20 = vadd.f32 %v3366_v16, %v2748_v37  ;;  %v2750_v46 = vpop.f32.mrb[11].mxu0  ;;  %v2828_v48 = vmax.f32 %v3407_v7, 0.0  ;;  %v3413_v13 = vadd.f32 %v5145_v32, %v2790_v44 }
 0x1ea   :  { %v2812_v47 = vmax.f32 %v3365_v18, 0.0  ;;  %v3369_v12 = vadd.f32 %v3368_v36, %v2750_v46  ;;  %v2829_v53 = vmax.f32 %v3410_v41, 0.0 }
 0x1eb   :  { %v2813_v50 = vmax.f32 %v3367_v20, 0.0  ;;  %v3318_v56 = vpack.c.bf16 %v2828_v48, %v2827_v45  ;;  %v2830_v27 = vmax.f32 %v3413_v13, 0.0 }
 0x1ec   :  { %v3310_v54 = vpack.c.bf16 %v2812_v47, %v2811_v40  ;;  %v2814_v14 = vmax.f32 %v3369_v12, 0.0 }
 0x1ed   :  { %2946 = vst.msk [vmem:[%s5295_s3 + $0x60] sm:$0xff] %vm5172_vm3, %v3318_v56  ;;  %v3319_v32 = vpack.c.bf16 %v2830_v27, %v2829_v53  ;;  %v2794_v60 = vpop.f32.mrb[44].mxu1 }
 0x1ee   :  { %2938 = vst.msk [vmem:[%s5295_s3 + $0x20] sm:$0xff] %vm5172_vm3, %v3310_v54  ;;  %v3311_v31 = vpack.c.bf16 %v2814_v14, %v2813_v50  ;;  %v2754_v58 = vpop.f32.mrb[12].mxu0  ;;  %v3416_v63 = vadd.f32 %v5149_v42, %v2794_v60  ;;  %v2796_v0 = vpop.f32.mrb[45].mxu1 }
 0x1ef   :  { %v3371_v23 = vadd.f32 %v3370_v55, %v2754_v58  ;;  %v2756_v15 = vpop.f32.mrb[13].mxu0  ;;  %2947 = vst.msk [vmem:[%s5295_s3 + $0x68] sm:$0xff] %vm5172_vm3, %v3319_v32  ;;  %v3419_v29 = vadd.f32 %v5152_v49, %v2796_v0  ;;  %v2798_v2 = vpop.f32.mrb[46].mxu1 }
 0x1f0   :  { %2939 = vst.msk [vmem:[%s5295_s3 + $0x28] sm:$0xff] %vm5172_vm3, %v3311_v31  ;;  %v3373_v24 = vadd.f32 %v3372_v57, %v2756_v15  ;;  %v2758_v42 = vpop.f32.mrb[14].mxu0  ;;  %v2831_v8 = vmax.f32 %v3416_v63, 0.0  ;;  %v3422_v30 = vadd.f32 %v5155_v51, %v2798_v2  ;;  %v2800_v5 = vpop.f32.mrb[47].mxu1 }
 0x1f1   :  { %v2815_v3 = vmax.f32 %v3371_v23, 0.0  ;;  %v3375_v26 = vadd.f32 %v3374_v22, %v2758_v42  ;;  %v2760_v4 = vpop.f32.mrb[15].mxu0  ;;  %v2832_v6 = vmax.f32 %v3419_v29, 0.0  ;;  %v3425_v21 = vadd.f32 %v5157_v52, %v2800_v5 }
 0x1f2   :  { %v2816_v9 = vmax.f32 %v3373_v24, 0.0  ;;  %v3377_v19 = vadd.f32 %v3376_v1, %v2760_v4  ;;  %v2833_v59 = vmax.f32 %v3422_v30, 0.0 }
 0x1f3   :  { %v2817_v10 = vmax.f32 %v3375_v26, 0.0  ;;  %v3320_v39 = vpack.c.bf16 %v2832_v6, %v2831_v8  ;;  %v2834_v49 = vmax.f32 %v3425_v21, 0.0 }
 0x1f4   :  { %v3312_v25 = vpack.c.bf16 %v2816_v9, %v2815_v3  ;;  %v2818_v61 = vmax.f32 %v3377_v19, 0.0 }
 0x1f5   :  { %2948 = vst.msk [vmem:[%s5295_s3 + $0x70] sm:$0xff] %vm5172_vm3, %v3320_v39  ;;  %v3321_v52 = vpack.c.bf16 %v2834_v49, %v2833_v59 }
 0x1f6   :  { %2940 = vst.msk [vmem:[%s5295_s3 + $0x30] sm:$0xff] %vm5172_vm3, %v3312_v25  ;;  %v3313_v51 = vpack.c.bf16 %v2818_v61, %v2817_v10 }
 0x1f7   :  { %2949 = vst.msk [vmem:[%s5295_s3 + $0x78] sm:$0xff] %vm5172_vm3, %v3321_v52 }
 0x1f8   :  { %2941 = vst.msk [vmem:[%s5295_s3 + $0x38] sm:$0xff] %vm5172_vm3, %v3313_v51 }

// kernel: model_c_forward.17
= control target key start
LH: loop header
LB: loop body
LE: loop exit
PB: predicated region body
PF: predicated region fallthrough
CT: control target
= control target key end

     0   :  { %vm193_vm0 = vcmask 523264   ;;  %v45_v28 = vlaneseq  ;;  %vm285_vm1 = vcmask 1043456   ;;  %vm286_vm2 = vcmask 523268   ;;  %s521_s1 = inlined_call_operand.vmem [shape: bf16[192,192], index: 1, kind: input, shape index: {}]   ;;  %s522_s0 = inlined_call_operand.vmem [shape: bf16[32,192], index: 0, kind: input, shape index: {}]   ;;  %s523_s2 = inlined_call_operand.vmem [shape: f32[1,192], index: 2, kind: input, shape index: {}]   ;;  %s524_s3 = inlined_call_operand.vmem [shape: bf16[32,192], index: 3, kind: output, shape index: {}]  }
   0x1   :  { %v358_v0 = vld [vmem:[%s521_s1 + $0x4] ss:$8 sps:$4 sm:$0xff]   ;;  %v360_v1 = vld [vmem:[%s521_s1] ss:$8 sps:$4 sm:$0xff]   ;;  %v361_v2 = vld [vmem:[%s521_s1 + $0x14] ss:$8 sps:$4 sm:$0xff]  }
   0x2   :  { %200 = vmatprep.subr.bf16.mxu0 %v358_v0  ;;  %334 = vmatprep.subr.bf16.mxu1 %v358_v0  ;;  %v363_v3 = vld [vmem:[%s521_s1 + $0x10] ss:$8 sps:$4 sm:$0xff]   ;;  %v364_v4 = vld [vmem:[%s521_s1 + $0x24] ss:$8 sps:$4 sm:$0xff]   ;;  %v366_v5 = vld [vmem:[%s521_s1 + $0x20] ss:$8 sps:$4 sm:$0xff]  }
   0x3   :  { %201 = vmatpush1.bf16.msra.mxu0 %v360_v1  ;;  %346 = vmatpush1.bf16.msra.mxu1 %v360_v1  ;;  %v367_v6 = vld [vmem:[%s521_s1 + $0x34] ss:$8 sps:$4 sm:$0xff]   ;;  %v369_v7 = vld [vmem:[%s521_s1 + $0x30] ss:$8 sps:$4 sm:$0xff]   ;;  %v370_v8 = vld [vmem:[%s521_s1 + $0x44] ss:$8 sps:$4 sm:$0xff]  }
   0x4   :  { %202 = vmatprep.subr.bf16.mxu0 %v361_v2  ;;  %335 = vmatprep.subr.bf16.mxu1 %v361_v2  ;;  %v372_v9 = vld [vmem:[%s521_s1 + $0x40] ss:$8 sps:$4 sm:$0xff]   ;;  %v373_v10 = vld [vmem:[%s521_s1 + $0x54] ss:$8 sps:$4 sm:$0xff]   ;;  %v396_v11 = vld [vmem:[%s522_s0 + $0x4] ss:$8 sps:$4 sm:$0xff]  }
   0x5   :  { %v399_v12 = vld [vmem:[%s522_s0 + $0x14] ss:$8 sps:$4 sm:$0xff]   ;;  %v375_v13 = vld [vmem:[%s521_s1 + $0x50] ss:$8 sps:$4 sm:$0xff]   ;;  %v376_v14 = vld [vmem:[%s521_s1 + $0x64] ss:$8 sps:$4 sm:$0xff]   ;;  %324 = vmatprep.mubr.msk.bf16.mxu0 %vm193_vm0, %v396_v11 }
   0x6   :  { %325 = vmatprep.mubr.msk.bf16.mxu1 %vm193_vm0, %v399_v12  ;;  %v378_v15 = vld [vmem:[%s521_s1 + $0x60] ss:$8 sps:$4 sm:$0xff]   ;;  %v379_v16 = vld [vmem:[%s521_s1 + $0x74] ss:$8 sps:$4 sm:$0xff]   ;;  %v381_v17 = vld [vmem:[%s521_s1 + $0x70] ss:$8 sps:$4 sm:$0xff]  }
   0x7   :  { %203 = vmatpush1.bf16.msra.mxu0 %v363_v3  ;;  %347 = vmatpush1.bf16.msra.mxu1 %v363_v3  ;;  %v382_v18 = vld [vmem:[%s521_s1 + $0x84] ss:$8 sps:$4 sm:$0xff]   ;;  %v384_v19 = vld [vmem:[%s521_s1 + $0x80] ss:$8 sps:$4 sm:$0xff]   ;;  %v385_v20 = vld [vmem:[%s521_s1 + $0x94] ss:$8 sps:$4 sm:$0xff]  }
   0x8   :  { %204 = vmatprep.subr.bf16.mxu0 %v364_v4  ;;  %336 = vmatprep.subr.bf16.mxu1 %v364_v4  ;;  %v387_v21 = vld [vmem:[%s521_s1 + $0x90] ss:$8 sps:$4 sm:$0xff]   ;;  %v388_v22 = vld [vmem:[%s521_s1 + $0xa4] ss:$8 sps:$4 sm:$0xff]   ;;  %v390_v23 = vld [vmem:[%s521_s1 + $0xa0] ss:$8 sps:$4 sm:$0xff]  }
   0x9   :  { %v391_v24 = vld [vmem:[%s521_s1 + $0xb4] ss:$8 sps:$4 sm:$0xff]   ;;  %v393_v25 = vld [vmem:[%s521_s1 + $0xb0] ss:$8 sps:$4 sm:$0xff]   ;;  %v394_v26 = vld [vmem:[%s522_s0] ss:$8 sps:$4 sm:$0xff]  }
   0xa   :  { %v397_v27 = vld [vmem:[%s522_s0 + $0x10] ss:$8 sps:$4 sm:$0xff]   ;;  %v46_v29 = vshrl.u32 %v45_v28, 7  ;;  %v43_v31 = vld [vmem:[%s523_s2] sm:$0x3]  ;;  %vm287_vm3 = vmor %vm286_vm2, %vm285_vm1 }
   0xb   :  { %205 = vmatpush1.bf16.msra.mxu0 %v366_v5  ;;  %348 = vmatpush1.bf16.msra.mxu1 %v366_v5 }
   0xc   :  { %206 = vmatprep.subr.bf16.mxu0 %v367_v6  ;;  %337 = vmatprep.subr.bf16.mxu1 %v367_v6  ;;  %v47_v30 = vsub.s32 0, %v46_v29  ;;  %v51_v32 = vsub.s32 1, %v46_v29 }
   0xe   :  { %v48_v33 = vrot.slane %v43_v31, %v47_v30  ;;  %v52_v34 = vrot.slane %v43_v31, %v51_v32 }
   0xf   :  { %207 = vmatpush1.bf16.msra.mxu0 %v369_v7  ;;  %349 = vmatpush1.bf16.msra.mxu1 %v369_v7 }
  0x10   :  { %208 = vmatprep.subr.bf16.mxu0 %v370_v8  ;;  %338 = vmatprep.subr.bf16.mxu1 %v370_v8 }
  0x13   :  { %209 = vmatpush1.bf16.msra.mxu0 %v372_v9  ;;  %350 = vmatpush1.bf16.msra.mxu1 %v372_v9 }
  0x14   :  { %210 = vmatprep.subr.bf16.mxu0 %v373_v10  ;;  %339 = vmatprep.subr.bf16.mxu1 %v373_v10 }
  0x17   :  { %211 = vmatpush1.bf16.msra.mxu0 %v375_v13  ;;  %351 = vmatpush1.bf16.msra.mxu1 %v375_v13 }
  0x18   :  { %212 = vmatprep.subr.bf16.mxu0 %v376_v14  ;;  %340 = vmatprep.subr.bf16.mxu1 %v376_v14 }
  0x1b   :  { %213 = vmatpush1.bf16.msra.mxu0 %v378_v15  ;;  %352 = vmatpush1.bf16.msra.mxu1 %v378_v15 }
  0x1c   :  { %214 = vmatprep.subr.bf16.mxu0 %v379_v16  ;;  %341 = vmatprep.subr.bf16.mxu1 %v379_v16 }
  0x1f   :  { %215 = vmatpush1.bf16.msra.mxu0 %v381_v17  ;;  %353 = vmatpush1.bf16.msra.mxu1 %v381_v17 }
  0x20   :  { %216 = vmatprep.subr.bf16.mxu0 %v382_v18  ;;  %342 = vmatprep.subr.bf16.mxu1 %v382_v18 }
  0x23   :  { %217 = vmatpush1.bf16.msra.mxu0 %v384_v19  ;;  %354 = vmatpush1.bf16.msra.mxu1 %v384_v19 }
  0x24   :  { %218 = vmatprep.subr.bf16.mxu0 %v385_v20  ;;  %343 = vmatprep.subr.bf16.mxu1 %v385_v20 }
  0x27   :  { %219 = vmatpush1.bf16.msra.mxu0 %v387_v21  ;;  %355 = vmatpush1.bf16.msra.mxu1 %v387_v21 }
  0x28   :  { %220 = vmatprep.subr.bf16.mxu0 %v388_v22  ;;  %344 = vmatprep.subr.bf16.mxu1 %v388_v22 }
  0x2b   :  { %221 = vmatpush1.bf16.msra.mxu0 %v390_v23  ;;  %356 = vmatpush1.bf16.msra.mxu1 %v390_v23 }
  0x2c   :  { %222 = vmatprep.subr.bf16.mxu0 %v391_v24  ;;  %345 = vmatprep.subr.bf16.mxu1 %v391_v24 }
  0x2f   :  { %223 = vmatpush1.bf16.msra.mxu0 %v393_v25  ;;  %357 = vmatpush1.bf16.msra.mxu1 %v393_v25 }
  0x32   :  { %233 = vmatmul.mubr.bf16.vlgmr.msra.gmra.mrb[0].mxu0 %v394_v26  ;;  %243 = vmatmul.mubr.bf16.vlgmr.msra.gmra.mrb[0].mxu1 %v397_v27 }
 0x105   :  { %v234_v35 = vpop.f32.mrb[0].mxu0  ;;  %v244_v36 = vpop.f32.mrb[0].mxu1 }
 0x106   :  { %v235_v37 = vadd.f32 %v234_v35, %v48_v33  ;;  %v245_v38 = vadd.f32 %v244_v36, %v48_v33  ;;  %v236_v39 = vpop.f32.mrb[1].mxu0  ;;  %v246_v40 = vpop.f32.mrb[1].mxu1 }
 0x107   :  { %v237_v41 = vadd.f32 %v236_v39, %v52_v34  ;;  %v247_v42 = vadd.f32 %v246_v40, %v52_v34  ;;  %v238_v43 = vpop.f32.mrb[2].mxu0  ;;  %v248_v44 = vpop.f32.mrb[2].mxu1 }
 0x108   :  { %v253_v45 = vmax.f32 %v235_v37, 0.0  ;;  %v257_v46 = vmax.f32 %v245_v38, 0.0  ;;  %v239_v47 = vadd.f32 %v238_v43, %v48_v33  ;;  %v249_v48 = vadd.f32 %v248_v44, %v48_v33  ;;  %v240_v49 = vpop.f32.mrb[3].mxu0  ;;  %v250_v50 = vpop.f32.mrb[3].mxu1 }
 0x109   :  { %v254_v51 = vmax.f32 %v237_v41, 0.0  ;;  %v258_v52 = vmax.f32 %v247_v42, 0.0  ;;  %v241_v53 = vadd.f32 %v240_v49, %v52_v34  ;;  %v251_v54 = vadd.f32 %v250_v50, %v52_v34 }
 0x10a   :  { %v255_v55 = vmax.f32 %v239_v47, 0.0  ;;  %v259_v56 = vmax.f32 %v249_v48, 0.0 }
 0x10b   :  { %v330_v57 = vpack.c.bf16 %v254_v51, %v253_v45  ;;  %v332_v58 = vpack.c.bf16 %v258_v52, %v257_v46  ;;  %v256_v59 = vmax.f32 %v241_v53, 0.0  ;;  %v260_v60 = vmax.f32 %v251_v54, 0.0 }
 0x10d   :  { %288 = vst.msk [vmem:[%s524_s3] sm:$0xff] %vm287_vm3, %v330_v57  ;;  %290 = vst.msk [vmem:[%s524_s3 + $0x10] sm:$0xff] %vm287_vm3, %v332_v58  ;;  %v331_v61 = vpack.c.bf16 %v256_v59, %v255_v55  ;;  %v333_v62 = vpack.c.bf16 %v260_v60, %v259_v56 }
 0x10f   :  { %289 = vst.msk [vmem:[%s524_s3 + $0x8] sm:$0xff] %vm287_vm3, %v331_v61  ;;  %291 = vst.msk [vmem:[%s524_s3 + $0x18] sm:$0xff] %vm287_vm3, %v333_v62 }

// kernel: model_c_forward.18
= control target key start
LH: loop header
LB: loop body
LE: loop exit
PB: predicated region body
PF: predicated region fallthrough
CT: control target
= control target key end

     0   :  { %v305_v0 = vmov 0   ;;  %vm140_vm0 = vcmask 523264   ;;  %s407_s1 = inlined_call_operand.vmem [shape: bf16[192,128], index: 1, kind: input, shape index: {}]   ;;  %s408_s0 = inlined_call_operand.vmem [shape: bf16[32,192], index: 0, kind: input, shape index: {}]   ;;  %s409_s2 = inlined_call_operand.vmem [shape: f32[1,128], index: 2, kind: input, shape index: {}]   ;;  %s410_s3 = inlined_call_operand.vmem [shape: bf16[32,128], index: 3, kind: output, shape index: {}]  }
   0x1   :  { %147 = vmatprep.subr.bf16.mxu0 %v305_v0  ;;  %262 = vmatprep.subr.bf16.mxu1 %v305_v0  ;;  %v287_v1 = vld [vmem:[%s407_s1] sm:$0xff]   ;;  %v288_v2 = vld [vmem:[%s407_s1 + $0x8] sm:$0xff]   ;;  %v289_v3 = vld [vmem:[%s407_s1 + $0x10] sm:$0xff]  }
   0x2   :  { %148 = vmatpush1.bf16.msra.mxu0 %v287_v1  ;;  %274 = vmatpush1.bf16.msra.mxu1 %v287_v1  ;;  %v290_v4 = vld [vmem:[%s407_s1 + $0x18] sm:$0xff]   ;;  %v301_v5 = vld [vmem:[%s408_s0 + $0x4] ss:$8 sps:$4 sm:$0xff]   ;;  %v293_v9 = vld [vmem:[%s407_s1 + $0x30] sm:$0xff]  }
   0x3   :  { %149 = vmatprep.subr.bf16.mxu0 %v305_v0  ;;  %263 = vmatprep.subr.bf16.mxu1 %v305_v0  ;;  %v291_v6 = vld [vmem:[%s407_s1 + $0x20] sm:$0xff]   ;;  %v304_v7 = vld [vmem:[%s408_s0 + $0x14] ss:$8 sps:$4 sm:$0xff]   ;;  %v292_v8 = vld [vmem:[%s407_s1 + $0x28] sm:$0xff]  }
   0x4   :  { %241 = vmatprep.mubr.msk.bf16.mxu0 %vm140_vm0, %v301_v5  ;;  %242 = vmatprep.mubr.msk.bf16.mxu1 %vm140_vm0, %v304_v7  ;;  %v294_v10 = vld [vmem:[%s407_s1 + $0x38] sm:$0xff]   ;;  %v295_v11 = vld [vmem:[%s407_s1 + $0x40] sm:$0xff]   ;;  %v296_v12 = vld [vmem:[%s407_s1 + $0x48] sm:$0xff]  }
   0x5   :  { %v297_v13 = vld [vmem:[%s407_s1 + $0x50] sm:$0xff]   ;;  %v298_v14 = vld [vmem:[%s407_s1 + $0x58] sm:$0xff]   ;;  %v299_v15 = vld [vmem:[%s408_s0] ss:$8 sps:$4 sm:$0xff]  }
   0x6   :  { %150 = vmatpush1.bf16.msra.mxu0 %v288_v2  ;;  %275 = vmatpush1.bf16.msra.mxu1 %v288_v2  ;;  %v302_v16 = vld [vmem:[%s408_s0 + $0x10] ss:$8 sps:$4 sm:$0xff]   ;;  %v224_v17 = vld [vmem:[%s409_s2] ss:$0 sm:$0xff] }
   0x7   :  { %151 = vmatprep.subr.bf16.mxu0 %v305_v0  ;;  %264 = vmatprep.subr.bf16.mxu1 %v305_v0 }
   0xa   :  { %152 = vmatpush1.bf16.msra.mxu0 %v289_v3  ;;  %276 = vmatpush1.bf16.msra.mxu1 %v289_v3 }
   0xb   :  { %153 = vmatprep.subr.bf16.mxu0 %v305_v0  ;;  %265 = vmatprep.subr.bf16.mxu1 %v305_v0 }
   0xe   :  { %154 = vmatpush1.bf16.msra.mxu0 %v290_v4  ;;  %277 = vmatpush1.bf16.msra.mxu1 %v290_v4 }
   0xf   :  { %155 = vmatprep.subr.bf16.mxu0 %v305_v0  ;;  %266 = vmatprep.subr.bf16.mxu1 %v305_v0 }
  0x12   :  { %156 = vmatpush1.bf16.msra.mxu0 %v291_v6  ;;  %278 = vmatpush1.bf16.msra.mxu1 %v291_v6 }
  0x13   :  { %157 = vmatprep.subr.bf16.mxu0 %v305_v0  ;;  %267 = vmatprep.subr.bf16.mxu1 %v305_v0 }
  0x16   :  { %158 = vmatpush1.bf16.msra.mxu0 %v292_v8  ;;  %279 = vmatpush1.bf16.msra.mxu1 %v292_v8 }
  0x17   :  { %159 = vmatprep.subr.bf16.mxu0 %v305_v0  ;;  %268 = vmatprep.subr.bf16.mxu1 %v305_v0 }
  0x1a   :  { %160 = vmatpush1.bf16.msra.mxu0 %v293_v9  ;;  %280 = vmatpush1.bf16.msra.mxu1 %v293_v9 }
  0x1b   :  { %161 = vmatprep.subr.bf16.mxu0 %v305_v0  ;;  %269 = vmatprep.subr.bf16.mxu1 %v305_v0 }
  0x1e   :  { %162 = vmatpush1.bf16.msra.mxu0 %v294_v10  ;;  %281 = vmatpush1.bf16.msra.mxu1 %v294_v10 }
  0x1f   :  { %163 = vmatprep.subr.bf16.mxu0 %v305_v0  ;;  %270 = vmatprep.subr.bf16.mxu1 %v305_v0 }
  0x22   :  { %164 = vmatpush1.bf16.msra.mxu0 %v295_v11  ;;  %282 = vmatpush1.bf16.msra.mxu1 %v295_v11 }
  0x23   :  { %165 = vmatprep.subr.bf16.mxu0 %v305_v0  ;;  %271 = vmatprep.subr.bf16.mxu1 %v305_v0 }
  0x26   :  { %166 = vmatpush1.bf16.msra.mxu0 %v296_v12  ;;  %283 = vmatpush1.bf16.msra.mxu1 %v296_v12 }
  0x27   :  { %167 = vmatprep.subr.bf16.mxu0 %v305_v0  ;;  %272 = vmatprep.subr.bf16.mxu1 %v305_v0 }
  0x2a   :  { %168 = vmatpush1.bf16.msra.mxu0 %v297_v13  ;;  %284 = vmatpush1.bf16.msra.mxu1 %v297_v13 }
  0x2b   :  { %169 = vmatprep.subr.bf16.mxu0 %v305_v0  ;;  %273 = vmatprep.subr.bf16.mxu1 %v305_v0 }
  0x2e   :  { %170 = vmatpush1.bf16.msra.mxu0 %v298_v14  ;;  %285 = vmatpush1.bf16.msra.mxu1 %v298_v14 }
  0x31   :  { %180 = vmatmul.mubr.bf16.vlgmr.msra.gmra.mrb[0].mxu0 %v299_v15  ;;  %188 = vmatmul.mubr.bf16.vlgmr.msra.gmra.mrb[0].mxu1 %v302_v16 }
 0x104   :  { %v181_v18 = vpop.f32.mrb[0].mxu0  ;;  %v189_v19 = vpop.f32.mrb[0].mxu1 }
 0x105   :  { %v182_v20 = vadd.f32 %v224_v17, %v181_v18  ;;  %v190_v21 = vadd.f32 %v224_v17, %v189_v19  ;;  %v183_v22 = vpop.f32.mrb[1].mxu0  ;;  %v191_v23 = vpop.f32.mrb[1].mxu1 }
 0x106   :  { %v184_v24 = vpop.f32.mrb[2].mxu0  ;;  %v192_v25 = vpop.f32.mrb[2].mxu1 }
 0x107   :  { %v185_v26 = vadd.f32 %v224_v17, %v184_v24  ;;  %v193_v27 = vadd.f32 %v224_v17, %v192_v25  ;;  %v186_v28 = vpop.f32.mrb[3].mxu0  ;;  %v194_v29 = vpop.f32.mrb[3].mxu1  ;;  %v196_v30 = vmax.f32 %v182_v20, 0.0  ;;  %v198_v31 = vmax.f32 %v190_v21, 0.0 }
 0x109   :  { %v197_v32 = vmax.f32 %v185_v26, 0.0  ;;  %v199_v33 = vmax.f32 %v193_v27, 0.0 }
 0x10b   :  { %v254_v34 = vpack.c.bf16 %v197_v32, %v196_v30  ;;  %v259_v35 = vpack.c.bf16 %v199_v33, %v198_v31 }
 0x10d   :  { %255 = vst [vmem:[%s410_s3] sm:$0xff] %v254_v34   ;;  %261 = vst [vmem:[%s410_s3 + $0x8] sm:$0xff] %v259_v35  }

// kernel: model_c_forward.15
= control target key start
LH: loop header
LB: loop body
LE: loop exit
PB: predicated region body
PF: predicated region fallthrough
CT: control target
= control target key end

     0   :  { %vm1489_vm0 = vcmask 523264   ;;  %vm1899_vm1 = vcmask 1043456   ;;  %vm1900_vm2 = vcmask 523268   ;;  %s3379_s1 = inlined_call_operand.vmem [shape: bf16[1728,192], index: 1, kind: input, shape index: {}]   ;;  %s3380_s0 = inlined_call_operand.vmem [shape: bf16[32,1728], index: 0, kind: input, shape index: {}]   ;;  %s3381_s2 = inlined_call_operand.vmem [shape: f32[1,192], index: 2, kind: input, shape index: {}]   ;;  %s3382_s3 = inlined_call_operand.vmem [shape: bf16[32,192], index: 3, kind: output, shape index: {}]  }
   0x1   :  { %v2244_v0 = vld [vmem:[%s3379_s1 + $0x4] ss:$8 sps:$4 sm:$0xff]   ;;  %v2248_v2 = vld [vmem:[%s3379_s1] ss:$8 sps:$4 sm:$0xff]   ;;  %v2250_v4 = vld [vmem:[%s3379_s1 + $0x14] ss:$8 sps:$4 sm:$0xff]  }
   0x2   :  { %v2246_v1 = vld [vmem:[%s3379_s1 + $0x304] ss:$8 sps:$4 sm:$0xff]   ;;  %1496 = vmatprep.subr.bf16.mxu1 %v2244_v0  ;;  %v2249_v3 = vld [vmem:[%s3379_s1 + $0x300] ss:$8 sps:$4 sm:$0xff]   ;;  %v2252_v5 = vld [vmem:[%s3379_s1 + $0x314] ss:$8 sps:$4 sm:$0xff]  }
   0x3   :  { %1655 = vmatprep.subr.bf16.mxu0 %v2246_v1  ;;  %1497 = vmatpush1.bf16.msra.mxu1 %v2248_v2  ;;  %v2254_v6 = vld [vmem:[%s3379_s1 + $0x10] ss:$8 sps:$4 sm:$0xff]   ;;  %v2256_v8 = vld [vmem:[%s3379_s1 + $0x24] ss:$8 sps:$4 sm:$0xff]   ;;  %v2260_v10 = vld [vmem:[%s3379_s1 + $0x20] ss:$8 sps:$4 sm:$0xff]  }
   0x4   :  { %1656 = vmatpush1.bf16.msra.mxu0 %v2249_v3  ;;  %1498 = vmatprep.subr.bf16.mxu1 %v2250_v4  ;;  %v2255_v7 = vld [vmem:[%s3379_s1 + $0x310] ss:$8 sps:$4 sm:$0xff]   ;;  %v2258_v9 = vld [vmem:[%s3379_s1 + $0x324] ss:$8 sps:$4 sm:$0xff]   ;;  %v2261_v11 = vld [vmem:[%s3379_s1 + $0x320] ss:$8 sps:$4 sm:$0xff]  }
   0x5   :  { %1657 = vmatprep.subr.bf16.mxu0 %v2252_v5  ;;  %v2262_v12 = vld [vmem:[%s3379_s1 + $0x34] ss:$8 sps:$4 sm:$0xff]   ;;  %v2266_v14 = vld [vmem:[%s3379_s1 + $0x30] ss:$8 sps:$4 sm:$0xff]   ;;  %v2268_v16 = vld [vmem:[%s3379_s1 + $0x44] ss:$8 sps:$4 sm:$0xff]  }
   0x6   :  { %v2264_v13 = vld [vmem:[%s3379_s1 + $0x334] ss:$8 sps:$4 sm:$0xff]   ;;  %v2267_v15 = vld [vmem:[%s3379_s1 + $0x330] ss:$8 sps:$4 sm:$0xff]   ;;  %v2270_v17 = vld [vmem:[%s3379_s1 + $0x344] ss:$8 sps:$4 sm:$0xff]  }
   0x7   :  { %1499 = vmatpush1.bf16.msra.mxu1 %v2254_v6  ;;  %v2272_v18 = vld [vmem:[%s3379_s1 + $0x40] ss:$8 sps:$4 sm:$0xff]   ;;  %v2274_v20 = vld [vmem:[%s3379_s1 + $0x54] ss:$8 sps:$4 sm:$0xff]   ;;  %v2278_v22 = vld [vmem:[%s3379_s1 + $0x50] ss:$8 sps:$4 sm:$0xff]  }
   0x8   :  { %1658 = vmatpush1.bf16.msra.mxu0 %v2255_v7  ;;  %1500 = vmatprep.subr.bf16.mxu1 %v2256_v8  ;;  %v2273_v19 = vld [vmem:[%s3379_s1 + $0x340] ss:$8 sps:$4 sm:$0xff]   ;;  %v2276_v21 = vld [vmem:[%s3379_s1 + $0x354] ss:$8 sps:$4 sm:$0xff]   ;;  %v2279_v23 = vld [vmem:[%s3379_s1 + $0x350] ss:$8 sps:$4 sm:$0xff]  }
   0x9   :  { %1659 = vmatprep.subr.bf16.mxu0 %v2258_v9  ;;  %v2280_v24 = vld [vmem:[%s3379_s1 + $0x64] ss:$8 sps:$4 sm:$0xff]   ;;  %v2284_v26 = vld [vmem:[%s3379_s1 + $0x60] ss:$8 sps:$4 sm:$0xff]   ;;  %v2286_v28 = vld [vmem:[%s3379_s1 + $0x74] ss:$8 sps:$4 sm:$0xff]  }
   0xa   :  { %v2282_v25 = vld [vmem:[%s3379_s1 + $0x364] ss:$8 sps:$4 sm:$0xff]   ;;  %v2285_v27 = vld [vmem:[%s3379_s1 + $0x360] ss:$8 sps:$4 sm:$0xff]   ;;  %v2288_v29 = vld [vmem:[%s3379_s1 + $0x374] ss:$8 sps:$4 sm:$0xff]  }
   0xb   :  { %1501 = vmatpush1.bf16.msra.mxu1 %v2260_v10  ;;  %v2290_v30 = vld [vmem:[%s3379_s1 + $0x70] ss:$8 sps:$4 sm:$0xff]   ;;  %v2292_v32 = vld [vmem:[%s3379_s1 + $0x84] ss:$8 sps:$4 sm:$0xff]   ;;  %v2296_v34 = vld [vmem:[%s3379_s1 + $0x80] ss:$8 sps:$4 sm:$0xff]  }
   0xc   :  { %1660 = vmatpush1.bf16.msra.mxu0 %v2261_v11  ;;  %1502 = vmatprep.subr.bf16.mxu1 %v2262_v12  ;;  %v2291_v31 = vld [vmem:[%s3379_s1 + $0x370] ss:$8 sps:$4 sm:$0xff]   ;;  %v2294_v33 = vld [vmem:[%s3379_s1 + $0x384] ss:$8 sps:$4 sm:$0xff]   ;;  %v2297_v35 = vld [vmem:[%s3379_s1 + $0x380] ss:$8 sps:$4 sm:$0xff]  }
   0xd   :  { %1661 = vmatprep.subr.bf16.mxu0 %v2264_v13  ;;  %v2298_v36 = vld [vmem:[%s3379_s1 + $0x94] ss:$8 sps:$4 sm:$0xff]   ;;  %v2302_v38 = vld [vmem:[%s3379_s1 + $0x90] ss:$8 sps:$4 sm:$0xff]   ;;  %v2304_v40 = vld [vmem:[%s3379_s1 + $0xa4] ss:$8 sps:$4 sm:$0xff]  }
   0xe   :  { %v2300_v37 = vld [vmem:[%s3379_s1 + $0x394] ss:$8 sps:$4 sm:$0xff]   ;;  %v2303_v39 = vld [vmem:[%s3379_s1 + $0x390] ss:$8 sps:$4 sm:$0xff]   ;;  %v2306_v41 = vld [vmem:[%s3379_s1 + $0x3a4] ss:$8 sps:$4 sm:$0xff]  }
   0xf   :  { %1503 = vmatpush1.bf16.msra.mxu1 %v2266_v14  ;;  %v2308_v42 = vld [vmem:[%s3379_s1 + $0xa0] ss:$8 sps:$4 sm:$0xff]   ;;  %v2310_v44 = vld [vmem:[%s3379_s1 + $0xb4] ss:$8 sps:$4 sm:$0xff]   ;;  %v2314_v46 = vld [vmem:[%s3379_s1 + $0xb0] ss:$8 sps:$4 sm:$0xff]  }
  0x10   :  { %1662 = vmatpush1.bf16.msra.mxu0 %v2267_v15  ;;  %1504 = vmatprep.subr.bf16.mxu1 %v2268_v16  ;;  %v2309_v43 = vld [vmem:[%s3379_s1 + $0x3a0] ss:$8 sps:$4 sm:$0xff]   ;;  %v2312_v45 = vld [vmem:[%s3379_s1 + $0x3b4] ss:$8 sps:$4 sm:$0xff]   ;;  %v2315_v47 = vld [vmem:[%s3379_s1 + $0x3b0] ss:$8 sps:$4 sm:$0xff]  }
  0x11   :  { %1663 = vmatprep.subr.bf16.mxu0 %v2270_v17  ;;  %v2342_v48 = vld [vmem:[%s3380_s0 + $0x4] ss:$56 sps:$4 sm:$0xff]   ;;  %v2320_v52 = vld [vmem:[%s3379_s1 + $0xc0] ss:$8 sps:$4 sm:$0xff]   ;;  %v2326_v56 = vld [vmem:[%s3379_s1 + $0xd0] ss:$8 sps:$4 sm:$0xff]  }
  0x12   :  { %v2316_v49 = vld [vmem:[%s3379_s1 + $0xc4] ss:$8 sps:$4 sm:$0xff]   ;;  %1528 = vmatprep.mubr.bf16.mxu1 %v2342_v48  ;;  %v2348_v51 = vld [vmem:[%s3380_s0 + $0x1c] ss:$56 sps:$4 sm:$0xff]   ;;  %v2321_v53 = vld [vmem:[%s3379_s1 + $0x3c0] ss:$8 sps:$4 sm:$0xff]  }
  0x13   :  { %1505 = vmatpush1.bf16.msra.mxu1 %v2272_v18  ;;  %v2318_v50 = vld [vmem:[%s3379_s1 + $0x3c4] ss:$8 sps:$4 sm:$0xff]   ;;  %v2322_v54 = vld [vmem:[%s3379_s1 + $0xd4] ss:$8 sps:$4 sm:$0xff]   ;;  %1687 = vmatprep.mubr.bf16.mxu0 %v2348_v51  ;;  %v2327_v57 = vld [vmem:[%s3379_s1 + $0x3d0] ss:$8 sps:$4 sm:$0xff]  }
  0x14   :  { %1664 = vmatpush1.bf16.msra.mxu0 %v2273_v19  ;;  %1506 = vmatprep.subr.bf16.mxu1 %v2274_v20  ;;  %v2324_v55 = vld [vmem:[%s3379_s1 + $0x3d4] ss:$8 sps:$4 sm:$0xff]   ;;  %v2328_v58 = vld [vmem:[%s3379_s1 + $0xe4] ss:$8 sps:$4 sm:$0xff]   ;;  %v2332_v60 = vld [vmem:[%s3379_s1 + $0xe0] ss:$8 sps:$4 sm:$0xff]  }
  0x15   :  { %1665 = vmatprep.subr.bf16.mxu0 %v2276_v21  ;;  %v2330_v59 = vld [vmem:[%s3379_s1 + $0x3e4] ss:$8 sps:$4 sm:$0xff]   ;;  %v2333_v61 = vld [vmem:[%s3379_s1 + $0x3e0] ss:$8 sps:$4 sm:$0xff]   ;;  %v2334_v62 = vld [vmem:[%s3379_s1 + $0xf4] ss:$8 sps:$4 sm:$0xff]  }
  0x16   :  { %v2336_v63 = vld [vmem:[%s3379_s1 + $0x3f4] ss:$8 sps:$4 sm:$0xff]   ;;  %v2338_v0 = vld [vmem:[%s3379_s1 + $0xf0] ss:$8 sps:$4 sm:$0xff]   ;;  %v2345_v2 = vld [vmem:[%s3379_s1 + $0x104] ss:$8 sps:$4 sm:$0xff]  }
  0x17   :  { %1507 = vmatpush1.bf16.msra.mxu1 %v2278_v22  ;;  %v2339_v1 = vld [vmem:[%s3379_s1 + $0x3f0] ss:$8 sps:$4 sm:$0xff]   ;;  %v2351_v3 = vld [vmem:[%s3379_s1 + $0x404] ss:$8 sps:$4 sm:$0xff]   ;;  %v2343_v5 = vld [vmem:[%s3379_s1 + $0x100] ss:$8 sps:$4 sm:$0xff]  }
  0x18   :  { %1666 = vmatpush1.bf16.msra.mxu0 %v2279_v23  ;;  %1508 = vmatprep.subr.bf16.mxu1 %v2280_v24  ;;  %v2340_v4 = vld [vmem:[%s3380_s0] ss:$56 sps:$4 sm:$0xff]   ;;  %v2354_v8 = vld [vmem:[%s3379_s1 + $0x114] ss:$8 sps:$4 sm:$0xff]   ;;  %v2360_v12 = vld [vmem:[%s3379_s1 + $0x124] ss:$8 sps:$4 sm:$0xff]  }
  0x19   :  { %1667 = vmatprep.subr.bf16.mxu0 %v2282_v25  ;;  %v2346_v6 = vld [vmem:[%s3380_s0 + $0x18] ss:$56 sps:$4 sm:$0xff]   ;;  %v2349_v7 = vld [vmem:[%s3379_s1 + $0x400] ss:$8 sps:$4 sm:$0xff]   ;;  %v2357_v9 = vld [vmem:[%s3379_s1 + $0x414] ss:$8 sps:$4 sm:$0xff]  }
  0x1a   :  { %v2352_v10 = vld [vmem:[%s3379_s1 + $0x110] ss:$8 sps:$4 sm:$0xff]   ;;  %v2363_v13 = vld [vmem:[%s3379_s1 + $0x424] ss:$8 sps:$4 sm:$0xff]   ;;  %v2358_v14 = vld [vmem:[%s3379_s1 + $0x120] ss:$8 sps:$4 sm:$0xff]  }
  0x1b   :  { %1509 = vmatpush1.bf16.msra.mxu1 %v2284_v26  ;;  %v2355_v11 = vld [vmem:[%s3379_s1 + $0x410] ss:$8 sps:$4 sm:$0xff]   ;;  %v2361_v15 = vld [vmem:[%s3379_s1 + $0x420] ss:$8 sps:$4 sm:$0xff]   ;;  %v2366_v16 = vld [vmem:[%s3379_s1 + $0x134] ss:$8 sps:$4 sm:$0xff]  }
  0x1c   :  { %1668 = vmatpush1.bf16.msra.mxu0 %v2285_v27  ;;  %1510 = vmatprep.subr.bf16.mxu1 %v2286_v28  ;;  %v2369_v17 = vld [vmem:[%s3379_s1 + $0x434] ss:$8 sps:$4 sm:$0xff]   ;;  %v2364_v18 = vld [vmem:[%s3379_s1 + $0x130] ss:$8 sps:$4 sm:$0xff]   ;;  %v2372_v20 = vld [vmem:[%s3379_s1 + $0x144] ss:$8 sps:$4 sm:$0xff]  }
  0x1d   :  { %1669 = vmatprep.subr.bf16.mxu0 %v2288_v29  ;;  %v2367_v19 = vld [vmem:[%s3379_s1 + $0x430] ss:$8 sps:$4 sm:$0xff]   ;;  %v2375_v21 = vld [vmem:[%s3379_s1 + $0x444] ss:$8 sps:$4 sm:$0xff]   ;;  %v2370_v22 = vld [vmem:[%s3379_s1 + $0x140] ss:$8 sps:$4 sm:$0xff]  }
  0x1e   :  { %v2373_v23 = vld [vmem:[%s3379_s1 + $0x440] ss:$8 sps:$4 sm:$0xff]   ;;  %v2378_v24 = vld [vmem:[%s3379_s1 + $0x154] ss:$8 sps:$4 sm:$0xff]   ;;  %v2376_v26 = vld [vmem:[%s3379_s1 + $0x150] ss:$8 sps:$4 sm:$0xff]  }
  0x1f   :  { %1511 = vmatpush1.bf16.msra.mxu1 %v2290_v30  ;;  %v2381_v25 = vld [vmem:[%s3379_s1 + $0x454] ss:$8 sps:$4 sm:$0xff]   ;;  %v2379_v27 = vld [vmem:[%s3379_s1 + $0x450] ss:$8 sps:$4 sm:$0xff]   ;;  %v2384_v29 = vld [vmem:[%s3379_s1 + $0x164] ss:$8 sps:$4 sm:$0xff]  }
  0x20   :  { %1670 = vmatpush1.bf16.msra.mxu0 %v2291_v31  ;;  %1512 = vmatprep.subr.bf16.mxu1 %v2292_v32  ;;  %v2430_v28 = vld [vmem:[%s3380_s0 + $0x74] ss:$56 sps:$4 sm:$0xff]   ;;  %v2382_v32 = vld [vmem:[%s3379_s1 + $0x160] ss:$8 sps:$4 sm:$0xff]   ;;  %v2400_v48 = vld [vmem:[%s3379_s1 + $0x190] ss:$8 sps:$4 sm:$0xff]  }
  0x21   :  { %1671 = vmatprep.subr.bf16.mxu0 %v2294_v33  ;;  %v2387_v30 = vld [vmem:[%s3379_s1 + $0x464] ss:$8 sps:$4 sm:$0xff]   ;;  %v2385_v33 = vld [vmem:[%s3379_s1 + $0x460] ss:$8 sps:$4 sm:$0xff]   ;;  %vm1901_vm3 = vmor %vm1900_vm2, %vm1899_vm1 }
  0x22   :  { %v2435_v31 = vld [vmem:[%s3380_s0 + $0x8c] ss:$56 sps:$4 sm:$0xff]  }
  0x23   :  { %1513 = vmatpush1.bf16.msra.mxu1 %v2296_v34  ;;  %v2440_v34 = vld [vmem:[%s3380_s0 + $0x70] ss:$56 sps:$4 sm:$0xff]   ;;  %v2411_v51 = vld [vmem:[%s3379_s1 + $0x4a4] ss:$8 sps:$4 sm:$0xff]  }
  0x24   :  { %1672 = vmatpush1.bf16.msra.mxu0 %v2297_v35  ;;  %1514 = vmatprep.subr.bf16.mxu1 %v2298_v36  ;;  %v2441_v35 = vld [vmem:[%s3380_s0 + $0x88] ss:$56 sps:$4 sm:$0xff]   ;;  %v2390_v36 = vld [vmem:[%s3379_s1 + $0x174] ss:$8 sps:$4 sm:$0xff]  }
  0x25   :  { %1673 = vmatprep.subr.bf16.mxu0 %v2300_v37  ;;  %v2393_v37 = vld [vmem:[%s3379_s1 + $0x474] ss:$8 sps:$4 sm:$0xff]  }
  0x27   :  { %1515 = vmatpush1.bf16.msra.mxu1 %v2302_v38  ;;  %v2388_v38 = vld [vmem:[%s3379_s1 + $0x170] ss:$8 sps:$4 sm:$0xff]  }
  0x28   :  { %1674 = vmatpush1.bf16.msra.mxu0 %v2303_v39  ;;  %1516 = vmatprep.subr.bf16.mxu1 %v2304_v40  ;;  %v2391_v39 = vld [vmem:[%s3379_s1 + $0x470] ss:$8 sps:$4 sm:$0xff]   ;;  %v2450_v40 = vld [vmem:[%s3380_s0 + $0xc] ss:$56 sps:$4 sm:$0xff]  }
  0x29   :  { %1675 = vmatprep.subr.bf16.mxu0 %v2306_v41  ;;  %v2396_v41 = vld [vmem:[%s3379_s1 + $0x184] ss:$8 sps:$4 sm:$0xff]  }
  0x2b   :  { %1517 = vmatpush1.bf16.msra.mxu1 %v2308_v42  ;;  %v2399_v42 = vld [vmem:[%s3379_s1 + $0x484] ss:$8 sps:$4 sm:$0xff]  }
  0x2c   :  { %1676 = vmatpush1.bf16.msra.mxu0 %v2309_v43  ;;  %1518 = vmatprep.subr.bf16.mxu1 %v2310_v44  ;;  %v2456_v43 = vld [vmem:[%s3380_s0 + $0x24] ss:$56 sps:$4 sm:$0xff]   ;;  %v2394_v44 = vld [vmem:[%s3379_s1 + $0x180] ss:$8 sps:$4 sm:$0xff]  }
  0x2d   :  { %1677 = vmatprep.subr.bf16.mxu0 %v2312_v45  ;;  %v2397_v45 = vld [vmem:[%s3379_s1 + $0x480] ss:$8 sps:$4 sm:$0xff]  }
  0x2f   :  { %1519 = vmatpush1.bf16.msra.mxu1 %v2314_v46  ;;  %v2402_v46 = vld [vmem:[%s3379_s1 + $0x194] ss:$8 sps:$4 sm:$0xff]  }
  0x30   :  { %1678 = vmatpush1.bf16.msra.mxu0 %v2315_v47  ;;  %1520 = vmatprep.subr.bf16.mxu1 %v2316_v49  ;;  %v2405_v47 = vld [vmem:[%s3379_s1 + $0x494] ss:$8 sps:$4 sm:$0xff]   ;;  %v2403_v49 = vld [vmem:[%s3379_s1 + $0x490] ss:$8 sps:$4 sm:$0xff]  }
  0x31   :  { %1679 = vmatprep.subr.bf16.mxu0 %v2318_v50  ;;  %v2408_v50 = vld [vmem:[%s3379_s1 + $0x1a4] ss:$8 sps:$4 sm:$0xff]  }
  0x33   :  { %1521 = vmatpush1.bf16.msra.mxu1 %v2320_v52  ;;  %v2406_v52 = vld [vmem:[%s3379_s1 + $0x1a0] ss:$8 sps:$4 sm:$0xff]  }
  0x34   :  { %1680 = vmatpush1.bf16.msra.mxu0 %v2321_v53  ;;  %1522 = vmatprep.subr.bf16.mxu1 %v2322_v54  ;;  %v2409_v53 = vld [vmem:[%s3379_s1 + $0x4a0] ss:$8 sps:$4 sm:$0xff]   ;;  %v2414_v54 = vld [vmem:[%s3379_s1 + $0x1b4] ss:$8 sps:$4 sm:$0xff]  }
  0x35   :  { %1681 = vmatprep.subr.bf16.mxu0 %v2324_v55  ;;  %v2417_v55 = vld [vmem:[%s3379_s1 + $0x4b4] ss:$8 sps:$4 sm:$0xff]  }
  0x37   :  { %1523 = vmatpush1.bf16.msra.mxu1 %v2326_v56  ;;  %v2412_v56 = vld [vmem:[%s3379_s1 + $0x1b0] ss:$8 sps:$4 sm:$0xff]  }
  0x38   :  { %1682 = vmatpush1.bf16.msra.mxu0 %v2327_v57  ;;  %1524 = vmatprep.subr.bf16.mxu1 %v2328_v58  ;;  %v2415_v57 = vld [vmem:[%s3379_s1 + $0x4b0] ss:$8 sps:$4 sm:$0xff]   ;;  %v2420_v58 = vld [vmem:[%s3379_s1 + $0x1c4] ss:$8 sps:$4 sm:$0xff]  }
  0x39   :  { %1683 = vmatprep.subr.bf16.mxu0 %v2330_v59  ;;  %v2423_v59 = vld [vmem:[%s3379_s1 + $0x4c4] ss:$8 sps:$4 sm:$0xff]  }
  0x3b   :  { %1525 = vmatpush1.bf16.msra.mxu1 %v2332_v60  ;;  %v2418_v60 = vld [vmem:[%s3379_s1 + $0x1c0] ss:$8 sps:$4 sm:$0xff]  }
  0x3c   :  { %1684 = vmatpush1.bf16.msra.mxu0 %v2333_v61  ;;  %1526 = vmatprep.subr.bf16.mxu1 %v2334_v62  ;;  %v2421_v61 = vld [vmem:[%s3379_s1 + $0x4c0] ss:$8 sps:$4 sm:$0xff]   ;;  %v2426_v62 = vld [vmem:[%s3379_s1 + $0x1d4] ss:$8 sps:$4 sm:$0xff]  }
  0x3d   :  { %1685 = vmatprep.subr.bf16.mxu0 %v2336_v63  ;;  %v2429_v63 = vld [vmem:[%s3379_s1 + $0x4d4] ss:$8 sps:$4 sm:$0xff]  }
  0x3f   :  { %1527 = vmatpush1.bf16.msra.mxu1 %v2338_v0  ;;  %v2424_v0 = vld [vmem:[%s3379_s1 + $0x1d0] ss:$8 sps:$4 sm:$0xff]  }
  0x40   :  { %1686 = vmatpush1.bf16.msra.mxu0 %v2339_v1  ;;  %1549 = vmatprep.subr.bf16.mxu1 %v2345_v2  ;;  %v2427_v1 = vld [vmem:[%s3379_s1 + $0x4d0] ss:$8 sps:$4 sm:$0xff]   ;;  %v2434_v2 = vld [vmem:[%s3379_s1 + $0x1e4] ss:$8 sps:$4 sm:$0xff]  }
  0x41   :  { %1708 = vmatprep.subr.bf16.mxu0 %v2351_v3  ;;  %v2439_v3 = vld [vmem:[%s3379_s1 + $0x4e4] ss:$8 sps:$4 sm:$0xff]  }
  0x42   :  { %1529 = vmatmul.mubr.bf16.vlgmr.msra.gmra.mrb[0].mxu1 %v2340_v4  ;;  %v2432_v4 = vld [vmem:[%s3379_s1 + $0x1e0] ss:$8 sps:$4 sm:$0xff]  }
  0x43   :  { %1688 = vmatmul.mubr.bf16.vlgmr.msra.gmra.mrb[0].mxu0 %v2346_v6  ;;  %1550 = vmatpush1.bf16.msra.mxu1 %v2343_v5  ;;  %v2437_v5 = vld [vmem:[%s3379_s1 + $0x4e0] ss:$8 sps:$4 sm:$0xff]   ;;  %v2444_v6 = vld [vmem:[%s3379_s1 + $0x1f4] ss:$8 sps:$4 sm:$0xff]  }
  0x44   :  { %1709 = vmatpush1.bf16.msra.mxu0 %v2349_v7  ;;  %1551 = vmatprep.subr.bf16.mxu1 %v2354_v8  ;;  %v2447_v7 = vld [vmem:[%s3379_s1 + $0x4f4] ss:$8 sps:$4 sm:$0xff]   ;;  %v2442_v8 = vld [vmem:[%s3379_s1 + $0x1f0] ss:$8 sps:$4 sm:$0xff]  }
  0x45   :  { %1710 = vmatprep.subr.bf16.mxu0 %v2357_v9  ;;  %1538 = vmatprep.mubr.bf16.mxu1 %v2430_v28  ;;  %v2445_v9 = vld [vmem:[%s3379_s1 + $0x4f0] ss:$8 sps:$4 sm:$0xff]   ;;  %v2474_v28 = vld [vmem:[%s3379_s1 + $0x234] ss:$8 sps:$4 sm:$0xff]  }
  0x46   :  { %1697 = vmatprep.mubr.bf16.mxu0 %v2435_v31  ;;  %v2475_v31 = vld [vmem:[%s3379_s1 + $0x530] ss:$8 sps:$4 sm:$0xff]  }
  0x47   :  { %1552 = vmatpush1.bf16.msra.mxu1 %v2352_v10  ;;  %v2453_v10 = vld [vmem:[%s3379_s1 + $0x204] ss:$8 sps:$4 sm:$0xff]  }
  0x48   :  { %1711 = vmatpush1.bf16.msra.mxu0 %v2355_v11  ;;  %1553 = vmatprep.subr.bf16.mxu1 %v2360_v12  ;;  %v2459_v11 = vld [vmem:[%s3379_s1 + $0x504] ss:$8 sps:$4 sm:$0xff]   ;;  %v2448_v12 = vld [vmem:[%s3380_s0 + $0x8] ss:$56 sps:$4 sm:$0xff]  }
  0x49   :  { %1712 = vmatprep.subr.bf16.mxu0 %v2363_v13  ;;  %v2451_v13 = vld [vmem:[%s3379_s1 + $0x200] ss:$8 sps:$4 sm:$0xff]  }
  0x4a   :  { %1539 = vmatmul.mubr.bf16.gmra.mrb[4].mxu1 %v2440_v34  ;;  %v2483_v34 = vld [vmem:[%s3379_s1 + $0x544] ss:$8 sps:$4 sm:$0xff]  }
  0x4b   :  { %1554 = vmatpush1.bf16.msra.mxu1 %v2358_v14  ;;  %1698 = vmatmul.mubr.bf16.gmra.mrb[4].mxu0 %v2441_v35  ;;  %v2454_v14 = vld [vmem:[%s3380_s0 + $0x20] ss:$56 sps:$4 sm:$0xff]   ;;  %v2561_v35 = vld [vmem:[%s3380_s0 + $0x2c] ss:$56 sps:$4 sm:$0xff]  }
  0x4c   :  { %1713 = vmatpush1.bf16.msra.mxu0 %v2361_v15  ;;  %1555 = vmatprep.subr.bf16.mxu1 %v2366_v16  ;;  %v2457_v15 = vld [vmem:[%s3379_s1 + $0x500] ss:$8 sps:$4 sm:$0xff]   ;;  %v2462_v16 = vld [vmem:[%s3379_s1 + $0x214] ss:$8 sps:$4 sm:$0xff]  }
  0x4d   :  { %1714 = vmatprep.subr.bf16.mxu0 %v2369_v17  ;;  %1581 = vmatprep.mubr.bf16.mxu1 %v2450_v40  ;;  %v2465_v17 = vld [vmem:[%s3379_s1 + $0x514] ss:$8 sps:$4 sm:$0xff]   ;;  %v2484_v40 = vld [vmem:[%s3379_s1 + $0x250] ss:$8 sps:$4 sm:$0xff]  }
  0x4e   :  { %1740 = vmatprep.mubr.bf16.mxu0 %v2456_v43  ;;  %v2495_v43 = vld [vmem:[%s3379_s1 + $0x564] ss:$8 sps:$4 sm:$0xff]  }
  0x4f   :  { %1556 = vmatpush1.bf16.msra.mxu1 %v2364_v18  ;;  %v2460_v18 = vld [vmem:[%s3379_s1 + $0x210] ss:$8 sps:$4 sm:$0xff]  }
  0x50   :  { %1715 = vmatpush1.bf16.msra.mxu0 %v2367_v19  ;;  %1557 = vmatprep.subr.bf16.mxu1 %v2372_v20  ;;  %v2463_v19 = vld [vmem:[%s3379_s1 + $0x510] ss:$8 sps:$4 sm:$0xff]   ;;  %v2538_v20 = vld [vmem:[%s3380_s0 + $0x7c] ss:$56 sps:$4 sm:$0xff]  }
  0x51   :  { %1716 = vmatprep.subr.bf16.mxu0 %v2375_v21  ;;  %v2468_v21 = vld [vmem:[%s3379_s1 + $0x224] ss:$8 sps:$4 sm:$0xff]  }
  0x53   :  { %1558 = vmatpush1.bf16.msra.mxu1 %v2370_v22  ;;  %v2540_v22 = vld [vmem:[%s3380_s0 + $0x94] ss:$56 sps:$4 sm:$0xff]  }
  0x54   :  { %1717 = vmatpush1.bf16.msra.mxu0 %v2373_v23  ;;  %1559 = vmatprep.subr.bf16.mxu1 %v2378_v24  ;;  %v2471_v23 = vld [vmem:[%s3379_s1 + $0x524] ss:$8 sps:$4 sm:$0xff]   ;;  %v2466_v24 = vld [vmem:[%s3379_s1 + $0x220] ss:$8 sps:$4 sm:$0xff]  }
  0x55   :  { %1718 = vmatprep.subr.bf16.mxu0 %v2381_v25  ;;  %v2469_v25 = vld [vmem:[%s3379_s1 + $0x520] ss:$8 sps:$4 sm:$0xff]  }
  0x57   :  { %1560 = vmatpush1.bf16.msra.mxu1 %v2376_v26  ;;  %v2542_v26 = vld [vmem:[%s3380_s0 + $0x78] ss:$56 sps:$4 sm:$0xff]  }
  0x58   :  { %1719 = vmatpush1.bf16.msra.mxu0 %v2379_v27  ;;  %1561 = vmatprep.subr.bf16.mxu1 %v2384_v29  ;;  %v2546_v27 = vld [vmem:[%s3380_s0 + $0x90] ss:$56 sps:$4 sm:$0xff]   ;;  %v2477_v29 = vld [vmem:[%s3379_s1 + $0x534] ss:$8 sps:$4 sm:$0xff]  }
  0x59   :  { %1720 = vmatprep.subr.bf16.mxu0 %v2387_v30  ;;  %v2472_v30 = vld [vmem:[%s3379_s1 + $0x230] ss:$8 sps:$4 sm:$0xff]  }
  0x5b   :  { %1562 = vmatpush1.bf16.msra.mxu1 %v2382_v32  ;;  %v2480_v32 = vld [vmem:[%s3379_s1 + $0x244] ss:$8 sps:$4 sm:$0xff]  }
  0x5c   :  { %1721 = vmatpush1.bf16.msra.mxu0 %v2385_v33  ;;  %1563 = vmatprep.subr.bf16.mxu1 %v2390_v36  ;;  %v2558_v33 = vld [vmem:[%s3380_s0 + $0x14] ss:$56 sps:$4 sm:$0xff]   ;;  %v2478_v36 = vld [vmem:[%s3379_s1 + $0x240] ss:$8 sps:$4 sm:$0xff]  }
  0x5d   :  { %1722 = vmatprep.subr.bf16.mxu0 %v2393_v37  ;;  %v2481_v37 = vld [vmem:[%s3379_s1 + $0x540] ss:$8 sps:$4 sm:$0xff]  }
  0x5f   :  { %1564 = vmatpush1.bf16.msra.mxu1 %v2388_v38  ;;  %v2486_v38 = vld [vmem:[%s3379_s1 + $0x254] ss:$8 sps:$4 sm:$0xff]  }
  0x60   :  { %1723 = vmatpush1.bf16.msra.mxu0 %v2391_v39  ;;  %1565 = vmatprep.subr.bf16.mxu1 %v2396_v41  ;;  %v2489_v39 = vld [vmem:[%s3379_s1 + $0x554] ss:$8 sps:$4 sm:$0xff]   ;;  %v2487_v41 = vld [vmem:[%s3379_s1 + $0x550] ss:$8 sps:$4 sm:$0xff]  }
  0x61   :  { %1724 = vmatprep.subr.bf16.mxu0 %v2399_v42  ;;  %v2492_v42 = vld [vmem:[%s3379_s1 + $0x264] ss:$8 sps:$4 sm:$0xff]  }
  0x63   :  { %1566 = vmatpush1.bf16.msra.mxu1 %v2394_v44  ;;  %v2490_v44 = vld [vmem:[%s3379_s1 + $0x260] ss:$8 sps:$4 sm:$0xff]  }
  0x64   :  { %1725 = vmatpush1.bf16.msra.mxu0 %v2397_v45  ;;  %1567 = vmatprep.subr.bf16.mxu1 %v2402_v46  ;;  %v2493_v45 = vld [vmem:[%s3379_s1 + $0x560] ss:$8 sps:$4 sm:$0xff]   ;;  %v2498_v46 = vld [vmem:[%s3379_s1 + $0x274] ss:$8 sps:$4 sm:$0xff]  }
  0x65   :  { %1726 = vmatprep.subr.bf16.mxu0 %v2405_v47  ;;  %v2501_v47 = vld [vmem:[%s3379_s1 + $0x574] ss:$8 sps:$4 sm:$0xff]  }
  0x67   :  { %1568 = vmatpush1.bf16.msra.mxu1 %v2400_v48  ;;  %v2496_v48 = vld [vmem:[%s3379_s1 + $0x270] ss:$8 sps:$4 sm:$0xff]  }
  0x68   :  { %1727 = vmatpush1.bf16.msra.mxu0 %v2403_v49  ;;  %1569 = vmatprep.subr.bf16.mxu1 %v2408_v50  ;;  %v2499_v49 = vld [vmem:[%s3379_s1 + $0x570] ss:$8 sps:$4 sm:$0xff]   ;;  %v2504_v50 = vld [vmem:[%s3379_s1 + $0x284] ss:$8 sps:$4 sm:$0xff]  }
  0x69   :  { %1728 = vmatprep.subr.bf16.mxu0 %v2411_v51  ;;  %v2507_v51 = vld [vmem:[%s3379_s1 + $0x584] ss:$8 sps:$4 sm:$0xff]  }
  0x6b   :  { %1570 = vmatpush1.bf16.msra.mxu1 %v2406_v52  ;;  %v2502_v52 = vld [vmem:[%s3379_s1 + $0x280] ss:$8 sps:$4 sm:$0xff]  }
  0x6c   :  { %1729 = vmatpush1.bf16.msra.mxu0 %v2409_v53  ;;  %1571 = vmatprep.subr.bf16.mxu1 %v2414_v54  ;;  %v2505_v53 = vld [vmem:[%s3379_s1 + $0x580] ss:$8 sps:$4 sm:$0xff]   ;;  %v2510_v54 = vld [vmem:[%s3379_s1 + $0x294] ss:$8 sps:$4 sm:$0xff]  }
  0x6d   :  { %1730 = vmatprep.subr.bf16.mxu0 %v2417_v55  ;;  %v2513_v55 = vld [vmem:[%s3379_s1 + $0x594] ss:$8 sps:$4 sm:$0xff]  }
  0x6f   :  { %1572 = vmatpush1.bf16.msra.mxu1 %v2412_v56  ;;  %v2508_v56 = vld [vmem:[%s3379_s1 + $0x290] ss:$8 sps:$4 sm:$0xff]  }
  0x70   :  { %1731 = vmatpush1.bf16.msra.mxu0 %v2415_v57  ;;  %1573 = vmatprep.subr.bf16.mxu1 %v2420_v58  ;;  %v2511_v57 = vld [vmem:[%s3379_s1 + $0x590] ss:$8 sps:$4 sm:$0xff]   ;;  %v2516_v58 = vld [vmem:[%s3379_s1 + $0x2a4] ss:$8 sps:$4 sm:$0xff]  }
  0x71   :  { %1732 = vmatprep.subr.bf16.mxu0 %v2423_v59  ;;  %v2519_v59 = vld [vmem:[%s3379_s1 + $0x5a4] ss:$8 sps:$4 sm:$0xff]  }
  0x73   :  { %1574 = vmatpush1.bf16.msra.mxu1 %v2418_v60  ;;  %v2514_v60 = vld [vmem:[%s3379_s1 + $0x2a0] ss:$8 sps:$4 sm:$0xff]  }
  0x74   :  { %1733 = vmatpush1.bf16.msra.mxu0 %v2421_v61  ;;  %1575 = vmatprep.subr.bf16.mxu1 %v2426_v62  ;;  %v2517_v61 = vld [vmem:[%s3379_s1 + $0x5a0] ss:$8 sps:$4 sm:$0xff]   ;;  %v2522_v62 = vld [vmem:[%s3379_s1 + $0x2b4] ss:$8 sps:$4 sm:$0xff]  }
  0x75   :  { %1734 = vmatprep.subr.bf16.mxu0 %v2429_v63  ;;  %v2525_v63 = vld [vmem:[%s3379_s1 + $0x5b4] ss:$8 sps:$4 sm:$0xff]  }
  0x77   :  { %1576 = vmatpush1.bf16.msra.mxu1 %v2424_v0  ;;  %v2520_v0 = vld [vmem:[%s3379_s1 + $0x2b0] ss:$8 sps:$4 sm:$0xff]  }
  0x78   :  { %1735 = vmatpush1.bf16.msra.mxu0 %v2427_v1  ;;  %1577 = vmatprep.subr.bf16.mxu1 %v2434_v2  ;;  %v2523_v1 = vld [vmem:[%s3379_s1 + $0x5b0] ss:$8 sps:$4 sm:$0xff]   ;;  %v2528_v2 = vld [vmem:[%s3379_s1 + $0x2c4] ss:$8 sps:$4 sm:$0xff]  }
  0x79   :  { %1736 = vmatprep.subr.bf16.mxu0 %v2439_v3  ;;  %v2531_v3 = vld [vmem:[%s3379_s1 + $0x5c4] ss:$8 sps:$4 sm:$0xff]  }
  0x7b   :  { %1578 = vmatpush1.bf16.msra.mxu1 %v2432_v4  ;;  %v2526_v4 = vld [vmem:[%s3379_s1 + $0x2c0] ss:$8 sps:$4 sm:$0xff]  }
  0x7c   :  { %1737 = vmatpush1.bf16.msra.mxu0 %v2437_v5  ;;  %1579 = vmatprep.subr.bf16.mxu1 %v2444_v6  ;;  %v2529_v5 = vld [vmem:[%s3379_s1 + $0x5c0] ss:$8 sps:$4 sm:$0xff]   ;;  %v2534_v6 = vld [vmem:[%s3379_s1 + $0x2d4] ss:$8 sps:$4 sm:$0xff]  }
  0x7d   :  { %1738 = vmatprep.subr.bf16.mxu0 %v2447_v7  ;;  %v2537_v7 = vld [vmem:[%s3379_s1 + $0x5d4] ss:$8 sps:$4 sm:$0xff]  }
  0x7f   :  { %1580 = vmatpush1.bf16.msra.mxu1 %v2442_v8  ;;  %v2532_v8 = vld [vmem:[%s3379_s1 + $0x2d0] ss:$8 sps:$4 sm:$0xff]  }
  0x80   :  { %1739 = vmatpush1.bf16.msra.mxu0 %v2445_v9  ;;  %1602 = vmatprep.subr.bf16.mxu1 %v2453_v10  ;;  %v2535_v9 = vld [vmem:[%s3379_s1 + $0x5d0] ss:$8 sps:$4 sm:$0xff]   ;;  %v2545_v10 = vld [vmem:[%s3379_s1 + $0x2e4] ss:$8 sps:$4 sm:$0xff]  }
  0x81   :  { %1761 = vmatprep.subr.bf16.mxu0 %v2459_v11  ;;  %v2549_v11 = vld [vmem:[%s3379_s1 + $0x5e4] ss:$8 sps:$4 sm:$0xff]  }
  0x82   :  { %1582 = vmatmul.mubr.bf16.vlgmr.msra.gmra.mrb[0].mxu1 %v2448_v12  ;;  %v2543_v12 = vld [vmem:[%s3379_s1 + $0x2e0] ss:$8 sps:$4 sm:$0xff]  }
  0x83   :  { %1741 = vmatmul.mubr.bf16.vlgmr.msra.gmra.mrb[0].mxu0 %v2454_v14  ;;  %1603 = vmatpush1.bf16.msra.mxu1 %v2451_v13  ;;  %v2547_v13 = vld [vmem:[%s3379_s1 + $0x5e0] ss:$8 sps:$4 sm:$0xff]   ;;  %v2552_v14 = vld [vmem:[%s3379_s1 + $0x2f4] ss:$8 sps:$4 sm:$0xff]  }
  0x84   :  { %1762 = vmatpush1.bf16.msra.mxu0 %v2457_v15  ;;  %1604 = vmatprep.subr.bf16.mxu1 %v2462_v16  ;;  %v2555_v15 = vld [vmem:[%s3379_s1 + $0x5f4] ss:$8 sps:$4 sm:$0xff]   ;;  %v2550_v16 = vld [vmem:[%s3379_s1 + $0x2f0] ss:$8 sps:$4 sm:$0xff]  }
  0x85   :  { %1763 = vmatprep.subr.bf16.mxu0 %v2465_v17  ;;  %1591 = vmatprep.mubr.bf16.mxu1 %v2538_v20  ;;  %v2553_v17 = vld [vmem:[%s3379_s1 + $0x5f0] ss:$8 sps:$4 sm:$0xff]   ;;  %v2559_v20 = vld [vmem:[%s3380_s0 + $0x28] ss:$56 sps:$4 sm:$0xff]  }
  0x86   :  { %1750 = vmatprep.mubr.bf16.mxu0 %v2540_v22  ;;  %v2567_v22 = vld [vmem:[%s3379_s1 + $0x614] ss:$8 sps:$4 sm:$0xff]  }
  0x87   :  { %1605 = vmatpush1.bf16.msra.mxu1 %v2460_v18  ;;  %v2564_v18 = vld [vmem:[%s3379_s1 + $0x604] ss:$8 sps:$4 sm:$0xff]  }
  0x88   :  { %1764 = vmatpush1.bf16.msra.mxu0 %v2463_v19  ;;  %1606 = vmatprep.subr.bf16.mxu1 %v2468_v21  ;;  %v2556_v19 = vld [vmem:[%s3380_s0 + $0x10] ss:$56 sps:$4 sm:$0xff]  }
  0x89   :  { %1765 = vmatprep.subr.bf16.mxu0 %v2471_v23  ;;  %v2562_v21 = vld [vmem:[%s3379_s1 + $0x600] ss:$8 sps:$4 sm:$0xff]   ;;  %v2568_v23 = vld [vmem:[%s3380_s0 + $0x84] ss:$56 sps:$4 sm:$0xff]  }
  0x8a   :  { %1592 = vmatmul.mubr.bf16.gmra.mrb[4].mxu1 %v2542_v26  ;;  %v2576_v26 = vld [vmem:[%s3379_s1 + $0x624] ss:$8 sps:$4 sm:$0xff]  }
  0x8b   :  { %1751 = vmatmul.mubr.bf16.gmra.mrb[4].mxu0 %v2546_v27  ;;  %1607 = vmatpush1.bf16.msra.mxu1 %v2466_v24  ;;  %v2570_v24 = vld [vmem:[%s3380_s0 + $0x9c] ss:$56 sps:$4 sm:$0xff]   ;;  %v2572_v27 = vld [vmem:[%s3380_s0 + $0x80] ss:$56 sps:$4 sm:$0xff]  }
  0x8c   :  { %1766 = vmatpush1.bf16.msra.mxu0 %v2469_v25  ;;  %1608 = vmatprep.subr.bf16.mxu1 %v2474_v28  ;;  %v2565_v25 = vld [vmem:[%s3379_s1 + $0x610] ss:$8 sps:$4 sm:$0xff]  }
  0x8d   :  { %1767 = vmatprep.subr.bf16.mxu0 %v2477_v29  ;;  %1634 = vmatprep.mubr.bf16.mxu1 %v2558_v33  ;;  %v2573_v28 = vld [vmem:[%s3380_s0 + $0x98] ss:$56 sps:$4 sm:$0xff]   ;;  %v2574_v29 = vld [vmem:[%s3379_s1 + $0x620] ss:$8 sps:$4 sm:$0xff]  }
  0x8e   :  { %1793 = vmatprep.mubr.bf16.mxu0 %v2561_v35  ;;  %v2577_v33 = vld [vmem:[%s3379_s1 + $0x630] ss:$8 sps:$4 sm:$0xff]   ;;  %v2580_v35 = vld [vmem:[%s3379_s1 + $0x640] ss:$8 sps:$4 sm:$0xff]  }
  0x8f   :  { %1609 = vmatpush1.bf16.msra.mxu1 %v2472_v30  ;;  %v2579_v30 = vld [vmem:[%s3379_s1 + $0x634] ss:$8 sps:$4 sm:$0xff]  }
  0x90   :  { %1768 = vmatpush1.bf16.msra.mxu0 %v2475_v31  ;;  %1610 = vmatprep.subr.bf16.mxu1 %v2480_v32  ;;  %v2606_v31 = vld [vmem:[%s3380_s0 + $0x34] ss:$56 sps:$4 sm:$0xff]   ;;  %v2609_v32 = vld [vmem:[%s3380_s0 + $0xa4] ss:$56 sps:$4 sm:$0xff]  }
  0x91   :  { %1769 = vmatprep.subr.bf16.mxu0 %v2483_v34  ;;  %v2582_v34 = vld [vmem:[%s3379_s1 + $0x644] ss:$8 sps:$4 sm:$0xff]  }
  0x93   :  { %1611 = vmatpush1.bf16.msra.mxu1 %v2478_v36  ;;  %v2585_v36 = vld [vmem:[%s3379_s1 + $0x654] ss:$8 sps:$4 sm:$0xff]  }
  0x94   :  { %1770 = vmatpush1.bf16.msra.mxu0 %v2481_v37  ;;  %1612 = vmatprep.subr.bf16.mxu1 %v2486_v38  ;;  %v2583_v37 = vld [vmem:[%s3379_s1 + $0x650] ss:$8 sps:$4 sm:$0xff]   ;;  %v2588_v38 = vld [vmem:[%s3379_s1 + $0x664] ss:$8 sps:$4 sm:$0xff]  }
  0x95   :  { %1771 = vmatprep.subr.bf16.mxu0 %v2489_v39  ;;  %v2586_v39 = vld [vmem:[%s3379_s1 + $0x660] ss:$8 sps:$4 sm:$0xff]  }
  0x97   :  { %1613 = vmatpush1.bf16.msra.mxu1 %v2484_v40  ;;  %v2591_v40 = vld [vmem:[%s3379_s1 + $0x674] ss:$8 sps:$4 sm:$0xff]  }
  0x98   :  { %1772 = vmatpush1.bf16.msra.mxu0 %v2487_v41  ;;  %1614 = vmatprep.subr.bf16.mxu1 %v2492_v42  ;;  %v2589_v41 = vld [vmem:[%s3379_s1 + $0x670] ss:$8 sps:$4 sm:$0xff]   ;;  %v2594_v42 = vld [vmem:[%s3379_s1 + $0x684] ss:$8 sps:$4 sm:$0xff]  }
  0x99   :  { %1773 = vmatprep.subr.bf16.mxu0 %v2495_v43  ;;  %v2592_v43 = vld [vmem:[%s3379_s1 + $0x680] ss:$8 sps:$4 sm:$0xff]  }
  0x9b   :  { %1615 = vmatpush1.bf16.msra.mxu1 %v2490_v44  ;;  %v2597_v44 = vld [vmem:[%s3379_s1 + $0x694] ss:$8 sps:$4 sm:$0xff]  }
  0x9c   :  { %1774 = vmatpush1.bf16.msra.mxu0 %v2493_v45  ;;  %1616 = vmatprep.subr.bf16.mxu1 %v2498_v46  ;;  %v2595_v45 = vld [vmem:[%s3379_s1 + $0x690] ss:$8 sps:$4 sm:$0xff]   ;;  %v2600_v46 = vld [vmem:[%s3379_s1 + $0x6a4] ss:$8 sps:$4 sm:$0xff]  }
  0x9d   :  { %1775 = vmatprep.subr.bf16.mxu0 %v2501_v47  ;;  %v2598_v47 = vld [vmem:[%s3379_s1 + $0x6a0] ss:$8 sps:$4 sm:$0xff]  }
  0x9f   :  { %1617 = vmatpush1.bf16.msra.mxu1 %v2496_v48  ;;  %v2603_v48 = vld [vmem:[%s3379_s1 + $0x6b4] ss:$8 sps:$4 sm:$0xff]  }
  0xa0   :  { %1776 = vmatpush1.bf16.msra.mxu0 %v2499_v49  ;;  %1618 = vmatprep.subr.bf16.mxu1 %v2504_v50  ;;  %v2601_v49 = vld [vmem:[%s3379_s1 + $0x6b0] ss:$8 sps:$4 sm:$0xff]  }
  0xa1   :  { %1777 = vmatprep.subr.bf16.mxu0 %v2507_v51  ;;  %v2604_v50 = vld [vmem:[%s3380_s0 + $0x30] ss:$56 sps:$4 sm:$0xff]   ;;  %v2607_v51 = vld [vmem:[%s3380_s0 + $0xa0] ss:$56 sps:$4 sm:$0xff]  }
  0xa3   :  { %1619 = vmatpush1.bf16.msra.mxu1 %v2502_v52  ;;  %v261_v52 = vlaneseq }
  0xa4   :  { %1778 = vmatpush1.bf16.msra.mxu0 %v2505_v53  ;;  %1620 = vmatprep.subr.bf16.mxu1 %v2510_v54 }
  0xa5   :  { %1779 = vmatprep.subr.bf16.mxu0 %v2513_v55  ;;  %v262_v53 = vshrl.u32 %v261_v52, 7 }
  0xa7   :  { %1621 = vmatpush1.bf16.msra.mxu1 %v2508_v56 }
  0xa8   :  { %1780 = vmatpush1.bf16.msra.mxu0 %v2511_v57  ;;  %1622 = vmatprep.subr.bf16.mxu1 %v2516_v58  ;;  %v263_v57 = vsub.s32 0, %v262_v53 }
  0xa9   :  { %1781 = vmatprep.subr.bf16.mxu0 %v2519_v59  ;;  %v259_v59 = vld [vmem:[%s3381_s2] sm:$0x3] }
  0xab   :  { %1623 = vmatpush1.bf16.msra.mxu1 %v2514_v60  ;;  %v267_v60 = vsub.s32 1, %v262_v53 }
  0xac   :  { %1782 = vmatpush1.bf16.msra.mxu0 %v2517_v61  ;;  %1624 = vmatprep.subr.bf16.mxu1 %v2522_v62  ;;  %v264_v61 = vrot.slane %v259_v59, %v263_v57 }
  0xad   :  { %1783 = vmatprep.subr.bf16.mxu0 %v2525_v63  ;;  %v268_v62 = vrot.slane %v259_v59, %v267_v60 }
  0xaf   :  { %1625 = vmatpush1.bf16.msra.mxu1 %v2520_v0 }
  0xb0   :  { %1784 = vmatpush1.bf16.msra.mxu0 %v2523_v1  ;;  %1626 = vmatprep.subr.bf16.mxu1 %v2528_v2 }
  0xb1   :  { %1785 = vmatprep.subr.bf16.mxu0 %v2531_v3 }
  0xb3   :  { %1627 = vmatpush1.bf16.msra.mxu1 %v2526_v4 }
  0xb4   :  { %1786 = vmatpush1.bf16.msra.mxu0 %v2529_v5  ;;  %1628 = vmatprep.subr.bf16.mxu1 %v2534_v6 }
  0xb5   :  { %1787 = vmatprep.subr.bf16.mxu0 %v2537_v7 }
  0xb7   :  { %1629 = vmatpush1.bf16.msra.mxu1 %v2532_v8 }
  0xb8   :  { %1788 = vmatpush1.bf16.msra.mxu0 %v2535_v9  ;;  %1630 = vmatprep.subr.bf16.mxu1 %v2545_v10 }
  0xb9   :  { %1789 = vmatprep.subr.bf16.mxu0 %v2549_v11 }
  0xbb   :  { %1631 = vmatpush1.bf16.msra.mxu1 %v2543_v12 }
  0xbc   :  { %1790 = vmatpush1.bf16.msra.mxu0 %v2547_v13  ;;  %1632 = vmatprep.subr.bf16.mxu1 %v2552_v14 }
  0xbd   :  { %1791 = vmatprep.subr.bf16.mxu0 %v2555_v15 }
  0xbf   :  { %1633 = vmatpush1.bf16.msra.mxu1 %v2550_v16 }
  0xc0   :  { %1792 = vmatpush1.bf16.msra.mxu0 %v2553_v17  ;;  %2164 = vmatprep.subr.bf16.mxu1 %v2564_v18 }
  0xc1   :  { %1814 = vmatprep.subr.bf16.mxu0 %v2564_v18 }
  0xc2   :  { %1635 = vmatmul.mubr.bf16.vlgmr.msra.gmra.mrb[0].mxu1 %v2556_v19 }
  0xc3   :  { %1794 = vmatmul.mubr.bf16.vlgmr.msra.gmra.mrb[0].mxu0 %v2559_v20  ;;  %2176 = vmatpush1.bf16.msra.mxu1 %v2562_v21 }
  0xc4   :  { %1815 = vmatpush1.bf16.msra.mxu0 %v2562_v21  ;;  %2165 = vmatprep.subr.bf16.mxu1 %v2567_v22 }
  0xc5   :  { %1816 = vmatprep.subr.bf16.mxu0 %v2567_v22  ;;  %1644 = vmatprep.mubr.bf16.mxu1 %v2568_v23 }
  0xc6   :  { %1803 = vmatprep.mubr.bf16.mxu0 %v2570_v24 }
  0xc7   :  { %2177 = vmatpush1.bf16.msra.mxu1 %v2565_v25 }
  0xc8   :  { %1817 = vmatpush1.bf16.msra.mxu0 %v2565_v25  ;;  %2166 = vmatprep.subr.bf16.mxu1 %v2576_v26 }
  0xc9   :  { %1818 = vmatprep.subr.bf16.mxu0 %v2576_v26 }
  0xca   :  { %1645 = vmatmul.mubr.bf16.gmra.mrb[4].mxu1 %v2572_v27 }
  0xcb   :  { %1804 = vmatmul.mubr.bf16.gmra.mrb[4].mxu0 %v2573_v28  ;;  %2178 = vmatpush1.bf16.msra.mxu1 %v2574_v29 }
  0xcc   :  { %1819 = vmatpush1.bf16.msra.mxu0 %v2574_v29  ;;  %2167 = vmatprep.subr.bf16.mxu1 %v2579_v30 }
  0xcd   :  { %1820 = vmatprep.subr.bf16.mxu0 %v2579_v30  ;;  %2154 = vmatprep.mubr.msk.bf16.mxu0 %vm1489_vm0, %v2606_v31 }
  0xce   :  { %2155 = vmatprep.mubr.msk.bf16.mxu1 %vm1489_vm0, %v2609_v32 }
  0xcf   :  { %2179 = vmatpush1.bf16.msra.mxu1 %v2577_v33 }
  0xd0   :  { %1821 = vmatpush1.bf16.msra.mxu0 %v2577_v33  ;;  %2168 = vmatprep.subr.bf16.mxu1 %v2582_v34 }
  0xd1   :  { %1822 = vmatprep.subr.bf16.mxu0 %v2582_v34 }
  0xd3   :  { %2180 = vmatpush1.bf16.msra.mxu1 %v2580_v35 }
  0xd4   :  { %1823 = vmatpush1.bf16.msra.mxu0 %v2580_v35  ;;  %2169 = vmatprep.subr.bf16.mxu1 %v2585_v36 }
  0xd5   :  { %1824 = vmatprep.subr.bf16.mxu0 %v2585_v36 }
  0xd7   :  { %2181 = vmatpush1.bf16.msra.mxu1 %v2583_v37 }
  0xd8   :  { %1825 = vmatpush1.bf16.msra.mxu0 %v2583_v37  ;;  %2170 = vmatprep.subr.bf16.mxu1 %v2588_v38 }
  0xd9   :  { %1826 = vmatprep.subr.bf16.mxu0 %v2588_v38 }
  0xdb   :  { %2182 = vmatpush1.bf16.msra.mxu1 %v2586_v39 }
  0xdc   :  { %1827 = vmatpush1.bf16.msra.mxu0 %v2586_v39  ;;  %2171 = vmatprep.subr.bf16.mxu1 %v2591_v40 }
  0xdd   :  { %1828 = vmatprep.subr.bf16.mxu0 %v2591_v40 }
  0xdf   :  { %2183 = vmatpush1.bf16.msra.mxu1 %v2589_v41 }
  0xe0   :  { %1829 = vmatpush1.bf16.msra.mxu0 %v2589_v41  ;;  %2172 = vmatprep.subr.bf16.mxu1 %v2594_v42 }
  0xe1   :  { %1830 = vmatprep.subr.bf16.mxu0 %v2594_v42 }
  0xe3   :  { %2184 = vmatpush1.bf16.msra.mxu1 %v2592_v43 }
  0xe4   :  { %1831 = vmatpush1.bf16.msra.mxu0 %v2592_v43  ;;  %2173 = vmatprep.subr.bf16.mxu1 %v2597_v44 }
  0xe5   :  { %1832 = vmatprep.subr.bf16.mxu0 %v2597_v44 }
  0xe7   :  { %2185 = vmatpush1.bf16.msra.mxu1 %v2595_v45 }
  0xe8   :  { %1833 = vmatpush1.bf16.msra.mxu0 %v2595_v45  ;;  %2174 = vmatprep.subr.bf16.mxu1 %v2600_v46 }
  0xe9   :  { %1834 = vmatprep.subr.bf16.mxu0 %v2600_v46 }
  0xeb   :  { %2186 = vmatpush1.bf16.msra.mxu1 %v2598_v47 }
  0xec   :  { %1835 = vmatpush1.bf16.msra.mxu0 %v2598_v47  ;;  %2175 = vmatprep.subr.bf16.mxu1 %v2603_v48 }
  0xed   :  { %1836 = vmatprep.subr.bf16.mxu0 %v2603_v48 }
  0xef   :  { %2187 = vmatpush1.bf16.msra.mxu1 %v2601_v49 }
  0xf0   :  { %1837 = vmatpush1.bf16.msra.mxu0 %v2601_v49 }
  0xf2   :  { %1857 = vmatmul.mubr.bf16.vlgmr.msra.gmra.mrb[8].mxu1 %v2607_v51 }
  0xf3   :  { %1847 = vmatmul.mubr.bf16.vlgmr.msra.gmra.mrb[0].mxu0 %v2604_v50 }
 0x195   :  { %v1636_v54 = vpop.f32.mrb[0].mxu1 }
 0x196   :  { %v1638_v55 = vpop.f32.mrb[1].mxu1  ;;  %v2188_v15 = vadd.f32 %v1636_v54, %v264_v61 }
 0x197   :  { %v1640_v56 = vpop.f32.mrb[2].mxu1  ;;  %v2190_v16 = vadd.f32 %v1638_v55, %v268_v62 }
 0x198   :  { %v1642_v58 = vpop.f32.mrb[3].mxu1  ;;  %v2192_v19 = vadd.f32 %v1640_v56, %v264_v61 }
 0x199   :  { %v2194_v24 = vadd.f32 %v1642_v58, %v268_v62 }
 0x19d   :  { %v1646_v63 = vpop.f32.mrb[4].mxu1 }
 0x19e   :  { %v1805_v0 = vpop.f32.mrb[4].mxu0  ;;  %v2196_v1 = vadd.f32 %v1646_v63, %v264_v61  ;;  %v1648_v2 = vpop.f32.mrb[5].mxu1 }
 0x19f   :  { %v1807_v3 = vpop.f32.mrb[5].mxu0  ;;  %v2199_v4 = vadd.f32 %v1648_v2, %v268_v62  ;;  %v1650_v5 = vpop.f32.mrb[6].mxu1 }
 0x1a0   :  { %v1809_v6 = vpop.f32.mrb[6].mxu0  ;;  %v2197_v7 = vadd.f32 %v2196_v1, %v1805_v0  ;;  %v2202_v8 = vadd.f32 %v1650_v5, %v264_v61  ;;  %v1652_v9 = vpop.f32.mrb[7].mxu1 }
 0x1a1   :  { %v1811_v10 = vpop.f32.mrb[7].mxu0  ;;  %v2200_v11 = vadd.f32 %v2199_v4, %v1807_v3  ;;  %v2205_v12 = vadd.f32 %v1652_v9, %v268_v62 }
 0x1a2   :  { %v2203_v13 = vadd.f32 %v2202_v8, %v1809_v6 }
 0x1a3   :  { %v2206_v14 = vadd.f32 %v2205_v12, %v1811_v10 }
 0x1c5   :  { %v1858_v18 = vpop.f32.mrb[8].mxu1 }
 0x1c6   :  { %v1848_v17 = vpop.f32.mrb[0].mxu0  ;;  %v2198_v21 = vadd.f32 %v2197_v7, %v1858_v18  ;;  %v1860_v23 = vpop.f32.mrb[9].mxu1 }
 0x1c7   :  { %v2189_v20 = vadd.f32 %v2188_v15, %v1848_v17  ;;  %v1850_v22 = vpop.f32.mrb[1].mxu0  ;;  %v2201_v26 = vadd.f32 %v2200_v11, %v1860_v23  ;;  %v1862_v28 = vpop.f32.mrb[10].mxu1 }
 0x1c8   :  { %v2191_v25 = vadd.f32 %v2190_v16, %v1850_v22  ;;  %v1852_v27 = vpop.f32.mrb[2].mxu0  ;;  %v1871_v30 = vmax.f32 %v2198_v21, 0.0  ;;  %v2204_v32 = vadd.f32 %v2203_v13, %v1862_v28  ;;  %v1864_v34 = vpop.f32.mrb[11].mxu1 }
 0x1c9   :  { %v1867_v29 = vmax.f32 %v2189_v20, 0.0  ;;  %v2193_v31 = vadd.f32 %v2192_v19, %v1852_v27  ;;  %v1854_v33 = vpop.f32.mrb[3].mxu0  ;;  %v1872_v36 = vmax.f32 %v2201_v26, 0.0  ;;  %v2207_v38 = vadd.f32 %v2206_v14, %v1864_v34 }
 0x1ca   :  { %v1868_v35 = vmax.f32 %v2191_v25, 0.0  ;;  %v2195_v37 = vadd.f32 %v2194_v24, %v1854_v33  ;;  %v1873_v40 = vmax.f32 %v2204_v32, 0.0 }
 0x1cb   :  { %v1869_v39 = vmax.f32 %v2193_v31, 0.0  ;;  %v2162_v42 = vpack.c.bf16 %v1872_v36, %v1871_v30  ;;  %v1874_v44 = vmax.f32 %v2207_v38, 0.0 }
 0x1cc   :  { %v2160_v41 = vpack.c.bf16 %v1868_v35, %v1867_v29  ;;  %v1870_v43 = vmax.f32 %v2195_v37, 0.0 }
 0x1cd   :  { %1904 = vst.msk [vmem:[%s3382_s3 + $0x10] sm:$0xff] %vm1901_vm3, %v2162_v42  ;;  %v2163_v46 = vpack.c.bf16 %v1874_v44, %v1873_v40 }
 0x1ce   :  { %1902 = vst.msk [vmem:[%s3382_s3] sm:$0xff] %vm1901_vm3, %v2160_v41  ;;  %v2161_v45 = vpack.c.bf16 %v1870_v43, %v1869_v39 }
 0x1cf   :  { %1905 = vst.msk [vmem:[%s3382_s3 + $0x18] sm:$0xff] %vm1901_vm3, %v2163_v46 }
 0x1d0   :  { %1903 = vst.msk [vmem:[%s3382_s3 + $0x8] sm:$0xff] %vm1901_vm3, %v2161_v45 }

// kernel: model_c_forward.19
= control target key start
LH: loop header
LB: loop body
LE: loop exit
PB: predicated region body
PF: predicated region fallthrough
CT: control target
= control target key end

     0   :  { %s117_s0 = inlined_call_operand.vmem [shape: bf16[2,16,128], index: 0, kind: input, shape index: {}]   ;;  %s118_s1 = inlined_call_operand.hbm [shape: f32[2,128], index: 1, kind: output, shape index: {}]  }
   0x1   :  { %v55_v0 = vld [vmem:[%s117_s0] sm:$0xff]   ;;  %v62_v1 = vld [vmem:[%s117_s0 + $0x8] sm:$0xff]  }
   0x2   :  { %6 = vsyncpa [#allocation3], 0  ;;  %v56_v2 = vunpack.c.l.bf16 %v55_v0  ;;  %v57_v3 = vunpack.c.h.bf16 %v55_v0  ;;  %v60_v4 = vunpack.c.l.bf16 %v62_v1  ;;  %v61_v5 = vunpack.c.h.bf16 %v62_v1  ;;  %s88_s0 = smov [#allocation2]  }
   0x3   :  { %s46_s10 = sshll.u32 %s88_s0, 4  ;;  %vm36_vm0 = vcmask 1041409   ;;  %s47_s10 = int_to_ptr.vmem [resolvable:$true] %s46_s10 }
   0x4   :  { %v17_v6 = vadd.f32 %v57_v3, %v56_v2  ;;  %v24_v7 = vadd.f32 %v61_v5, %v60_v4  ;;  %s64_s11 = scalar_lea.vmem %s47_s10, 32  ;;  %p69_p1 = scmp.lt.s32.totalorder %s47_s10, %s47_s10 }
   0x5   :  { %p65_p0 = scmp.ne.s32.totalorder %s47_s10, %s64_s11  ;;  %p70_p2 = scmp.lt.s32.totalorder %s64_s11, %s64_s11 }
   0x6   :  { %v18_v8 = vrot.slane %v17_v6, 4  ;;  %v25_v9 = vrot.slane %v24_v7, 4 }
   0x7   :  { %p71_p3 = por %p70_p2, %p69_p1 }
   0x8   :  { %v19_v10 = vadd.f32 %v18_v8, %v17_v6  ;;  %v26_v11 = vadd.f32 %v25_v9, %v24_v7 }
   0x9   :  { %p72_p4 = pnand %p71_p3, %p65_p0 }
   0xa   :  { %v20_v12 = vrot.slane %v19_v10, 2  ;;  %v27_v13 = vrot.slane %v26_v11, 2 }
   0xc   :  { %v21_v14 = vadd.f32 %v20_v12, %v19_v10  ;;  %v28_v15 = vadd.f32 %v27_v13, %v26_v11 }
   0xe   :  { %v22_v16 = vrot.slane %v21_v14, 1  ;;  %v29_v17 = vrot.slane %v28_v15, 1 }
  0x10   :  { %v23_v18 = vadd.f32 %v22_v16, %v21_v14  ;;  %v30_v19 = vadd.f32 %v29_v17, %v28_v15 }
  0x12   :  { %v32_v20 = vmul.f32 0.0625, %v23_v18  ;;  %v33_v21 = vmul.f32 0.0625, %v30_v19 }
  0x14   :  { %v37_v22 = vsel %vm36_vm0, %v33_v21, %v32_v20 }
  0x15   :  { %39 = vst [vmem:[#allocation2] sm:$0x3] %v37_v22 }
  0x16   :  { %75 = shalt.err (!%p72_p4)
}
  0x17   :  { %s76_s14 = scalar_lea.hbm %s118_s1, 32 }
  0x18   :  { %p77_p5 = scmp.ne.s32.totalorder %s118_s1, %s76_s14  ;;  %p80_p6 = scmp.lt.u32.totalorder %s76_s14, %s118_s1 }
  0x1a   :  { %p82_p7 = pnand %p80_p6, %p77_p5 }
  0x1c   :  { %85 = shalt.err (!%p82_p7)
}
  0x1d   :  { %49 = dma.vmem_to_hbm [thread:$0]  %s47_s10, 32, %s118_s1, [#allocation3]  }
  0x1e   :  { %86 = dma.done.wait [#allocation3], 32  }
  0x1f   :  { %87 = vsyncadd [#allocation3], 4294967264 }
  0x20   :  { %53 = vsyncpa [#allocation3], 1 }

</bundles_post_ra>
